<compile_context>
chip_gen: v5e
topology: v5e:2x2
jax: 0.10.0
libtpu: 0.0.40
codegen_flags: <defaults>
</compile_context>

<pallas_src>
import jax
import jax.numpy as jnp
from jax.experimental import pallas as pl
from jax.experimental.pallas import tpu as pltpu

SEQ = 10            # tokens per example (forward reshapes to 10 * 300)
EMB = 300           # Navec embedding dim
HID = 1000          # hidden width of first Linear
OUT = 300           # output width of second Linear
VOCAB = 512         # synthetic vocab (real Navec is 500K quantized; weights synthetic)

# Padded (lane/sublane aligned) dims used inside the kernel.
K_PAD = 3072        # 3000 -> 3072 (24 * 128)
HID_PAD = 1024      # 1000 -> 1024
OUT_PAD = 384       # 300  -> 384  (3 * 128)
TN = 512            # hidden tile streamed per grid step
NTILES = HID_PAD // TN   # = 2


def _mlp_kernel(x_ref, w1_ref, b1_ref, w2_ref, o_ref):
    # Grid step c handles hidden tile c:
    #   x_ref : (Bp, K_PAD)    bf16  (same block every step, stays resident)
    #   w1_ref: (K_PAD, TN)    bf16  (contiguous slab c of pre-tiled w1)
    #   b1_ref: (1, TN)        f32
    #   w2_ref: (TN, OUT_PAD)  bf16
    #   o_ref : (Bp, OUT_PAD)  f32   partial output for tile c
    h = jnp.dot(x_ref[...], w1_ref[...], preferred_element_type=jnp.float32)
    h = jnp.maximum(h + b1_ref[...], 0.0)                    # bias + ReLU (per hidden tile)
    o_ref[...] = jnp.dot(h.astype(jnp.bfloat16), w2_ref[...],
                         preferred_element_type=jnp.float32)


def mlp_pallas(x_pad, w1_tiles, b1p, w2p):
    Bp = x_pad.shape[0]
    flops = 2 * Bp * K_PAD * HID_PAD + 2 * Bp * HID_PAD * OUT_PAD
    bytes_accessed = (w1_tiles.size * 2 + w2p.size * 2 + NTILES * x_pad.size * 2
                      + b1p.size * 4 + NTILES * Bp * OUT_PAD * 4)
    return pl.pallas_call(
        _mlp_kernel,
        out_shape=jax.ShapeDtypeStruct((NTILES, Bp, OUT_PAD), jnp.float32),
        grid=(NTILES,),
        in_specs=[
            pl.BlockSpec((Bp, K_PAD), lambda c: (0, 0)),          # x (resident)
            pl.BlockSpec((None, K_PAD, TN), lambda c: (c, 0, 0)), # w1 slab c (contiguous)
            pl.BlockSpec((1, TN), lambda c: (0, c)),              # b1 tile c
            pl.BlockSpec((TN, OUT_PAD), lambda c: (c, 0)),        # w2 tile c
        ],
        out_specs=pl.BlockSpec((None, Bp, OUT_PAD), lambda c: (c, 0, 0)),
        compiler_params=pltpu.CompilerParams(
            # Tiles are independent partials -> shard across TCs on v7x megacore;
            # plain 2-step pipelined loop on v5e/v6e.
            dimension_semantics=("parallel",),
        ),
        cost_estimate=pl.CostEstimate(flops=flops, transcendentals=0,
                                      bytes_accessed=bytes_accessed),
    )(x_pad, w1_tiles, b1p, w2p)


def prepare_params(w1, b1, w2, b2):
    """One-time: zero-pad to aligned dims, cast weights to bf16, pre-tile w1."""
    w1p = jnp.zeros((K_PAD, HID_PAD), jnp.bfloat16).at[: SEQ * EMB, :HID].set(
        w1.astype(jnp.bfloat16))
    # Pre-tile so each grid step DMAs one fully contiguous (K_PAD, TN) slab.
    w1_tiles = w1p.reshape(K_PAD, NTILES, TN).transpose(1, 0, 2)   # (NTILES, K_PAD, TN)
    b1p = jnp.zeros((1, HID_PAD), jnp.float32).at[:, :HID].set(b1)
    w2p = jnp.zeros((HID_PAD, OUT_PAD), jnp.bfloat16).at[:HID, :OUT].set(
        w2.astype(jnp.bfloat16))
    b2p = jnp.zeros((1, OUT_PAD), jnp.float32).at[:, :OUT].set(b2)
    return w1_tiles, b1p, w2p, b2p


def model_forward(x_ids, emb_table, w1_tiles, b1p, w2p, b2p):
    # Embedding lookup + flatten (glue, ~KBs of traffic; weights dominate).
    # TODO(synk): real NavecEmbedding decodes a 100-codebook quantized table; here it is
    #             a plain dense gather over a synthetic table.
    ids = x_ids.astype(jnp.int32)                         # x.type(torch.int)
    embedded = jnp.take(emb_table, ids, axis=0)           # (B, 10, 300) f32
    x_flat = embedded.reshape(-1, SEQ * EMB)              # .view(-1, 10*300)

    B = x_flat.shape[0]
    Bp = ((B + 15) // 16) * 16                            # bf16 sublane packing
    x_pad = jnp.pad(x_flat.astype(jnp.bfloat16),
                    ((0, Bp - B), (0, K_PAD - SEQ * EMB)))

    partials = mlp_pallas(x_pad, w1_tiles, b1p, w2p)      # (NTILES, Bp, OUT_PAD) f32
    out_pad = partials.sum(axis=0) + b2p                  # 24 KB add in the wrapper
    return out_pad[:B, :OUT]                              # (B, 300)


def init_params(key):
    k_emb, k_w1, k_b1, k_w2, k_b2 = jax.random.split(key, 5)
    emb_table = jax.random.normal(k_emb, (VOCAB, EMB), dtype=jnp.float32)
    # PyTorch: every Linear parameter is overwritten with uniform_() in [0, 1).
    # torch Linear stores weight as (out, in); we store the transpose (in, out)
    # so the kernel computes x @ W, matching x @ weight.T.
    w1 = jax.random.uniform(k_w1, (SEQ * EMB, HID), dtype=jnp.float32)
    b1 = jax.random.uniform(k_b1, (1, HID), dtype=jnp.float32)
    w2 = jax.random.uniform(k_w2, (HID, OUT), dtype=jnp.float32)
    b2 = jax.random.uniform(k_b2, (1, OUT), dtype=jnp.float32)
    return emb_table, w1, b1, w2, b2


if __name__ == "__main__":
    key = jax.random.PRNGKey(0)
    k_ids, k_params = jax.random.split(key)

    emb_table, w1, b1, w2, b2 = init_params(k_params)
    w1_tiles, b1p, w2p, b2p = prepare_params(w1, b1, w2, b2)

    B = 2
    x_ids = jax.random.randint(k_ids, (B, SEQ), 0, VOCAB, dtype=jnp.int32)

    fwd = jax.jit(model_forward)
    out = jax.block_until_ready(fwd(x_ids, emb_table, w1_tiles, b1p, w2p, b2p))

    # Reference in plain JAX at matched (bf16-weight, f32-accum) precision.
    x_flat = jnp.take(emb_table, x_ids, axis=0).reshape(-1, SEQ * EMB)
    h_ref = jnp.dot(x_flat.astype(jnp.bfloat16), w1.astype(jnp.bfloat16),
                    preferred_element_type=jnp.float32) + b1
    h_ref = jnp.maximum(h_ref, 0.0)
    ref = jnp.dot(h_ref.astype(jnp.bfloat16), w2.astype(jnp.bfloat16),
                  preferred_element_type=jnp.float32) + b2

    assert out.shape == (B, OUT), out.shape
    assert jnp.allclose(out, ref, rtol=2e-2, atol=1e-1), "mismatch vs reference"

    print("KERNEL_OK")
</pallas_src>

<mosaic_0001>
module attributes {stable_mosaic.version = 11 : i64} {
  func.func @_mlp_kernel(%arg0: i32, %arg1: memref<16x3072xbf16, #tpu.memory_space<vmem>>, %arg2: memref<1x3072x512xbf16, #tpu.memory_space<vmem>>, %arg3: memref<1x512xf32, #tpu.memory_space<vmem>>, %arg4: memref<512x384xbf16, #tpu.memory_space<vmem>>, %arg5: memref<1x16x384xf32, #tpu.memory_space<vmem>>) attributes {dimension_semantics = [#tpu.dimension_semantics<parallel>], iteration_bounds = array<i64: 2>, scalar_prefetch = 0 : i64, scratch_operands = 0 : i64, tpu.core_type = #tpu.core_type<tc>, window_params = [{pipeline_mode = #tpu.pipeline_mode<synchronous>, transform_indices = @transform_0, window_bounds = array<i64: 16, 3072>}, {transform_indices = @transform_1, window_bounds = array<i64: 1, 3072, 512>}, {transform_indices = @transform_2, window_bounds = array<i64: 1, 512>}, {transform_indices = @transform_3, window_bounds = array<i64: 512, 384>}, {transform_indices = @transform_4, window_bounds = array<i64: 1, 16, 384>}]} {
    %c0 = arith.constant 0 : index
    %c0_0 = arith.constant 0 : index
    %0 = vector.load %arg1[%c0, %c0_0] : memref<16x3072xbf16, #tpu.memory_space<vmem>>, vector<16x3072xbf16>
    %c0_1 = arith.constant 0 : index
    %c0_2 = arith.constant 0 : index
    %c0_3 = arith.constant 0 : index
    %1 = vector.load %arg2[%c0_1, %c0_2, %c0_3] : memref<1x3072x512xbf16, #tpu.memory_space<vmem>>, vector<1x3072x512xbf16>
    %2 = vector.shape_cast %1 : vector<1x3072x512xbf16> to vector<3072x512xbf16>
    %cst = arith.constant dense<0.000000e+00> : vector<16x512xf32>
    %3 = tpu.matmul %0, %2, %cst {dimension_numbers = #tpu.dot_dimension_numbers<[1], [0], [0], [1], [0, 0, 1, 1], [], []>} : vector<16x3072xbf16>, vector<3072x512xbf16>, vector<16x512xf32> -> vector<16x512xf32>
    %c0_4 = arith.constant 0 : index
    %c0_5 = arith.constant 0 : index
    %4 = vector.load %arg3[%c0_4, %c0_5] : memref<1x512xf32, #tpu.memory_space<vmem>>, vector<1x512xf32>
    %5 = vector.broadcast %4 : vector<1x512xf32> to vector<16x512xf32>
    %6 = arith.addf %3, %5 : vector<16x512xf32>
    %cst_6 = arith.constant 0.000000e+00 : f32
    %7 = vector.broadcast %cst_6 : f32 to vector<16x512xf32>
    %8 = arith.maximumf %6, %7 : vector<16x512xf32>
    %9 = arith.truncf %8 : vector<16x512xf32> to vector<16x512xbf16>
    %c0_7 = arith.constant 0 : index
    %c0_8 = arith.constant 0 : index
    %10 = vector.load %arg4[%c0_7, %c0_8] : memref<512x384xbf16, #tpu.memory_space<vmem>>, vector<512x384xbf16>
    %cst_9 = arith.constant dense<0.000000e+00> : vector<16x384xf32>
    %11 = tpu.matmul %9, %10, %cst_9 {dimension_numbers = #tpu.dot_dimension_numbers<[1], [0], [0], [1], [0, 0, 1, 1], [], []>} : vector<16x512xbf16>, vector<512x384xbf16>, vector<16x384xf32> -> vector<16x384xf32>
    %c0_10 = arith.constant 0 : index
    %c0_11 = arith.constant 0 : index
    %c0_12 = arith.constant 0 : index
    %12 = vector.load %arg5[%c0_10, %c0_11, %c0_12] : memref<1x16x384xf32, #tpu.memory_space<vmem>>, vector<1x16x384xf32>
    %13 = vector.shape_cast %12 : vector<1x16x384xf32> to vector<16x384xf32>
    %14 = vector.shape_cast %11 : vector<16x384xf32> to vector<1x16x384xf32>
    tpu.vector_store %arg5[%c0_10, %c0_11, %c0_12], %14 {strides = array<i32>} : memref<1x16x384xf32, #tpu.memory_space<vmem>>, vector<1x16x384xf32>,
    return
  }
  func.func @transform_0(%arg0: i32) -> (i32, i32) {
    %c0_i32 = arith.constant 0 : i32
    %c0_i32_0 = arith.constant 0 : i32
    %c0_i32_1 = arith.constant 0 : i32
    return %c0_i32, %c0_i32_0 : i32, i32
  }
  func.func @transform_1(%arg0: i32) -> (i32, i32, i32) {
    %c0_i32 = arith.constant 0 : i32
    %c0_i32_0 = arith.constant 0 : i32
    %c0_i32_1 = arith.constant 0 : i32
    return %arg0, %c0_i32, %c0_i32_0 : i32, i32, i32
  }
  func.func @transform_2(%arg0: i32) -> (i32, i32) {
    %c0_i32 = arith.constant 0 : i32
    %c0_i32_0 = arith.constant 0 : i32
    return %c0_i32, %arg0 : i32, i32
  }
  func.func @transform_3(%arg0: i32) -> (i32, i32) {
    %c0_i32 = arith.constant 0 : i32
    %c0_i32_0 = arith.constant 0 : i32
    return %arg0, %c0_i32 : i32, i32
  }
  func.func @transform_4(%arg0: i32) -> (i32, i32, i32) {
    %c0_i32 = arith.constant 0 : i32
    %c0_i32_0 = arith.constant 0 : i32
    %c0_i32_1 = arith.constant 0 : i32
    return %arg0, %c0_i32, %c0_i32_0 : i32, i32, i32
  }
}

</mosaic_0001>

<bundles_post_ra>
// kernel: model_forward.1
= control target key start
LH: loop header
LB: loop body
LE: loop exit
PB: predicated region body
PF: predicated region fallthrough
CT: control target
= control target key end

     0   :  { %9 = vsyncpa [#allocation3], 0  ;;  %s14593_s0 = inlined_call_operand.vmem [shape: bf16[16,3072], index: 0, kind: input, shape index: {}]   ;;  %s14594_s1 = inlined_call_operand.hbm [shape: bf16[2,3072,512], index: 1, kind: input, shape index: {}]   ;;  %s14595_s2 = inlined_call_operand.hbm [shape: f32[1,1024], index: 2, kind: input, shape index: {}]   ;;  %s14596_s3 = inlined_call_operand.hbm [shape: bf16[1024,384], index: 3, kind: input, shape index: {}]   ;;  %s14597_s4 = inlined_call_operand.vmem [shape: f32[2,16,384], index: 4, kind: output, shape index: {}]  }
   0x1   :  { %11 = vsyncpa [#allocation3 + $0x1], 0 }
   0x2   :  { %12 = vsyncpa [#allocation5], 0 }
   0x3   :  { %14 = vsyncpa [#allocation5 + $0x1], 0  ;;  %s12019_s15 = smov 0   ;;  %s12021_s16 = smov 0  }
   0x4   :  { %s12023_s17 = smov 0   ;;  %s12025_s18 = smov 0  }
   0x5 LB: > { %s12038_s19 = sadd.s32 4294967295, %s11988_s18   ;;  %s12041_s20 = sadd.s32 1, %s11988_s18   ;;  %s11988_s18 = sphi %s12025_s18, %s14682_s18   ;;  %s11984_s17 = sphi %s12023_s17, %s14681_s17   ;;  %s11980_s16 = sphi %s12021_s16, %s14680_s16   ;;  %s11976_s15 = sphi %s12019_s15, %s14679_s15  }
   0x6   : > { %s45_s21 = ssub.s32 %s11988_s18, %s12041_s20  ;;  %s48_s22 = sadd.s32 1, %s11984_s17 }
   0x7   : > { %p46_p0 = scmp.eq.s32.totalorder %s45_s21, 0  ;;  %p55_p1 = scmp.ne.s32.totalorder %s11984_s17, %s11980_s16 }
   0x8   : > { %p56_p2 = scmp.eq.s32.totalorder %s11988_s18, 0  ;;  %p61_p3 = scmp.ne.s32.totalorder %s11980_s16, %s11976_s15 }
   0x9   : > { %s12051_s23 = scalar_select %p46_p0, %s11984_s17, %s48_s22  }
   0xa   : > { %p57_p4 = por %p56_p2, %p55_p1  ;;  %p62_p5 = scmp.eq.s32.totalorder %s12038_s19, 0 }
   0xb   : > { %p11820_p6 = scmp.lt.s32.totalorder %s11988_s18, 2  ;;  %s12060_s25 = sand.u32 1, %s11984_s17  }
   0xc   : > { %p12055_p7 = por %p62_p5, %p61_p3  ;;  %s188_s27 = sand.u32 1, %s11988_s18  }
   0xd   : > { %p12062_p8 = pnand %p11820_p6, %p57_p4  ;;  %s7347_s28 = sshll.u32 %s12060_s25, 2 }
   0xe   : > { %s7348_s29 = sshll.u32 %s11988_s18, 2  ;;  %s192_s30 = scalar_lea.vmem [#allocation4], %s7347_s28 }
   0xf   : > { %s200_s5 = sshll.u32 %s192_s30, 4  ;;  %s196_s8 = scalar_lea.hbm %s14595_s2, %s7348_s29  ;;  %s201_s5 = int_to_ptr.vmem [resolvable:$true] %s200_s5 }
  0x10   : > { %s198_s9 = sshll.u32 %s196_s8, 4  ;;  %s11799_s10 = smul.u32 768, %s12060_s25  ;;  %s199_s9 = int_to_ptr.hbm [resolvable:$true] %s198_s9 }
  0x11   : > { %p7352_p9 = scmp.ge.s32.totalorder %s11988_s18, 1  ;;  %s12074_s11 = scalar_lea.sflag [#allocation5], %s188_s27 }
  0x12   : > { %s11860_s12 = sshra.s32 %s199_s9, 4  ;;  %p11864_p11 = pneg %p12062_p8  ;;  %s11861_s12 = int_to_ptr.hbm [resolvable:$true] %s11860_s12 }
  0x13   : > { %s11862_s13 = scalar_lea.hbm %s11861_s12, 4  ;;  %s11867_s21 = scalar_lea.hbm %s14595_s2, 8 }
  0x14   : > { %p11863_p10 = scmp.ne.s32.totalorder %s11861_s12, %s11862_s13  ;;  %p11868_p0 = scmp.lt.s32.totalorder %s11861_s12, %s14595_s2 }
  0x15   : > { %p11869_p1 = scmp.lt.s32.totalorder %s11867_s21, %s11862_s13 }
  0x16   : > { %p11865_p12 = pnand %p11864_p11, %p11863_p10 }
  0x17   : > { %p11870_p2 = por %p11869_p1, %p11868_p0 }
  0x18   : > { %p11866_p13 = pneg %p11865_p12 }
  0x1a   : > { %p11871_p3 = pnand %p11870_p2, %p11866_p13 }
  0x1c   : > { %11874 = shalt.err (!%p11871_p3)
}
  0x1d   : > { %11816 = dma.hbm_to_vmem [thread:$0]  (!%p12062_p8), %s199_s9, 64, %s201_s5, %s12074_s11  }
  0x1e   : > { %p228_p4 = scmp.lt.s32.totalorder %s11988_s18, 3  ;;  %s11797_s27 = smul.u32 6144, %s12060_s25 }
  0x1f   : > { %s11798_s30 = smul.u32 6144, %s11988_s18  ;;  %s167_s15 = scalar_lea.sflag [#allocation3], %s12060_s25 }
  0x20   : > { %p12094_p5 = pnand %p7352_p9, %p228_p4  ;;  %s170_s12 = scalar_lea.vmem [#allocation2], %s11797_s27 }
  0x21   : > { %s175_s8 = scalar_lea.hbm %s14594_s1, %s11798_s30  ;;  %s178_s13 = sshll.u32 %s170_s12, 4  ;;  %s179_s13 = int_to_ptr.vmem [resolvable:$true] %s178_s13 }
  0x22   : > { %s176_s14 = sshll.u32 %s175_s8, 4  ;;  %s11897_s28 = scalar_lea.hbm %s14594_s1, 12288  ;;  %s177_s14 = int_to_ptr.hbm [resolvable:$true] %s176_s14 }
  0x23   : > { %s11890_s5 = sshra.s32 %s177_s14, 4  ;;  %s11891_s5 = int_to_ptr.hbm [resolvable:$true] %s11890_s5 }
  0x24   : > { %s11892_s9 = scalar_lea.hbm %s11891_s5, 6144  ;;  %p11898_p12 = scmp.lt.s32.totalorder %s11891_s5, %s14594_s1 }
  0x25   : > { %p11893_p6 = scmp.ne.s32.totalorder %s11891_s5, %s11892_s9  ;;  %p11899_p13 = scmp.lt.s32.totalorder %s11897_s28, %s11892_s9 }
  0x27   : > { %p11895_p9 = pnand %p11893_p6, %p11864_p11  ;;  %p11900_p0 = por %p11899_p13, %p11898_p12 }
  0x29   : > { %p11896_p10 = pneg %p11895_p9 }
  0x2b   : > { %p11901_p1 = pnand %p11900_p0, %p11896_p10 }
  0x2d   : > { %11904 = shalt.err (!%p11901_p1)
}
  0x2e   : > { %s11990_s27 = smov 256   ;;  %s11991_s7 = smov 16  }
  0x2f   : > { %11813 = dma.hbm_to_vmem [thread:$0]  (!%p12062_p8), %s177_s14, 98304, %s179_s13, %s167_s15, %s11990_s27, %s11990_s27, %s11991_s7  }
  0x30   : > { %s11800_s8 = smul.u32 768, %s11988_s18  ;;  %s211_s12 = scalar_lea.vmem [#allocation6], %s11799_s10 }
  0x31   : > { %s220_s21 = sshll.u32 %s211_s12, 4  ;;  %s11927_s25 = scalar_lea.hbm %s14596_s3, 1536  ;;  %s221_s21 = int_to_ptr.vmem [resolvable:$true] %s220_s21 }
  0x32   : > { %s217_s5 = scalar_lea.hbm %s14596_s3, %s11800_s8 }
  0x33   : > { %s218_s9 = sshll.u32 %s217_s5, 4  ;;  %s219_s9 = int_to_ptr.hbm [resolvable:$true] %s218_s9 }
  0x34   : > { %s11920_s28 = sshra.s32 %s219_s9, 4  ;;  %s11921_s28 = int_to_ptr.hbm [resolvable:$true] %s11920_s28 }
  0x35   : > { %s11922_s30 = scalar_lea.hbm %s11921_s28, 768  ;;  %p11928_p6 = scmp.lt.s32.totalorder %s11921_s28, %s14596_s3 }
  0x36   : > { %p11923_p2 = scmp.ne.s32.totalorder %s11921_s28, %s11922_s30  ;;  %p11929_p9 = scmp.lt.s32.totalorder %s11927_s25, %s11922_s30 }
  0x38   : > { %p11925_p3 = pnand %p11923_p2, %p11864_p11  ;;  %p11930_p10 = por %p11929_p9, %p11928_p6 }
  0x3a   : > { %p11926_p4 = pneg %p11925_p3 }
  0x3c   : > { %p11931_p12 = pnand %p11930_p10, %p11926_p4 }
  0x3e   : > { %11934 = shalt.err (!%p11931_p12)
}
  0x3f   : > { %s11992_s15 = smov 192   ;;  %s11993_s27 = smov 12  }
  0x40   : > { %11819 = dma.hbm_to_vmem [thread:$0]  (!%p12062_p8), %s219_s9, 12288, %s221_s21, %s12074_s11, %s11992_s15, %s11992_s15, %s11993_s27  }
  0x41   : > { %232 = sbr.rel (%p12094_p5) target bundleno = 1180 (0x49c), region = 36 }
  0x46   : > { %s12135_s7 = sand.u32 1, %s11980_s16  }
  0x47   : > { %s11801_s8 = smul.u32 6144, %s12135_s7  ;;  %s235_s12 = scalar_lea.sflag [#allocation3], %s12135_s7 }
  0x49   : > { %s12139_s22 = scalar_lea.vmem [#allocation2], %s11801_s8 }
  0x4a   : > { %11967 = dma.done.wait (%p12055_p7), %s235_s12, 98304  }
  0x4b   : > { %11969 = vsyncadd (%p12055_p7), %s235_s12, 4294868992  ;;  %s244_s26 = sand.u32 1, %s12038_s19   ;;  %s7353_s11 = sshll.u32 %s12135_s7, 2 }
  0x4c   : > { %s245_s29 = scalar_lea.sflag [#allocation5], %s244_s26  ;;  %s12147_s21 = scalar_lea.vmem [#allocation4], %s7353_s11 }
  0x4d   : > { %11971 = dma.done.wait (%p12055_p7), %s245_s29, 12352  }
  0x4e   : > { %11973 = vsyncadd (%p12055_p7), %s245_s29, 4294954944  ;;  %v7565_v0 = vld [vmem:[%s12139_s22 + $0xe0] sm:$0xf]  ;;  %v10963_v1 = vld [vmem:[%s12139_s22 + $0xec] sm:$0xf0]  ;;  %s11802_s13 = smul.u32 768, %s12135_s7 }
  0x4f   : > { %v7693_v2 = vld [vmem:[%s12139_s22 + $0x1e0] sm:$0xf]  ;;  %v7566_v3 = vor.u32 %v10963_v1, %v7565_v0  ;;  %v10995_v4 = vld [vmem:[%s12139_s22 + $0x1ec] sm:$0xf0]  ;;  %p296_p7 = scmp.lt.s32.totalorder %s12038_s19, 1 }
  0x50   : > { %v7821_v5 = vld [vmem:[%s12139_s22 + $0x2e0] sm:$0xf]  ;;  %v11027_v6 = vld [vmem:[%s12139_s22 + $0x2ec] sm:$0xf0]  ;;  %v7694_v7 = vor.u32 %v10995_v4, %v7693_v2  ;;  %s14252_s18 = scalar_lea.vmem [#allocation6], %s11802_s13 }
  0x51   : > { %v7822_v8 = vor.u32 %v11027_v6, %v7821_v5  ;;  %v7949_v9 = vld [vmem:[%s12139_s22 + $0x3e0] sm:$0xf]  ;;  %v11059_v10 = vld [vmem:[%s12139_s22 + $0x3ec] sm:$0xf0]  ;;  %5063 = vmatpush.bf16.msra.mxu0 %v7566_v3  ;;  %s14684_s19 = smov (!%p296_p7, %s12038_s19), 1 }
  0x52   : > { %v7549_v11 = vld [vmem:[%s12139_s22 + $0xc0] sm:$0xf]  ;;  %v7950_v12 = vor.u32 %v11059_v10, %v7949_v9  ;;  %v10959_v13 = vld [vmem:[%s12139_s22 + $0xcc] sm:$0xf0]  ;;  %5077 = vmatpush.bf16.msra.mxu1 %v7694_v7  ;;  %s11803_s7 = smul.u32 48, %s14684_s19 }
  0x53   : > { %v7677_v14 = vld [vmem:[%s12139_s22 + $0x1c0] sm:$0xf]  ;;  %v10991_v15 = vld [vmem:[%s12139_s22 + $0x1cc] sm:$0xf0]  ;;  %5091 = vmatpush.bf16.msra.mxu2 %v7822_v8  ;;  %v7550_v16 = vor.u32 %v10959_v13, %v7549_v11 }
  0x54   : > { %v7678_v17 = vor.u32 %v10991_v15, %v7677_v14  ;;  %v7805_v18 = vld [vmem:[%s12139_s22 + $0x2c0] sm:$0xf]  ;;  %v11023_v19 = vld [vmem:[%s12139_s22 + $0x2cc] sm:$0xf0]  ;;  %5105 = vmatpush.bf16.msra.mxu3 %v7950_v12  ;;  %s14572_s25 = scalar_lea.vmem %s14597_s4, %s11803_s7 }
  0x55   : > { %v7933_v20 = vld [vmem:[%s12139_s22 + $0x3c0] sm:$0xf]  ;;  %v7806_v21 = vor.u32 %v11023_v19, %v7805_v18  ;;  %v11055_v22 = vld [vmem:[%s12139_s22 + $0x3cc] sm:$0xf0]  ;;  %5064 = vmatpush.bf16.msra.mxu0 %v7550_v16 }
  0x56   : > { %v7533_v23 = vld [vmem:[%s12139_s22 + $0xa0] sm:$0xf]  ;;  %v10955_v24 = vld [vmem:[%s12139_s22 + $0xac] sm:$0xf0]  ;;  %v7934_v25 = vor.u32 %v11055_v22, %v7933_v20  ;;  %5078 = vmatpush.bf16.msra.mxu1 %v7678_v17 }
  0x57   : > { %v7661_v26 = vld [vmem:[%s12139_s22 + $0x1a0] sm:$0xf]  ;;  %v10987_v27 = vld [vmem:[%s12139_s22 + $0x1ac] sm:$0xf0]  ;;  %v7534_v29 = vor.u32 %v10955_v24, %v7533_v23  ;;  %5092 = vmatpush.bf16.msra.mxu2 %v7806_v21 }
  0x58   : > { %v7789_v28 = vld [vmem:[%s12139_s22 + $0x2a0] sm:$0xf]  ;;  %v11019_v30 = vld [vmem:[%s12139_s22 + $0x2ac] sm:$0xf0]  ;;  %v7662_v33 = vor.u32 %v10987_v27, %v7661_v26  ;;  %5106 = vmatpush.bf16.msra.mxu3 %v7934_v25 }
  0x59   : > { %v7917_v31 = vld [vmem:[%s12139_s22 + $0x3a0] sm:$0xf]  ;;  %v11051_v32 = vld [vmem:[%s12139_s22 + $0x3ac] sm:$0xf0]  ;;  %v7790_v34 = vor.u32 %v11019_v30, %v7789_v28  ;;  %5065 = vmatpush.bf16.msra.mxu0 %v7534_v29 }
  0x5a   : > { %v7517_v35 = vld [vmem:[%s12139_s22 + $0x80] sm:$0xf]  ;;  %v10951_v36 = vld [vmem:[%s12139_s22 + $0x8c] sm:$0xf0]  ;;  %v7918_v38 = vor.u32 %v11051_v32, %v7917_v31  ;;  %5079 = vmatpush.bf16.msra.mxu1 %v7662_v33 }
  0x5b   : > { %v7645_v37 = vld [vmem:[%s12139_s22 + $0x180] sm:$0xf]  ;;  %v10983_v39 = vld [vmem:[%s12139_s22 + $0x18c] sm:$0xf0]  ;;  %v7518_v44 = vor.u32 %v10951_v36, %v7517_v35  ;;  %5093 = vmatpush.bf16.msra.mxu2 %v7790_v34 }
  0x5c   : > { %v7773_v40 = vld [vmem:[%s12139_s22 + $0x280] sm:$0xf]  ;;  %v11015_v41 = vld [vmem:[%s12139_s22 + $0x28c] sm:$0xf0]  ;;  %v7646_v45 = vor.u32 %v10983_v39, %v7645_v37  ;;  %5107 = vmatpush.bf16.msra.mxu3 %v7918_v38 }
  0x5d   : > { %v7901_v42 = vld [vmem:[%s12139_s22 + $0x380] sm:$0xf]  ;;  %v11047_v43 = vld [vmem:[%s12139_s22 + $0x38c] sm:$0xf0]  ;;  %v7774_v46 = vor.u32 %v11015_v41, %v7773_v40  ;;  %5066 = vmatpush.bf16.msra.mxu0 %v7518_v44 }
  0x5e   : > { %v7501_v47 = vld [vmem:[%s12139_s22 + $0x60] sm:$0xf]  ;;  %v10947_v48 = vld [vmem:[%s12139_s22 + $0x6c] sm:$0xf0]  ;;  %v7902_v50 = vor.u32 %v11047_v43, %v7901_v42  ;;  %5080 = vmatpush.bf16.msra.mxu1 %v7646_v45 }
  0x5f   : > { %v7629_v49 = vld [vmem:[%s12139_s22 + $0x160] sm:$0xf]  ;;  %v10979_v51 = vld [vmem:[%s12139_s22 + $0x16c] sm:$0xf0]  ;;  %v7502_v56 = vor.u32 %v10947_v48, %v7501_v47  ;;  %5094 = vmatpush.bf16.msra.mxu2 %v7774_v46 }
  0x60   : > { %v7757_v52 = vld [vmem:[%s12139_s22 + $0x260] sm:$0xf]  ;;  %v11011_v53 = vld [vmem:[%s12139_s22 + $0x26c] sm:$0xf0]  ;;  %v7630_v57 = vor.u32 %v10979_v51, %v7629_v49  ;;  %5108 = vmatpush.bf16.msra.mxu3 %v7902_v50 }
  0x61   : > { %v7885_v54 = vld [vmem:[%s12139_s22 + $0x360] sm:$0xf]  ;;  %v11043_v55 = vld [vmem:[%s12139_s22 + $0x36c] sm:$0xf0]  ;;  %v7758_v58 = vor.u32 %v11011_v53, %v7757_v52  ;;  %5067 = vmatpush.bf16.msra.mxu0 %v7502_v56 }
  0x62   : > { %v7485_v59 = vld [vmem:[%s12139_s22 + $0x40] sm:$0xf]  ;;  %v10943_v60 = vld [vmem:[%s12139_s22 + $0x4c] sm:$0xf0]  ;;  %v7886_v62 = vor.u32 %v11043_v55, %v7885_v54  ;;  %5081 = vmatpush.bf16.msra.mxu1 %v7630_v57  ;;  %v7365_v54 = vld [vmem:[%s14593_s0 + $0x8] sm:$0xf] }
  0x63   : > { %v7613_v61 = vld [vmem:[%s12139_s22 + $0x140] sm:$0xf]  ;;  %v10975_v63 = vld [vmem:[%s12139_s22 + $0x14c] sm:$0xf0]  ;;  %v7486_v4 = vor.u32 %v10943_v60, %v7485_v59  ;;  %5095 = vmatpush.bf16.msra.mxu2 %v7758_v58  ;;  %v10922_v59 = vld [vmem:[%s14593_s0 + $0x64] sm:$0xf0] }
  0x64   : > { %v7741_v0 = vld [vmem:[%s12139_s22 + $0x240] sm:$0xf]  ;;  %v11007_v1 = vld [vmem:[%s12139_s22 + $0x24c] sm:$0xf0]  ;;  %v7614_v5 = vor.u32 %v10975_v63, %v7613_v61  ;;  %5109 = vmatpush.bf16.msra.mxu3 %v7886_v62 }
  0x65   : > { %v7869_v2 = vld [vmem:[%s12139_s22 + $0x340] sm:$0xf]  ;;  %v11039_v3 = vld [vmem:[%s12139_s22 + $0x34c] sm:$0xf0]  ;;  %v7742_v6 = vor.u32 %v11007_v1, %v7741_v0  ;;  %5068 = vmatpush.bf16.msra.mxu0 %v7486_v4  ;;  %v12252_v1 = vor.u32 %v10922_v59, %v7365_v54 }
  0x66   : > { %v7469_v7 = vld [vmem:[%s12139_s22 + $0x20] sm:$0xf]  ;;  %v10939_v8 = vld [vmem:[%s12139_s22 + $0x2c] sm:$0xf0]  ;;  %v7870_v10 = vor.u32 %v11039_v3, %v7869_v2  ;;  %5082 = vmatpush.bf16.msra.mxu1 %v7614_v5 }
  0x67   : > { %v7597_v9 = vld [vmem:[%s12139_s22 + $0x120] sm:$0xf]  ;;  %v10971_v11 = vld [vmem:[%s12139_s22 + $0x12c] sm:$0xf0]  ;;  %v7470_v16 = vor.u32 %v10939_v8, %v7469_v7  ;;  %5096 = vmatpush.bf16.msra.mxu2 %v7742_v6  ;;  %v10909_v6 = vld [vmem:[%s14593_s0 + $0x4] sm:$0xf] }
  0x68   : > { %v7725_v12 = vld [vmem:[%s12139_s22 + $0x220] sm:$0xf]  ;;  %v11003_v13 = vld [vmem:[%s12139_s22 + $0x22c] sm:$0xf0]  ;;  %v7598_v19 = vor.u32 %v10971_v11, %v7597_v9  ;;  %5110 = vmatpush.bf16.msra.mxu3 %v7870_v10  ;;  %v7359_v7 = vld [vmem:[%s14593_s0 + $0x60] sm:$0xf0] }
  0x69   : > { %v7853_v14 = vld [vmem:[%s12139_s22 + $0x320] sm:$0xf]  ;;  %v11035_v15 = vld [vmem:[%s12139_s22 + $0x32c] sm:$0xf0]  ;;  %v7726_v20 = vor.u32 %v11003_v13, %v7725_v12  ;;  %5069 = vmatpush.bf16.msra.mxu0 %v7470_v16  ;;  %v10910_v8 = vld [vmem:[%s14593_s0 + $0xc] sm:$0xf]  ;;  %v12268_v10 = vor.u32 %v10909_v6, %v7359_v7 }
  0x6a   : > { %v7453_v17 = vld [vmem:[%s12139_s22] sm:$0xf]  ;;  %v10935_v18 = vld [vmem:[%s12139_s22 + $0xc] sm:$0xf0]  ;;  %v7854_v24 = vor.u32 %v11035_v15, %v7853_v14  ;;  %5083 = vmatpush.bf16.msra.mxu1 %v7598_v19  ;;  %v7367_v11 = vld [vmem:[%s14593_s0 + $0x68] sm:$0xf0] }
  0x6b   : > { %v7581_v21 = vld [vmem:[%s12139_s22 + $0x100] sm:$0xf]  ;;  %v10967_v22 = vld [vmem:[%s12139_s22 + $0x10c] sm:$0xf0]  ;;  %v7454_v31 = vor.u32 %v10935_v18, %v7453_v17  ;;  %5097 = vmatpush.bf16.msra.mxu2 %v7726_v20  ;;  %v12276_v17 = vor.u32 %v10910_v8, %v7367_v11 }
  0x6c   : > { %v7709_v23 = vld [vmem:[%s12139_s22 + $0x200] sm:$0xf]  ;;  %v10999_v25 = vld [vmem:[%s12139_s22 + $0x20c] sm:$0xf0]  ;;  %v7582_v35 = vor.u32 %v10967_v22, %v7581_v21  ;;  %5111 = vmatpush.bf16.msra.mxu3 %v7854_v24 }
  0x6d   : > { %v7837_v26 = vld [vmem:[%s12139_s22 + $0x300] sm:$0xf]  ;;  %v11031_v27 = vld [vmem:[%s12139_s22 + $0x30c] sm:$0xf0]  ;;  %v7710_v36 = vor.u32 %v10999_v25, %v7709_v23  ;;  %5070 = vmatpush.bf16.msra.mxu0 %v7454_v31 }
  0x6e   : > { %v8077_v28 = vld [vmem:[%s12139_s22 + $0x4e0] sm:$0xf]  ;;  %v11091_v29 = vld [vmem:[%s12139_s22 + $0x4ec] sm:$0xf0]  ;;  %v7838_v39 = vor.u32 %v11031_v27, %v7837_v26  ;;  %5084 = vmatpush.bf16.msra.mxu1 %v7582_v35 }
  0x6f   : > { %v8205_v30 = vld [vmem:[%s12139_s22 + $0x5e0] sm:$0xf]  ;;  %v11123_v32 = vld [vmem:[%s12139_s22 + $0x5ec] sm:$0xf0]  ;;  %v8078_v40 = vor.u32 %v11091_v29, %v8077_v28  ;;  %5098 = vmatpush.bf16.msra.mxu2 %v7710_v36 }
  0x70   : > { %v8333_v33 = vld [vmem:[%s12139_s22 + $0x6e0] sm:$0xf]  ;;  %v11155_v34 = vld [vmem:[%s12139_s22 + $0x6ec] sm:$0xf0]  ;;  %v8206_v43 = vor.u32 %v11123_v32, %v8205_v30  ;;  %5112 = vmatpush.bf16.msra.mxu3 %v7838_v39 }
  0x71   : > { %v8461_v37 = vld [vmem:[%s12139_s22 + $0x7e0] sm:$0xf]  ;;  %v11187_v38 = vld [vmem:[%s12139_s22 + $0x7ec] sm:$0xf0]  ;;  %v8334_v44 = vor.u32 %v11155_v34, %v8333_v33  ;;  %5119 = vmatpush.bf16.msrb.mxu0 %v8078_v40  ;;  %5085 = vmatmul.bf16.vlgmr.msra.gmra.mxu1 %v12268_v10 }
  0x72   : > { %v8061_v41 = vld [vmem:[%s12139_s22 + $0x4c0] sm:$0xf]  ;;  %v11087_v42 = vld [vmem:[%s12139_s22 + $0x4cc] sm:$0xf0]  ;;  %v8462_v48 = vor.u32 %v11187_v38, %v8461_v37  ;;  %5133 = vmatpush.bf16.msrb.mxu1 %v8206_v43  ;;  %5099 = vmatmul.bf16.vlgmr.msra.gmra.mxu2 %v12252_v1 }
  0x73   : > { %v8189_v45 = vld [vmem:[%s12139_s22 + $0x5c0] sm:$0xf]  ;;  %v11119_v46 = vld [vmem:[%s12139_s22 + $0x5cc] sm:$0xf0]  ;;  %v8062_v55 = vor.u32 %v11087_v42, %v8061_v41  ;;  %5147 = vmatpush.bf16.msrb.mxu2 %v8334_v44  ;;  %5113 = vmatmul.bf16.vlgmr.msra.gmra.mxu3 %v12276_v17 }
  0x74   : > { %v8317_v47 = vld [vmem:[%s12139_s22 + $0x6c0] sm:$0xf]  ;;  %v11151_v49 = vld [vmem:[%s12139_s22 + $0x6cc] sm:$0xf0]  ;;  %v8190_v60 = vor.u32 %v11119_v46, %v8189_v45  ;;  %5161 = vmatpush.bf16.msrb.mxu3 %v8462_v48 }
  0x75   : > { %v8445_v50 = vld [vmem:[%s12139_s22 + $0x7c0] sm:$0xf]  ;;  %v11183_v51 = vld [vmem:[%s12139_s22 + $0x7cc] sm:$0xf0]  ;;  %v8318_v61 = vor.u32 %v11151_v49, %v8317_v47  ;;  %5120 = vmatpush.bf16.msrb.mxu0 %v8062_v55 }
  0x76   : > { %v7357_v52 = vld [vmem:[%s14593_s0] sm:$0xf]  ;;  %v11083_v57 = vld [vmem:[%s12139_s22 + $0x4ac] sm:$0xf0]  ;;  %v8446_v2 = vor.u32 %v11183_v51, %v8445_v50  ;;  %5134 = vmatpush.bf16.msrb.mxu1 %v8190_v60 }
  0x77   : > { %v10921_v53 = vld [vmem:[%s14593_s0 + $0x5c] sm:$0xf0]  ;;  %v11115_v63 = vld [vmem:[%s12139_s22 + $0x5ac] sm:$0xf0]  ;;  %5148 = vmatpush.bf16.msrb.mxu2 %v8318_v61 }
  0x78   : > { %v8045_v56 = vld [vmem:[%s12139_s22 + $0x4a0] sm:$0xf]  ;;  %v12244_v58 = vor.u32 %v10921_v53, %v7357_v52  ;;  %v11147_v3 = vld [vmem:[%s12139_s22 + $0x6ac] sm:$0xf0]  ;;  %5162 = vmatpush.bf16.msrb.mxu3 %v8446_v2 }
  0x79   : > { %v8173_v62 = vld [vmem:[%s12139_s22 + $0x5a0] sm:$0xf]  ;;  %v11179_v5 = vld [vmem:[%s12139_s22 + $0x7ac] sm:$0xf0]  ;;  %v8046_v9 = vor.u32 %v11083_v57, %v8045_v56 }
  0x7a   : > { %v8301_v0 = vld [vmem:[%s12139_s22 + $0x6a0] sm:$0xf]  ;;  %5071 = vmatmul.bf16.vlgmr.msra.gmra.mxu0 %v12244_v58  ;;  %v8174_v12 = vor.u32 %v11115_v63, %v8173_v62  ;;  %v11079_v15 = vld [vmem:[%s12139_s22 + $0x48c] sm:$0xf0] }
  0x7b   : > { %v8429_v4 = vld [vmem:[%s12139_s22 + $0x7a0] sm:$0xf]  ;;  %v8302_v13 = vor.u32 %v11147_v3, %v8301_v0  ;;  %v11111_v19 = vld [vmem:[%s12139_s22 + $0x58c] sm:$0xf0]  ;;  %5121 = vmatpush.bf16.msrb.mxu0 %v8046_v9 }
  0x7c   : > { %v8029_v14 = vld [vmem:[%s12139_s22 + $0x480] sm:$0xf]  ;;  %v8430_v18 = vor.u32 %v11179_v5, %v8429_v4  ;;  %v11143_v21 = vld [vmem:[%s12139_s22 + $0x68c] sm:$0xf0]  ;;  %5135 = vmatpush.bf16.msrb.mxu1 %v8174_v12 }
  0x7d   : > { %v8157_v16 = vld [vmem:[%s12139_s22 + $0x580] sm:$0xf]  ;;  %v11175_v23 = vld [vmem:[%s12139_s22 + $0x78c] sm:$0xf0]  ;;  %v8030_v24 = vor.u32 %v11079_v15, %v8029_v14  ;;  %5149 = vmatpush.bf16.msrb.mxu2 %v8302_v13 }
  0x7e   : > { %v8285_v20 = vld [vmem:[%s12139_s22 + $0x680] sm:$0xf]  ;;  %v8158_v25 = vor.u32 %v11111_v19, %v8157_v16  ;;  %v11075_v28 = vld [vmem:[%s12139_s22 + $0x46c] sm:$0xf0]  ;;  %5163 = vmatpush.bf16.msrb.mxu3 %v8430_v18 }
  0x7f   : > { %v8413_v22 = vld [vmem:[%s12139_s22 + $0x780] sm:$0xf]  ;;  %v8286_v26 = vor.u32 %v11143_v21, %v8285_v20  ;;  %v11107_v31 = vld [vmem:[%s12139_s22 + $0x56c] sm:$0xf0]  ;;  %5122 = vmatpush.bf16.msrb.mxu0 %v8030_v24 }
  0x80   : > { %v8013_v27 = vld [vmem:[%s12139_s22 + $0x460] sm:$0xf]  ;;  %v8414_v30 = vor.u32 %v11175_v23, %v8413_v22  ;;  %v11139_v33 = vld [vmem:[%s12139_s22 + $0x66c] sm:$0xf0]  ;;  %5136 = vmatpush.bf16.msrb.mxu1 %v8158_v25  ;;  %v7381_v25 = vld [vmem:[%s14593_s0 + $0x18] sm:$0xf] }
  0x81   : > { %v8141_v29 = vld [vmem:[%s12139_s22 + $0x560] sm:$0xf]  ;;  %v11171_v35 = vld [vmem:[%s12139_s22 + $0x76c] sm:$0xf0]  ;;  %v8014_v36 = vor.u32 %v11075_v28, %v8013_v27  ;;  %5150 = vmatpush.bf16.msrb.mxu2 %v8286_v26  ;;  %v10924_v26 = vld [vmem:[%s14593_s0 + $0x74] sm:$0xf0] }
  0x82   : > { %v8269_v32 = vld [vmem:[%s12139_s22 + $0x660] sm:$0xf]  ;;  %v8142_v37 = vor.u32 %v11107_v31, %v8141_v29  ;;  %v11071_v40 = vld [vmem:[%s12139_s22 + $0x44c] sm:$0xf0]  ;;  %5164 = vmatpush.bf16.msrb.mxu3 %v8414_v30  ;;  %v10911_v27 = vld [vmem:[%s14593_s0 + $0x14] sm:$0xf] }
  0x83   : > { %v8397_v34 = vld [vmem:[%s12139_s22 + $0x760] sm:$0xf]  ;;  %v8270_v38 = vor.u32 %v11139_v33, %v8269_v32  ;;  %v11103_v43 = vld [vmem:[%s12139_s22 + $0x54c] sm:$0xf0]  ;;  %5123 = vmatpush.bf16.msrb.mxu0 %v8014_v36  ;;  %v7375_v30 = vld [vmem:[%s14593_s0 + $0x70] sm:$0xf0] }
  0x84   : > { %v7997_v39 = vld [vmem:[%s12139_s22 + $0x440] sm:$0xf]  ;;  %v8398_v42 = vor.u32 %v11171_v35, %v8397_v34  ;;  %v11135_v45 = vld [vmem:[%s12139_s22 + $0x64c] sm:$0xf0]  ;;  %5137 = vmatpush.bf16.msrb.mxu1 %v8142_v37  ;;  %v10912_v31 = vld [vmem:[%s14593_s0 + $0x1c] sm:$0xf] }
  0x85   : > { %v8125_v41 = vld [vmem:[%s12139_s22 + $0x540] sm:$0xf]  ;;  %v11167_v47 = vld [vmem:[%s12139_s22 + $0x74c] sm:$0xf0]  ;;  %v7998_v48 = vor.u32 %v11071_v40, %v7997_v39  ;;  %5151 = vmatpush.bf16.msrb.mxu2 %v8270_v38  ;;  %v7383_v32 = vld [vmem:[%s14593_s0 + $0x78] sm:$0xf0] }
  0x86   : > { %v8253_v44 = vld [vmem:[%s12139_s22 + $0x640] sm:$0xf]  ;;  %v8126_v50 = vor.u32 %v11103_v43, %v8125_v41  ;;  %v11067_v52 = vld [vmem:[%s12139_s22 + $0x42c] sm:$0xf0]  ;;  %5165 = vmatpush.bf16.msrb.mxu3 %v8398_v42  ;;  %v12357_v43 = vor.u32 %v10924_v26, %v7381_v25 }
  0x87   : > { %v8381_v46 = vld [vmem:[%s12139_s22 + $0x740] sm:$0xf]  ;;  %v8254_v51 = vor.u32 %v11135_v45, %v8253_v44  ;;  %v11099_v54 = vld [vmem:[%s12139_s22 + $0x52c] sm:$0xf0]  ;;  %5124 = vmatpush.bf16.msrb.mxu0 %v7998_v48  ;;  %v12359_v44 = vor.u32 %v10911_v27, %v7375_v30 }
  0x88   : > { %v7981_v49 = vld [vmem:[%s12139_s22 + $0x420] sm:$0xf]  ;;  %v8382_v55 = vor.u32 %v11167_v47, %v8381_v46  ;;  %v11131_v57 = vld [vmem:[%s12139_s22 + $0x62c] sm:$0xf0]  ;;  %5138 = vmatpush.bf16.msrb.mxu1 %v8126_v50  ;;  %v12363_v47 = vor.u32 %v10912_v31, %v7383_v32 }
  0x89   : > { %v8109_v53 = vld [vmem:[%s12139_s22 + $0x520] sm:$0xf]  ;;  %v11163_v60 = vld [vmem:[%s12139_s22 + $0x72c] sm:$0xf0]  ;;  %v7982_v63 = vor.u32 %v11067_v52, %v7981_v49  ;;  %5152 = vmatpush.bf16.msrb.mxu2 %v8254_v51 }
  0x8a   : > { %v8237_v56 = vld [vmem:[%s12139_s22 + $0x620] sm:$0xf]  ;;  %v11063_v62 = vld [vmem:[%s12139_s22 + $0x40c] sm:$0xf0]  ;;  %v8110_v5 = vor.u32 %v11099_v54, %v8109_v53  ;;  %5166 = vmatpush.bf16.msrb.mxu3 %v8382_v55 }
  0x8b   : > { %v8365_v59 = vld [vmem:[%s12139_s22 + $0x720] sm:$0xf]  ;;  %v11095_v2 = vld [vmem:[%s12139_s22 + $0x50c] sm:$0xf0]  ;;  %v8238_v6 = vor.u32 %v11131_v57, %v8237_v56  ;;  %5125 = vmatpush.bf16.msrb.mxu0 %v7982_v63 }
  0x8c   : > { %v7965_v61 = vld [vmem:[%s12139_s22 + $0x400] sm:$0xf]  ;;  %v11127_v4 = vld [vmem:[%s12139_s22 + $0x60c] sm:$0xf0]  ;;  %v8366_v11 = vor.u32 %v11163_v60, %v8365_v59  ;;  %5139 = vmatpush.bf16.msrb.mxu1 %v8110_v5 }
  0x8d   : > { %v8093_v0 = vld [vmem:[%s12139_s22 + $0x500] sm:$0xf]  ;;  %v11159_v8 = vld [vmem:[%s12139_s22 + $0x70c] sm:$0xf0]  ;;  %v7966_v19 = vor.u32 %v11063_v62, %v7965_v61  ;;  %5153 = vmatpush.bf16.msrb.mxu2 %v8238_v6 }
  0x8e   : > { %v8221_v3 = vld [vmem:[%s12139_s22 + $0x600] sm:$0xf]  ;;  %v11219_v12 = vld [vmem:[%s12139_s22 + $0x8ec] sm:$0xf0]  ;;  %v8094_v23 = vor.u32 %v11095_v2, %v8093_v0  ;;  %5167 = vmatpush.bf16.msrb.mxu3 %v8366_v11 }
  0x8f   : > { %v8349_v7 = vld [vmem:[%s12139_s22 + $0x700] sm:$0xf]  ;;  %v11251_v14 = vld [vmem:[%s12139_s22 + $0x9ec] sm:$0xf0]  ;;  %v8222_v24 = vor.u32 %v11127_v4, %v8221_v3  ;;  %5126 = vmatpush.bf16.msrb.mxu0 %v7966_v19 }
  0x90   : > { %v8589_v9 = vld [vmem:[%s12139_s22 + $0x8e0] sm:$0xf]  ;;  %v11283_v16 = vld [vmem:[%s12139_s22 + $0xaec] sm:$0xf0]  ;;  %v8350_v28 = vor.u32 %v11159_v8, %v8349_v7  ;;  %5140 = vmatpush.bf16.msrb.mxu1 %v8094_v23 }
  0x91   : > { %v8717_v13 = vld [vmem:[%s12139_s22 + $0x9e0] sm:$0xf]  ;;  %v11315_v20 = vld [vmem:[%s12139_s22 + $0xbec] sm:$0xf0]  ;;  %v8590_v29 = vor.u32 %v11219_v12, %v8589_v9  ;;  %5154 = vmatpush.bf16.msrb.mxu2 %v8222_v24 }
  0x92   : > { %v8845_v15 = vld [vmem:[%s12139_s22 + $0xae0] sm:$0xf]  ;;  %v7373_v21 = vld [vmem:[%s14593_s0 + $0x10] sm:$0xf]  ;;  %v8718_v33 = vor.u32 %v11251_v14, %v8717_v13  ;;  %5168 = vmatpush.bf16.msrb.mxu3 %v8350_v28 }
  0x93   : > { %v8973_v18 = vld [vmem:[%s12139_s22 + $0xbe0] sm:$0xf]  ;;  %v10923_v22 = vld [vmem:[%s14593_s0 + $0x6c] sm:$0xf0]  ;;  %v8846_v34 = vor.u32 %v11283_v16, %v8845_v15  ;;  %5175 = vmatpush.bf16.msra.mxu0 %v8590_v29  ;;  %5141 = vmatmul.bf16.vlgmr.msrb.gmra.mxu1 %v12359_v44 }
  0x94   : > { %v8573_v35 = vld [vmem:[%s12139_s22 + $0x8c0] sm:$0xf]  ;;  %v11215_v36 = vld [vmem:[%s12139_s22 + $0x8cc] sm:$0xf0]  ;;  %v8974_v38 = vor.u32 %v11315_v20, %v8973_v18  ;;  %v12352_v39 = vor.u32 %v10923_v22, %v7373_v21  ;;  %5189 = vmatpush.bf16.msra.mxu1 %v8718_v33  ;;  %5155 = vmatmul.bf16.vlgmr.msrb.gmra.mxu2 %v12357_v43 }
  0x95   : > { %v8701_v37 = vld [vmem:[%s12139_s22 + $0x9c0] sm:$0xf]  ;;  %v11247_v40 = vld [vmem:[%s12139_s22 + $0x9cc] sm:$0xf0]  ;;  %v8574_v48 = vor.u32 %v11215_v36, %v8573_v35  ;;  %5203 = vmatpush.bf16.msra.mxu2 %v8846_v34  ;;  %5169 = vmatmul.bf16.vlgmr.msrb.gmra.mxu3 %v12363_v47 }
  0x96   : > { %v8829_v41 = vld [vmem:[%s12139_s22 + $0xac0] sm:$0xf]  ;;  %v11279_v42 = vld [vmem:[%s12139_s22 + $0xacc] sm:$0xf0]  ;;  %v8702_v49 = vor.u32 %v11247_v40, %v8701_v37  ;;  %5217 = vmatpush.bf16.msra.mxu3 %v8974_v38  ;;  %5127 = vmatmul.bf16.vlgmr.msrb.gmra.mxu0 %v12352_v39 }
  0x97   : > { %v8957_v45 = vld [vmem:[%s12139_s22 + $0xbc0] sm:$0xf]  ;;  %v11311_v46 = vld [vmem:[%s12139_s22 + $0xbcc] sm:$0xf0]  ;;  %v8830_v50 = vor.u32 %v11279_v42, %v8829_v41  ;;  %5176 = vmatpush.bf16.msra.mxu0 %v8574_v48 }
  0x98   : > { %v8557_v51 = vld [vmem:[%s12139_s22 + $0x8a0] sm:$0xf]  ;;  %v11211_v52 = vld [vmem:[%s12139_s22 + $0x8ac] sm:$0xf0]  ;;  %v8958_v54 = vor.u32 %v11311_v46, %v8957_v45  ;;  %5190 = vmatpush.bf16.msra.mxu1 %v8702_v49 }
  0x99   : > { %v8685_v53 = vld [vmem:[%s12139_s22 + $0x9a0] sm:$0xf]  ;;  %v11243_v55 = vld [vmem:[%s12139_s22 + $0x9ac] sm:$0xf0]  ;;  %v8558_v61 = vor.u32 %v11211_v52, %v8557_v51  ;;  %5204 = vmatpush.bf16.msra.mxu2 %v8830_v50 }
  0x9a   : > { %v8813_v56 = vld [vmem:[%s12139_s22 + $0xaa0] sm:$0xf]  ;;  %v11275_v57 = vld [vmem:[%s12139_s22 + $0xaac] sm:$0xf0]  ;;  %v8686_v62 = vor.u32 %v11243_v55, %v8685_v53  ;;  %5218 = vmatpush.bf16.msra.mxu3 %v8958_v54 }
  0x9b   : > { %v8941_v59 = vld [vmem:[%s12139_s22 + $0xba0] sm:$0xf]  ;;  %v11307_v60 = vld [vmem:[%s12139_s22 + $0xbac] sm:$0xf0]  ;;  %v8814_v63 = vor.u32 %v11275_v57, %v8813_v56  ;;  %5177 = vmatpush.bf16.msra.mxu0 %v8558_v61 }
  0x9c   : > { %v8541_v0 = vld [vmem:[%s12139_s22 + $0x880] sm:$0xf]  ;;  %v11207_v2 = vld [vmem:[%s12139_s22 + $0x88c] sm:$0xf0]  ;;  %v8942_v4 = vor.u32 %v11307_v60, %v8941_v59  ;;  %5191 = vmatpush.bf16.msra.mxu1 %v8686_v62 }
  0x9d   : > { %v8669_v3 = vld [vmem:[%s12139_s22 + $0x980] sm:$0xf]  ;;  %v11239_v5 = vld [vmem:[%s12139_s22 + $0x98c] sm:$0xf0]  ;;  %v8542_v11 = vor.u32 %v11207_v2, %v8541_v0  ;;  %5205 = vmatpush.bf16.msra.mxu2 %v8814_v63 }
  0x9e   : > { %v8797_v6 = vld [vmem:[%s12139_s22 + $0xa80] sm:$0xf]  ;;  %v11271_v7 = vld [vmem:[%s12139_s22 + $0xa8c] sm:$0xf0]  ;;  %v8670_v12 = vor.u32 %v11239_v5, %v8669_v3  ;;  %5219 = vmatpush.bf16.msra.mxu3 %v8942_v4 }
  0x9f   : > { %v8925_v8 = vld [vmem:[%s12139_s22 + $0xb80] sm:$0xf]  ;;  %v11303_v9 = vld [vmem:[%s12139_s22 + $0xb8c] sm:$0xf0]  ;;  %v8798_v13 = vor.u32 %v11271_v7, %v8797_v6  ;;  %5178 = vmatpush.bf16.msra.mxu0 %v8542_v11 }
  0xa0   : > { %v8525_v14 = vld [vmem:[%s12139_s22 + $0x860] sm:$0xf]  ;;  %v11203_v15 = vld [vmem:[%s12139_s22 + $0x86c] sm:$0xf0]  ;;  %v8926_v18 = vor.u32 %v11303_v9, %v8925_v8  ;;  %5192 = vmatpush.bf16.msra.mxu1 %v8670_v12 }
  0xa1   : > { %v8653_v16 = vld [vmem:[%s12139_s22 + $0x960] sm:$0xf]  ;;  %v11235_v19 = vld [vmem:[%s12139_s22 + $0x96c] sm:$0xf0]  ;;  %v8526_v24 = vor.u32 %v11203_v15, %v8525_v14  ;;  %5206 = vmatpush.bf16.msra.mxu2 %v8798_v13 }
  0xa2   : > { %v8781_v20 = vld [vmem:[%s12139_s22 + $0xa60] sm:$0xf]  ;;  %v11267_v21 = vld [vmem:[%s12139_s22 + $0xa6c] sm:$0xf0]  ;;  %v8654_v25 = vor.u32 %v11235_v19, %v8653_v16  ;;  %5220 = vmatpush.bf16.msra.mxu3 %v8926_v18  ;;  %v7397_v16 = vld [vmem:[%s14593_s0 + $0x28] sm:$0xf] }
  0xa3   : > { %v8909_v22 = vld [vmem:[%s12139_s22 + $0xb60] sm:$0xf]  ;;  %v11299_v23 = vld [vmem:[%s12139_s22 + $0xb6c] sm:$0xf0]  ;;  %v8782_v26 = vor.u32 %v11267_v21, %v8781_v20  ;;  %5179 = vmatpush.bf16.msra.mxu0 %v8526_v24  ;;  %v10926_v18 = vld [vmem:[%s14593_s0 + $0x84] sm:$0xf0] }
  0xa4   : > { %v8509_v27 = vld [vmem:[%s12139_s22 + $0x840] sm:$0xf]  ;;  %v11199_v28 = vld [vmem:[%s12139_s22 + $0x84c] sm:$0xf0]  ;;  %v8910_v30 = vor.u32 %v11299_v23, %v8909_v22  ;;  %5193 = vmatpush.bf16.msra.mxu1 %v8654_v25  ;;  %v10913_v19 = vld [vmem:[%s14593_s0 + $0x24] sm:$0xf] }
  0xa5   : > { %v8637_v29 = vld [vmem:[%s12139_s22 + $0x940] sm:$0xf]  ;;  %v11231_v31 = vld [vmem:[%s12139_s22 + $0x94c] sm:$0xf0]  ;;  %v8510_v36 = vor.u32 %v11199_v28, %v8509_v27  ;;  %5207 = vmatpush.bf16.msra.mxu2 %v8782_v26  ;;  %v7391_v22 = vld [vmem:[%s14593_s0 + $0x80] sm:$0xf0] }
  0xa6   : > { %v8765_v32 = vld [vmem:[%s12139_s22 + $0xa40] sm:$0xf]  ;;  %v11263_v33 = vld [vmem:[%s12139_s22 + $0xa4c] sm:$0xf0]  ;;  %v8638_v38 = vor.u32 %v11231_v31, %v8637_v29  ;;  %5221 = vmatpush.bf16.msra.mxu3 %v8910_v30  ;;  %v10914_v23 = vld [vmem:[%s14593_s0 + $0x2c] sm:$0xf] }
  0xa7   : > { %v8893_v34 = vld [vmem:[%s12139_s22 + $0xb40] sm:$0xf]  ;;  %v11295_v35 = vld [vmem:[%s12139_s22 + $0xb4c] sm:$0xf0]  ;;  %v8766_v40 = vor.u32 %v11263_v33, %v8765_v32  ;;  %5180 = vmatpush.bf16.msra.mxu0 %v8510_v36  ;;  %v7399_v24 = vld [vmem:[%s14593_s0 + $0x88] sm:$0xf0]  ;;  %v12459_v36 = vor.u32 %v10913_v19, %v7391_v22 }
  0xa8   : > { %v8493_v37 = vld [vmem:[%s12139_s22 + $0x820] sm:$0xf]  ;;  %v11195_v41 = vld [vmem:[%s12139_s22 + $0x82c] sm:$0xf0]  ;;  %v8894_v46 = vor.u32 %v11295_v35, %v8893_v34  ;;  %5194 = vmatpush.bf16.msra.mxu1 %v8638_v38  ;;  %v12457_v35 = vor.u32 %v10926_v18, %v7397_v16 }
  0xa9   : > { %v8621_v42 = vld [vmem:[%s12139_s22 + $0x920] sm:$0xf]  ;;  %v11227_v45 = vld [vmem:[%s12139_s22 + $0x92c] sm:$0xf0]  ;;  %v8494_v54 = vor.u32 %v11195_v41, %v8493_v37  ;;  %5208 = vmatpush.bf16.msra.mxu2 %v8766_v40  ;;  %v12463_v40 = vor.u32 %v10914_v23, %v7399_v24 }
  0xaa   : > { %v8749_v48 = vld [vmem:[%s12139_s22 + $0xa20] sm:$0xf]  ;;  %v11259_v49 = vld [vmem:[%s12139_s22 + $0xa2c] sm:$0xf0]  ;;  %v8622_v60 = vor.u32 %v11227_v45, %v8621_v42  ;;  %5222 = vmatpush.bf16.msra.mxu3 %v8894_v46 }
  0xab   : > { %v8877_v50 = vld [vmem:[%s12139_s22 + $0xb20] sm:$0xf]  ;;  %v11291_v51 = vld [vmem:[%s12139_s22 + $0xb2c] sm:$0xf0]  ;;  %v8750_v61 = vor.u32 %v11259_v49, %v8749_v48  ;;  %5181 = vmatpush.bf16.msra.mxu0 %v8494_v54 }
  0xac   : > { %v8477_v52 = vld [vmem:[%s12139_s22 + $0x800] sm:$0xf]  ;;  %v11191_v53 = vld [vmem:[%s12139_s22 + $0x80c] sm:$0xf0]  ;;  %v8878_v2 = vor.u32 %v11291_v51, %v8877_v50  ;;  %5195 = vmatpush.bf16.msra.mxu1 %v8622_v60 }
  0xad   : > { %v8605_v55 = vld [vmem:[%s12139_s22 + $0x900] sm:$0xf]  ;;  %v11223_v56 = vld [vmem:[%s12139_s22 + $0x90c] sm:$0xf0]  ;;  %v8478_v9 = vor.u32 %v11191_v53, %v8477_v52  ;;  %5209 = vmatpush.bf16.msra.mxu2 %v8750_v61 }
  0xae   : > { %v8733_v57 = vld [vmem:[%s12139_s22 + $0xa00] sm:$0xf]  ;;  %v11255_v59 = vld [vmem:[%s12139_s22 + $0xa0c] sm:$0xf0]  ;;  %v8606_v14 = vor.u32 %v11223_v56, %v8605_v55  ;;  %5223 = vmatpush.bf16.msra.mxu3 %v8878_v2 }
  0xaf   : > { %v8861_v62 = vld [vmem:[%s12139_s22 + $0xb00] sm:$0xf]  ;;  %v11287_v63 = vld [vmem:[%s12139_s22 + $0xb0c] sm:$0xf0]  ;;  %v8734_v15 = vor.u32 %v11255_v59, %v8733_v57  ;;  %5182 = vmatpush.bf16.msra.mxu0 %v8478_v9 }
  0xb0   : > { %v9101_v0 = vld [vmem:[%s12139_s22 + $0xce0] sm:$0xf]  ;;  %v11347_v3 = vld [vmem:[%s12139_s22 + $0xcec] sm:$0xf0]  ;;  %v8862_v20 = vor.u32 %v11287_v63, %v8861_v62  ;;  %5196 = vmatpush.bf16.msra.mxu1 %v8606_v14 }
  0xb1   : > { %v9229_v4 = vld [vmem:[%s12139_s22 + $0xde0] sm:$0xf]  ;;  %v11379_v5 = vld [vmem:[%s12139_s22 + $0xdec] sm:$0xf0]  ;;  %v9102_v21 = vor.u32 %v11347_v3, %v9101_v0  ;;  %5210 = vmatpush.bf16.msra.mxu2 %v8734_v15 }
  0xb2   : > { %v9357_v6 = vld [vmem:[%s12139_s22 + $0xee0] sm:$0xf]  ;;  %v11411_v7 = vld [vmem:[%s12139_s22 + $0xeec] sm:$0xf0]  ;;  %v9230_v25 = vor.u32 %v11379_v5, %v9229_v4  ;;  %5224 = vmatpush.bf16.msra.mxu3 %v8862_v20 }
  0xb3   : > { %v9485_v8 = vld [vmem:[%s12139_s22 + $0xfe0] sm:$0xf]  ;;  %v11443_v11 = vld [vmem:[%s12139_s22 + $0xfec] sm:$0xf0]  ;;  %v9358_v26 = vor.u32 %v11411_v7, %v9357_v6  ;;  %5231 = vmatpush.bf16.msrb.mxu0 %v9102_v21  ;;  %5197 = vmatmul.bf16.vlgmr.msra.gmra.mxu1 %v12459_v36 }
  0xb4   : > { %v7389_v12 = vld [vmem:[%s14593_s0 + $0x20] sm:$0xf]  ;;  %v11343_v28 = vld [vmem:[%s12139_s22 + $0xccc] sm:$0xf0]  ;;  %v9486_v30 = vor.u32 %v11443_v11, %v9485_v8  ;;  %5245 = vmatpush.bf16.msrb.mxu1 %v9230_v25  ;;  %5211 = vmatmul.bf16.vlgmr.msra.gmra.mxu2 %v12457_v35 }
  0xb5   : > { %v10925_v13 = vld [vmem:[%s14593_s0 + $0x7c] sm:$0xf0]  ;;  %v11375_v32 = vld [vmem:[%s12139_s22 + $0xdcc] sm:$0xf0]  ;;  %5259 = vmatpush.bf16.msrb.mxu2 %v9358_v26  ;;  %5225 = vmatmul.bf16.vlgmr.msra.gmra.mxu3 %v12463_v40 }
  0xb6   : > { %v9085_v27 = vld [vmem:[%s12139_s22 + $0xcc0] sm:$0xf]  ;;  %v12452_v31 = vor.u32 %v10925_v13, %v7389_v12  ;;  %v11407_v34 = vld [vmem:[%s12139_s22 + $0xecc] sm:$0xf0]  ;;  %5273 = vmatpush.bf16.msrb.mxu3 %v9486_v30 }
  0xb7   : > { %v9213_v29 = vld [vmem:[%s12139_s22 + $0xdc0] sm:$0xf]  ;;  %v11439_v38 = vld [vmem:[%s12139_s22 + $0xfcc] sm:$0xf0]  ;;  %v9086_v41 = vor.u32 %v11343_v28, %v9085_v27 }
  0xb8   : > { %v9341_v33 = vld [vmem:[%s12139_s22 + $0xec0] sm:$0xf]  ;;  %v9214_v42 = vor.u32 %v11375_v32, %v9213_v29  ;;  %v11339_v48 = vld [vmem:[%s12139_s22 + $0xcac] sm:$0xf0]  ;;  %5183 = vmatmul.bf16.vlgmr.msra.gmra.mxu0 %v12452_v31 }
  0xb9   : > { %v9469_v37 = vld [vmem:[%s12139_s22 + $0xfc0] sm:$0xf]  ;;  %v9342_v45 = vor.u32 %v11407_v34, %v9341_v33  ;;  %v11371_v51 = vld [vmem:[%s12139_s22 + $0xdac] sm:$0xf0]  ;;  %5232 = vmatpush.bf16.msrb.mxu0 %v9086_v41 }
  0xba   : > { %v9069_v46 = vld [vmem:[%s12139_s22 + $0xca0] sm:$0xf]  ;;  %v9470_v50 = vor.u32 %v11439_v38, %v9469_v37  ;;  %v11403_v53 = vld [vmem:[%s12139_s22 + $0xeac] sm:$0xf0]  ;;  %5246 = vmatpush.bf16.msrb.mxu1 %v9214_v42 }
  0xbb   : > { %v9197_v49 = vld [vmem:[%s12139_s22 + $0xda0] sm:$0xf]  ;;  %v11435_v55 = vld [vmem:[%s12139_s22 + $0xfac] sm:$0xf0]  ;;  %v9070_v56 = vor.u32 %v11339_v48, %v9069_v46  ;;  %5260 = vmatpush.bf16.msrb.mxu2 %v9342_v45 }
  0xbc   : > { %v9325_v52 = vld [vmem:[%s12139_s22 + $0xea0] sm:$0xf]  ;;  %v9198_v57 = vor.u32 %v11371_v51, %v9197_v49  ;;  %v11335_v61 = vld [vmem:[%s12139_s22 + $0xc8c] sm:$0xf0]  ;;  %5274 = vmatpush.bf16.msrb.mxu3 %v9470_v50 }
  0xbd   : > { %v9453_v54 = vld [vmem:[%s12139_s22 + $0xfa0] sm:$0xf]  ;;  %v9326_v59 = vor.u32 %v11403_v53, %v9325_v52  ;;  %v11367_v0 = vld [vmem:[%s12139_s22 + $0xd8c] sm:$0xf0]  ;;  %5233 = vmatpush.bf16.msrb.mxu0 %v9070_v56 }
  0xbe   : > { %v9053_v60 = vld [vmem:[%s12139_s22 + $0xc80] sm:$0xf]  ;;  %v9454_v63 = vor.u32 %v11435_v55, %v9453_v54  ;;  %v11399_v3 = vld [vmem:[%s12139_s22 + $0xe8c] sm:$0xf0]  ;;  %5247 = vmatpush.bf16.msrb.mxu1 %v9198_v57 }
  0xbf   : > { %v9181_v62 = vld [vmem:[%s12139_s22 + $0xd80] sm:$0xf]  ;;  %v11431_v5 = vld [vmem:[%s12139_s22 + $0xf8c] sm:$0xf0]  ;;  %v9054_v6 = vor.u32 %v11335_v61, %v9053_v60  ;;  %5261 = vmatpush.bf16.msrb.mxu2 %v9326_v59 }
  0xc0   : > { %v9309_v2 = vld [vmem:[%s12139_s22 + $0xe80] sm:$0xf]  ;;  %v9182_v7 = vor.u32 %v11367_v0, %v9181_v62  ;;  %v11331_v11 = vld [vmem:[%s12139_s22 + $0xc6c] sm:$0xf0]  ;;  %5275 = vmatpush.bf16.msrb.mxu3 %v9454_v63 }
  0xc1   : > { %v9437_v4 = vld [vmem:[%s12139_s22 + $0xf80] sm:$0xf]  ;;  %v9310_v8 = vor.u32 %v11399_v3, %v9309_v2  ;;  %v11363_v14 = vld [vmem:[%s12139_s22 + $0xd6c] sm:$0xf0]  ;;  %5234 = vmatpush.bf16.msrb.mxu0 %v9054_v6 }
  0xc2   : > { %v9037_v9 = vld [vmem:[%s12139_s22 + $0xc60] sm:$0xf]  ;;  %v9438_v13 = vor.u32 %v11431_v5, %v9437_v4  ;;  %v11395_v16 = vld [vmem:[%s12139_s22 + $0xe6c] sm:$0xf0]  ;;  %5248 = vmatpush.bf16.msrb.mxu1 %v9182_v7 }
  0xc3   : > { %v9165_v12 = vld [vmem:[%s12139_s22 + $0xd60] sm:$0xf]  ;;  %v11427_v19 = vld [vmem:[%s12139_s22 + $0xf6c] sm:$0xf0]  ;;  %v9038_v20 = vor.u32 %v11331_v11, %v9037_v9  ;;  %5262 = vmatpush.bf16.msrb.mxu2 %v9310_v8 }
  0xc4   : > { %v9293_v15 = vld [vmem:[%s12139_s22 + $0xe60] sm:$0xf]  ;;  %v9166_v21 = vor.u32 %v11363_v14, %v9165_v12  ;;  %v11327_v24 = vld [vmem:[%s12139_s22 + $0xc4c] sm:$0xf0]  ;;  %5276 = vmatpush.bf16.msrb.mxu3 %v9438_v13 }
  0xc5   : > { %v9421_v18 = vld [vmem:[%s12139_s22 + $0xf60] sm:$0xf]  ;;  %v9294_v22 = vor.u32 %v11395_v16, %v9293_v15  ;;  %v11359_v27 = vld [vmem:[%s12139_s22 + $0xd4c] sm:$0xf0]  ;;  %5235 = vmatpush.bf16.msrb.mxu0 %v9038_v20  ;;  %v7413_v16 = vld [vmem:[%s14593_s0 + $0x38] sm:$0xf] }
  0xc6   : > { %v9021_v23 = vld [vmem:[%s12139_s22 + $0xc40] sm:$0xf]  ;;  %v9422_v26 = vor.u32 %v11427_v19, %v9421_v18  ;;  %v11391_v29 = vld [vmem:[%s12139_s22 + $0xe4c] sm:$0xf0]  ;;  %5249 = vmatpush.bf16.msrb.mxu1 %v9166_v21  ;;  %v10928_v18 = vld [vmem:[%s14593_s0 + $0x94] sm:$0xf0] }
  0xc7   : > { %v9149_v25 = vld [vmem:[%s12139_s22 + $0xd40] sm:$0xf]  ;;  %v11423_v32 = vld [vmem:[%s12139_s22 + $0xf4c] sm:$0xf0]  ;;  %v9022_v33 = vor.u32 %v11327_v24, %v9021_v23  ;;  %5263 = vmatpush.bf16.msrb.mxu2 %v9294_v22  ;;  %v10915_v19 = vld [vmem:[%s14593_s0 + $0x34] sm:$0xf] }
  0xc8   : > { %v9277_v28 = vld [vmem:[%s12139_s22 + $0xe40] sm:$0xf]  ;;  %v9150_v37 = vor.u32 %v11359_v27, %v9149_v25  ;;  %v11323_v41 = vld [vmem:[%s12139_s22 + $0xc2c] sm:$0xf0]  ;;  %5277 = vmatpush.bf16.msrb.mxu3 %v9422_v26  ;;  %v7407_v22 = vld [vmem:[%s14593_s0 + $0x90] sm:$0xf0] }
  0xc9   : > { %v9405_v30 = vld [vmem:[%s12139_s22 + $0xf40] sm:$0xf]  ;;  %v9278_v38 = vor.u32 %v11391_v29, %v9277_v28  ;;  %v11355_v45 = vld [vmem:[%s12139_s22 + $0xd2c] sm:$0xf0]  ;;  %5236 = vmatpush.bf16.msrb.mxu0 %v9022_v33  ;;  %v10916_v23 = vld [vmem:[%s14593_s0 + $0x3c] sm:$0xf] }
  0xca   : > { %v9005_v34 = vld [vmem:[%s12139_s22 + $0xc20] sm:$0xf]  ;;  %v9406_v46 = vor.u32 %v11423_v32, %v9405_v30  ;;  %v11387_v49 = vld [vmem:[%s12139_s22 + $0xe2c] sm:$0xf0]  ;;  %5250 = vmatpush.bf16.msrb.mxu1 %v9150_v37  ;;  %v7415_v24 = vld [vmem:[%s14593_s0 + $0x98] sm:$0xf0] }
  0xcb   : > { %v9133_v42 = vld [vmem:[%s12139_s22 + $0xd20] sm:$0xf]  ;;  %v11419_v51 = vld [vmem:[%s12139_s22 + $0xf2c] sm:$0xf0]  ;;  %v9006_v54 = vor.u32 %v11323_v41, %v9005_v34  ;;  %5264 = vmatpush.bf16.msrb.mxu2 %v9278_v38  ;;  %v12557_v38 = vor.u32 %v10928_v18, %v7413_v16  ;;  %v12559_v41 = vor.u32 %v10915_v19, %v7407_v22 }
  0xcc   : > { %v9261_v48 = vld [vmem:[%s12139_s22 + $0xe20] sm:$0xf]  ;;  %v11319_v53 = vld [vmem:[%s12139_s22 + $0xc0c] sm:$0xf0]  ;;  %v9134_v60 = vor.u32 %v11355_v45, %v9133_v42  ;;  %5278 = vmatpush.bf16.msrb.mxu3 %v9406_v46  ;;  %v12563_v46 = vor.u32 %v10916_v23, %v7415_v24 }
  0xcd   : > { %v9389_v50 = vld [vmem:[%s12139_s22 + $0xf20] sm:$0xf]  ;;  %v11351_v56 = vld [vmem:[%s12139_s22 + $0xd0c] sm:$0xf0]  ;;  %v9262_v61 = vor.u32 %v11387_v49, %v9261_v48  ;;  %5237 = vmatpush.bf16.msrb.mxu0 %v9006_v54 }
  0xce   : > { %v8989_v52 = vld [vmem:[%s12139_s22 + $0xc00] sm:$0xf]  ;;  %v11383_v59 = vld [vmem:[%s12139_s22 + $0xe0c] sm:$0xf0]  ;;  %v9390_v2 = vor.u32 %v11419_v51, %v9389_v50  ;;  %5251 = vmatpush.bf16.msrb.mxu1 %v9134_v60 }
  0xcf   : > { %v9117_v55 = vld [vmem:[%s12139_s22 + $0xd00] sm:$0xf]  ;;  %v11415_v63 = vld [vmem:[%s12139_s22 + $0xf0c] sm:$0xf0]  ;;  %v8990_v9 = vor.u32 %v11319_v53, %v8989_v52  ;;  %5265 = vmatpush.bf16.msrb.mxu2 %v9262_v61 }
  0xd0   : > { %v9245_v57 = vld [vmem:[%s12139_s22 + $0xe00] sm:$0xf]  ;;  %v11475_v3 = vld [vmem:[%s12139_s22 + $0x10ec] sm:$0xf0]  ;;  %v9118_v14 = vor.u32 %v11351_v56, %v9117_v55  ;;  %5279 = vmatpush.bf16.msrb.mxu3 %v9390_v2 }
  0xd1   : > { %v9373_v62 = vld [vmem:[%s12139_s22 + $0xf00] sm:$0xf]  ;;  %v11507_v5 = vld [vmem:[%s12139_s22 + $0x11ec] sm:$0xf0]  ;;  %v9246_v15 = vor.u32 %v11383_v59, %v9245_v57  ;;  %5238 = vmatpush.bf16.msrb.mxu0 %v8990_v9 }
  0xd2   : > { %v9613_v0 = vld [vmem:[%s12139_s22 + $0x10e0] sm:$0xf]  ;;  %v11539_v7 = vld [vmem:[%s12139_s22 + $0x12ec] sm:$0xf0]  ;;  %v9374_v20 = vor.u32 %v11415_v63, %v9373_v62  ;;  %5252 = vmatpush.bf16.msrb.mxu1 %v9118_v14 }
  0xd3   : > { %v9741_v4 = vld [vmem:[%s12139_s22 + $0x11e0] sm:$0xf]  ;;  %v11571_v11 = vld [vmem:[%s12139_s22 + $0x13ec] sm:$0xf0]  ;;  %v9614_v21 = vor.u32 %v11475_v3, %v9613_v0  ;;  %5266 = vmatpush.bf16.msrb.mxu2 %v9246_v15 }
  0xd4   : > { %v9869_v6 = vld [vmem:[%s12139_s22 + $0x12e0] sm:$0xf]  ;;  %v7405_v12 = vld [vmem:[%s14593_s0 + $0x30] sm:$0xf]  ;;  %v9742_v25 = vor.u32 %v11507_v5, %v9741_v4  ;;  %5280 = vmatpush.bf16.msrb.mxu3 %v9374_v20 }
  0xd5   : > { %v9997_v8 = vld [vmem:[%s12139_s22 + $0x13e0] sm:$0xf]  ;;  %v10927_v13 = vld [vmem:[%s14593_s0 + $0x8c] sm:$0xf0]  ;;  %v9870_v26 = vor.u32 %v11539_v7, %v9869_v6  ;;  %5287 = vmatpush.bf16.msra.mxu0 %v9614_v21  ;;  %5253 = vmatmul.bf16.vlgmr.msrb.gmra.mxu1 %v12559_v41 }
  0xd6   : > { %v9597_v27 = vld [vmem:[%s12139_s22 + $0x10c0] sm:$0xf]  ;;  %v11471_v28 = vld [vmem:[%s12139_s22 + $0x10cc] sm:$0xf0]  ;;  %v9998_v30 = vor.u32 %v11571_v11, %v9997_v8  ;;  %v12552_v32 = vor.u32 %v10927_v13, %v7405_v12  ;;  %5301 = vmatpush.bf16.msra.mxu1 %v9742_v25  ;;  %5267 = vmatmul.bf16.vlgmr.msrb.gmra.mxu2 %v12557_v38 }
  0xd7   : > { %v9725_v29 = vld [vmem:[%s12139_s22 + $0x11c0] sm:$0xf]  ;;  %v11503_v33 = vld [vmem:[%s12139_s22 + $0x11cc] sm:$0xf0]  ;;  %v9598_v48 = vor.u32 %v11471_v28, %v9597_v27  ;;  %5315 = vmatpush.bf16.msra.mxu2 %v9870_v26  ;;  %5281 = vmatmul.bf16.vlgmr.msrb.gmra.mxu3 %v12563_v46 }
  0xd8   : > { %v9853_v34 = vld [vmem:[%s12139_s22 + $0x12c0] sm:$0xf]  ;;  %v11535_v37 = vld [vmem:[%s12139_s22 + $0x12cc] sm:$0xf0]  ;;  %v9726_v49 = vor.u32 %v11503_v33, %v9725_v29  ;;  %5329 = vmatpush.bf16.msra.mxu3 %v9998_v30  ;;  %5239 = vmatmul.bf16.vlgmr.msrb.gmra.mxu0 %v12552_v32 }
  0xd9   : > { %v9981_v42 = vld [vmem:[%s12139_s22 + $0x13c0] sm:$0xf]  ;;  %v11567_v45 = vld [vmem:[%s12139_s22 + $0x13cc] sm:$0xf0]  ;;  %v9854_v50 = vor.u32 %v11535_v37, %v9853_v34  ;;  %5288 = vmatpush.bf16.msra.mxu0 %v9598_v48 }
  0xda   : > { %v9581_v51 = vld [vmem:[%s12139_s22 + $0x10a0] sm:$0xf]  ;;  %v11467_v52 = vld [vmem:[%s12139_s22 + $0x10ac] sm:$0xf0]  ;;  %v9982_v54 = vor.u32 %v11567_v45, %v9981_v42  ;;  %5302 = vmatpush.bf16.msra.mxu1 %v9726_v49 }
  0xdb   : > { %v9709_v53 = vld [vmem:[%s12139_s22 + $0x11a0] sm:$0xf]  ;;  %v11499_v55 = vld [vmem:[%s12139_s22 + $0x11ac] sm:$0xf0]  ;;  %v9582_v61 = vor.u32 %v11467_v52, %v9581_v51  ;;  %5316 = vmatpush.bf16.msra.mxu2 %v9854_v50 }
  0xdc   : > { %v9837_v56 = vld [vmem:[%s12139_s22 + $0x12a0] sm:$0xf]  ;;  %v11531_v57 = vld [vmem:[%s12139_s22 + $0x12ac] sm:$0xf0]  ;;  %v9710_v62 = vor.u32 %v11499_v55, %v9709_v53  ;;  %5330 = vmatpush.bf16.msra.mxu3 %v9982_v54 }
  0xdd   : > { %v9965_v59 = vld [vmem:[%s12139_s22 + $0x13a0] sm:$0xf]  ;;  %v11563_v60 = vld [vmem:[%s12139_s22 + $0x13ac] sm:$0xf0]  ;;  %v9838_v63 = vor.u32 %v11531_v57, %v9837_v56  ;;  %5289 = vmatpush.bf16.msra.mxu0 %v9582_v61 }
  0xde   : > { %v9565_v0 = vld [vmem:[%s12139_s22 + $0x1080] sm:$0xf]  ;;  %v11463_v2 = vld [vmem:[%s12139_s22 + $0x108c] sm:$0xf0]  ;;  %v9966_v4 = vor.u32 %v11563_v60, %v9965_v59  ;;  %5303 = vmatpush.bf16.msra.mxu1 %v9710_v62 }
  0xdf   : > { %v9693_v3 = vld [vmem:[%s12139_s22 + $0x1180] sm:$0xf]  ;;  %v11495_v5 = vld [vmem:[%s12139_s22 + $0x118c] sm:$0xf0]  ;;  %v9566_v11 = vor.u32 %v11463_v2, %v9565_v0  ;;  %5317 = vmatpush.bf16.msra.mxu2 %v9838_v63 }
  0xe0   : > { %v9821_v6 = vld [vmem:[%s12139_s22 + $0x1280] sm:$0xf]  ;;  %v11527_v7 = vld [vmem:[%s12139_s22 + $0x128c] sm:$0xf0]  ;;  %v9694_v12 = vor.u32 %v11495_v5, %v9693_v3  ;;  %5331 = vmatpush.bf16.msra.mxu3 %v9966_v4 }
  0xe1   : > { %v9949_v8 = vld [vmem:[%s12139_s22 + $0x1380] sm:$0xf]  ;;  %v11559_v9 = vld [vmem:[%s12139_s22 + $0x138c] sm:$0xf0]  ;;  %v9822_v13 = vor.u32 %v11527_v7, %v9821_v6  ;;  %5290 = vmatpush.bf16.msra.mxu0 %v9566_v11 }
  0xe2   : > { %v9549_v14 = vld [vmem:[%s12139_s22 + $0x1060] sm:$0xf]  ;;  %v11459_v15 = vld [vmem:[%s12139_s22 + $0x106c] sm:$0xf0]  ;;  %v9950_v18 = vor.u32 %v11559_v9, %v9949_v8  ;;  %5304 = vmatpush.bf16.msra.mxu1 %v9694_v12 }
  0xe3   : > { %v9677_v16 = vld [vmem:[%s12139_s22 + $0x1160] sm:$0xf]  ;;  %v11491_v19 = vld [vmem:[%s12139_s22 + $0x116c] sm:$0xf0]  ;;  %v9550_v24 = vor.u32 %v11459_v15, %v9549_v14  ;;  %5318 = vmatpush.bf16.msra.mxu2 %v9822_v13 }
  0xe4   : > { %v9805_v20 = vld [vmem:[%s12139_s22 + $0x1260] sm:$0xf]  ;;  %v11523_v21 = vld [vmem:[%s12139_s22 + $0x126c] sm:$0xf0]  ;;  %v9678_v25 = vor.u32 %v11491_v19, %v9677_v16  ;;  %5332 = vmatpush.bf16.msra.mxu3 %v9950_v18 }
  0xe5   : > { %v9933_v22 = vld [vmem:[%s12139_s22 + $0x1360] sm:$0xf]  ;;  %v11555_v23 = vld [vmem:[%s12139_s22 + $0x136c] sm:$0xf0]  ;;  %v9806_v26 = vor.u32 %v11523_v21, %v9805_v20  ;;  %5291 = vmatpush.bf16.msra.mxu0 %v9550_v24 }
  0xe6   : > { %v9533_v27 = vld [vmem:[%s12139_s22 + $0x1040] sm:$0xf]  ;;  %v11455_v28 = vld [vmem:[%s12139_s22 + $0x104c] sm:$0xf0]  ;;  %v9934_v30 = vor.u32 %v11555_v23, %v9933_v22  ;;  %5305 = vmatpush.bf16.msra.mxu1 %v9678_v25  ;;  %v7429_v25 = vld [vmem:[%s14593_s0 + $0x48] sm:$0xf] }
  0xe7   : > { %v9661_v29 = vld [vmem:[%s12139_s22 + $0x1140] sm:$0xf]  ;;  %v11487_v33 = vld [vmem:[%s12139_s22 + $0x114c] sm:$0xf0]  ;;  %v9534_v48 = vor.u32 %v11455_v28, %v9533_v27  ;;  %5319 = vmatpush.bf16.msra.mxu2 %v9806_v26  ;;  %v10930_v26 = vld [vmem:[%s14593_s0 + $0xa4] sm:$0xf0] }
  0xe8   : > { %v9789_v34 = vld [vmem:[%s12139_s22 + $0x1240] sm:$0xf]  ;;  %v11519_v37 = vld [vmem:[%s12139_s22 + $0x124c] sm:$0xf0]  ;;  %v9662_v50 = vor.u32 %v11487_v33, %v9661_v29  ;;  %5333 = vmatpush.bf16.msra.mxu3 %v9934_v30  ;;  %v10917_v27 = vld [vmem:[%s14593_s0 + $0x44] sm:$0xf] }
  0xe9   : > { %v9917_v42 = vld [vmem:[%s12139_s22 + $0x1340] sm:$0xf]  ;;  %v11551_v45 = vld [vmem:[%s12139_s22 + $0x134c] sm:$0xf0]  ;;  %v9790_v51 = vor.u32 %v11519_v37, %v9789_v34  ;;  %5292 = vmatpush.bf16.msra.mxu0 %v9534_v48  ;;  %v7423_v30 = vld [vmem:[%s14593_s0 + $0xa0] sm:$0xf0] }
  0xea   : > { %v9517_v49 = vld [vmem:[%s12139_s22 + $0x1020] sm:$0xf]  ;;  %v11451_v52 = vld [vmem:[%s12139_s22 + $0x102c] sm:$0xf0]  ;;  %v9918_v55 = vor.u32 %v11551_v45, %v9917_v42  ;;  %5306 = vmatpush.bf16.msra.mxu1 %v9662_v50  ;;  %v10918_v33 = vld [vmem:[%s14593_s0 + $0x4c] sm:$0xf] }
  0xeb   : > { %v9645_v53 = vld [vmem:[%s12139_s22 + $0x1120] sm:$0xf]  ;;  %v11483_v54 = vld [vmem:[%s12139_s22 + $0x112c] sm:$0xf0]  ;;  %v9518_v63 = vor.u32 %v11451_v52, %v9517_v49  ;;  %5320 = vmatpush.bf16.msra.mxu2 %v9790_v51  ;;  %v7431_v34 = vld [vmem:[%s14593_s0 + $0xa8] sm:$0xf0] }
  0xec   : > { %v9773_v56 = vld [vmem:[%s12139_s22 + $0x1220] sm:$0xf]  ;;  %v11515_v57 = vld [vmem:[%s12139_s22 + $0x122c] sm:$0xf0]  ;;  %v9646_v5 = vor.u32 %v11483_v54, %v9645_v53  ;;  %5334 = vmatpush.bf16.msra.mxu3 %v9918_v55  ;;  %v12657_v55 = vor.u32 %v10930_v26, %v7429_v25 }
  0xed   : > { %v9901_v59 = vld [vmem:[%s12139_s22 + $0x1320] sm:$0xf]  ;;  %v11547_v60 = vld [vmem:[%s12139_s22 + $0x132c] sm:$0xf0]  ;;  %v9774_v6 = vor.u32 %v11515_v57, %v9773_v56  ;;  %5293 = vmatpush.bf16.msra.mxu0 %v9518_v63  ;;  %v12659_v56 = vor.u32 %v10917_v27, %v7423_v30 }
  0xee   : > { %v9501_v61 = vld [vmem:[%s12139_s22 + $0x1000] sm:$0xf]  ;;  %v11447_v62 = vld [vmem:[%s12139_s22 + $0x100c] sm:$0xf0]  ;;  %v9902_v11 = vor.u32 %v11547_v60, %v9901_v59  ;;  %5307 = vmatpush.bf16.msra.mxu1 %v9646_v5  ;;  %v12663_v60 = vor.u32 %v10918_v33, %v7431_v34 }
  0xef   : > { %v9629_v0 = vld [vmem:[%s12139_s22 + $0x1100] sm:$0xf]  ;;  %v11479_v2 = vld [vmem:[%s12139_s22 + $0x110c] sm:$0xf0]  ;;  %v9502_v19 = vor.u32 %v11447_v62, %v9501_v61  ;;  %5321 = vmatpush.bf16.msra.mxu2 %v9774_v6 }
  0xf0   : > { %v9757_v3 = vld [vmem:[%s12139_s22 + $0x1200] sm:$0xf]  ;;  %v11511_v4 = vld [vmem:[%s12139_s22 + $0x120c] sm:$0xf0]  ;;  %v9630_v23 = vor.u32 %v11479_v2, %v9629_v0  ;;  %5335 = vmatpush.bf16.msra.mxu3 %v9902_v11 }
  0xf1   : > { %v9885_v7 = vld [vmem:[%s12139_s22 + $0x1300] sm:$0xf]  ;;  %v11543_v8 = vld [vmem:[%s12139_s22 + $0x130c] sm:$0xf0]  ;;  %v9758_v24 = vor.u32 %v11511_v4, %v9757_v3  ;;  %5294 = vmatpush.bf16.msra.mxu0 %v9502_v19 }
  0xf2   : > { %v10125_v9 = vld [vmem:[%s12139_s22 + $0x14e0] sm:$0xf]  ;;  %v11603_v12 = vld [vmem:[%s12139_s22 + $0x14ec] sm:$0xf0]  ;;  %v9886_v28 = vor.u32 %v11543_v8, %v9885_v7  ;;  %5308 = vmatpush.bf16.msra.mxu1 %v9630_v23 }
  0xf3   : > { %v10253_v13 = vld [vmem:[%s12139_s22 + $0x15e0] sm:$0xf]  ;;  %v11635_v14 = vld [vmem:[%s12139_s22 + $0x15ec] sm:$0xf0]  ;;  %v10126_v29 = vor.u32 %v11603_v12, %v10125_v9  ;;  %5322 = vmatpush.bf16.msra.mxu2 %v9758_v24 }
  0xf4   : > { %v10381_v15 = vld [vmem:[%s12139_s22 + $0x16e0] sm:$0xf]  ;;  %v11667_v16 = vld [vmem:[%s12139_s22 + $0x16ec] sm:$0xf0]  ;;  %v10254_v37 = vor.u32 %v11635_v14, %v10253_v13  ;;  %5336 = vmatpush.bf16.msra.mxu3 %v9886_v28 }
  0xf5   : > { %v10509_v18 = vld [vmem:[%s12139_s22 + $0x17e0] sm:$0xf]  ;;  %v11699_v20 = vld [vmem:[%s12139_s22 + $0x17ec] sm:$0xf0]  ;;  %v10382_v42 = vor.u32 %v11667_v16, %v10381_v15  ;;  %5343 = vmatpush.bf16.msrb.mxu0 %v10126_v29  ;;  %5309 = vmatmul.bf16.vlgmr.msra.gmra.mxu1 %v12659_v56 }
  0xf6   : > { %v7421_v21 = vld [vmem:[%s14593_s0 + $0x40] sm:$0xf]  ;;  %v11599_v48 = vld [vmem:[%s12139_s22 + $0x14cc] sm:$0xf0]  ;;  %v10510_v50 = vor.u32 %v11699_v20, %v10509_v18  ;;  %5357 = vmatpush.bf16.msrb.mxu1 %v10254_v37  ;;  %5323 = vmatmul.bf16.vlgmr.msra.gmra.mxu2 %v12657_v55 }
  0xf7   : > { %v10929_v22 = vld [vmem:[%s14593_s0 + $0x9c] sm:$0xf0]  ;;  %v11631_v52 = vld [vmem:[%s12139_s22 + $0x15cc] sm:$0xf0]  ;;  %5371 = vmatpush.bf16.msrb.mxu2 %v10382_v42  ;;  %5337 = vmatmul.bf16.vlgmr.msra.gmra.mxu3 %v12663_v60  ;;  %v5072_v26 = vpop.f32.mrf.mxu0 }
  0xf8   : > { %v10109_v45 = vld [vmem:[%s12139_s22 + $0x14c0] sm:$0xf]  ;;  %v12652_v51 = vor.u32 %v10929_v22, %v7421_v21  ;;  %v11663_v54 = vld [vmem:[%s12139_s22 + $0x16cc] sm:$0xf0]  ;;  %5385 = vmatpush.bf16.msrb.mxu3 %v10510_v50 }
  0xf9   : > { %v10237_v49 = vld [vmem:[%s12139_s22 + $0x15c0] sm:$0xf]  ;;  %v11695_v59 = vld [vmem:[%s12139_s22 + $0x17cc] sm:$0xf0]  ;;  %v10110_v61 = vor.u32 %v11599_v48, %v10109_v45 }
  0xfa   : > { %v10365_v53 = vld [vmem:[%s12139_s22 + $0x16c0] sm:$0xf]  ;;  %v10238_v63 = vor.u32 %v11631_v52, %v10237_v49  ;;  %v11595_v2 = vld [vmem:[%s12139_s22 + $0x14ac] sm:$0xf0]  ;;  %5295 = vmatmul.bf16.vlgmr.msra.gmra.mxu0 %v12652_v51 }
  0xfb   : > { %v10493_v57 = vld [vmem:[%s12139_s22 + $0x17c0] sm:$0xf]  ;;  %v10366_v0 = vor.u32 %v11663_v54, %v10365_v53  ;;  %v11627_v6 = vld [vmem:[%s12139_s22 + $0x15ac] sm:$0xf0]  ;;  %5344 = vmatpush.bf16.msrb.mxu0 %v10110_v61  ;;  %v5086_v53 = vpop.f32.mrf.mxu1 }
  0xfc   : > { %v10093_v62 = vld [vmem:[%s12139_s22 + $0x14a0] sm:$0xf]  ;;  %v10494_v5 = vor.u32 %v11695_v59, %v10493_v57  ;;  %v11659_v8 = vld [vmem:[%s12139_s22 + $0x16ac] sm:$0xf0]  ;;  %5358 = vmatpush.bf16.msrb.mxu1 %v10238_v63 }
  0xfd   : > { %v10221_v3 = vld [vmem:[%s12139_s22 + $0x15a0] sm:$0xf]  ;;  %v11691_v11 = vld [vmem:[%s12139_s22 + $0x17ac] sm:$0xf0]  ;;  %v10094_v12 = vor.u32 %v11595_v2, %v10093_v62  ;;  %5372 = vmatpush.bf16.msrb.mxu2 %v10366_v0 }
  0xfe   : > { %v12669_v4 = vld [vmem:[%s12147_s21] sm:$0xf]  ;;  %v10222_v14 = vor.u32 %v11627_v6, %v10221_v3  ;;  %v11591_v18 = vld [vmem:[%s12139_s22 + $0x148c] sm:$0xf0]  ;;  %5386 = vmatpush.bf16.msrb.mxu3 %v10494_v5 }
  0xff   : > { %v10349_v7 = vld [vmem:[%s12139_s22 + $0x16a0] sm:$0xf]  ;;  %v14598_v13 = vperm.slane %v12669_v4, 0  ;;  %v11623_v21 = vld [vmem:[%s12139_s22 + $0x158c] sm:$0xf0]  ;;  %5345 = vmatpush.bf16.msrb.mxu0 %v10094_v12 }
 0x100   : > { %v10477_v9 = vld [vmem:[%s12139_s22 + $0x17a0] sm:$0xf]  ;;  %v10350_v15 = vor.u32 %v11659_v8, %v10349_v7  ;;  %v11655_v23 = vld [vmem:[%s12139_s22 + $0x168c] sm:$0xf0]  ;;  %5359 = vmatpush.bf16.msrb.mxu1 %v10222_v14  ;;  %v5100_v7 = vpop.f32.mrf.mxu2 }
 0x101   : > { %v10077_v16 = vld [vmem:[%s12139_s22 + $0x1480] sm:$0xf]  ;;  %v10478_v20 = vor.u32 %v11691_v11, %v10477_v9  ;;  %v11687_v25 = vld [vmem:[%s12139_s22 + $0x178c] sm:$0xf0]  ;;  %v5073_v28 = vadd.f32 %v5072_v26, %v14598_v13  ;;  %v9087_v13 = vld [vmem:[%s12139_s22 + $0xcd0] sm:$0xf0] }
 0x102   : > { %v10205_v19 = vld [vmem:[%s12139_s22 + $0x1580] sm:$0xf]  ;;  %v10078_v27 = vor.u32 %v11591_v18, %v10077_v16  ;;  %5373 = vmatpush.bf16.msrb.mxu2 %v10350_v15  ;;  %v11587_v34 = vld [vmem:[%s12139_s22 + $0x146c] sm:$0xf0] }
 0x103   : > { %v10333_v22 = vld [vmem:[%s12139_s22 + $0x1680] sm:$0xf]  ;;  %v10206_v29 = vor.u32 %v11623_v21, %v10205_v19  ;;  %5387 = vmatpush.bf16.msrb.mxu3 %v10478_v20  ;;  %v11619_v45 = vld [vmem:[%s12139_s22 + $0x156c] sm:$0xf0]  ;;  %v5087_v57 = vadd.f32 %v5086_v53, %v5073_v28 }
 0x104   : > { %v10461_v24 = vld [vmem:[%s12139_s22 + $0x1780] sm:$0xf]  ;;  %v10334_v30 = vor.u32 %v11655_v23, %v10333_v22  ;;  %v11651_v49 = vld [vmem:[%s12139_s22 + $0x166c] sm:$0xf0]  ;;  %5346 = vmatpush.bf16.msrb.mxu0 %v10078_v27 }
 0x105   : > { %v10061_v33 = vld [vmem:[%s12139_s22 + $0x1460] sm:$0xf]  ;;  %v10462_v42 = vor.u32 %v11687_v25, %v10461_v24  ;;  %v11683_v52 = vld [vmem:[%s12139_s22 + $0x176c] sm:$0xf0]  ;;  %5360 = vmatpush.bf16.msrb.mxu1 %v10206_v29  ;;  %v5101_v11 = vadd.f32 %v5100_v7, %v5087_v57  ;;  %v5114_v25 = vpop.f32.mrf.mxu3  ;;  %v10993_v57 = vld [vmem:[%s12139_s22 + $0x1e4] sm:$0xf] }
 0x106   : > { %v10189_v37 = vld [vmem:[%s12139_s22 + $0x1560] sm:$0xf]  ;;  %v10062_v54 = vor.u32 %v11587_v34, %v10061_v33  ;;  %5374 = vmatpush.bf16.msrb.mxu2 %v10334_v30  ;;  %v11583_v63 = vld [vmem:[%s12139_s22 + $0x144c] sm:$0xf0] }
 0x107   : > { %v10317_v48 = vld [vmem:[%s12139_s22 + $0x1660] sm:$0xf]  ;;  %v10190_v59 = vor.u32 %v11619_v45, %v10189_v37  ;;  %5388 = vmatpush.bf16.msrb.mxu3 %v10462_v42  ;;  %v11615_v3 = vld [vmem:[%s12139_s22 + $0x154c] sm:$0xf0]  ;;  %v12717_v29 = vadd.f32 %v5114_v25, %v5101_v11  ;;  %v10919_v11 = vld [vmem:[%s14593_s0 + $0x54] sm:$0xf] }
 0x108   : > { %v10445_v50 = vld [vmem:[%s12139_s22 + $0x1760] sm:$0xf]  ;;  %v10318_v61 = vor.u32 %v11651_v49, %v10317_v48  ;;  %v11647_v6 = vld [vmem:[%s12139_s22 + $0x164c] sm:$0xf0]  ;;  %5347 = vmatpush.bf16.msrb.mxu0 %v10062_v54  ;;  %v7567_v54 = vld [vmem:[%s12139_s22 + $0xf0] sm:$0xf0] }
 0x109   : > { %v10045_v62 = vld [vmem:[%s12139_s22 + $0x1440] sm:$0xf]  ;;  %v10446_v2 = vor.u32 %v11683_v52, %v10445_v50  ;;  %v11679_v9 = vld [vmem:[%s12139_s22 + $0x174c] sm:$0xf0]  ;;  %5361 = vmatpush.bf16.msrb.mxu1 %v10190_v59  ;;  %v10961_v52 = vld [vmem:[%s12139_s22 + $0xe4] sm:$0xf] }
 0x10a   : > { %v10173_v0 = vld [vmem:[%s12139_s22 + $0x1540] sm:$0xf]  ;;  %v10046_v12 = vor.u32 %v11583_v63, %v10045_v62  ;;  %5375 = vmatpush.bf16.msrb.mxu2 %v10318_v61  ;;  %v11579_v18 = vld [vmem:[%s12139_s22 + $0x142c] sm:$0xf0]  ;;  %v7695_v59 = vld [vmem:[%s12139_s22 + $0x1f0] sm:$0xf0] }
 0x10b   : > { %v10301_v5 = vld [vmem:[%s12139_s22 + $0x1640] sm:$0xf]  ;;  %v10174_v15 = vor.u32 %v11615_v3, %v10173_v0  ;;  %v11611_v20 = vld [vmem:[%s12139_s22 + $0x152c] sm:$0xf0]  ;;  %5389 = vmatpush.bf16.msrb.mxu3 %v10446_v2  ;;  %v11025_v61 = vld [vmem:[%s12139_s22 + $0x2e4] sm:$0xf] }
 0x10c   : > { %v10429_v8 = vld [vmem:[%s12139_s22 + $0x1740] sm:$0xf]  ;;  %v10302_v16 = vor.u32 %v11647_v6, %v10301_v5  ;;  %v11643_v23 = vld [vmem:[%s12139_s22 + $0x162c] sm:$0xf0]  ;;  %5348 = vmatpush.bf16.msrb.mxu0 %v10046_v12  ;;  %v7823_v62 = vld [vmem:[%s12139_s22 + $0x2f0] sm:$0xf0] }
 0x10d   : > { %v10029_v14 = vld [vmem:[%s12139_s22 + $0x1420] sm:$0xf]  ;;  %v10430_v21 = vor.u32 %v11679_v9, %v10429_v8  ;;  %v11675_v26 = vld [vmem:[%s12139_s22 + $0x172c] sm:$0xf0]  ;;  %5362 = vmatpush.bf16.msrb.mxu1 %v10174_v15  ;;  %v11057_v63 = vld [vmem:[%s12139_s22 + $0x3e4] sm:$0xf] }
 0x10e   : > { %v10157_v19 = vld [vmem:[%s12139_s22 + $0x1520] sm:$0xf]  ;;  %v11575_v28 = vld [vmem:[%s12139_s22 + $0x140c] sm:$0xf0]  ;;  %v10030_v30 = vor.u32 %v11579_v18, %v10029_v14  ;;  %5376 = vmatpush.bf16.msrb.mxu2 %v10302_v16  ;;  %v7951_v2 = vld [vmem:[%s12139_s22 + $0x3f0] sm:$0xf0]  ;;  %v7570_v14 = vor.u32 %v10961_v52, %v7567_v54 }
 0x10f   : > { %v10285_v22 = vld [vmem:[%s12139_s22 + $0x1620] sm:$0xf]  ;;  %v11607_v34 = vld [vmem:[%s12139_s22 + $0x150c] sm:$0xf0]  ;;  %v10158_v45 = vor.u32 %v11611_v20, %v10157_v19  ;;  %5390 = vmatpush.bf16.msrb.mxu3 %v10430_v21  ;;  %v7445_v8 = vld [vmem:[%s14593_s0 + $0x58] sm:$0xf]  ;;  %v7698_v19 = vor.u32 %v10993_v57, %v7695_v59  ;;  %v7826_v20 = vor.u32 %v11025_v61, %v7823_v62  ;;  %v12757_v21 = vpop.f32.mrf.mxu0  ;;  %v7954_v25 = vor.u32 %v11057_v63, %v7951_v2 }
 0x110   : > { %v10413_v24 = vld [vmem:[%s12139_s22 + $0x1720] sm:$0xf]  ;;  %v11639_v42 = vld [vmem:[%s12139_s22 + $0x160c] sm:$0xf0]  ;;  %v10286_v48 = vor.u32 %v11643_v23, %v10285_v22  ;;  %5349 = vmatpush.bf16.msrb.mxu0 %v10030_v30  ;;  %v10932_v9 = vld [vmem:[%s14593_s0 + $0xb4] sm:$0xf0] }
 0x111   : > { %v10013_v27 = vld [vmem:[%s12139_s22 + $0x1400] sm:$0xf]  ;;  %v11671_v50 = vld [vmem:[%s12139_s22 + $0x170c] sm:$0xf0]  ;;  %v10414_v53 = vor.u32 %v11675_v26, %v10413_v24  ;;  %5363 = vmatpush.bf16.msrb.mxu1 %v10158_v45  ;;  %v7439_v15 = vld [vmem:[%s14593_s0 + $0xb0] sm:$0xf0]  ;;  %v12773_v45 = vpop.f32.mrf.mxu1 }
 0x112   : > { %v10141_v33 = vld [vmem:[%s12139_s22 + $0x1500] sm:$0xf]  ;;  %v10014_v0 = vor.u32 %v11575_v28, %v10013_v27  ;;  %v7437_v3 = vld [vmem:[%s14593_s0 + $0x50] sm:$0xf]  ;;  %5377 = vmatpush.bf16.msrb.mxu2 %v10286_v48  ;;  %v10920_v16 = vld [vmem:[%s14593_s0 + $0x5c] sm:$0xf] }
 0x113   : > { %v10269_v37 = vld [vmem:[%s12139_s22 + $0x1600] sm:$0xf]  ;;  %v10931_v5 = vld [vmem:[%s14593_s0 + $0xac] sm:$0xf0]  ;;  %v10142_v6 = vor.u32 %v11607_v34, %v10141_v33  ;;  %5391 = vmatpush.bf16.msrb.mxu3 %v10414_v53  ;;  %v7447_v18 = vld [vmem:[%s14593_s0 + $0xb8] sm:$0xf0]  ;;  %v12767_v33 = vor.u32 %v10932_v9, %v7445_v8  ;;  %v12769_v34 = vor.u32 %v10919_v11, %v7439_v15 }
 0x114   : > { %v10397_v49 = vld [vmem:[%s12139_s22 + $0x1700] sm:$0xf]  ;;  %v10270_v7 = vor.u32 %v11639_v42, %v10269_v37  ;;  %v10957_v22 = vld [vmem:[%s12139_s22 + $0xc4] sm:$0xf]  ;;  %v7551_v23 = vld [vmem:[%s12139_s22 + $0xd0] sm:$0xf0]  ;;  %5350 = vmatpush.bf16.msrb.mxu0 %v10014_v0  ;;  %v12762_v26 = vor.u32 %v10931_v5, %v7437_v3  ;;  %v12775_v48 = vor.u32 %v10920_v16, %v7447_v18  ;;  %v12789_v5 = vpop.f32.mrf.mxu2 }
 0x115   : > { %v10398_v12 = vor.u32 %v11671_v50, %v10397_v49  ;;  %v10989_v24 = vld [vmem:[%s12139_s22 + $0x1c4] sm:$0xf]  ;;  %v7679_v27 = vld [vmem:[%s12139_s22 + $0x1d0] sm:$0xf0]  ;;  %5364 = vmatpush.bf16.msrb.mxu1 %v10142_v6  ;;  %v7554_v49 = vor.u32 %v10957_v22, %v7551_v23 }
 0x116   : > { %v11021_v28 = vld [vmem:[%s12139_s22 + $0x2c4] sm:$0xf]  ;;  %v7807_v30 = vld [vmem:[%s12139_s22 + $0x2d0] sm:$0xf0]  ;;  %5378 = vmatpush.bf16.msrb.mxu2 %v10270_v7  ;;  %v7682_v50 = vor.u32 %v10989_v24, %v7679_v27 }
 0x117   : > { %v11053_v37 = vld [vmem:[%s12139_s22 + $0x3c4] sm:$0xf]  ;;  %v7935_v42 = vld [vmem:[%s12139_s22 + $0x3d0] sm:$0xf0]  ;;  %5392 = vmatpush.bf16.msrb.mxu3 %v10398_v12  ;;  %v7810_v52 = vor.u32 %v11021_v28, %v7807_v30  ;;  %5351 = vmatmul.bf16.vlgmr.msrb.gmra.mxu0 %v12762_v26 }
 0x118   : > { %5399 = vmatpush.bf16.msra.mxu0 %v7570_v14  ;;  %v10953_v53 = vld [vmem:[%s12139_s22 + $0xa4] sm:$0xf]  ;;  %v7535_v54 = vld [vmem:[%s12139_s22 + $0xb0] sm:$0xf0]  ;;  %v7938_v59 = vor.u32 %v11053_v37, %v7935_v42  ;;  %5365 = vmatmul.bf16.vlgmr.msrb.gmra.mxu1 %v12769_v34  ;;  %v12794_v14 = vpop.f32.mrf.mxu3 }
 0x119   : > { %5413 = vmatpush.bf16.msra.mxu1 %v7698_v19  ;;  %v10985_v57 = vld [vmem:[%s12139_s22 + $0x1a4] sm:$0xf]  ;;  %v7663_v61 = vld [vmem:[%s12139_s22 + $0x1b0] sm:$0xf0]  ;;  %5379 = vmatmul.bf16.vlgmr.msrb.gmra.mxu2 %v12767_v33  ;;  %v7538_v3 = vor.u32 %v10953_v53, %v7535_v54  ;;  %v5128_v19 = vpop.f32.mrf.mxu0  ;;  %v5142_v28 = vpop.f32.mrf.mxu1 }
 0x11a   : > { %5427 = vmatpush.bf16.msra.mxu2 %v7826_v20  ;;  %v11017_v62 = vld [vmem:[%s12139_s22 + $0x2a4] sm:$0xf]  ;;  %v7791_v63 = vld [vmem:[%s12139_s22 + $0x2b0] sm:$0xf0]  ;;  %5393 = vmatmul.bf16.vlgmr.msrb.gmra.mxu3 %v12775_v48  ;;  %v7666_v6 = vor.u32 %v10985_v57, %v7663_v61  ;;  %v5129_v23 = vadd.f32 %v5128_v19, %v12717_v29 }
 0x11b   : > { %5441 = vmatpush.bf16.msra.mxu3 %v7954_v25  ;;  %v11049_v0 = vld [vmem:[%s12139_s22 + $0x3a4] sm:$0xf]  ;;  %v7919_v2 = vld [vmem:[%s12139_s22 + $0x3b0] sm:$0xf0]  ;;  %v7794_v7 = vor.u32 %v11017_v62, %v7791_v63 }
 0x11c   : > { %5400 = vmatpush.bf16.msra.mxu0 %v7554_v49  ;;  %v10949_v8 = vld [vmem:[%s12139_s22 + $0x84] sm:$0xf]  ;;  %v7519_v9 = vld [vmem:[%s12139_s22 + $0x90] sm:$0xf0]  ;;  %v7922_v12 = vor.u32 %v11049_v0, %v7919_v2 }
 0x11d   : > { %5414 = vmatpush.bf16.msra.mxu1 %v7682_v50  ;;  %v10981_v11 = vld [vmem:[%s12139_s22 + $0x184] sm:$0xf]  ;;  %v7647_v15 = vld [vmem:[%s12139_s22 + $0x190] sm:$0xf0]  ;;  %v7522_v24 = vor.u32 %v10949_v8, %v7519_v9  ;;  %v5143_v50 = vadd.f32 %v5142_v28, %v5129_v23 }
 0x11e   : > { %5428 = vmatpush.bf16.msra.mxu2 %v7810_v52  ;;  %v11013_v16 = vld [vmem:[%s12139_s22 + $0x284] sm:$0xf]  ;;  %v7775_v18 = vld [vmem:[%s12139_s22 + $0x290] sm:$0xf0]  ;;  %v7650_v25 = vor.u32 %v10981_v11, %v7647_v15 }
 0x11f   : > { %5442 = vmatpush.bf16.msra.mxu3 %v7938_v59  ;;  %v11045_v20 = vld [vmem:[%s12139_s22 + $0x384] sm:$0xf]  ;;  %v7903_v22 = vld [vmem:[%s12139_s22 + $0x390] sm:$0xf0]  ;;  %v7778_v27 = vor.u32 %v11013_v16, %v7775_v18 }
 0x120   : > { %5401 = vmatpush.bf16.msra.mxu0 %v7538_v3  ;;  %v10945_v30 = vld [vmem:[%s12139_s22 + $0x64] sm:$0xf]  ;;  %v7503_v37 = vld [vmem:[%s12139_s22 + $0x70] sm:$0xf0]  ;;  %v7906_v49 = vor.u32 %v11045_v20, %v7903_v22  ;;  %v5170_v16 = vpop.f32.mrf.mxu3 }
 0x121   : > { %5415 = vmatpush.bf16.msra.mxu1 %v7666_v6  ;;  %v10977_v42 = vld [vmem:[%s12139_s22 + $0x164] sm:$0xf]  ;;  %v7631_v52 = vld [vmem:[%s12139_s22 + $0x170] sm:$0xf0]  ;;  %v7506_v59 = vor.u32 %v10945_v30, %v7503_v37  ;;  %v5156_v6 = vpop.f32.mrf.mxu2 }
 0x122   : > { %5429 = vmatpush.bf16.msra.mxu2 %v7794_v7  ;;  %v11009_v53 = vld [vmem:[%s12139_s22 + $0x264] sm:$0xf]  ;;  %v7759_v29 = vld [vmem:[%s12139_s22 + $0x270] sm:$0xf0]  ;;  %v7634_v61 = vor.u32 %v10977_v42, %v7631_v52  ;;  %v5157_v11 = vadd.f32 %v5156_v6, %v5143_v50 }
 0x123   : > { %5443 = vmatpush.bf16.msra.mxu3 %v7922_v12  ;;  %v11041_v54 = vld [vmem:[%s12139_s22 + $0x364] sm:$0xf]  ;;  %v7887_v57 = vld [vmem:[%s12139_s22 + $0x370] sm:$0xf0]  ;;  %v7762_v62 = vor.u32 %v11009_v53, %v7759_v29 }
 0x124   : > { %5402 = vmatpush.bf16.msra.mxu0 %v7522_v24  ;;  %v10941_v63 = vld [vmem:[%s12139_s22 + $0x44] sm:$0xf]  ;;  %v7487_v0 = vld [vmem:[%s12139_s22 + $0x50] sm:$0xf0]  ;;  %v7890_v3 = vor.u32 %v11041_v54, %v7887_v57  ;;  %v12818_v19 = vadd.f32 %v5170_v16, %v5157_v11 }
 0x125   : > { %5416 = vmatpush.bf16.msra.mxu1 %v7650_v25  ;;  %v10973_v2 = vld [vmem:[%s12139_s22 + $0x144] sm:$0xf]  ;;  %v7615_v7 = vld [vmem:[%s12139_s22 + $0x150] sm:$0xf0]  ;;  %v7490_v18 = vor.u32 %v10941_v63, %v7487_v0 }
 0x126   : > { %5430 = vmatpush.bf16.msra.mxu2 %v7778_v27  ;;  %v11005_v8 = vld [vmem:[%s12139_s22 + $0x244] sm:$0xf]  ;;  %v7743_v9 = vld [vmem:[%s12139_s22 + $0x250] sm:$0xf0]  ;;  %v7618_v20 = vor.u32 %v10973_v2, %v7615_v7 }
 0x127   : > { %5444 = vmatpush.bf16.msra.mxu3 %v7906_v49  ;;  %v11037_v12 = vld [vmem:[%s12139_s22 + $0x344] sm:$0xf]  ;;  %v7871_v15 = vld [vmem:[%s12139_s22 + $0x350] sm:$0xf0]  ;;  %v7746_v22 = vor.u32 %v11005_v8, %v7743_v9 }
 0x128   : > { %5403 = vmatpush.bf16.msra.mxu0 %v7506_v59  ;;  %v10937_v23 = vld [vmem:[%s12139_s22 + $0x24] sm:$0xf]  ;;  %v7471_v24 = vld [vmem:[%s12139_s22 + $0x30] sm:$0xf0]  ;;  %v7874_v27 = vor.u32 %v11037_v12, %v7871_v15 }
 0x129   : > { %5417 = vmatpush.bf16.msra.mxu1 %v7634_v61  ;;  %v10969_v25 = vld [vmem:[%s12139_s22 + $0x124] sm:$0xf]  ;;  %v7599_v28 = vld [vmem:[%s12139_s22 + $0x130] sm:$0xf0]  ;;  %v7474_v50 = vor.u32 %v10937_v23, %v7471_v24 }
 0x12a   : > { %5431 = vmatpush.bf16.msra.mxu2 %v7762_v62  ;;  %v11001_v30 = vld [vmem:[%s12139_s22 + $0x224] sm:$0xf]  ;;  %v7727_v37 = vld [vmem:[%s12139_s22 + $0x230] sm:$0xf0]  ;;  %v7602_v29 = vor.u32 %v10969_v25, %v7599_v28 }
 0x12b   : > { %5445 = vmatpush.bf16.msra.mxu3 %v7890_v3  ;;  %v11033_v42 = vld [vmem:[%s12139_s22 + $0x324] sm:$0xf]  ;;  %v7855_v49 = vld [vmem:[%s12139_s22 + $0x330] sm:$0xf0]  ;;  %v7730_v54 = vor.u32 %v11001_v30, %v7727_v37 }
 0x12c   : > { %5404 = vmatpush.bf16.msra.mxu0 %v7490_v18  ;;  %v10933_v52 = vld [vmem:[%s12139_s22 + $0x4] sm:$0xf]  ;;  %v7455_v53 = vld [vmem:[%s12139_s22 + $0x10] sm:$0xf0]  ;;  %v7858_v62 = vor.u32 %v11033_v42, %v7855_v49 }
 0x12d   : > { %5418 = vmatpush.bf16.msra.mxu1 %v7618_v20  ;;  %v10965_v57 = vld [vmem:[%s12139_s22 + $0x104] sm:$0xf]  ;;  %v7583_v59 = vld [vmem:[%s12139_s22 + $0x110] sm:$0xf0]  ;;  %v7458_v8 = vor.u32 %v10933_v52, %v7455_v53  ;;  %v12850_v52 = vpop.f32.mrf.mxu0 }
 0x12e   : > { %5432 = vmatpush.bf16.msra.mxu2 %v7746_v22  ;;  %v10997_v61 = vld [vmem:[%s12139_s22 + $0x204] sm:$0xf]  ;;  %v7711_v63 = vld [vmem:[%s12139_s22 + $0x210] sm:$0xf0]  ;;  %v7586_v15 = vor.u32 %v10965_v57, %v7583_v59 }
 0x12f   : > { %5446 = vmatpush.bf16.msra.mxu3 %v7874_v27  ;;  %v11029_v0 = vld [vmem:[%s12139_s22 + $0x304] sm:$0xf]  ;;  %v7839_v2 = vld [vmem:[%s12139_s22 + $0x310] sm:$0xf0]  ;;  %v7714_v16 = vor.u32 %v10997_v61, %v7711_v63 }
 0x130   : > { %v11089_v3 = vld [vmem:[%s12139_s22 + $0x4e4] sm:$0xf]  ;;  %v8079_v6 = vld [vmem:[%s12139_s22 + $0x4f0] sm:$0xf0]  ;;  %5405 = vmatpush.bf16.msra.mxu0 %v7474_v50  ;;  %v7842_v22 = vor.u32 %v11029_v0, %v7839_v2 }
 0x131   : > { %v11121_v7 = vld [vmem:[%s12139_s22 + $0x5e4] sm:$0xf]  ;;  %v8207_v9 = vld [vmem:[%s12139_s22 + $0x5f0] sm:$0xf0]  ;;  %5419 = vmatpush.bf16.msra.mxu1 %v7602_v29  ;;  %v8082_v23 = vor.u32 %v11089_v3, %v8079_v6 }
 0x132   : > { %v11153_v11 = vld [vmem:[%s12139_s22 + $0x6e4] sm:$0xf]  ;;  %v8335_v12 = vld [vmem:[%s12139_s22 + $0x6f0] sm:$0xf0]  ;;  %5433 = vmatpush.bf16.msra.mxu2 %v7730_v54  ;;  %v8210_v24 = vor.u32 %v11121_v7, %v8207_v9  ;;  %v12854_v54 = vpop.f32.mrf.mxu1 }
 0x133   : > { %v11185_v18 = vld [vmem:[%s12139_s22 + $0x7e4] sm:$0xf]  ;;  %v8463_v20 = vld [vmem:[%s12139_s22 + $0x7f0] sm:$0xf0]  ;;  %5447 = vmatpush.bf16.msra.mxu3 %v7858_v62  ;;  %v8338_v25 = vor.u32 %v11153_v11, %v8335_v12  ;;  %14603 = vst [vmem:[#allocation9_spill] sm:$0xff] %v12854_v54 }
 0x134   : > { %v11085_v27 = vld [vmem:[%s12139_s22 + $0x4c4] sm:$0xf]  ;;  %v8063_v28 = vld [vmem:[%s12139_s22 + $0x4d0] sm:$0xf0]  ;;  %5406 = vmatpush.bf16.msra.mxu0 %v7458_v8  ;;  %v8466_v37 = vor.u32 %v11185_v18, %v8463_v20  ;;  %v11120_v54 = vld [vmem:[%s12139_s22 + $0x5d4] sm:$0xf0] }
 0x135   : > { %v11117_v30 = vld [vmem:[%s12139_s22 + $0x5c4] sm:$0xf]  ;;  %v8191_v42 = vld [vmem:[%s12139_s22 + $0x5d0] sm:$0xf0]  ;;  %5420 = vmatpush.bf16.msra.mxu1 %v7586_v15  ;;  %v8066_v57 = vor.u32 %v11085_v27, %v8063_v28  ;;  %v12876_v28 = vpop.f32.mrf.mxu3 }
 0x136   : > { %v11149_v49 = vld [vmem:[%s12139_s22 + $0x6c4] sm:$0xf]  ;;  %v8319_v50 = vld [vmem:[%s12139_s22 + $0x6d0] sm:$0xf0]  ;;  %5434 = vmatpush.bf16.msra.mxu2 %v7714_v16  ;;  %v8194_v59 = vor.u32 %v11117_v30, %v8191_v42  ;;  %14605 = vst [vmem:[#allocation11_spill] sm:$0xff] %v12876_v28  ;;  %v5184_v30 = vpop.f32.mrf.mxu0 }
 0x137   : > { %v11181_v53 = vld [vmem:[%s12139_s22 + $0x7c4] sm:$0xf]  ;;  %v8447_v29 = vld [vmem:[%s12139_s22 + $0x7d0] sm:$0xf0]  ;;  %5448 = vmatpush.bf16.msra.mxu3 %v7842_v22  ;;  %v8322_v61 = vor.u32 %v11149_v49, %v8319_v50  ;;  %5407 = vmatmul.bf16.vlgmr.msra.gmra.mxu0 %v12244_v58  ;;  %v12871_v22 = vpop.f32.mrf.mxu2  ;;  %v5185_v49 = vadd.f32 %v5184_v30, %v12818_v19  ;;  %v11088_v28 = vld [vmem:[%s12139_s22 + $0x4d4] sm:$0xf0] }
 0x138   : > { %5455 = vmatpush.bf16.msrb.mxu0 %v8082_v23  ;;  %v11081_v62 = vld [vmem:[%s12139_s22 + $0x4a4] sm:$0xf]  ;;  %v8047_v63 = vld [vmem:[%s12139_s22 + $0x4b0] sm:$0xf0]  ;;  %v8450_v2 = vor.u32 %v11181_v53, %v8447_v29  ;;  %5421 = vmatmul.bf16.vlgmr.msra.gmra.mxu1 %v12268_v10  ;;  %14604 = vst [vmem:[#allocation10_spill] sm:$0xff] %v12871_v22 }
 0x139   : > { %5469 = vmatpush.bf16.msrb.mxu1 %v8210_v24  ;;  %v11113_v0 = vld [vmem:[%s12139_s22 + $0x5a4] sm:$0xf]  ;;  %v8175_v3 = vld [vmem:[%s12139_s22 + $0x5b0] sm:$0xf0]  ;;  %5435 = vmatmul.bf16.vlgmr.msra.gmra.mxu2 %v12252_v1  ;;  %v8050_v11 = vor.u32 %v11081_v62, %v8047_v63  ;;  %v8197_v22 = vld [vmem:[%s12139_s22 + $0x5c8] sm:$0xf] }
 0x13a   : > { %5483 = vmatpush.bf16.msrb.mxu2 %v8338_v25  ;;  %v11145_v6 = vld [vmem:[%s12139_s22 + $0x6a4] sm:$0xf]  ;;  %v8303_v7 = vld [vmem:[%s12139_s22 + $0x6b0] sm:$0xf0]  ;;  %5449 = vmatmul.bf16.vlgmr.msra.gmra.mxu3 %v12276_v17  ;;  %v8178_v12 = vor.u32 %v11113_v0, %v8175_v3  ;;  %v5198_v53 = vpop.f32.mrf.mxu1 }
 0x13b   : > { %5497 = vmatpush.bf16.msrb.mxu3 %v8466_v37  ;;  %v11177_v8 = vld [vmem:[%s12139_s22 + $0x7a4] sm:$0xf]  ;;  %v8431_v9 = vld [vmem:[%s12139_s22 + $0x7b0] sm:$0xf0]  ;;  %v8306_v15 = vor.u32 %v11145_v6, %v8303_v7  ;;  %v5199_v0 = vadd.f32 %v5198_v53, %v5185_v49 }
 0x13c   : > { %5456 = vmatpush.bf16.msrb.mxu0 %v8066_v57  ;;  %v11077_v16 = vld [vmem:[%s12139_s22 + $0x484] sm:$0xf]  ;;  %v8031_v18 = vld [vmem:[%s12139_s22 + $0x490] sm:$0xf0]  ;;  %v8434_v23 = vor.u32 %v11177_v8, %v8431_v9 }
 0x13d   : > { %5470 = vmatpush.bf16.msrb.mxu1 %v8194_v59  ;;  %v11109_v20 = vld [vmem:[%s12139_s22 + $0x584] sm:$0xf]  ;;  %v8159_v24 = vld [vmem:[%s12139_s22 + $0x590] sm:$0xf0]  ;;  %v8034_v50 = vor.u32 %v11077_v16, %v8031_v18  ;;  %v5226_v30 = vpop.f32.mrf.mxu3 }
 0x13e   : > { %5484 = vmatpush.bf16.msrb.mxu2 %v8322_v61  ;;  %v11141_v25 = vld [vmem:[%s12139_s22 + $0x684] sm:$0xf]  ;;  %v8287_v27 = vld [vmem:[%s12139_s22 + $0x690] sm:$0xf0]  ;;  %v8162_v29 = vor.u32 %v11109_v20, %v8159_v24 }
 0x13f   : > { %5498 = vmatpush.bf16.msrb.mxu3 %v8450_v2  ;;  %v11173_v37 = vld [vmem:[%s12139_s22 + $0x784] sm:$0xf]  ;;  %v8415_v42 = vld [vmem:[%s12139_s22 + $0x790] sm:$0xf0]  ;;  %v8290_v57 = vor.u32 %v11141_v25, %v8287_v27  ;;  %v5212_v20 = vpop.f32.mrf.mxu2 }
 0x140   : > { %5457 = vmatpush.bf16.msrb.mxu0 %v8050_v11  ;;  %v11073_v59 = vld [vmem:[%s12139_s22 + $0x464] sm:$0xf]  ;;  %v8015_v61 = vld [vmem:[%s12139_s22 + $0x470] sm:$0xf0]  ;;  %v8418_v63 = vor.u32 %v11173_v37, %v8415_v42  ;;  %v5213_v27 = vadd.f32 %v5212_v20, %v5199_v0 }
 0x141   : > { %5471 = vmatpush.bf16.msrb.mxu1 %v8178_v12  ;;  %v11105_v62 = vld [vmem:[%s12139_s22 + $0x564] sm:$0xf]  ;;  %v8143_v2 = vld [vmem:[%s12139_s22 + $0x570] sm:$0xf0]  ;;  %v8018_v8 = vor.u32 %v11073_v59, %v8015_v61 }
 0x142   : > { %5485 = vmatpush.bf16.msrb.mxu2 %v8306_v15  ;;  %v11137_v3 = vld [vmem:[%s12139_s22 + $0x664] sm:$0xf]  ;;  %v8271_v19 = vld [vmem:[%s12139_s22 + $0x670] sm:$0xf0]  ;;  %v8146_v9 = vor.u32 %v11105_v62, %v8143_v2 }
 0x143   : > { %5499 = vmatpush.bf16.msrb.mxu3 %v8434_v23  ;;  %v11169_v6 = vld [vmem:[%s12139_s22 + $0x764] sm:$0xf]  ;;  %v8399_v7 = vld [vmem:[%s12139_s22 + $0x770] sm:$0xf0]  ;;  %v8274_v11 = vor.u32 %v11137_v3, %v8271_v19 }
 0x144   : > { %5458 = vmatpush.bf16.msrb.mxu0 %v8034_v50  ;;  %v11069_v12 = vld [vmem:[%s12139_s22 + $0x444] sm:$0xf]  ;;  %v7999_v15 = vld [vmem:[%s12139_s22 + $0x450] sm:$0xf0]  ;;  %v8402_v18 = vor.u32 %v11169_v6, %v8399_v7  ;;  %v12897_v50 = vadd.f32 %v5226_v30, %v5213_v27 }
 0x145   : > { %5472 = vmatpush.bf16.msrb.mxu1 %v8162_v29  ;;  %v11101_v16 = vld [vmem:[%s12139_s22 + $0x544] sm:$0xf]  ;;  %v8127_v23 = vld [vmem:[%s12139_s22 + $0x550] sm:$0xf0]  ;;  %v8002_v49 = vor.u32 %v11069_v12, %v7999_v15 }
 0x146   : > { %5486 = vmatpush.bf16.msrb.mxu2 %v8290_v57  ;;  %v11133_v24 = vld [vmem:[%s12139_s22 + $0x644] sm:$0xf]  ;;  %v8255_v25 = vld [vmem:[%s12139_s22 + $0x650] sm:$0xf0]  ;;  %v8130_v53 = vor.u32 %v11101_v16, %v8127_v23 }
 0x147   : > { %5500 = vmatpush.bf16.msrb.mxu3 %v8418_v63  ;;  %v11165_v37 = vld [vmem:[%s12139_s22 + $0x744] sm:$0xf]  ;;  %v8383_v42 = vld [vmem:[%s12139_s22 + $0x750] sm:$0xf0]  ;;  %v8258_v29 = vor.u32 %v11133_v24, %v8255_v25 }
 0x148   : > { %5459 = vmatpush.bf16.msrb.mxu0 %v8018_v8  ;;  %v11065_v57 = vld [vmem:[%s12139_s22 + $0x424] sm:$0xf]  ;;  %v7983_v59 = vld [vmem:[%s12139_s22 + $0x430] sm:$0xf0]  ;;  %v8386_v62 = vor.u32 %v11165_v37, %v8383_v42 }
 0x149   : > { %5473 = vmatpush.bf16.msrb.mxu1 %v8146_v9  ;;  %v11097_v61 = vld [vmem:[%s12139_s22 + $0x524] sm:$0xf]  ;;  %v8111_v63 = vld [vmem:[%s12139_s22 + $0x530] sm:$0xf0]  ;;  %v7986_v6 = vor.u32 %v11065_v57, %v7983_v59 }
 0x14a   : > { %5487 = vmatpush.bf16.msrb.mxu2 %v8274_v11  ;;  %v11129_v0 = vld [vmem:[%s12139_s22 + $0x624] sm:$0xf]  ;;  %v8239_v2 = vld [vmem:[%s12139_s22 + $0x630] sm:$0xf0]  ;;  %v8114_v9 = vor.u32 %v11097_v61, %v8111_v63 }
 0x14b   : > { %5501 = vmatpush.bf16.msrb.mxu3 %v8402_v18  ;;  %v11161_v3 = vld [vmem:[%s12139_s22 + $0x724] sm:$0xf]  ;;  %v8367_v19 = vld [vmem:[%s12139_s22 + $0x730] sm:$0xf0]  ;;  %v8242_v11 = vor.u32 %v11129_v0, %v8239_v2 }
 0x14c   : > { %5460 = vmatpush.bf16.msrb.mxu0 %v8002_v49  ;;  %v11061_v7 = vld [vmem:[%s12139_s22 + $0x404] sm:$0xf]  ;;  %v7967_v8 = vld [vmem:[%s12139_s22 + $0x410] sm:$0xf0]  ;;  %v8370_v18 = vor.u32 %v11161_v3, %v8367_v19 }
 0x14d   : > { %5474 = vmatpush.bf16.msrb.mxu1 %v8130_v53  ;;  %v11093_v12 = vld [vmem:[%s12139_s22 + $0x504] sm:$0xf]  ;;  %v8095_v15 = vld [vmem:[%s12139_s22 + $0x510] sm:$0xf0]  ;;  %v7970_v37 = vor.u32 %v11061_v7, %v7967_v8 }
 0x14e   : > { %5488 = vmatpush.bf16.msrb.mxu2 %v8258_v29  ;;  %v11125_v16 = vld [vmem:[%s12139_s22 + $0x604] sm:$0xf]  ;;  %v8223_v20 = vld [vmem:[%s12139_s22 + $0x610] sm:$0xf0]  ;;  %v8098_v29 = vor.u32 %v11093_v12, %v8095_v15  ;;  %v12929_v12 = vpop.f32.mrf.mxu0 }
 0x14f   : > { %5502 = vmatpush.bf16.msrb.mxu3 %v8386_v62  ;;  %v11157_v23 = vld [vmem:[%s12139_s22 + $0x704] sm:$0xf]  ;;  %v8351_v24 = vld [vmem:[%s12139_s22 + $0x710] sm:$0xf0]  ;;  %v8226_v57 = vor.u32 %v11125_v16, %v8223_v20  ;;  %14606 = vst [vmem:[#allocation12_spill] sm:$0xff] %v12929_v12 }
 0x150   : > { %v11217_v25 = vld [vmem:[%s12139_s22 + $0x8e4] sm:$0xf]  ;;  %v8591_v27 = vld [vmem:[%s12139_s22 + $0x8f0] sm:$0xf0]  ;;  %5461 = vmatpush.bf16.msrb.mxu0 %v7986_v6  ;;  %v8354_v62 = vor.u32 %v11157_v23, %v8351_v24  ;;  %v8069_v12 = vld [vmem:[%s12139_s22 + $0x4c8] sm:$0xf] }
 0x151   : > { %v11249_v30 = vld [vmem:[%s12139_s22 + $0x9e4] sm:$0xf]  ;;  %v8719_v42 = vld [vmem:[%s12139_s22 + $0x9f0] sm:$0xf0]  ;;  %5475 = vmatpush.bf16.msrb.mxu1 %v8114_v9  ;;  %v8594_v63 = vor.u32 %v11217_v25, %v8591_v27 }
 0x152   : > { %v11281_v49 = vld [vmem:[%s12139_s22 + $0xae4] sm:$0xf]  ;;  %v8847_v53 = vld [vmem:[%s12139_s22 + $0xaf0] sm:$0xf0]  ;;  %5489 = vmatpush.bf16.msrb.mxu2 %v8242_v11  ;;  %v8722_v0 = vor.u32 %v11249_v30, %v8719_v42 }
 0x153   : > { %v11313_v59 = vld [vmem:[%s12139_s22 + $0xbe4] sm:$0xf]  ;;  %v8975_v61 = vld [vmem:[%s12139_s22 + $0xbf0] sm:$0xf0]  ;;  %5503 = vmatpush.bf16.msrb.mxu3 %v8370_v18  ;;  %v8850_v2 = vor.u32 %v11281_v49, %v8847_v53  ;;  %v12933_v18 = vpop.f32.mrf.mxu1 }
 0x154   : > { %v11213_v3 = vld [vmem:[%s12139_s22 + $0x8c4] sm:$0xf]  ;;  %v8575_v19 = vld [vmem:[%s12139_s22 + $0x8d0] sm:$0xf0]  ;;  %5462 = vmatpush.bf16.msrb.mxu0 %v7970_v37  ;;  %v8978_v7 = vor.u32 %v11313_v59, %v8975_v61  ;;  %14607 = vst [vmem:[#allocation13_spill] sm:$0xff] %v12933_v18 }
 0x155   : > { %v11245_v6 = vld [vmem:[%s12139_s22 + $0x9c4] sm:$0xf]  ;;  %v8703_v8 = vld [vmem:[%s12139_s22 + $0x9d0] sm:$0xf0]  ;;  %5476 = vmatpush.bf16.msrb.mxu1 %v8098_v29  ;;  %v8578_v20 = vor.u32 %v11213_v3, %v8575_v19  ;;  %v12950_v3 = vpop.f32.mrf.mxu2  ;;  %v7765_v18 = vld [vmem:[%s12139_s22 + $0x268] sm:$0xf] }
 0x156   : > { %v11277_v9 = vld [vmem:[%s12139_s22 + $0xac4] sm:$0xf]  ;;  %v8831_v11 = vld [vmem:[%s12139_s22 + $0xad0] sm:$0xf0]  ;;  %5490 = vmatpush.bf16.msrb.mxu2 %v8226_v57  ;;  %v8706_v23 = vor.u32 %v11245_v6, %v8703_v8  ;;  %14608 = vst [vmem:[#allocation14_spill] sm:$0xff] %v12950_v3 }
 0x157   : > { %v11309_v15 = vld [vmem:[%s12139_s22 + $0xbc4] sm:$0xf]  ;;  %v8959_v16 = vld [vmem:[%s12139_s22 + $0xbd0] sm:$0xf0]  ;;  %5504 = vmatpush.bf16.msrb.mxu3 %v8354_v62  ;;  %v8834_v24 = vor.u32 %v11277_v9, %v8831_v11  ;;  %5463 = vmatmul.bf16.vlgmr.msrb.gmra.mxu0 %v12352_v39  ;;  %v12955_v9 = vpop.f32.mrf.mxu3  ;;  %v5240_v11 = vpop.f32.mrf.mxu0 }
 0x158   : > { %5511 = vmatpush.bf16.msra.mxu0 %v8594_v63  ;;  %v11209_v25 = vld [vmem:[%s12139_s22 + $0x8a4] sm:$0xf]  ;;  %v8559_v27 = vld [vmem:[%s12139_s22 + $0x8b0] sm:$0xf0]  ;;  %v8962_v37 = vor.u32 %v11309_v15, %v8959_v16  ;;  %5477 = vmatmul.bf16.vlgmr.msrb.gmra.mxu1 %v12359_v44  ;;  %14609 = vst [vmem:[#allocation15_spill] sm:$0xff] %v12955_v9 }
 0x159   : > { %5525 = vmatpush.bf16.msra.mxu1 %v8722_v0  ;;  %v11241_v30 = vld [vmem:[%s12139_s22 + $0x9a4] sm:$0xf]  ;;  %v8687_v42 = vld [vmem:[%s12139_s22 + $0x9b0] sm:$0xf0]  ;;  %5491 = vmatmul.bf16.vlgmr.msrb.gmra.mxu2 %v12357_v43  ;;  %v8562_v59 = vor.u32 %v11209_v25, %v8559_v27 }
 0x15a   : > { %5539 = vmatpush.bf16.msra.mxu2 %v8850_v2  ;;  %v11273_v49 = vld [vmem:[%s12139_s22 + $0xaa4] sm:$0xf]  ;;  %v8815_v53 = vld [vmem:[%s12139_s22 + $0xab0] sm:$0xf0]  ;;  %5505 = vmatmul.bf16.vlgmr.msrb.gmra.mxu3 %v12363_v47  ;;  %v8690_v61 = vor.u32 %v11241_v30, %v8687_v42 }
 0x15b   : > { %5553 = vmatpush.bf16.msra.mxu3 %v8978_v7  ;;  %v11305_v29 = vld [vmem:[%s12139_s22 + $0xba4] sm:$0xf]  ;;  %v8943_v57 = vld [vmem:[%s12139_s22 + $0xbb0] sm:$0xf0]  ;;  %v8818_v62 = vor.u32 %v11273_v49, %v8815_v53 }
 0x15c   : > { %5512 = vmatpush.bf16.msra.mxu0 %v8578_v20  ;;  %v11205_v63 = vld [vmem:[%s12139_s22 + $0x884] sm:$0xf]  ;;  %v8543_v0 = vld [vmem:[%s12139_s22 + $0x890] sm:$0xf0]  ;;  %v8946_v19 = vor.u32 %v11305_v29, %v8943_v57  ;;  %v5241_v20 = vadd.f32 %v5240_v11, %v12897_v50 }
 0x15d   : > { %5526 = vmatpush.bf16.msra.mxu1 %v8706_v23  ;;  %v11237_v2 = vld [vmem:[%s12139_s22 + $0x984] sm:$0xf]  ;;  %v8671_v6 = vld [vmem:[%s12139_s22 + $0x990] sm:$0xf0]  ;;  %v8546_v23 = vor.u32 %v11205_v63, %v8543_v0 }
 0x15e   : > { %5540 = vmatpush.bf16.msra.mxu2 %v8834_v24  ;;  %v11269_v7 = vld [vmem:[%s12139_s22 + $0xa84] sm:$0xf]  ;;  %v8799_v8 = vld [vmem:[%s12139_s22 + $0xa90] sm:$0xf0]  ;;  %v5254_v24 = vpop.f32.mrf.mxu1  ;;  %v8674_v25 = vor.u32 %v11237_v2, %v8671_v6 }
 0x15f   : > { %5554 = vmatpush.bf16.msra.mxu3 %v8962_v37  ;;  %v11301_v15 = vld [vmem:[%s12139_s22 + $0xb84] sm:$0xf]  ;;  %v8927_v16 = vld [vmem:[%s12139_s22 + $0xb90] sm:$0xf0]  ;;  %v8802_v27 = vor.u32 %v11269_v7, %v8799_v8  ;;  %v5255_v53 = vadd.f32 %v5254_v24, %v5241_v20  ;;  %v5268_v8 = vpop.f32.mrf.mxu2 }
 0x160   : > { %5513 = vmatpush.bf16.msra.mxu0 %v8562_v59  ;;  %v11201_v30 = vld [vmem:[%s12139_s22 + $0x864] sm:$0xf]  ;;  %v8527_v37 = vld [vmem:[%s12139_s22 + $0x870] sm:$0xf0]  ;;  %v8930_v49 = vor.u32 %v11301_v15, %v8927_v16 }
 0x161   : > { %5527 = vmatpush.bf16.msra.mxu1 %v8690_v61  ;;  %v11233_v42 = vld [vmem:[%s12139_s22 + $0x964] sm:$0xf]  ;;  %v8655_v29 = vld [vmem:[%s12139_s22 + $0x970] sm:$0xf0]  ;;  %v5269_v20 = vadd.f32 %v5268_v8, %v5255_v53 }
 0x162   : > { %5541 = vmatpush.bf16.msra.mxu2 %v8818_v62  ;;  %v11265_v57 = vld [vmem:[%s12139_s22 + $0xa64] sm:$0xf]  ;;  %v8783_v50 = vld [vmem:[%s12139_s22 + $0xa70] sm:$0xf0]  ;;  %v8530_v62 = vor.u32 %v11201_v30, %v8527_v37  ;;  %v8658_v63 = vor.u32 %v11233_v42, %v8655_v29 }
 0x163   : > { %5555 = vmatpush.bf16.msra.mxu3 %v8946_v19  ;;  %v11297_v59 = vld [vmem:[%s12139_s22 + $0xb64] sm:$0xf]  ;;  %v8911_v61 = vld [vmem:[%s12139_s22 + $0xb70] sm:$0xf0]  ;;  %v8786_v0 = vor.u32 %v11265_v57, %v8783_v50 }
 0x164   : > { %5514 = vmatpush.bf16.msra.mxu0 %v8546_v23  ;;  %v11197_v2 = vld [vmem:[%s12139_s22 + $0x844] sm:$0xf]  ;;  %v8511_v19 = vld [vmem:[%s12139_s22 + $0x850] sm:$0xf0]  ;;  %v8914_v7 = vor.u32 %v11297_v59, %v8911_v61  ;;  %v5282_v23 = vpop.f32.mrf.mxu3 }
 0x165   : > { %5528 = vmatpush.bf16.msra.mxu1 %v8674_v25  ;;  %v11229_v6 = vld [vmem:[%s12139_s22 + $0x944] sm:$0xf]  ;;  %v8639_v11 = vld [vmem:[%s12139_s22 + $0x950] sm:$0xf0]  ;;  %v12976_v30 = vadd.f32 %v5282_v23, %v5269_v20 }
 0x166   : > { %5542 = vmatpush.bf16.msra.mxu2 %v8802_v27  ;;  %v11261_v15 = vld [vmem:[%s12139_s22 + $0xa44] sm:$0xf]  ;;  %v8767_v16 = vld [vmem:[%s12139_s22 + $0xa50] sm:$0xf0]  ;;  %v8514_v27 = vor.u32 %v11197_v2, %v8511_v19  ;;  %v8642_v37 = vor.u32 %v11229_v6, %v8639_v11 }
 0x167   : > { %5556 = vmatpush.bf16.msra.mxu3 %v8930_v49  ;;  %v11293_v24 = vld [vmem:[%s12139_s22 + $0xb44] sm:$0xf]  ;;  %v8895_v25 = vld [vmem:[%s12139_s22 + $0xb50] sm:$0xf0]  ;;  %v8770_v42 = vor.u32 %v11261_v15, %v8767_v16 }
 0x168   : > { %5515 = vmatpush.bf16.msra.mxu0 %v8530_v62  ;;  %v11193_v49 = vld [vmem:[%s12139_s22 + $0x824] sm:$0xf]  ;;  %v8495_v53 = vld [vmem:[%s12139_s22 + $0x830] sm:$0xf0]  ;;  %v8898_v57 = vor.u32 %v11293_v24, %v8895_v25 }
 0x169   : > { %5529 = vmatpush.bf16.msra.mxu1 %v8658_v63  ;;  %v11225_v29 = vld [vmem:[%s12139_s22 + $0x924] sm:$0xf]  ;;  %v8623_v50 = vld [vmem:[%s12139_s22 + $0x930] sm:$0xf0] }
 0x16a   : > { %5543 = vmatpush.bf16.msra.mxu2 %v8786_v0  ;;  %v11257_v59 = vld [vmem:[%s12139_s22 + $0xa24] sm:$0xf]  ;;  %v8751_v61 = vld [vmem:[%s12139_s22 + $0xa30] sm:$0xf0]  ;;  %v8498_v0 = vor.u32 %v11193_v49, %v8495_v53  ;;  %v8626_v6 = vor.u32 %v11225_v29, %v8623_v50 }
 0x16b   : > { %5557 = vmatpush.bf16.msra.mxu3 %v8914_v7  ;;  %v11289_v62 = vld [vmem:[%s12139_s22 + $0xb24] sm:$0xf]  ;;  %v8879_v63 = vld [vmem:[%s12139_s22 + $0xb30] sm:$0xf0]  ;;  %v8754_v7 = vor.u32 %v11257_v59, %v8751_v61 }
 0x16c   : > { %5516 = vmatpush.bf16.msra.mxu0 %v8514_v27  ;;  %v11189_v2 = vld [vmem:[%s12139_s22 + $0x804] sm:$0xf]  ;;  %v8479_v19 = vld [vmem:[%s12139_s22 + $0x810] sm:$0xf0]  ;;  %v8882_v16 = vor.u32 %v11289_v62, %v8879_v63 }
 0x16d   : > { %5530 = vmatpush.bf16.msra.mxu1 %v8642_v37  ;;  %v11221_v8 = vld [vmem:[%s12139_s22 + $0x904] sm:$0xf]  ;;  %v8607_v11 = vld [vmem:[%s12139_s22 + $0x910] sm:$0xf0]  ;;  %v8482_v37 = vor.u32 %v11189_v2, %v8479_v19 }
 0x16e   : > { %5544 = vmatpush.bf16.msra.mxu2 %v8770_v42  ;;  %v11253_v15 = vld [vmem:[%s12139_s22 + $0xa04] sm:$0xf]  ;;  %v8735_v20 = vld [vmem:[%s12139_s22 + $0xa10] sm:$0xf0] }
 0x16f   : > { %5558 = vmatpush.bf16.msra.mxu3 %v8898_v57  ;;  %v11285_v23 = vld [vmem:[%s12139_s22 + $0xb04] sm:$0xf]  ;;  %v8863_v24 = vld [vmem:[%s12139_s22 + $0xb10] sm:$0xf0]  ;;  %v8610_v57 = vor.u32 %v11221_v8, %v8607_v11  ;;  %v8738_v50 = vor.u32 %v11253_v15, %v8735_v20  ;;  %v13008_v11 = vpop.f32.mrf.mxu0  ;;  %v13012_v20 = vpop.f32.mrf.mxu1 }
 0x170   : > { %v11345_v25 = vld [vmem:[%s12139_s22 + $0xce4] sm:$0xf]  ;;  %v9103_v27 = vld [vmem:[%s12139_s22 + $0xcf0] sm:$0xf0]  ;;  %5517 = vmatpush.bf16.msra.mxu0 %v8498_v0  ;;  %v8866_v62 = vor.u32 %v11285_v23, %v8863_v24  ;;  %14610 = vst [vmem:[#allocation16_spill] sm:$0xff] %v13008_v11 }
 0x171   : > { %v11377_v49 = vld [vmem:[%s12139_s22 + $0xde4] sm:$0xf]  ;;  %v9231_v42 = vld [vmem:[%s12139_s22 + $0xdf0] sm:$0xf0]  ;;  %5531 = vmatpush.bf16.msra.mxu1 %v8626_v6  ;;  %v9106_v63 = vor.u32 %v11345_v25, %v9103_v27  ;;  %14611 = vst [vmem:[#allocation17_spill] sm:$0xff] %v13012_v20 }
 0x172   : > { %v11409_v53 = vld [vmem:[%s12139_s22 + $0xee4] sm:$0xf]  ;;  %v9359_v29 = vld [vmem:[%s12139_s22 + $0xef0] sm:$0xf0]  ;;  %5545 = vmatpush.bf16.msra.mxu2 %v8754_v7  ;;  %v9234_v0 = vor.u32 %v11377_v49, %v9231_v42 }
 0x173   : > { %v11441_v59 = vld [vmem:[%s12139_s22 + $0xfe4] sm:$0xf]  ;;  %v9487_v61 = vld [vmem:[%s12139_s22 + $0xff0] sm:$0xf0]  ;;  %5559 = vmatpush.bf16.msra.mxu3 %v8882_v16  ;;  %v9362_v2 = vor.u32 %v11409_v53, %v9359_v29 }
 0x174   : > { %v11341_v19 = vld [vmem:[%s12139_s22 + $0xcc4] sm:$0xf]  ;;  %5518 = vmatpush.bf16.msra.mxu0 %v8482_v37  ;;  %v9490_v6 = vor.u32 %v11441_v59, %v9487_v61  ;;  %v9215_v3 = vld [vmem:[%s12139_s22 + $0xdd0] sm:$0xf0] }
 0x175   : > { %v11373_v9 = vld [vmem:[%s12139_s22 + $0xdc4] sm:$0xf]  ;;  %v9343_v8 = vld [vmem:[%s12139_s22 + $0xed0] sm:$0xf0]  ;;  %5532 = vmatpush.bf16.msra.mxu1 %v8610_v57  ;;  %v9090_v23 = vor.u32 %v11341_v19, %v9087_v13 }
 0x176   : > { %v11405_v7 = vld [vmem:[%s12139_s22 + $0xec4] sm:$0xf]  ;;  %5546 = vmatpush.bf16.msra.mxu2 %v8738_v50  ;;  %v9471_v16 = vld [vmem:[%s12139_s22 + $0xfd0] sm:$0xf0]  ;;  %v9218_v24 = vor.u32 %v11373_v9, %v9215_v3 }
 0x177   : > { %v11437_v15 = vld [vmem:[%s12139_s22 + $0xfc4] sm:$0xf]  ;;  %5560 = vmatpush.bf16.msra.mxu3 %v8866_v62  ;;  %v9346_v25 = vor.u32 %v11405_v7, %v9343_v8  ;;  %v9071_v49 = vld [vmem:[%s12139_s22 + $0xcb0] sm:$0xf0]  ;;  %5519 = vmatmul.bf16.vlgmr.msra.gmra.mxu0 %v12452_v31  ;;  %v13034_v8 = vpop.f32.mrf.mxu3 }
 0x178   : > { %5567 = vmatpush.bf16.msrb.mxu0 %v9106_v63  ;;  %v11337_v27 = vld [vmem:[%s12139_s22 + $0xca4] sm:$0xf]  ;;  %v9474_v42 = vor.u32 %v11437_v15, %v9471_v16  ;;  %v9199_v53 = vld [vmem:[%s12139_s22 + $0xdb0] sm:$0xf0]  ;;  %5533 = vmatmul.bf16.vlgmr.msra.gmra.mxu1 %v12459_v36  ;;  %14613 = vst [vmem:[#allocation19_spill] sm:$0xff] %v13034_v8  ;;  %v5296_v15 = vpop.f32.mrf.mxu0 }
 0x179   : > { %5581 = vmatpush.bf16.msrb.mxu1 %v9234_v0  ;;  %v11369_v37 = vld [vmem:[%s12139_s22 + $0xda4] sm:$0xf]  ;;  %v9327_v57 = vld [vmem:[%s12139_s22 + $0xeb0] sm:$0xf0]  ;;  %5547 = vmatmul.bf16.vlgmr.msra.gmra.mxu2 %v12457_v35  ;;  %v9074_v9 = vor.u32 %v11337_v27, %v9071_v49  ;;  %v13029_v0 = vpop.f32.mrf.mxu2  ;;  %v5310_v27 = vpop.f32.mrf.mxu1 }
 0x17a   : > { %5595 = vmatpush.bf16.msrb.mxu2 %v9362_v2  ;;  %v11401_v29 = vld [vmem:[%s12139_s22 + $0xea4] sm:$0xf]  ;;  %v9455_v3 = vld [vmem:[%s12139_s22 + $0xfb0] sm:$0xf0]  ;;  %5561 = vmatmul.bf16.vlgmr.msra.gmra.mxu3 %v12463_v40  ;;  %v9202_v50 = vor.u32 %v11369_v37, %v9199_v53  ;;  %14612 = vst [vmem:[#allocation18_spill] sm:$0xff] %v13029_v0 }
 0x17b   : > { %5609 = vmatpush.bf16.msrb.mxu3 %v9490_v6  ;;  %v11433_v13 = vld [vmem:[%s12139_s22 + $0xfa4] sm:$0xf]  ;;  %v9330_v59 = vor.u32 %v11401_v29, %v9327_v57  ;;  %v9055_v62 = vld [vmem:[%s12139_s22 + $0xc90] sm:$0xf0] }
 0x17c   : > { %5568 = vmatpush.bf16.msrb.mxu0 %v9090_v23  ;;  %v11333_v61 = vld [vmem:[%s12139_s22 + $0xc84] sm:$0xf]  ;;  %v9458_v2 = vor.u32 %v11433_v13, %v9455_v3  ;;  %v9183_v19 = vld [vmem:[%s12139_s22 + $0xd90] sm:$0xf0] }
 0x17d   : > { %5582 = vmatpush.bf16.msrb.mxu1 %v9218_v24  ;;  %v11365_v63 = vld [vmem:[%s12139_s22 + $0xd84] sm:$0xf]  ;;  %v9311_v7 = vld [vmem:[%s12139_s22 + $0xe90] sm:$0xf0]  ;;  %v5297_v24 = vadd.f32 %v5296_v15, %v12976_v30 }
 0x17e   : > { %5596 = vmatpush.bf16.msrb.mxu2 %v9346_v25  ;;  %v11397_v6 = vld [vmem:[%s12139_s22 + $0xe84] sm:$0xf]  ;;  %v9439_v23 = vld [vmem:[%s12139_s22 + $0xf90] sm:$0xf0]  ;;  %v9058_v25 = vor.u32 %v11333_v61, %v9055_v62  ;;  %v9186_v49 = vor.u32 %v11365_v63, %v9183_v19 }
 0x17f   : > { %5610 = vmatpush.bf16.msrb.mxu3 %v9474_v42  ;;  %v11429_v16 = vld [vmem:[%s12139_s22 + $0xf84] sm:$0xf]  ;;  %v9314_v37 = vor.u32 %v11397_v6, %v9311_v7  ;;  %v9039_v53 = vld [vmem:[%s12139_s22 + $0xc70] sm:$0xf0]  ;;  %v5311_v13 = vadd.f32 %v5310_v27, %v5297_v24  ;;  %v5338_v27 = vpop.f32.mrf.mxu3 }
 0x180   : > { %5569 = vmatpush.bf16.msrb.mxu0 %v9074_v9  ;;  %v11329_v42 = vld [vmem:[%s12139_s22 + $0xc64] sm:$0xf]  ;;  %v9442_v57 = vor.u32 %v11429_v16, %v9439_v23  ;;  %v9167_v3 = vld [vmem:[%s12139_s22 + $0xd70] sm:$0xf0] }
 0x181   : > { %5583 = vmatpush.bf16.msrb.mxu1 %v9202_v50  ;;  %v11361_v29 = vld [vmem:[%s12139_s22 + $0xd64] sm:$0xf]  ;;  %v9295_v30 = vld [vmem:[%s12139_s22 + $0xe70] sm:$0xf0]  ;;  %v5324_v15 = vpop.f32.mrf.mxu2 }
 0x182   : > { %5597 = vmatpush.bf16.msrb.mxu2 %v9330_v59  ;;  %v11393_v9 = vld [vmem:[%s12139_s22 + $0xe64] sm:$0xf]  ;;  %v9423_v50 = vld [vmem:[%s12139_s22 + $0xf70] sm:$0xf0]  ;;  %v9042_v59 = vor.u32 %v11329_v42, %v9039_v53  ;;  %v9170_v62 = vor.u32 %v11361_v29, %v9167_v3 }
 0x183   : > { %5611 = vmatpush.bf16.msrb.mxu3 %v9458_v2  ;;  %v11425_v61 = vld [vmem:[%s12139_s22 + $0xf64] sm:$0xf]  ;;  %v9298_v63 = vor.u32 %v11393_v9, %v9295_v30  ;;  %v9023_v19 = vld [vmem:[%s12139_s22 + $0xc50] sm:$0xf0] }
 0x184   : > { %5570 = vmatpush.bf16.msrb.mxu0 %v9058_v25  ;;  %v11325_v2 = vld [vmem:[%s12139_s22 + $0xc44] sm:$0xf]  ;;  %v9426_v7 = vor.u32 %v11425_v61, %v9423_v50  ;;  %v9151_v16 = vld [vmem:[%s12139_s22 + $0xd50] sm:$0xf0]  ;;  %v5325_v25 = vadd.f32 %v5324_v15, %v5311_v13 }
 0x185   : > { %5584 = vmatpush.bf16.msrb.mxu1 %v9186_v49  ;;  %v11357_v6 = vld [vmem:[%s12139_s22 + $0xd44] sm:$0xf]  ;;  %v9279_v24 = vld [vmem:[%s12139_s22 + $0xe50] sm:$0xf0]  ;;  %v9026_v42 = vor.u32 %v11325_v2, %v9023_v19 }
 0x186   : > { %5598 = vmatpush.bf16.msrb.mxu2 %v9314_v37  ;;  %v11389_v23 = vld [vmem:[%s12139_s22 + $0xe44] sm:$0xf]  ;;  %v9407_v37 = vld [vmem:[%s12139_s22 + $0xf50] sm:$0xf0]  ;;  %v13055_v53 = vadd.f32 %v5338_v27, %v5325_v25  ;;  %v9154_v29 = vor.u32 %v11357_v6, %v9151_v16 }
 0x187   : > { %5612 = vmatpush.bf16.msrb.mxu3 %v9442_v57  ;;  %v11421_v49 = vld [vmem:[%s12139_s22 + $0xf44] sm:$0xf]  ;;  %v9282_v57 = vor.u32 %v11389_v23, %v9279_v24  ;;  %v9007_v13 = vld [vmem:[%s12139_s22 + $0xc30] sm:$0xf0] }
 0x188   : > { %5571 = vmatpush.bf16.msrb.mxu0 %v9042_v59  ;;  %v11321_v3 = vld [vmem:[%s12139_s22 + $0xc24] sm:$0xf]  ;;  %v9410_v30 = vor.u32 %v11421_v49, %v9407_v37  ;;  %v9135_v61 = vld [vmem:[%s12139_s22 + $0xd30] sm:$0xf0] }
 0x189   : > { %5585 = vmatpush.bf16.msrb.mxu1 %v9170_v62  ;;  %v11353_v9 = vld [vmem:[%s12139_s22 + $0xd24] sm:$0xf]  ;;  %v9263_v59 = vld [vmem:[%s12139_s22 + $0xe30] sm:$0xf0]  ;;  %v9010_v2 = vor.u32 %v11321_v3, %v9007_v13 }
 0x18a   : > { %5599 = vmatpush.bf16.msrb.mxu2 %v9298_v63  ;;  %v11385_v50 = vld [vmem:[%s12139_s22 + $0xe24] sm:$0xf]  ;;  %v9391_v63 = vld [vmem:[%s12139_s22 + $0xf30] sm:$0xf0] }
 0x18b   : > { %5613 = vmatpush.bf16.msrb.mxu3 %v9426_v7  ;;  %v11417_v62 = vld [vmem:[%s12139_s22 + $0xf24] sm:$0xf]  ;;  %v8991_v6 = vld [vmem:[%s12139_s22 + $0xc10] sm:$0xf0]  ;;  %v9138_v7 = vor.u32 %v11353_v9, %v9135_v61  ;;  %v9266_v15 = vor.u32 %v11385_v50, %v9263_v59 }
 0x18c   : > { %5572 = vmatpush.bf16.msrb.mxu0 %v9026_v42  ;;  %v11317_v19 = vld [vmem:[%s12139_s22 + $0xc04] sm:$0xf]  ;;  %v9119_v23 = vld [vmem:[%s12139_s22 + $0xd10] sm:$0xf0]  ;;  %v9394_v25 = vor.u32 %v11417_v62, %v9391_v63 }
 0x18d   : > { %5586 = vmatpush.bf16.msrb.mxu1 %v9154_v29  ;;  %v11349_v16 = vld [vmem:[%s12139_s22 + $0xd04] sm:$0xf]  ;;  %v9247_v27 = vld [vmem:[%s12139_s22 + $0xe10] sm:$0xf0]  ;;  %v8994_v29 = vor.u32 %v11317_v19, %v8991_v6 }
 0x18e   : > { %5600 = vmatpush.bf16.msrb.mxu2 %v9282_v57  ;;  %v11381_v24 = vld [vmem:[%s12139_s22 + $0xe04] sm:$0xf]  ;;  %v9375_v37 = vld [vmem:[%s12139_s22 + $0xf10] sm:$0xf0] }
 0x18f   : > { %5614 = vmatpush.bf16.msrb.mxu3 %v9410_v30  ;;  %v11413_v49 = vld [vmem:[%s12139_s22 + $0xf04] sm:$0xf]  ;;  %v9615_v3 = vld [vmem:[%s12139_s22 + $0x10f0] sm:$0xf0]  ;;  %v9122_v30 = vor.u32 %v11349_v16, %v9119_v23  ;;  %v9250_v50 = vor.u32 %v11381_v24, %v9247_v27  ;;  %v13087_v23 = vpop.f32.mrf.mxu0  ;;  %v13091_v27 = vpop.f32.mrf.mxu1 }
 0x190   : > { %v11473_v42 = vld [vmem:[%s12139_s22 + $0x10e4] sm:$0xf]  ;;  %5573 = vmatpush.bf16.msrb.mxu0 %v9010_v2  ;;  %v9743_v57 = vld [vmem:[%s12139_s22 + $0x11f0] sm:$0xf0]  ;;  %v9378_v63 = vor.u32 %v11413_v49, %v9375_v37  ;;  %14614 = vst [vmem:[#allocation20_spill] sm:$0xff] %v13087_v23 }
 0x191   : > { %v11505_v13 = vld [vmem:[%s12139_s22 + $0x11e4] sm:$0xf]  ;;  %v9871_v61 = vld [vmem:[%s12139_s22 + $0x12f0] sm:$0xf0]  ;;  %5587 = vmatpush.bf16.msrb.mxu1 %v9138_v7  ;;  %v9618_v2 = vor.u32 %v11473_v42, %v9615_v3  ;;  %14615 = vst [vmem:[#allocation21_spill] sm:$0xff] %v13091_v27 }
 0x192   : > { %v11537_v9 = vld [vmem:[%s12139_s22 + $0x12e4] sm:$0xf]  ;;  %5601 = vmatpush.bf16.msrb.mxu2 %v9266_v15  ;;  %v9999_v62 = vld [vmem:[%s12139_s22 + $0x13f0] sm:$0xf0]  ;;  %v9746_v19 = vor.u32 %v11505_v13, %v9743_v57  ;;  %v10960_v23 = vld [vmem:[%s12139_s22 + $0xd4] sm:$0xf0] }
 0x193   : > { %v11569_v59 = vld [vmem:[%s12139_s22 + $0x13e4] sm:$0xf]  ;;  %5615 = vmatpush.bf16.msrb.mxu3 %v9394_v25  ;;  %v9874_v6 = vor.u32 %v11537_v9, %v9871_v61  ;;  %v9599_v0 = vld [vmem:[%s12139_s22 + $0x10d0] sm:$0xf0] }
 0x194   : > { %v11469_v8 = vld [vmem:[%s12139_s22 + $0x10c4] sm:$0xf]  ;;  %5574 = vmatpush.bf16.msrb.mxu0 %v8994_v29  ;;  %v10002_v7 = vor.u32 %v11569_v59, %v9999_v62  ;;  %v9727_v11 = vld [vmem:[%s12139_s22 + $0x11d0] sm:$0xf0] }
 0x195   : > { %v11501_v20 = vld [vmem:[%s12139_s22 + $0x11c4] sm:$0xf]  ;;  %v9855_v16 = vld [vmem:[%s12139_s22 + $0x12d0] sm:$0xf0]  ;;  %5588 = vmatpush.bf16.msrb.mxu1 %v9122_v30  ;;  %v9602_v49 = vor.u32 %v11469_v8, %v9599_v0 }
 0x196   : > { %v11533_v15 = vld [vmem:[%s12139_s22 + $0x12c4] sm:$0xf]  ;;  %5602 = vmatpush.bf16.msrb.mxu2 %v9250_v50  ;;  %v9983_v25 = vld [vmem:[%s12139_s22 + $0x13d0] sm:$0xf0]  ;;  %v9730_v37 = vor.u32 %v11501_v20, %v9727_v11 }
 0x197   : > { %v11565_v24 = vld [vmem:[%s12139_s22 + $0x13c4] sm:$0xf]  ;;  %5616 = vmatpush.bf16.msrb.mxu3 %v9378_v63  ;;  %v9858_v42 = vor.u32 %v11533_v15, %v9855_v16  ;;  %v9583_v13 = vld [vmem:[%s12139_s22 + $0x10b0] sm:$0xf0]  ;;  %5575 = vmatmul.bf16.vlgmr.msrb.gmra.mxu0 %v12552_v32  ;;  %v13113_v16 = vpop.f32.mrf.mxu3 }
 0x198   : > { %5623 = vmatpush.bf16.msra.mxu0 %v9618_v2  ;;  %v11465_v3 = vld [vmem:[%s12139_s22 + $0x10a4] sm:$0xf]  ;;  %v9986_v57 = vor.u32 %v11565_v24, %v9983_v25  ;;  %v9711_v9 = vld [vmem:[%s12139_s22 + $0x11b0] sm:$0xf0]  ;;  %5589 = vmatmul.bf16.vlgmr.msrb.gmra.mxu1 %v12559_v41  ;;  %v13108_v2 = vpop.f32.mrf.mxu2  ;;  %14617 = vst [vmem:[#allocation23_spill] sm:$0xff] %v13113_v16  ;;  %v5352_v24 = vpop.f32.mrf.mxu0 }
 0x199   : > { %5637 = vmatpush.bf16.msra.mxu1 %v9746_v19  ;;  %v11497_v29 = vld [vmem:[%s12139_s22 + $0x11a4] sm:$0xf]  ;;  %v9839_v30 = vld [vmem:[%s12139_s22 + $0x12b0] sm:$0xf0]  ;;  %5603 = vmatmul.bf16.vlgmr.msrb.gmra.mxu2 %v12557_v38  ;;  %v9586_v0 = vor.u32 %v11465_v3, %v9583_v13  ;;  %14616 = vst [vmem:[#allocation22_spill] sm:$0xff] %v13108_v2  ;;  %v5366_v3 = vpop.f32.mrf.mxu1 }
 0x19a   : > { %5651 = vmatpush.bf16.msra.mxu2 %v9874_v6  ;;  %v11529_v61 = vld [vmem:[%s12139_s22 + $0x12a4] sm:$0xf]  ;;  %v9967_v20 = vld [vmem:[%s12139_s22 + $0x13b0] sm:$0xf0]  ;;  %5617 = vmatmul.bf16.vlgmr.msrb.gmra.mxu3 %v12563_v46  ;;  %v9714_v8 = vor.u32 %v11497_v29, %v9711_v9 }
 0x19b   : > { %5665 = vmatpush.bf16.msra.mxu3 %v10002_v7  ;;  %v11561_v11 = vld [vmem:[%s12139_s22 + $0x13a4] sm:$0xf]  ;;  %v9842_v50 = vor.u32 %v11529_v61, %v9839_v30  ;;  %v9567_v62 = vld [vmem:[%s12139_s22 + $0x1090] sm:$0xf0] }
 0x19c   : > { %5624 = vmatpush.bf16.msra.mxu0 %v9602_v49  ;;  %v11461_v59 = vld [vmem:[%s12139_s22 + $0x1084] sm:$0xf]  ;;  %v9970_v19 = vor.u32 %v11561_v11, %v9967_v20  ;;  %v9695_v6 = vld [vmem:[%s12139_s22 + $0x1190] sm:$0xf0] }
 0x19d   : > { %5638 = vmatpush.bf16.msra.mxu1 %v9730_v37  ;;  %v11493_v63 = vld [vmem:[%s12139_s22 + $0x1184] sm:$0xf]  ;;  %v9823_v15 = vld [vmem:[%s12139_s22 + $0x1290] sm:$0xf0]  ;;  %v5353_v37 = vadd.f32 %v5352_v24, %v13055_v53 }
 0x19e   : > { %5652 = vmatpush.bf16.msra.mxu2 %v9858_v42  ;;  %v11525_v7 = vld [vmem:[%s12139_s22 + $0x1284] sm:$0xf]  ;;  %v9951_v49 = vld [vmem:[%s12139_s22 + $0x1390] sm:$0xf0]  ;;  %v9570_v42 = vor.u32 %v11461_v59, %v9567_v62  ;;  %v9698_v13 = vor.u32 %v11493_v63, %v9695_v6 }
 0x19f   : > { %5666 = vmatpush.bf16.msra.mxu3 %v9986_v57  ;;  %v11557_v25 = vld [vmem:[%s12139_s22 + $0x1384] sm:$0xf]  ;;  %v9826_v29 = vor.u32 %v11525_v7, %v9823_v15  ;;  %v9551_v9 = vld [vmem:[%s12139_s22 + $0x1070] sm:$0xf0]  ;;  %v5367_v11 = vadd.f32 %v5366_v3, %v5353_v37  ;;  %v5394_v3 = vpop.f32.mrf.mxu3 }
 0x1a0   : > { %5625 = vmatpush.bf16.msra.mxu0 %v9586_v0  ;;  %v11457_v57 = vld [vmem:[%s12139_s22 + $0x1064] sm:$0xf]  ;;  %v9954_v30 = vor.u32 %v11557_v25, %v9951_v49  ;;  %v9679_v20 = vld [vmem:[%s12139_s22 + $0x1170] sm:$0xf0]  ;;  %v5380_v24 = vpop.f32.mrf.mxu2 }
 0x1a1   : > { %5639 = vmatpush.bf16.msra.mxu1 %v9714_v8  ;;  %v11489_v61 = vld [vmem:[%s12139_s22 + $0x1164] sm:$0xf]  ;;  %v9807_v53 = vld [vmem:[%s12139_s22 + $0x1270] sm:$0xf0] }
 0x1a2   : > { %5653 = vmatpush.bf16.msra.mxu2 %v9842_v50  ;;  %v11521_v0 = vld [vmem:[%s12139_s22 + $0x1264] sm:$0xf]  ;;  %v9935_v8 = vld [vmem:[%s12139_s22 + $0x1370] sm:$0xf0]  ;;  %v9554_v50 = vor.u32 %v11457_v57, %v9551_v9  ;;  %v9682_v62 = vor.u32 %v11489_v61, %v9679_v20 }
 0x1a3   : > { %5667 = vmatpush.bf16.msra.mxu3 %v9970_v19  ;;  %v11553_v59 = vld [vmem:[%s12139_s22 + $0x1364] sm:$0xf]  ;;  %v9810_v63 = vor.u32 %v11521_v0, %v9807_v53  ;;  %v9535_v6 = vld [vmem:[%s12139_s22 + $0x1050] sm:$0xf0] }
 0x1a4   : > { %5626 = vmatpush.bf16.msra.mxu0 %v9570_v42  ;;  %v11453_v19 = vld [vmem:[%s12139_s22 + $0x1044] sm:$0xf]  ;;  %v9938_v15 = vor.u32 %v11553_v59, %v9935_v8  ;;  %v9663_v25 = vld [vmem:[%s12139_s22 + $0x1150] sm:$0xf0]  ;;  %v5381_v42 = vadd.f32 %v5380_v24, %v5367_v11 }
 0x1a5   : > { %5640 = vmatpush.bf16.msra.mxu1 %v9698_v13  ;;  %v11485_v7 = vld [vmem:[%s12139_s22 + $0x1144] sm:$0xf]  ;;  %v9791_v37 = vld [vmem:[%s12139_s22 + $0x1250] sm:$0xf0]  ;;  %v9538_v57 = vor.u32 %v11453_v19, %v9535_v6 }
 0x1a6   : > { %5654 = vmatpush.bf16.msra.mxu2 %v9826_v29  ;;  %v11517_v49 = vld [vmem:[%s12139_s22 + $0x1244] sm:$0xf]  ;;  %v9919_v29 = vld [vmem:[%s12139_s22 + $0x1350] sm:$0xf0]  ;;  %v13134_v9 = vadd.f32 %v5394_v3, %v5381_v42  ;;  %v9666_v61 = vor.u32 %v11485_v7, %v9663_v25 }
 0x1a7   : > { %5668 = vmatpush.bf16.msra.mxu3 %v9954_v30  ;;  %v11549_v13 = vld [vmem:[%s12139_s22 + $0x1344] sm:$0xf]  ;;  %v9794_v30 = vor.u32 %v11517_v49, %v9791_v37  ;;  %v9519_v11 = vld [vmem:[%s12139_s22 + $0x1030] sm:$0xf0] }
 0x1a8   : > { %5627 = vmatpush.bf16.msra.mxu0 %v9554_v50  ;;  %14618 = vst [vmem:[#allocation24_spill] sm:$0xff] %v13134_v9  ;;  %v11449_v20 = vld [vmem:[%s12139_s22 + $0x1024] sm:$0xf]  ;;  %v9922_v53 = vor.u32 %v11549_v13, %v9919_v29  ;;  %v9647_v59 = vld [vmem:[%s12139_s22 + $0x1130] sm:$0xf0] }
 0x1a9   : > { %5641 = vmatpush.bf16.msra.mxu1 %v9682_v62  ;;  %v11481_v0 = vld [vmem:[%s12139_s22 + $0x1124] sm:$0xf]  ;;  %v9775_v50 = vld [vmem:[%s12139_s22 + $0x1230] sm:$0xf0]  ;;  %v9522_v19 = vor.u32 %v11449_v20, %v9519_v11 }
 0x1aa   : > { %5655 = vmatpush.bf16.msra.mxu2 %v9810_v63  ;;  %v11513_v8 = vld [vmem:[%s12139_s22 + $0x1224] sm:$0xf]  ;;  %v9903_v63 = vld [vmem:[%s12139_s22 + $0x1330] sm:$0xf0] }
 0x1ab   : > { %5669 = vmatpush.bf16.msra.mxu3 %v9938_v15  ;;  %v11545_v62 = vld [vmem:[%s12139_s22 + $0x1324] sm:$0xf]  ;;  %v9503_v7 = vld [vmem:[%s12139_s22 + $0x1010] sm:$0xf0]  ;;  %v9650_v15 = vor.u32 %v11481_v0, %v9647_v59  ;;  %v9778_v24 = vor.u32 %v11513_v8, %v9775_v50 }
 0x1ac   : > { %5628 = vmatpush.bf16.msra.mxu0 %v9538_v57  ;;  %v11445_v6 = vld [vmem:[%s12139_s22 + $0x1004] sm:$0xf]  ;;  %v9631_v49 = vld [vmem:[%s12139_s22 + $0x1110] sm:$0xf0]  ;;  %v9906_v42 = vor.u32 %v11545_v62, %v9903_v63 }
 0x1ad   : > { %5642 = vmatpush.bf16.msra.mxu1 %v9666_v61  ;;  %v11477_v25 = vld [vmem:[%s12139_s22 + $0x1104] sm:$0xf]  ;;  %v9759_v3 = vld [vmem:[%s12139_s22 + $0x1210] sm:$0xf0]  ;;  %v9506_v61 = vor.u32 %v11445_v6, %v9503_v7 }
 0x1ae   : > { %5656 = vmatpush.bf16.msra.mxu2 %v9794_v30  ;;  %v11509_v37 = vld [vmem:[%s12139_s22 + $0x1204] sm:$0xf]  ;;  %v9887_v29 = vld [vmem:[%s12139_s22 + $0x1310] sm:$0xf0] }
 0x1af   : > { %5670 = vmatpush.bf16.msra.mxu3 %v9922_v53  ;;  %v11541_v13 = vld [vmem:[%s12139_s22 + $0x1304] sm:$0xf]  ;;  %v10127_v20 = vld [vmem:[%s12139_s22 + $0x14f0] sm:$0xf0]  ;;  %v9634_v53 = vor.u32 %v11477_v25, %v9631_v49  ;;  %v9762_v8 = vor.u32 %v11509_v37, %v9759_v3  ;;  %v13166_v49 = vpop.f32.mrf.mxu0 }
 0x1b0   : > { %v11601_v57 = vld [vmem:[%s12139_s22 + $0x14e4] sm:$0xf]  ;;  %5629 = vmatpush.bf16.msra.mxu0 %v9522_v19  ;;  %v10255_v30 = vld [vmem:[%s12139_s22 + $0x15f0] sm:$0xf0]  ;;  %v9890_v63 = vor.u32 %v11541_v13, %v9887_v29  ;;  %14619 = vst [vmem:[#allocation25_spill] sm:$0xff] %v13166_v49  ;;  %v13170_v13 = vpop.f32.mrf.mxu1 }
 0x1b1   : > { %v11633_v11 = vld [vmem:[%s12139_s22 + $0x15e4] sm:$0xf]  ;;  %v10383_v59 = vld [vmem:[%s12139_s22 + $0x16f0] sm:$0xf0]  ;;  %5643 = vmatpush.bf16.msra.mxu1 %v9650_v15  ;;  %v10130_v19 = vor.u32 %v11601_v57, %v10127_v20  ;;  %14620 = vst [vmem:[#allocation26_spill] sm:$0xff] %v13170_v13 }
 0x1b2   : > { %v11665_v0 = vld [vmem:[%s12139_s22 + $0x16e4] sm:$0xf]  ;;  %5657 = vmatpush.bf16.msra.mxu2 %v9778_v24  ;;  %v10511_v62 = vld [vmem:[%s12139_s22 + $0x17f0] sm:$0xf0]  ;;  %v10258_v6 = vor.u32 %v11633_v11, %v10255_v30  ;;  %v7557_v49 = vld [vmem:[%s12139_s22 + $0xc8] sm:$0xf] }
 0x1b3   : > { %v11697_v50 = vld [vmem:[%s12139_s22 + $0x17e4] sm:$0xf]  ;;  %5671 = vmatpush.bf16.msra.mxu3 %v9906_v42  ;;  %v10386_v7 = vor.u32 %v11665_v0, %v10383_v59  ;;  %v10111_v16 = vld [vmem:[%s12139_s22 + $0x14d0] sm:$0xf0] }
 0x1b4   : > { %v11597_v9 = vld [vmem:[%s12139_s22 + $0x14c4] sm:$0xf]  ;;  %5630 = vmatpush.bf16.msra.mxu0 %v9506_v61  ;;  %v10514_v15 = vor.u32 %v11697_v50, %v10511_v62  ;;  %v10239_v27 = vld [vmem:[%s12139_s22 + $0x15d0] sm:$0xf0] }
 0x1b5   : > { %v11629_v2 = vld [vmem:[%s12139_s22 + $0x15c4] sm:$0xf]  ;;  %v10367_v25 = vld [vmem:[%s12139_s22 + $0x16d0] sm:$0xf0]  ;;  %5644 = vmatpush.bf16.msra.mxu1 %v9634_v53  ;;  %v10114_v3 = vor.u32 %v11597_v9, %v10111_v16 }
 0x1b6   : > { %v11661_v24 = vld [vmem:[%s12139_s22 + $0x16c4] sm:$0xf]  ;;  %5658 = vmatpush.bf16.msra.mxu2 %v9762_v8  ;;  %v10495_v42 = vld [vmem:[%s12139_s22 + $0x17d0] sm:$0xf0]  ;;  %v10242_v29 = vor.u32 %v11629_v2, %v10239_v27 }
 0x1b7   : > { %v11693_v37 = vld [vmem:[%s12139_s22 + $0x17c4] sm:$0xf]  ;;  %5672 = vmatpush.bf16.msra.mxu3 %v9890_v63  ;;  %v10370_v57 = vor.u32 %v11661_v24, %v10367_v25  ;;  %v10095_v11 = vld [vmem:[%s12139_s22 + $0x14b0] sm:$0xf0]  ;;  %5631 = vmatmul.bf16.vlgmr.msra.gmra.mxu0 %v12652_v51 }
 0x1b8   : > { %5679 = vmatpush.bf16.msrb.mxu0 %v10130_v19  ;;  %v11593_v20 = vld [vmem:[%s12139_s22 + $0x14a4] sm:$0xf]  ;;  %v10498_v30 = vor.u32 %v11693_v37, %v10495_v42  ;;  %v10223_v0 = vld [vmem:[%s12139_s22 + $0x15b0] sm:$0xf0]  ;;  %5645 = vmatmul.bf16.vlgmr.msra.gmra.mxu1 %v12659_v56 }
 0x1b9   : > { %5693 = vmatpush.bf16.msrb.mxu1 %v10258_v6  ;;  %v11625_v61 = vld [vmem:[%s12139_s22 + $0x15a4] sm:$0xf]  ;;  %v10351_v16 = vld [vmem:[%s12139_s22 + $0x16b0] sm:$0xf0]  ;;  %5659 = vmatmul.bf16.vlgmr.msra.gmra.mxu2 %v12657_v55  ;;  %v10098_v9 = vor.u32 %v11593_v20, %v10095_v11 }
 0x1ba   : > { %5707 = vmatpush.bf16.msrb.mxu2 %v10386_v7  ;;  %v11657_v59 = vld [vmem:[%s12139_s22 + $0x16a4] sm:$0xf]  ;;  %v10479_v2 = vld [vmem:[%s12139_s22 + $0x17b0] sm:$0xf0]  ;;  %5673 = vmatmul.bf16.vlgmr.msra.gmra.mxu3 %v12663_v60  ;;  %v10226_v50 = vor.u32 %v11625_v61, %v10223_v0  ;;  %v13191_v7 = vpop.f32.mrf.mxu2 }
 0x1bb   : > { %5721 = vmatpush.bf16.msrb.mxu3 %v10514_v15  ;;  %v11689_v27 = vld [vmem:[%s12139_s22 + $0x17a4] sm:$0xf]  ;;  %v10354_v62 = vor.u32 %v11657_v59, %v10351_v16  ;;  %v10079_v19 = vld [vmem:[%s12139_s22 + $0x1490] sm:$0xf0]  ;;  %14621 = vst [vmem:[#allocation27_spill] sm:$0xff] %v13191_v7 }
 0x1bc   : > { %5680 = vmatpush.bf16.msrb.mxu0 %v10114_v3  ;;  %v13185_v53 = vld [vmem:[%s12147_s21] sm:$0xf]  ;;  %v10482_v15 = vor.u32 %v11689_v27, %v10479_v2  ;;  %v10207_v24 = vld [vmem:[%s12139_s22 + $0x1590] sm:$0xf0]  ;;  %v5422_v27 = vpop.f32.mrf.mxu1 }
 0x1bd   : > { %v14599_v8 = vperm.slane %v13185_v53, 1  ;;  %5694 = vmatpush.bf16.msrb.mxu1 %v10242_v29  ;;  %v11589_v63 = vld [vmem:[%s12139_s22 + $0x1484] sm:$0xf]  ;;  %v10335_v37 = vld [vmem:[%s12139_s22 + $0x1690] sm:$0xf0]  ;;  %v5408_v29 = vpop.f32.mrf.mxu0 }
 0x1be   : > { %5708 = vmatpush.bf16.msrb.mxu2 %v10370_v57  ;;  %v11621_v6 = vld [vmem:[%s12139_s22 + $0x1584] sm:$0xf]  ;;  %v10463_v3 = vld [vmem:[%s12139_s22 + $0x1790] sm:$0xf0]  ;;  %v13198_v57 = vpop.f32.mrf.mxu3  ;;  %v10082_v20 = vor.u32 %v11589_v63, %v10079_v19 }
 0x1bf   : > { %5722 = vmatpush.bf16.msrb.mxu3 %v10498_v30  ;;  %v11653_v25 = vld [vmem:[%s12139_s22 + $0x1684] sm:$0xf]  ;;  %14622 = vst [vmem:[#allocation28_spill] sm:$0xff] %v13198_v57  ;;  %v5409_v11 = vadd.f32 %v5408_v29, %v14599_v8  ;;  %v10210_v61 = vor.u32 %v11621_v6, %v10207_v24  ;;  %v10063_v59 = vld [vmem:[%s12139_s22 + $0x1470] sm:$0xf0] }
 0x1c0   : > { %v11685_v42 = vld [vmem:[%s12139_s22 + $0x1784] sm:$0xf]  ;;  %5681 = vmatpush.bf16.msrb.mxu0 %v10098_v9  ;;  %v10338_v30 = vor.u32 %v11653_v25, %v10335_v37  ;;  %v10191_v9 = vld [vmem:[%s12139_s22 + $0x1570] sm:$0xf0] }
 0x1c1   : > { %5695 = vmatpush.bf16.msrb.mxu1 %v10226_v50  ;;  %v11585_v0 = vld [vmem:[%s12139_s22 + $0x1464] sm:$0xf]  ;;  %v10466_v2 = vor.u32 %v11685_v42, %v10463_v3  ;;  %v10319_v19 = vld [vmem:[%s12139_s22 + $0x1670] sm:$0xf0]  ;;  %v5423_v29 = vadd.f32 %v5422_v27, %v5409_v11 }
 0x1c2   : > { %5709 = vmatpush.bf16.msrb.mxu2 %v10354_v62  ;;  %v11617_v16 = vld [vmem:[%s12139_s22 + $0x1564] sm:$0xf]  ;;  %v10447_v62 = vld [vmem:[%s12139_s22 + $0x1770] sm:$0xf0]  ;;  %v10066_v6 = vor.u32 %v11585_v0, %v10063_v59  ;;  %v5436_v57 = vpop.f32.mrf.mxu2 }
 0x1c3   : > { %5723 = vmatpush.bf16.msrb.mxu3 %v10482_v15  ;;  %v11649_v63 = vld [vmem:[%s12139_s22 + $0x1664] sm:$0xf]  ;;  %v10194_v24 = vor.u32 %v11617_v16, %v10191_v9  ;;  %v10047_v37 = vld [vmem:[%s12139_s22 + $0x1450] sm:$0xf0] }
 0x1c4   : > { %v11681_v50 = vld [vmem:[%s12139_s22 + $0x1764] sm:$0xf]  ;;  %5682 = vmatpush.bf16.msrb.mxu0 %v10082_v20  ;;  %v10322_v25 = vor.u32 %v11649_v63, %v10319_v19  ;;  %v10175_v8 = vld [vmem:[%s12139_s22 + $0x1550] sm:$0xf0] }
 0x1c5   : > { %5696 = vmatpush.bf16.msrb.mxu1 %v10210_v61  ;;  %v11581_v15 = vld [vmem:[%s12139_s22 + $0x1444] sm:$0xf]  ;;  %v10450_v3 = vor.u32 %v11681_v50, %v10447_v62  ;;  %v10303_v27 = vld [vmem:[%s12139_s22 + $0x1650] sm:$0xf0]  ;;  %v5437_v61 = vadd.f32 %v5436_v57, %v5423_v29  ;;  %v13244_v13 = vpop.f32.mrf.mxu0 }
 0x1c6   : > { %5710 = vmatpush.bf16.msrb.mxu2 %v10338_v30  ;;  %v11613_v42 = vld [vmem:[%s12139_s22 + $0x1544] sm:$0xf]  ;;  %v10431_v20 = vld [vmem:[%s12139_s22 + $0x1750] sm:$0xf0]  ;;  %v10050_v30 = vor.u32 %v11581_v15, %v10047_v37  ;;  %v5450_v0 = vpop.f32.mrf.mxu3 }
 0x1c7   : > { %5724 = vmatpush.bf16.msrb.mxu3 %v10466_v2  ;;  %v11645_v11 = vld [vmem:[%s12139_s22 + $0x1644] sm:$0xf]  ;;  %v10178_v59 = vor.u32 %v11613_v42, %v10175_v8  ;;  %v10031_v9 = vld [vmem:[%s12139_s22 + $0x1430] sm:$0xf0]  ;;  %v13221_v19 = vadd.f32 %v5450_v0, %v5437_v61  ;;  %v7573_v0 = vld [vmem:[%s12139_s22 + $0xe8] sm:$0xf] }
 0x1c8   : > { %v11677_v7 = vld [vmem:[%s12139_s22 + $0x1744] sm:$0xf]  ;;  %5683 = vmatpush.bf16.msrb.mxu0 %v10066_v6  ;;  %v10306_v16 = vor.u32 %v11645_v11, %v10303_v27  ;;  %v10159_v29 = vld [vmem:[%s12139_s22 + $0x1530] sm:$0xf0] }
 0x1c9   : > { %5697 = vmatpush.bf16.msrb.mxu1 %v10194_v24  ;;  %v11577_v2 = vld [vmem:[%s12139_s22 + $0x1424] sm:$0xf]  ;;  %v10434_v57 = vor.u32 %v11677_v7, %v10431_v20  ;;  %v10287_v62 = vld [vmem:[%s12139_s22 + $0x1630] sm:$0xf0] }
 0x1ca   : > { %5711 = vmatpush.bf16.msrb.mxu2 %v10322_v25  ;;  %v11609_v63 = vld [vmem:[%s12139_s22 + $0x1524] sm:$0xf]  ;;  %v10415_v24 = vld [vmem:[%s12139_s22 + $0x1730] sm:$0xf0]  ;;  %v10034_v8 = vor.u32 %v11577_v2, %v10031_v9  ;;  %v10964_v2 = vld [vmem:[%s12139_s22 + $0xf4] sm:$0xf0] }
 0x1cb   : > { %5725 = vmatpush.bf16.msrb.mxu3 %v10450_v3  ;;  %v11641_v50 = vld [vmem:[%s12139_s22 + $0x1624] sm:$0xf]  ;;  %v10015_v15 = vld [vmem:[%s12139_s22 + $0x1410] sm:$0xf0]  ;;  %v10162_v7 = vor.u32 %v11609_v63, %v10159_v29  ;;  %v7701_v9 = vld [vmem:[%s12139_s22 + $0x1e8] sm:$0xf] }
 0x1cc   : > { %v11673_v6 = vld [vmem:[%s12139_s22 + $0x1724] sm:$0xf]  ;;  %5684 = vmatpush.bf16.msrb.mxu0 %v10050_v30  ;;  %v10290_v37 = vor.u32 %v11641_v50, %v10287_v62  ;;  %v10143_v3 = vld [vmem:[%s12139_s22 + $0x1510] sm:$0xf0]  ;;  %v7829_v63 = vld [vmem:[%s12139_s22 + $0x2e8] sm:$0xf] }
 0x1cd   : > { %v11573_v25 = vld [vmem:[%s12139_s22 + $0x1404] sm:$0xf]  ;;  %5698 = vmatpush.bf16.msrb.mxu1 %v10178_v59  ;;  %v10418_v27 = vor.u32 %v11673_v6, %v10415_v24  ;;  %v10271_v20 = vld [vmem:[%s12139_s22 + $0x1610] sm:$0xf0]  ;;  %v11028_v29 = vld [vmem:[%s12139_s22 + $0x2f4] sm:$0xf0] }
 0x1ce   : > { %5712 = vmatpush.bf16.msrb.mxu2 %v10306_v16  ;;  %v11605_v42 = vld [vmem:[%s12139_s22 + $0x1504] sm:$0xf]  ;;  %v10399_v30 = vld [vmem:[%s12139_s22 + $0x1710] sm:$0xf0]  ;;  %v10018_v59 = vor.u32 %v11573_v25, %v10015_v15  ;;  %v10996_v16 = vld [vmem:[%s12139_s22 + $0x1f4] sm:$0xf0]  ;;  %v7830_v15 = vor.u32 %v11028_v29, %v7829_v63 }
 0x1cf   : > { %v11637_v11 = vld [vmem:[%s12139_s22 + $0x1604] sm:$0xf]  ;;  %5726 = vmatpush.bf16.msrb.mxu3 %v10434_v57  ;;  %v10146_v57 = vor.u32 %v11605_v42, %v10143_v3  ;;  %v7957_v62 = vld [vmem:[%s12139_s22 + $0x3e8] sm:$0xf]  ;;  %v11060_v6 = vld [vmem:[%s12139_s22 + $0x3f4] sm:$0xf0]  ;;  %v7702_v25 = vor.u32 %v10996_v16, %v7701_v9 }
 0x1d0   : > { %v11669_v61 = vld [vmem:[%s12139_s22 + $0x1704] sm:$0xf]  ;;  %5685 = vmatpush.bf16.msrb.mxu0 %v10034_v8  ;;  %v10274_v50 = vor.u32 %v11637_v11, %v10271_v20  ;;  %v7574_v8 = vor.u32 %v10964_v2, %v7573_v0  ;;  %v10992_v42 = vld [vmem:[%s12139_s22 + $0x1d4] sm:$0xf0]  ;;  %v7813_v3 = vld [vmem:[%s12139_s22 + $0x2c8] sm:$0xf] }
 0x1d1   : > { %5699 = vmatpush.bf16.msrb.mxu1 %v10162_v7  ;;  %v10402_v24 = vor.u32 %v11669_v61, %v10399_v30  ;;  %v7685_v7 = vld [vmem:[%s12139_s22 + $0x1c8] sm:$0xf]  ;;  %v11024_v11 = vld [vmem:[%s12139_s22 + $0x2d4] sm:$0xf0]  ;;  %v13254_v61 = vpop.f32.mrf.mxu1  ;;  %v7558_v30 = vor.u32 %v10960_v23, %v7557_v49 }
 0x1d2   : > { %5713 = vmatpush.bf16.msrb.mxu2 %v10290_v37  ;;  %v7958_v37 = vor.u32 %v11060_v6, %v7957_v62  ;;  %v11056_v20 = vld [vmem:[%s12139_s22 + $0x3d4] sm:$0xf0]  ;;  %v7686_v0 = vor.u32 %v10992_v42, %v7685_v7  ;;  %v7814_v2 = vor.u32 %v11024_v11, %v7813_v3  ;;  %v7541_v9 = vld [vmem:[%s12139_s22 + $0xa8] sm:$0xf]  ;;  %v13268_v6 = vpop.f32.mrf.mxu2  ;;  %v13273_v42 = vpop.f32.mrf.mxu3 }
 0x1d3   : > { %5727 = vmatpush.bf16.msrb.mxu3 %v10418_v27  ;;  %v7941_v27 = vld [vmem:[%s12139_s22 + $0x3c8] sm:$0xf]  ;;  %v10988_v29 = vld [vmem:[%s12139_s22 + $0x1b4] sm:$0xf0] }
 0x1d4   : > { %5686 = vmatpush.bf16.msrb.mxu0 %v10018_v59  ;;  %v10956_v59 = vld [vmem:[%s12139_s22 + $0xb4] sm:$0xf0]  ;;  %v7669_v16 = vld [vmem:[%s12139_s22 + $0x1a8] sm:$0xf]  ;;  %v7942_v63 = vor.u32 %v11056_v20, %v7941_v27  ;;  %v5464_v20 = vpop.f32.mrf.mxu0 }
 0x1d5   : > { %5700 = vmatpush.bf16.msrb.mxu1 %v10146_v57  ;;  %v7797_v57 = vld [vmem:[%s12139_s22 + $0x2a8] sm:$0xf]  ;;  %v11052_v49 = vld [vmem:[%s12139_s22 + $0x3b4] sm:$0xf0]  ;;  %v7542_v62 = vor.u32 %v10956_v59, %v7541_v9 }
 0x1d6   : > { %5714 = vmatpush.bf16.msrb.mxu2 %v10274_v50  ;;  %v11020_v50 = vld [vmem:[%s12139_s22 + $0x2b4] sm:$0xf0]  ;;  %v7925_v23 = vld [vmem:[%s12139_s22 + $0x3a8] sm:$0xf] }
 0x1d7   : > { %5728 = vmatpush.bf16.msrb.mxu3 %v10402_v24  ;;  %5687 = vmatmul.bf16.vlgmr.msrb.gmra.mxu0 %v12762_v26  ;;  %v7670_v24 = vor.u32 %v10988_v29, %v7669_v16  ;;  %v7653_v7 = vld [vmem:[%s12139_s22 + $0x188] sm:$0xf]  ;;  %v10984_v3 = vld [vmem:[%s12139_s22 + $0x194] sm:$0xf0] }
 0x1d8   : > { %5735 = vmatpush.bf16.msra.mxu0 %v7574_v8  ;;  %5701 = vmatmul.bf16.vlgmr.msrb.gmra.mxu1 %v12769_v34  ;;  %v7798_v8 = vor.u32 %v11020_v50, %v7797_v57  ;;  %v7781_v11 = vld [vmem:[%s12139_s22 + $0x288] sm:$0xf]  ;;  %v11016_v27 = vld [vmem:[%s12139_s22 + $0x294] sm:$0xf0]  ;;  %v7654_v59 = vor.u32 %v10984_v3, %v7653_v7 }
 0x1d9   : > { %5749 = vmatpush.bf16.msra.mxu1 %v7702_v25  ;;  %5715 = vmatmul.bf16.vlgmr.msrb.gmra.mxu2 %v12767_v33  ;;  %v7525_v25 = vld [vmem:[%s12139_s22 + $0x88] sm:$0xf]  ;;  %v7782_v16 = vor.u32 %v11016_v27, %v7781_v11  ;;  %v10948_v57 = vld [vmem:[%s12139_s22 + $0x74] sm:$0xf0] }
 0x1da   : > { %5763 = vmatpush.bf16.msra.mxu2 %v7830_v15  ;;  %5729 = vmatmul.bf16.vlgmr.msrb.gmra.mxu3 %v12775_v48  ;;  %v10952_v15 = vld [vmem:[%s12139_s22 + $0x94] sm:$0xf0]  ;;  %v7509_v29 = vld [vmem:[%s12139_s22 + $0x68] sm:$0xf] }
 0x1db   : > { %5777 = vmatpush.bf16.msra.mxu3 %v7958_v37  ;;  %v7926_v37 = vor.u32 %v11052_v49, %v7925_v23  ;;  %v7526_v9 = vor.u32 %v10952_v15, %v7525_v25  ;;  %v7637_v50 = vld [vmem:[%s12139_s22 + $0x168] sm:$0xf]  ;;  %v10944_v3 = vld [vmem:[%s12139_s22 + $0x54] sm:$0xf0] }
 0x1dc   : > { %5736 = vmatpush.bf16.msra.mxu0 %v7558_v30  ;;  %v7909_v30 = vld [vmem:[%s12139_s22 + $0x388] sm:$0xf] }
 0x1dd   : > { %5750 = vmatpush.bf16.msra.mxu1 %v7686_v0  ;;  %v11048_v0 = vld [vmem:[%s12139_s22 + $0x394] sm:$0xf0]  ;;  %v7893_v25 = vld [vmem:[%s12139_s22 + $0x368] sm:$0xf] }
 0x1de   : > { %5764 = vmatpush.bf16.msra.mxu2 %v7814_v2  ;;  %v5465_v2 = vadd.f32 %v5464_v20, %v13221_v19  ;;  %v7910_v23 = vor.u32 %v11048_v0, %v7909_v30  ;;  %v11012_v19 = vld [vmem:[%s12139_s22 + $0x274] sm:$0xf0]  ;;  %v7621_v11 = vld [vmem:[%s12139_s22 + $0x148] sm:$0xf]  ;;  %v5492_v20 = vpop.f32.mrf.mxu2 }
 0x1df   : > { %5778 = vmatpush.bf16.msra.mxu3 %v7942_v63  ;;  %v5478_v63 = vpop.f32.mrf.mxu1  ;;  %v7766_v7 = vor.u32 %v11012_v19, %v7765_v18  ;;  %v10976_v30 = vld [vmem:[%s12139_s22 + $0x154] sm:$0xf0]  ;;  %v7749_v0 = vld [vmem:[%s12139_s22 + $0x248] sm:$0xf]  ;;  %v5506_v18 = vpop.f32.mrf.mxu3 }
 0x1e0   : > { %5737 = vmatpush.bf16.msra.mxu0 %v7542_v62  ;;  %v5479_v49 = vadd.f32 %v5478_v63, %v5465_v2  ;;  %v10980_v62 = vld [vmem:[%s12139_s22 + $0x174] sm:$0xf0]  ;;  %v7877_v63 = vld [vmem:[%s12139_s22 + $0x348] sm:$0xf] }
 0x1e1   : > { %5751 = vmatpush.bf16.msra.mxu1 %v7670_v24  ;;  %v11044_v24 = vld [vmem:[%s12139_s22 + $0x374] sm:$0xf0]  ;;  %v7638_v15 = vor.u32 %v10980_v62, %v7637_v50  ;;  %v7605_v62 = vld [vmem:[%s12139_s22 + $0x128] sm:$0xf] }
 0x1e2   : > { %5765 = vmatpush.bf16.msra.mxu2 %v7798_v8  ;;  %v7510_v8 = vor.u32 %v10948_v57, %v7509_v29  ;;  %v7894_v27 = vor.u32 %v11044_v24, %v7893_v25  ;;  %v11008_v2 = vld [vmem:[%s12139_s22 + $0x254] sm:$0xf0]  ;;  %v7622_v57 = vor.u32 %v10976_v30, %v7621_v11  ;;  %v7733_v24 = vld [vmem:[%s12139_s22 + $0x228] sm:$0xf] }
 0x1e3   : > { %5779 = vmatpush.bf16.msra.mxu3 %v7926_v37  ;;  %v7493_v37 = vld [vmem:[%s12139_s22 + $0x48] sm:$0xf]  ;;  %v7750_v50 = vor.u32 %v11008_v2, %v7749_v0  ;;  %v10972_v25 = vld [vmem:[%s12139_s22 + $0x134] sm:$0xf0] }
 0x1e4   : > { %5738 = vmatpush.bf16.msra.mxu0 %v7526_v9  ;;  %v5493_v9 = vadd.f32 %v5492_v20, %v5479_v49  ;;  %v10940_v49 = vld [vmem:[%s12139_s22 + $0x34] sm:$0xf0]  ;;  %v7589_v30 = vld [vmem:[%s12139_s22 + $0x108] sm:$0xf] }
 0x1e5   : > { %5752 = vmatpush.bf16.msra.mxu1 %v7654_v59  ;;  %v11040_v59 = vld [vmem:[%s12139_s22 + $0x354] sm:$0xf0]  ;;  %v7717_v2 = vld [vmem:[%s12139_s22 + $0x208] sm:$0xf] }
 0x1e6   : > { %5766 = vmatpush.bf16.msra.mxu2 %v7782_v16  ;;  %v7494_v16 = vor.u32 %v10944_v3, %v7493_v37  ;;  %v13297_v29 = vadd.f32 %v5506_v18, %v5493_v9  ;;  %v7878_v19 = vor.u32 %v11040_v59, %v7877_v63  ;;  %v7461_v3 = vld [vmem:[%s12139_s22 + $0x8] sm:$0xf]  ;;  %v10936_v11 = vld [vmem:[%s12139_s22 + $0x14] sm:$0xf0] }
 0x1e7   : > { %5780 = vmatpush.bf16.msra.mxu3 %v7910_v23  ;;  %v7477_v23 = vld [vmem:[%s12139_s22 + $0x28] sm:$0xf]  ;;  %v10968_v0 = vld [vmem:[%s12139_s22 + $0x114] sm:$0xf0] }
 0x1e8   : > { %5739 = vmatpush.bf16.msra.mxu0 %v7510_v8  ;;  %v11004_v8 = vld [vmem:[%s12139_s22 + $0x234] sm:$0xf0]  ;;  %v7478_v37 = vor.u32 %v10940_v49, %v7477_v23  ;;  %v7845_v59 = vld [vmem:[%s12139_s22 + $0x308] sm:$0xf] }
 0x1e9   : > { %5753 = vmatpush.bf16.msra.mxu1 %v7638_v15  ;;  %v7861_v15 = vld [vmem:[%s12139_s22 + $0x328] sm:$0xf]  ;;  %v7734_v20 = vor.u32 %v11004_v8, %v7733_v24  ;;  %v11000_v63 = vld [vmem:[%s12139_s22 + $0x214] sm:$0xf0] }
 0x1ea   : > { %5767 = vmatpush.bf16.msra.mxu2 %v7766_v7  ;;  %v11036_v7 = vld [vmem:[%s12139_s22 + $0x334] sm:$0xf0]  ;;  %v8213_v49 = vld [vmem:[%s12139_s22 + $0x5e8] sm:$0xf]  ;;  %v7718_v24 = vor.u32 %v11000_v63, %v7717_v2  ;;  %v13333_v63 = vpop.f32.mrf.mxu1 }
 0x1eb   : > { %5781 = vmatpush.bf16.msra.mxu3 %v7894_v27  ;;  %v7606_v27 = vor.u32 %v10972_v25, %v7605_v62  ;;  %v7862_v9 = vor.u32 %v11036_v7, %v7861_v15  ;;  %v11032_v18 = vld [vmem:[%s12139_s22 + $0x314] sm:$0xf0]  ;;  %v8341_v62 = vld [vmem:[%s12139_s22 + $0x6e8] sm:$0xf]  ;;  %14624 = vst [vmem:[#allocation30_spill] sm:$0xff] %v13333_v63 }
 0x1ec   : > { %5740 = vmatpush.bf16.msra.mxu0 %v7494_v16  ;;  %v8085_v16 = vld [vmem:[%s12139_s22 + $0x4e8] sm:$0xf]  ;;  %v11092_v23 = vld [vmem:[%s12139_s22 + $0x4f4] sm:$0xf0]  ;;  %v7846_v7 = vor.u32 %v11032_v18, %v7845_v59  ;;  %v8070_v59 = vor.u32 %v11088_v28, %v8069_v12  ;;  %v8198_v18 = vor.u32 %v11120_v54, %v8197_v22 }
 0x1ed   : > { %5754 = vmatpush.bf16.msra.mxu1 %v7622_v57  ;;  %v7462_v57 = vor.u32 %v10936_v11, %v7461_v3  ;;  %v11156_v25 = vld [vmem:[%s12139_s22 + $0x6f4] sm:$0xf0]  ;;  %v8469_v8 = vld [vmem:[%s12139_s22 + $0x7e8] sm:$0xf] }
 0x1ee   : > { %5768 = vmatpush.bf16.msra.mxu2 %v7750_v50  ;;  %v11124_v50 = vld [vmem:[%s12139_s22 + $0x5f4] sm:$0xf0]  ;;  %v8342_v11 = vor.u32 %v11156_v25, %v8341_v62  ;;  %v8453_v2 = vld [vmem:[%s12139_s22 + $0x7c8] sm:$0xf] }
 0x1ef   : > { %5782 = vmatpush.bf16.msra.mxu3 %v7878_v19  ;;  %v7590_v19 = vor.u32 %v10968_v0, %v7589_v30  ;;  %v11188_v15 = vld [vmem:[%s12139_s22 + $0x7f4] sm:$0xf0]  ;;  %v8214_v3 = vor.u32 %v11124_v50, %v8213_v49  ;;  %v13329_v0 = vpop.f32.mrf.mxu0  ;;  %v8309_v25 = vld [vmem:[%s12139_s22 + $0x6a8] sm:$0xf] }
 0x1f0   : > { %5741 = vmatpush.bf16.msra.mxu0 %v7478_v37  ;;  %v8086_v37 = vor.u32 %v11092_v23, %v8085_v16  ;;  %v11152_v30 = vld [vmem:[%s12139_s22 + $0x6d4] sm:$0xf0]  ;;  %14623 = vst [vmem:[#allocation29_spill] sm:$0xff] %v13329_v0  ;;  %v8053_v23 = vld [vmem:[%s12139_s22 + $0x4a8] sm:$0xf] }
 0x1f1   : > { %5755 = vmatpush.bf16.msra.mxu1 %v7606_v27  ;;  %v8470_v27 = vor.u32 %v11188_v15, %v8469_v8  ;;  %v11084_v49 = vld [vmem:[%s12139_s22 + $0x4b4] sm:$0xf0]  ;;  %v8037_v12 = vld [vmem:[%s12139_s22 + $0x488] sm:$0xf] }
 0x1f2   : > { %5769 = vmatpush.bf16.msra.mxu2 %v7734_v20  ;;  %v8325_v20 = vld [vmem:[%s12139_s22 + $0x6c8] sm:$0xf]  ;;  %v11116_v62 = vld [vmem:[%s12139_s22 + $0x5b4] sm:$0xf0]  ;;  %v8054_v54 = vor.u32 %v11084_v49, %v8053_v23 }
 0x1f3   : > { %5783 = vmatpush.bf16.msra.mxu3 %v7862_v9  ;;  %v11184_v9 = vld [vmem:[%s12139_s22 + $0x7d4] sm:$0xf0]  ;;  %v8326_v16 = vor.u32 %v11152_v30, %v8325_v20  ;;  %v13355_v30 = vpop.f32.mrf.mxu3  ;;  %v8709_v63 = vld [vmem:[%s12139_s22 + $0x9c8] sm:$0xf] }
 0x1f4   : > { %5742 = vmatpush.bf16.msra.mxu0 %v7462_v57  ;;  %v8181_v57 = vld [vmem:[%s12139_s22 + $0x5a8] sm:$0xf]  ;;  %v8454_v50 = vor.u32 %v11184_v9, %v8453_v2  ;;  %v11180_v8 = vld [vmem:[%s12139_s22 + $0x7b4] sm:$0xf0]  ;;  %14626 = vst [vmem:[#allocation32_spill] sm:$0xff] %v13355_v30 }
 0x1f5   : > { %5756 = vmatpush.bf16.msra.mxu1 %v7590_v19  ;;  %v11148_v19 = vld [vmem:[%s12139_s22 + $0x6b4] sm:$0xf0]  ;;  %v8182_v22 = vor.u32 %v11116_v62, %v8181_v57  ;;  %v8421_v9 = vld [vmem:[%s12139_s22 + $0x788] sm:$0xf]  ;;  %v5534_v23 = vpop.f32.mrf.mxu1 }
 0x1f6   : > { %5770 = vmatpush.bf16.msra.mxu2 %v7718_v24  ;;  %v8437_v24 = vld [vmem:[%s12139_s22 + $0x7a8] sm:$0xf]  ;;  %v8310_v28 = vor.u32 %v11148_v19, %v8309_v25  ;;  %v11080_v15 = vld [vmem:[%s12139_s22 + $0x494] sm:$0xf0] }
 0x1f7   : > { %5784 = vmatpush.bf16.msra.mxu3 %v7846_v7  ;;  %5743 = vmatmul.bf16.vlgmr.msra.gmra.mxu0 %v12244_v58  ;;  %v8165_v7 = vld [vmem:[%s12139_s22 + $0x588] sm:$0xf]  ;;  %v11144_v20 = vld [vmem:[%s12139_s22 + $0x694] sm:$0xf0]  ;;  %v5520_v2 = vpop.f32.mrf.mxu0 }
 0x1f8   : > { %5791 = vmatpush.bf16.msrb.mxu0 %v8086_v37  ;;  %5757 = vmatmul.bf16.vlgmr.msra.gmra.mxu1 %v12268_v10  ;;  %v13350_v37 = vpop.f32.mrf.mxu2  ;;  %v11076_v62 = vld [vmem:[%s12139_s22 + $0x474] sm:$0xf0]  ;;  %v8149_v25 = vld [vmem:[%s12139_s22 + $0x568] sm:$0xf] }
 0x1f9   : > { %5805 = vmatpush.bf16.msrb.mxu1 %v8214_v3  ;;  %5771 = vmatmul.bf16.vlgmr.msra.gmra.mxu2 %v12252_v1  ;;  %14625 = vst [vmem:[#allocation31_spill] sm:$0xff] %v13350_v37  ;;  %v8438_v3 = vor.u32 %v11180_v8, %v8437_v24  ;;  %v11108_v8 = vld [vmem:[%s12139_s22 + $0x574] sm:$0xf0]  ;;  %v8581_v30 = vld [vmem:[%s12139_s22 + $0x8c8] sm:$0xf] }
 0x1fa   : > { %5819 = vmatpush.bf16.msrb.mxu2 %v8342_v11  ;;  %5785 = vmatmul.bf16.vlgmr.msra.gmra.mxu3 %v12276_v17  ;;  %v11112_v11 = vld [vmem:[%s12139_s22 + $0x594] sm:$0xf0] }
 0x1fb   : > { %5833 = vmatpush.bf16.msrb.mxu3 %v8470_v27  ;;  %v8293_v27 = vld [vmem:[%s12139_s22 + $0x688] sm:$0xf]  ;;  %v8166_v49 = vor.u32 %v11112_v11, %v8165_v7  ;;  %v11072_v11 = vld [vmem:[%s12139_s22 + $0x454] sm:$0xf0] }
 0x1fc   : > { %5792 = vmatpush.bf16.msrb.mxu0 %v8070_v59  ;;  %v11176_v59 = vld [vmem:[%s12139_s22 + $0x794] sm:$0xf0]  ;;  %v8294_v57 = vor.u32 %v11144_v20, %v8293_v27  ;;  %v8133_v27 = vld [vmem:[%s12139_s22 + $0x548] sm:$0xf] }
 0x1fd   : > { %5806 = vmatpush.bf16.msrb.mxu1 %v8198_v18  ;;  %v5521_v18 = vadd.f32 %v5520_v2, %v13297_v29  ;;  %v8422_v19 = vor.u32 %v11176_v59, %v8421_v9  ;;  %v11140_v29 = vld [vmem:[%s12139_s22 + $0x674] sm:$0xf0]  ;;  %v8261_v59 = vld [vmem:[%s12139_s22 + $0x648] sm:$0xf] }
 0x1fe   : > { %5820 = vmatpush.bf16.msrb.mxu2 %v8326_v16  ;;  %v8038_v16 = vor.u32 %v11080_v15, %v8037_v12  ;;  %v8405_v12 = vld [vmem:[%s12139_s22 + $0x768] sm:$0xf]  ;;  %v8150_v15 = vor.u32 %v11108_v8, %v8149_v25  ;;  %v11104_v9 = vld [vmem:[%s12139_s22 + $0x554] sm:$0xf0] }
 0x1ff   : > { %5834 = vmatpush.bf16.msrb.mxu3 %v8454_v50  ;;  %v8021_v50 = vld [vmem:[%s12139_s22 + $0x468] sm:$0xf]  ;;  %v5535_v24 = vadd.f32 %v5534_v23, %v5521_v18  ;;  %v11136_v18 = vld [vmem:[%s12139_s22 + $0x654] sm:$0xf0]  ;;  %v5562_v23 = vpop.f32.mrf.mxu3  ;;  %v8134_v25 = vor.u32 %v11104_v9, %v8133_v27 }
 0x200   : > { %5793 = vmatpush.bf16.msrb.mxu0 %v8054_v54  ;;  %v8277_v54 = vld [vmem:[%s12139_s22 + $0x668] sm:$0xf]  ;;  %v5548_v2 = vpop.f32.mrf.mxu2  ;;  %v11064_v27 = vld [vmem:[%s12139_s22 + $0x414] sm:$0xf0] }
 0x201   : > { %5807 = vmatpush.bf16.msrb.mxu1 %v8182_v22  ;;  %v11172_v22 = vld [vmem:[%s12139_s22 + $0x774] sm:$0xf0]  ;;  %v8278_v7 = vor.u32 %v11140_v29, %v8277_v54  ;;  %v7989_v8 = vld [vmem:[%s12139_s22 + $0x428] sm:$0xf] }
 0x202   : > { %5821 = vmatpush.bf16.msrb.mxu2 %v8310_v28  ;;  %v8022_v28 = vor.u32 %v11076_v62, %v8021_v50  ;;  %v8406_v20 = vor.u32 %v11172_v22, %v8405_v12  ;;  %v8117_v54 = vld [vmem:[%s12139_s22 + $0x528] sm:$0xf]  ;;  %v11100_v12 = vld [vmem:[%s12139_s22 + $0x534] sm:$0xf0] }
 0x203   : > { %5835 = vmatpush.bf16.msrb.mxu3 %v8438_v3  ;;  %v8005_v3 = vld [vmem:[%s12139_s22 + $0x448] sm:$0xf]  ;;  %v11216_v37 = vld [vmem:[%s12139_s22 + $0x8d4] sm:$0xf0] }
 0x204   : > { %5794 = vmatpush.bf16.msrb.mxu0 %v8038_v16  ;;  %v5549_v16 = vadd.f32 %v5548_v2, %v5535_v24  ;;  %v8006_v50 = vor.u32 %v11072_v11, %v8005_v3  ;;  %v11068_v24 = vld [vmem:[%s12139_s22 + $0x434] sm:$0xf0]  ;;  %v8245_v22 = vld [vmem:[%s12139_s22 + $0x628] sm:$0xf] }
 0x205   : > { %5808 = vmatpush.bf16.msrb.mxu1 %v8166_v49  ;;  %v8389_v49 = vld [vmem:[%s12139_s22 + $0x748] sm:$0xf]  ;;  %v7990_v3 = vor.u32 %v11068_v24, %v7989_v8  ;;  %v11220_v8 = vld [vmem:[%s12139_s22 + $0x8f4] sm:$0xf0] }
 0x206   : > { %5822 = vmatpush.bf16.msrb.mxu2 %v8294_v57  ;;  %v11168_v57 = vld [vmem:[%s12139_s22 + $0x754] sm:$0xf0]  ;;  %v13376_v62 = vadd.f32 %v5562_v23, %v5549_v16  ;;  %v7973_v11 = vld [vmem:[%s12139_s22 + $0x408] sm:$0xf] }
 0x207   : > { %5836 = vmatpush.bf16.msrb.mxu3 %v8422_v19  ;;  %v8262_v19 = vor.u32 %v11136_v18, %v8261_v59  ;;  %v8390_v29 = vor.u32 %v11168_v57, %v8389_v49  ;;  %v8101_v9 = vld [vmem:[%s12139_s22 + $0x508] sm:$0xf]  ;;  %v11096_v59 = vld [vmem:[%s12139_s22 + $0x514] sm:$0xf0] }
 0x208   : > { %5795 = vmatpush.bf16.msrb.mxu0 %v8022_v28  ;;  %v11132_v28 = vld [vmem:[%s12139_s22 + $0x634] sm:$0xf0]  ;;  %v8229_v18 = vld [vmem:[%s12139_s22 + $0x608] sm:$0xf] }
 0x209   : > { %5809 = vmatpush.bf16.msrb.mxu1 %v8150_v15  ;;  %v8373_v15 = vld [vmem:[%s12139_s22 + $0x728] sm:$0xf]  ;;  %v8246_v2 = vor.u32 %v11132_v28, %v8245_v22  ;;  %v11128_v23 = vld [vmem:[%s12139_s22 + $0x614] sm:$0xf0] }
 0x20a   : > { %5823 = vmatpush.bf16.msrb.mxu2 %v8278_v7  ;;  %v11164_v7 = vld [vmem:[%s12139_s22 + $0x734] sm:$0xf0]  ;;  %v8357_v49 = vld [vmem:[%s12139_s22 + $0x708] sm:$0xf]  ;;  %v8230_v22 = vor.u32 %v11128_v23, %v8229_v18  ;;  %v13412_v23 = vpop.f32.mrf.mxu1 }
 0x20b   : > { %5837 = vmatpush.bf16.msrb.mxu3 %v8406_v20  ;;  %v8118_v20 = vor.u32 %v11100_v12, %v8117_v54  ;;  %v8374_v16 = vor.u32 %v11164_v7, %v8373_v15  ;;  %v11160_v57 = vld [vmem:[%s12139_s22 + $0x714] sm:$0xf0]  ;;  %v8725_v24 = vld [vmem:[%s12139_s22 + $0x9e8] sm:$0xf]  ;;  %14628 = vst [vmem:[#allocation34_spill] sm:$0xff] %v13412_v23 }
 0x20c   : > { %5796 = vmatpush.bf16.msrb.mxu0 %v8006_v50  ;;  %v8597_v50 = vld [vmem:[%s12139_s22 + $0x8e8] sm:$0xf]  ;;  %v11284_v12 = vld [vmem:[%s12139_s22 + $0xaf4] sm:$0xf0]  ;;  %v8358_v7 = vor.u32 %v11160_v57, %v8357_v49  ;;  %v8582_v49 = vor.u32 %v11216_v37, %v8581_v30 }
 0x20d   : > { %5810 = vmatpush.bf16.msrb.mxu1 %v8134_v25  ;;  %v7974_v25 = vor.u32 %v11064_v27, %v7973_v11  ;;  %v8853_v54 = vld [vmem:[%s12139_s22 + $0xae8] sm:$0xf]  ;;  %v11316_v15 = vld [vmem:[%s12139_s22 + $0xbf4] sm:$0xf0] }
 0x20e   : > { %5824 = vmatpush.bf16.msrb.mxu2 %v8262_v19  ;;  %v11252_v19 = vld [vmem:[%s12139_s22 + $0x9f4] sm:$0xf0]  ;;  %v8981_v28 = vld [vmem:[%s12139_s22 + $0xbe8] sm:$0xf]  ;;  %v8854_v27 = vor.u32 %v11284_v12, %v8853_v54 }
 0x20f   : > { %5838 = vmatpush.bf16.msrb.mxu3 %v8390_v29  ;;  %v8102_v29 = vor.u32 %v11096_v59, %v8101_v9  ;;  %v8726_v11 = vor.u32 %v11252_v19, %v8725_v24  ;;  %v11248_v0 = vld [vmem:[%s12139_s22 + $0x9d4] sm:$0xf0]  ;;  %v13408_v59 = vpop.f32.mrf.mxu0  ;;  %v8965_v18 = vld [vmem:[%s12139_s22 + $0xbc8] sm:$0xf] }
 0x210   : > { %5797 = vmatpush.bf16.msrb.mxu0 %v7990_v3  ;;  %v8598_v3 = vor.u32 %v11220_v8, %v8597_v50  ;;  %v11280_v9 = vld [vmem:[%s12139_s22 + $0xad4] sm:$0xf0]  ;;  %14627 = vst [vmem:[#allocation33_spill] sm:$0xff] %v13408_v59  ;;  %v8710_v57 = vor.u32 %v11248_v0, %v8709_v63  ;;  %v8565_v8 = vld [vmem:[%s12139_s22 + $0x8a8] sm:$0xf] }
 0x211   : > { %5811 = vmatpush.bf16.msrb.mxu1 %v8118_v20  ;;  %v8982_v20 = vor.u32 %v11316_v15, %v8981_v28  ;;  %v11212_v24 = vld [vmem:[%s12139_s22 + $0x8b4] sm:$0xf0]  ;;  %v8821_v12 = vld [vmem:[%s12139_s22 + $0xaa8] sm:$0xf] }
 0x212   : > { %5825 = vmatpush.bf16.msrb.mxu2 %v8246_v2  ;;  %v8837_v2 = vld [vmem:[%s12139_s22 + $0xac8] sm:$0xf]  ;;  %v11244_v54 = vld [vmem:[%s12139_s22 + $0x9b4] sm:$0xf0]  ;;  %v8566_v37 = vor.u32 %v11212_v24, %v8565_v8 }
 0x213   : > { %5839 = vmatpush.bf16.msrb.mxu3 %v8374_v16  ;;  %v11312_v16 = vld [vmem:[%s12139_s22 + $0xbd4] sm:$0xf0]  ;;  %v8838_v50 = vor.u32 %v11280_v9, %v8837_v2  ;;  %v8949_v0 = vld [vmem:[%s12139_s22 + $0xba8] sm:$0xf]  ;;  %v13434_v9 = vpop.f32.mrf.mxu3 }
 0x214   : > { %5798 = vmatpush.bf16.msrb.mxu0 %v7974_v25  ;;  %v8693_v25 = vld [vmem:[%s12139_s22 + $0x9a8] sm:$0xf]  ;;  %v8966_v19 = vor.u32 %v11312_v16, %v8965_v18  ;;  %v11308_v63 = vld [vmem:[%s12139_s22 + $0xbb4] sm:$0xf0]  ;;  %14630 = vst [vmem:[#allocation36_spill] sm:$0xff] %v13434_v9 }
 0x215   : > { %5812 = vmatpush.bf16.msrb.mxu1 %v8102_v29  ;;  %v11276_v29 = vld [vmem:[%s12139_s22 + $0xab4] sm:$0xf0]  ;;  %v8694_v30 = vor.u32 %v11244_v54, %v8693_v25  ;;  %v8549_v28 = vld [vmem:[%s12139_s22 + $0x888] sm:$0xf]  ;;  %v5590_v8 = vpop.f32.mrf.mxu1 }
 0x216   : > { %5826 = vmatpush.bf16.msrb.mxu2 %v8230_v22  ;;  %v8822_v22 = vor.u32 %v11276_v29, %v8821_v12  ;;  %v11208_v15 = vld [vmem:[%s12139_s22 + $0x894] sm:$0xf0]  ;;  %v8933_v16 = vld [vmem:[%s12139_s22 + $0xb88] sm:$0xf] }
 0x217   : > { %5840 = vmatpush.bf16.msrb.mxu3 %v8358_v7  ;;  %5799 = vmatmul.bf16.vlgmr.msrb.gmra.mxu0 %v12352_v39  ;;  %v8677_v7 = vld [vmem:[%s12139_s22 + $0x988] sm:$0xf]  ;;  %v11272_v2 = vld [vmem:[%s12139_s22 + $0xa94] sm:$0xf0]  ;;  %v5576_v18 = vpop.f32.mrf.mxu0 }
 0x218   : > { %5847 = vmatpush.bf16.msra.mxu0 %v8598_v3  ;;  %5813 = vmatmul.bf16.vlgmr.msrb.gmra.mxu1 %v12359_v44  ;;  %v13429_v3 = vpop.f32.mrf.mxu2  ;;  %v11204_v54 = vld [vmem:[%s12139_s22 + $0x874] sm:$0xf0]  ;;  %v8661_v12 = vld [vmem:[%s12139_s22 + $0x968] sm:$0xf] }
 0x219   : > { %5861 = vmatpush.bf16.msra.mxu1 %v8726_v11  ;;  %5827 = vmatmul.bf16.vlgmr.msrb.gmra.mxu2 %v12357_v43  ;;  %14629 = vst [vmem:[#allocation35_spill] sm:$0xff] %v13429_v3  ;;  %v8950_v11 = vor.u32 %v11308_v63, %v8949_v0  ;;  %v11236_v63 = vld [vmem:[%s12139_s22 + $0x974] sm:$0xf0]  ;;  %v9093_v9 = vld [vmem:[%s12139_s22 + $0xcc8] sm:$0xf] }
 0x21a   : > { %5875 = vmatpush.bf16.msra.mxu2 %v8854_v27  ;;  %5841 = vmatmul.bf16.vlgmr.msrb.gmra.mxu3 %v12363_v47  ;;  %v11240_v27 = vld [vmem:[%s12139_s22 + $0x994] sm:$0xf0]  ;;  %v9221_v23 = vld [vmem:[%s12139_s22 + $0xdc8] sm:$0xf] }
 0x21b   : > { %5889 = vmatpush.bf16.msra.mxu3 %v8982_v20  ;;  %v8805_v20 = vld [vmem:[%s12139_s22 + $0xa88] sm:$0xf]  ;;  %v8678_v24 = vor.u32 %v11240_v27, %v8677_v7  ;;  %v11200_v27 = vld [vmem:[%s12139_s22 + $0x854] sm:$0xf0] }
 0x21c   : > { %5848 = vmatpush.bf16.msra.mxu0 %v8582_v49  ;;  %v11304_v49 = vld [vmem:[%s12139_s22 + $0xb94] sm:$0xf0]  ;;  %v8806_v25 = vor.u32 %v11272_v2, %v8805_v20  ;;  %v8645_v20 = vld [vmem:[%s12139_s22 + $0x948] sm:$0xf] }
 0x21d   : > { %5862 = vmatpush.bf16.msra.mxu1 %v8710_v57  ;;  %v5577_v57 = vadd.f32 %v5576_v18, %v13376_v62  ;;  %v8934_v29 = vor.u32 %v11304_v49, %v8933_v16  ;;  %v11268_v62 = vld [vmem:[%s12139_s22 + $0xa74] sm:$0xf0]  ;;  %v8773_v49 = vld [vmem:[%s12139_s22 + $0xa48] sm:$0xf] }
 0x21e   : > { %5876 = vmatpush.bf16.msra.mxu2 %v8838_v50  ;;  %v8550_v50 = vor.u32 %v11208_v15, %v8549_v28  ;;  %v8917_v28 = vld [vmem:[%s12139_s22 + $0xb68] sm:$0xf]  ;;  %v8662_v15 = vor.u32 %v11236_v63, %v8661_v12  ;;  %v11232_v16 = vld [vmem:[%s12139_s22 + $0x954] sm:$0xf0] }
 0x21f   : > { %5890 = vmatpush.bf16.msra.mxu3 %v8966_v19  ;;  %v8533_v19 = vld [vmem:[%s12139_s22 + $0x868] sm:$0xf]  ;;  %v5591_v0 = vadd.f32 %v5590_v8, %v5577_v57  ;;  %v11264_v57 = vld [vmem:[%s12139_s22 + $0xa54] sm:$0xf0]  ;;  %v5618_v8 = vpop.f32.mrf.mxu3  ;;  %v8646_v12 = vor.u32 %v11232_v16, %v8645_v20 }
 0x220   : > { %5849 = vmatpush.bf16.msra.mxu0 %v8566_v37  ;;  %v8789_v37 = vld [vmem:[%s12139_s22 + $0xa68] sm:$0xf]  ;;  %v5604_v18 = vpop.f32.mrf.mxu2  ;;  %v11192_v20 = vld [vmem:[%s12139_s22 + $0x814] sm:$0xf0] }
 0x221   : > { %5863 = vmatpush.bf16.msra.mxu1 %v8694_v30  ;;  %v11300_v30 = vld [vmem:[%s12139_s22 + $0xb74] sm:$0xf0]  ;;  %v8790_v7 = vor.u32 %v11268_v62, %v8789_v37  ;;  %v8501_v63 = vld [vmem:[%s12139_s22 + $0x828] sm:$0xf] }
 0x222   : > { %5877 = vmatpush.bf16.msra.mxu2 %v8822_v22  ;;  %v8534_v22 = vor.u32 %v11204_v54, %v8533_v19  ;;  %v8918_v2 = vor.u32 %v11300_v30, %v8917_v28  ;;  %v8629_v37 = vld [vmem:[%s12139_s22 + $0x928] sm:$0xf]  ;;  %v11228_v28 = vld [vmem:[%s12139_s22 + $0x934] sm:$0xf0] }
 0x223   : > { %5891 = vmatpush.bf16.msra.mxu3 %v8950_v11  ;;  %v8517_v11 = vld [vmem:[%s12139_s22 + $0x848] sm:$0xf]  ;;  %v11344_v3 = vld [vmem:[%s12139_s22 + $0xcd4] sm:$0xf0] }
 0x224   : > { %5850 = vmatpush.bf16.msra.mxu0 %v8550_v50  ;;  %v5605_v50 = vadd.f32 %v5604_v18, %v5591_v0  ;;  %v8518_v19 = vor.u32 %v11200_v27, %v8517_v11  ;;  %v11196_v0 = vld [vmem:[%s12139_s22 + $0x834] sm:$0xf0]  ;;  %v8757_v30 = vld [vmem:[%s12139_s22 + $0xa28] sm:$0xf] }
 0x225   : > { %5864 = vmatpush.bf16.msra.mxu1 %v8678_v24  ;;  %v8901_v24 = vld [vmem:[%s12139_s22 + $0xb48] sm:$0xf]  ;;  %v8502_v11 = vor.u32 %v11196_v0, %v8501_v63  ;;  %v11348_v63 = vld [vmem:[%s12139_s22 + $0xcf4] sm:$0xf0] }
 0x226   : > { %5878 = vmatpush.bf16.msra.mxu2 %v8806_v25  ;;  %v11296_v25 = vld [vmem:[%s12139_s22 + $0xb54] sm:$0xf0]  ;;  %v13455_v54 = vadd.f32 %v5618_v8, %v5605_v50  ;;  %v8485_v27 = vld [vmem:[%s12139_s22 + $0x808] sm:$0xf] }
 0x227   : > { %5892 = vmatpush.bf16.msra.mxu3 %v8934_v29  ;;  %v8774_v29 = vor.u32 %v11264_v57, %v8773_v49  ;;  %v8902_v62 = vor.u32 %v11296_v25, %v8901_v24  ;;  %v8613_v16 = vld [vmem:[%s12139_s22 + $0x908] sm:$0xf]  ;;  %v11224_v49 = vld [vmem:[%s12139_s22 + $0x914] sm:$0xf0] }
 0x228   : > { %5851 = vmatpush.bf16.msra.mxu0 %v8534_v22  ;;  %v11260_v22 = vld [vmem:[%s12139_s22 + $0xa34] sm:$0xf0]  ;;  %v8741_v57 = vld [vmem:[%s12139_s22 + $0xa08] sm:$0xf] }
 0x229   : > { %5865 = vmatpush.bf16.msra.mxu1 %v8662_v15  ;;  %v8885_v15 = vld [vmem:[%s12139_s22 + $0xb28] sm:$0xf]  ;;  %v8758_v18 = vor.u32 %v11260_v22, %v8757_v30  ;;  %v11256_v8 = vld [vmem:[%s12139_s22 + $0xa14] sm:$0xf0] }
 0x22a   : > { %5879 = vmatpush.bf16.msra.mxu2 %v8790_v7  ;;  %v11292_v7 = vld [vmem:[%s12139_s22 + $0xb34] sm:$0xf0]  ;;  %v8869_v24 = vld [vmem:[%s12139_s22 + $0xb08] sm:$0xf]  ;;  %v8742_v30 = vor.u32 %v11256_v8, %v8741_v57  ;;  %v13491_v8 = vpop.f32.mrf.mxu1 }
 0x22b   : > { %5893 = vmatpush.bf16.msra.mxu3 %v8918_v2  ;;  %v8630_v2 = vor.u32 %v11228_v28, %v8629_v37  ;;  %v8886_v50 = vor.u32 %v11292_v7, %v8885_v15  ;;  %v11288_v25 = vld [vmem:[%s12139_s22 + $0xb14] sm:$0xf0]  ;;  %v9237_v0 = vld [vmem:[%s12139_s22 + $0xde8] sm:$0xf]  ;;  %14632 = vst [vmem:[#allocation38_spill] sm:$0xff] %v13491_v8 }
 0x22c   : > { %5852 = vmatpush.bf16.msra.mxu0 %v8518_v19  ;;  %v9109_v19 = vld [vmem:[%s12139_s22 + $0xce8] sm:$0xf]  ;;  %v11412_v28 = vld [vmem:[%s12139_s22 + $0xef4] sm:$0xf0]  ;;  %v8870_v7 = vor.u32 %v11288_v25, %v8869_v24  ;;  %v9094_v24 = vor.u32 %v11344_v3, %v9093_v9 }
 0x22d   : > { %5866 = vmatpush.bf16.msra.mxu1 %v8646_v12  ;;  %v8486_v12 = vor.u32 %v11192_v20, %v8485_v27  ;;  %v9365_v37 = vld [vmem:[%s12139_s22 + $0xee8] sm:$0xf]  ;;  %v11444_v15 = vld [vmem:[%s12139_s22 + $0xff4] sm:$0xf0] }
 0x22e   : > { %5880 = vmatpush.bf16.msra.mxu2 %v8774_v29  ;;  %v11380_v29 = vld [vmem:[%s12139_s22 + $0xdf4] sm:$0xf0]  ;;  %v9493_v22 = vld [vmem:[%s12139_s22 + $0xfe8] sm:$0xf]  ;;  %v9366_v20 = vor.u32 %v11412_v28, %v9365_v37 }
 0x22f   : > { %5894 = vmatpush.bf16.msra.mxu3 %v8902_v62  ;;  %v8614_v62 = vor.u32 %v11224_v49, %v8613_v16  ;;  %v9238_v27 = vor.u32 %v11380_v29, %v9237_v0  ;;  %v11376_v59 = vld [vmem:[%s12139_s22 + $0xdd4] sm:$0xf0]  ;;  %v13487_v49 = vpop.f32.mrf.mxu0  ;;  %v9477_v57 = vld [vmem:[%s12139_s22 + $0xfc8] sm:$0xf] }
 0x230   : > { %5853 = vmatpush.bf16.msra.mxu0 %v8502_v11  ;;  %v9110_v11 = vor.u32 %v11348_v63, %v9109_v19  ;;  %v11408_v16 = vld [vmem:[%s12139_s22 + $0xed4] sm:$0xf0]  ;;  %14631 = vst [vmem:[#allocation37_spill] sm:$0xff] %v13487_v49  ;;  %v9222_v25 = vor.u32 %v11376_v59, %v9221_v23  ;;  %v9077_v63 = vld [vmem:[%s12139_s22 + $0xca8] sm:$0xf] }
 0x231   : > { %5867 = vmatpush.bf16.msra.mxu1 %v8630_v2  ;;  %v9494_v2 = vor.u32 %v11444_v15, %v9493_v22  ;;  %v11340_v0 = vld [vmem:[%s12139_s22 + $0xcb4] sm:$0xf0]  ;;  %v9333_v28 = vld [vmem:[%s12139_s22 + $0xea8] sm:$0xf] }
 0x232   : > { %5881 = vmatpush.bf16.msra.mxu2 %v8758_v18  ;;  %v9349_v18 = vld [vmem:[%s12139_s22 + $0xec8] sm:$0xf]  ;;  %v11372_v37 = vld [vmem:[%s12139_s22 + $0xdb4] sm:$0xf0]  ;;  %v9078_v3 = vor.u32 %v11340_v0, %v9077_v63 }
 0x233   : > { %5895 = vmatpush.bf16.msra.mxu3 %v8886_v50  ;;  %v11440_v50 = vld [vmem:[%s12139_s22 + $0xfd4] sm:$0xf0]  ;;  %v9350_v19 = vor.u32 %v11408_v16, %v9349_v18  ;;  %v9461_v59 = vld [vmem:[%s12139_s22 + $0xfa8] sm:$0xf]  ;;  %v13513_v16 = vpop.f32.mrf.mxu3 }
 0x234   : > { %5854 = vmatpush.bf16.msra.mxu0 %v8486_v12  ;;  %v9205_v12 = vld [vmem:[%s12139_s22 + $0xda8] sm:$0xf]  ;;  %v9478_v29 = vor.u32 %v11440_v50, %v9477_v57  ;;  %v11436_v23 = vld [vmem:[%s12139_s22 + $0xfb4] sm:$0xf0]  ;;  %14634 = vst [vmem:[#allocation40_spill] sm:$0xff] %v13513_v16 }
 0x235   : > { %5868 = vmatpush.bf16.msra.mxu1 %v8614_v62  ;;  %v11404_v62 = vld [vmem:[%s12139_s22 + $0xeb4] sm:$0xf0]  ;;  %v9206_v9 = vor.u32 %v11372_v37, %v9205_v12  ;;  %v9061_v22 = vld [vmem:[%s12139_s22 + $0xc88] sm:$0xf]  ;;  %v5646_v63 = vpop.f32.mrf.mxu1 }
 0x236   : > { %5882 = vmatpush.bf16.msra.mxu2 %v8742_v30  ;;  %v9334_v30 = vor.u32 %v11404_v62, %v9333_v28  ;;  %v11336_v15 = vld [vmem:[%s12139_s22 + $0xc94] sm:$0xf0]  ;;  %v9445_v50 = vld [vmem:[%s12139_s22 + $0xf88] sm:$0xf] }
 0x237   : > { %5896 = vmatpush.bf16.msra.mxu3 %v8870_v7  ;;  %5855 = vmatmul.bf16.vlgmr.msra.gmra.mxu0 %v12452_v31  ;;  %v9189_v7 = vld [vmem:[%s12139_s22 + $0xd88] sm:$0xf]  ;;  %v11400_v18 = vld [vmem:[%s12139_s22 + $0xe94] sm:$0xf0]  ;;  %v5632_v57 = vpop.f32.mrf.mxu0 }
 0x238   : > { %5903 = vmatpush.bf16.msrb.mxu0 %v9110_v11  ;;  %5869 = vmatmul.bf16.vlgmr.msra.gmra.mxu1 %v12459_v36  ;;  %v13508_v11 = vpop.f32.mrf.mxu2  ;;  %v11332_v37 = vld [vmem:[%s12139_s22 + $0xc74] sm:$0xf0]  ;;  %v9173_v28 = vld [vmem:[%s12139_s22 + $0xd68] sm:$0xf] }
 0x239   : > { %5917 = vmatpush.bf16.msrb.mxu1 %v9238_v27  ;;  %5883 = vmatmul.bf16.vlgmr.msra.gmra.mxu2 %v12457_v35  ;;  %14633 = vst [vmem:[#allocation39_spill] sm:$0xff] %v13508_v11  ;;  %v9462_v27 = vor.u32 %v11436_v23, %v9461_v59  ;;  %v11364_v23 = vld [vmem:[%s12139_s22 + $0xd74] sm:$0xf0]  ;;  %v9605_v16 = vld [vmem:[%s12139_s22 + $0x10c8] sm:$0xf] }
 0x23a   : > { %5931 = vmatpush.bf16.msrb.mxu2 %v9366_v20  ;;  %5897 = vmatmul.bf16.vlgmr.msra.gmra.mxu3 %v12463_v40  ;;  %v11368_v20 = vld [vmem:[%s12139_s22 + $0xd94] sm:$0xf0]  ;;  %v9733_v8 = vld [vmem:[%s12139_s22 + $0x11c8] sm:$0xf] }
 0x23b   : > { %5945 = vmatpush.bf16.msrb.mxu3 %v9494_v2  ;;  %v9317_v2 = vld [vmem:[%s12139_s22 + $0xe88] sm:$0xf]  ;;  %v9190_v0 = vor.u32 %v11368_v20, %v9189_v7  ;;  %v11328_v20 = vld [vmem:[%s12139_s22 + $0xc54] sm:$0xf0] }
 0x23c   : > { %5904 = vmatpush.bf16.msrb.mxu0 %v9094_v24  ;;  %v11432_v24 = vld [vmem:[%s12139_s22 + $0xf94] sm:$0xf0]  ;;  %v9318_v12 = vor.u32 %v11400_v18, %v9317_v2  ;;  %v9157_v2 = vld [vmem:[%s12139_s22 + $0xd48] sm:$0xf] }
 0x23d   : > { %5918 = vmatpush.bf16.msrb.mxu1 %v9222_v25  ;;  %v5633_v25 = vadd.f32 %v5632_v57, %v13455_v54  ;;  %v9446_v62 = vor.u32 %v11432_v24, %v9445_v50  ;;  %v11396_v54 = vld [vmem:[%s12139_s22 + $0xe74] sm:$0xf0]  ;;  %v9285_v24 = vld [vmem:[%s12139_s22 + $0xe48] sm:$0xf] }
 0x23e   : > { %5932 = vmatpush.bf16.msrb.mxu2 %v9350_v19  ;;  %v9062_v19 = vor.u32 %v11336_v15, %v9061_v22  ;;  %v9429_v22 = vld [vmem:[%s12139_s22 + $0xf68] sm:$0xf]  ;;  %v9174_v15 = vor.u32 %v11364_v23, %v9173_v28  ;;  %v11360_v50 = vld [vmem:[%s12139_s22 + $0xd54] sm:$0xf0] }
 0x23f   : > { %5946 = vmatpush.bf16.msrb.mxu3 %v9478_v29  ;;  %v9045_v29 = vld [vmem:[%s12139_s22 + $0xc68] sm:$0xf]  ;;  %v5647_v59 = vadd.f32 %v5646_v63, %v5633_v25  ;;  %v11392_v25 = vld [vmem:[%s12139_s22 + $0xe54] sm:$0xf0]  ;;  %v5674_v63 = vpop.f32.mrf.mxu3  ;;  %v9158_v28 = vor.u32 %v11360_v50, %v9157_v2 }
 0x240   : > { %5905 = vmatpush.bf16.msrb.mxu0 %v9078_v3  ;;  %v9301_v3 = vld [vmem:[%s12139_s22 + $0xe68] sm:$0xf]  ;;  %v5660_v57 = vpop.f32.mrf.mxu2  ;;  %v11320_v2 = vld [vmem:[%s12139_s22 + $0xc14] sm:$0xf0] }
 0x241   : > { %5919 = vmatpush.bf16.msrb.mxu1 %v9206_v9  ;;  %v11428_v9 = vld [vmem:[%s12139_s22 + $0xf74] sm:$0xf0]  ;;  %v9302_v7 = vor.u32 %v11396_v54, %v9301_v3  ;;  %v9013_v23 = vld [vmem:[%s12139_s22 + $0xc28] sm:$0xf] }
 0x242   : > { %5933 = vmatpush.bf16.msrb.mxu2 %v9334_v30  ;;  %v9046_v30 = vor.u32 %v11332_v37, %v9045_v29  ;;  %v9430_v18 = vor.u32 %v11428_v9, %v9429_v22  ;;  %v9141_v3 = vld [vmem:[%s12139_s22 + $0xd28] sm:$0xf]  ;;  %v11356_v22 = vld [vmem:[%s12139_s22 + $0xd34] sm:$0xf0] }
 0x243   : > { %5947 = vmatpush.bf16.msrb.mxu3 %v9462_v27  ;;  %v9029_v27 = vld [vmem:[%s12139_s22 + $0xc48] sm:$0xf]  ;;  %v11472_v11 = vld [vmem:[%s12139_s22 + $0x10d4] sm:$0xf0] }
 0x244   : > { %5906 = vmatpush.bf16.msrb.mxu0 %v9062_v19  ;;  %v5661_v19 = vadd.f32 %v5660_v57, %v5647_v59  ;;  %v9030_v29 = vor.u32 %v11328_v20, %v9029_v27  ;;  %v11324_v59 = vld [vmem:[%s12139_s22 + $0xc34] sm:$0xf0]  ;;  %v9269_v9 = vld [vmem:[%s12139_s22 + $0xe28] sm:$0xf] }
 0x245   : > { %5920 = vmatpush.bf16.msrb.mxu1 %v9190_v0  ;;  %v9413_v0 = vld [vmem:[%s12139_s22 + $0xf48] sm:$0xf]  ;;  %v9014_v27 = vor.u32 %v11324_v59, %v9013_v23  ;;  %v11476_v23 = vld [vmem:[%s12139_s22 + $0x10f4] sm:$0xf0] }
 0x246   : > { %5934 = vmatpush.bf16.msrb.mxu2 %v9318_v12  ;;  %v11424_v12 = vld [vmem:[%s12139_s22 + $0xf54] sm:$0xf0]  ;;  %v13534_v37 = vadd.f32 %v5674_v63, %v5661_v19  ;;  %v8997_v20 = vld [vmem:[%s12139_s22 + $0xc08] sm:$0xf] }
 0x247   : > { %5948 = vmatpush.bf16.msrb.mxu3 %v9446_v62  ;;  %v9286_v62 = vor.u32 %v11392_v25, %v9285_v24  ;;  %v9414_v54 = vor.u32 %v11424_v12, %v9413_v0  ;;  %v9125_v50 = vld [vmem:[%s12139_s22 + $0xd08] sm:$0xf]  ;;  %v11352_v24 = vld [vmem:[%s12139_s22 + $0xd14] sm:$0xf0] }
 0x248   : > { %5907 = vmatpush.bf16.msrb.mxu0 %v9046_v30  ;;  %v11388_v30 = vld [vmem:[%s12139_s22 + $0xe34] sm:$0xf0]  ;;  %v9253_v25 = vld [vmem:[%s12139_s22 + $0xe08] sm:$0xf] }
 0x249   : > { %5921 = vmatpush.bf16.msrb.mxu1 %v9174_v15  ;;  %v9397_v15 = vld [vmem:[%s12139_s22 + $0xf28] sm:$0xf]  ;;  %v9270_v57 = vor.u32 %v11388_v30, %v9269_v9  ;;  %v11384_v63 = vld [vmem:[%s12139_s22 + $0xe14] sm:$0xf0] }
 0x24a   : > { %5935 = vmatpush.bf16.msrb.mxu2 %v9302_v7  ;;  %v11420_v7 = vld [vmem:[%s12139_s22 + $0xf34] sm:$0xf0]  ;;  %v9381_v0 = vld [vmem:[%s12139_s22 + $0xf08] sm:$0xf]  ;;  %v9254_v9 = vor.u32 %v11384_v63, %v9253_v25  ;;  %v13570_v63 = vpop.f32.mrf.mxu1 }
 0x24b   : > { %5949 = vmatpush.bf16.msrb.mxu3 %v9430_v18  ;;  %v9142_v18 = vor.u32 %v11356_v22, %v9141_v3  ;;  %v9398_v19 = vor.u32 %v11420_v7, %v9397_v15  ;;  %v11416_v12 = vld [vmem:[%s12139_s22 + $0xf14] sm:$0xf0]  ;;  %v9749_v59 = vld [vmem:[%s12139_s22 + $0x11e8] sm:$0xf] }
 0x24c   : > { %5908 = vmatpush.bf16.msrb.mxu0 %v9030_v29  ;;  %v9621_v29 = vld [vmem:[%s12139_s22 + $0x10e8] sm:$0xf]  ;;  %v11540_v22 = vld [vmem:[%s12139_s22 + $0x12f4] sm:$0xf0]  ;;  %v9382_v7 = vor.u32 %v11416_v12, %v9381_v0  ;;  %v9606_v0 = vor.u32 %v11472_v11, %v9605_v16 }
 0x24d   : > { %5922 = vmatpush.bf16.msrb.mxu1 %v9158_v28  ;;  %v8998_v28 = vor.u32 %v11320_v2, %v8997_v20  ;;  %v9877_v3 = vld [vmem:[%s12139_s22 + $0x12e8] sm:$0xf]  ;;  %v11572_v15 = vld [vmem:[%s12139_s22 + $0x13f4] sm:$0xf0] }
 0x24e   : > { %5936 = vmatpush.bf16.msrb.mxu2 %v9286_v62  ;;  %v11508_v62 = vld [vmem:[%s12139_s22 + $0x11f4] sm:$0xf0]  ;;  %v10005_v30 = vld [vmem:[%s12139_s22 + $0x13e8] sm:$0xf]  ;;  %v9878_v2 = vor.u32 %v11540_v22, %v9877_v3 }
 0x24f   : > { %5950 = vmatpush.bf16.msrb.mxu3 %v9414_v54  ;;  %v9126_v54 = vor.u32 %v11352_v24, %v9125_v50  ;;  %v9750_v20 = vor.u32 %v11508_v62, %v9749_v59  ;;  %v11504_v49 = vld [vmem:[%s12139_s22 + $0x11d4] sm:$0xf0]  ;;  %v13566_v24 = vpop.f32.mrf.mxu0  ;;  %v9989_v25 = vld [vmem:[%s12139_s22 + $0x13c8] sm:$0xf] }
 0x250   : > { %5909 = vmatpush.bf16.msrb.mxu0 %v9014_v27  ;;  %v9622_v27 = vor.u32 %v11476_v23, %v9621_v29  ;;  %v11536_v50 = vld [vmem:[%s12139_s22 + $0x12d4] sm:$0xf0]  ;;  %v9734_v12 = vor.u32 %v11504_v49, %v9733_v8  ;;  %v9589_v23 = vld [vmem:[%s12139_s22 + $0x10a8] sm:$0xf] }
 0x251   : > { %5923 = vmatpush.bf16.msrb.mxu1 %v9142_v18  ;;  %v10006_v18 = vor.u32 %v11572_v15, %v10005_v30  ;;  %v11468_v59 = vld [vmem:[%s12139_s22 + $0x10b4] sm:$0xf0]  ;;  %v9845_v22 = vld [vmem:[%s12139_s22 + $0x12a8] sm:$0xf] }
 0x252   : > { %5937 = vmatpush.bf16.msrb.mxu2 %v9270_v57  ;;  %v9861_v57 = vld [vmem:[%s12139_s22 + $0x12c8] sm:$0xf]  ;;  %v11500_v3 = vld [vmem:[%s12139_s22 + $0x11b4] sm:$0xf0]  ;;  %v9590_v11 = vor.u32 %v11468_v59, %v9589_v23 }
 0x253   : > { %5951 = vmatpush.bf16.msrb.mxu3 %v9398_v19  ;;  %v11568_v19 = vld [vmem:[%s12139_s22 + $0x13d4] sm:$0xf0]  ;;  %v9862_v29 = vor.u32 %v11536_v50, %v9861_v57  ;;  %v9973_v49 = vld [vmem:[%s12139_s22 + $0x13a8] sm:$0xf]  ;;  %v13592_v50 = vpop.f32.mrf.mxu3 }
 0x254   : > { %5910 = vmatpush.bf16.msrb.mxu0 %v8998_v28  ;;  %v9717_v28 = vld [vmem:[%s12139_s22 + $0x11a8] sm:$0xf]  ;;  %v9990_v62 = vor.u32 %v11568_v19, %v9989_v25  ;;  %v11564_v8 = vld [vmem:[%s12139_s22 + $0x13b4] sm:$0xf0]  ;;  %14636 = vst [vmem:[#allocation42_spill] sm:$0xff] %v13592_v50 }
 0x255   : > { %5924 = vmatpush.bf16.msrb.mxu1 %v9126_v54  ;;  %v11532_v54 = vld [vmem:[%s12139_s22 + $0x12b4] sm:$0xf0]  ;;  %v9718_v16 = vor.u32 %v11500_v3, %v9717_v28  ;;  %v9573_v30 = vld [vmem:[%s12139_s22 + $0x1088] sm:$0xf]  ;;  %v5702_v23 = vpop.f32.mrf.mxu1 }
 0x256   : > { %5938 = vmatpush.bf16.msrb.mxu2 %v9254_v9  ;;  %v9846_v9 = vor.u32 %v11532_v54, %v9845_v22  ;;  %v11464_v15 = vld [vmem:[%s12139_s22 + $0x1094] sm:$0xf0]  ;;  %v9957_v19 = vld [vmem:[%s12139_s22 + $0x1388] sm:$0xf] }
 0x257   : > { %5952 = vmatpush.bf16.msrb.mxu3 %v9382_v7  ;;  %5911 = vmatmul.bf16.vlgmr.msrb.gmra.mxu0 %v12552_v32  ;;  %v9701_v7 = vld [vmem:[%s12139_s22 + $0x1188] sm:$0xf]  ;;  %v11528_v57 = vld [vmem:[%s12139_s22 + $0x1294] sm:$0xf0]  ;;  %v5688_v25 = vpop.f32.mrf.mxu0 }
 0x258   : > { %5959 = vmatpush.bf16.msra.mxu0 %v9622_v27  ;;  %5925 = vmatmul.bf16.vlgmr.msrb.gmra.mxu1 %v12559_v41  ;;  %v13587_v27 = vpop.f32.mrf.mxu2  ;;  %v11460_v3 = vld [vmem:[%s12139_s22 + $0x1074] sm:$0xf0]  ;;  %v9685_v22 = vld [vmem:[%s12139_s22 + $0x1168] sm:$0xf] }
 0x259   : > { %5973 = vmatpush.bf16.msra.mxu1 %v9750_v20  ;;  %5939 = vmatmul.bf16.vlgmr.msrb.gmra.mxu2 %v12557_v38  ;;  %14635 = vst [vmem:[#allocation41_spill] sm:$0xff] %v13587_v27  ;;  %v9974_v20 = vor.u32 %v11564_v8, %v9973_v49  ;;  %v11492_v8 = vld [vmem:[%s12139_s22 + $0x1174] sm:$0xf0]  ;;  %v10245_v27 = vld [vmem:[%s12139_s22 + $0x15c8] sm:$0xf] }
 0x25a   : > { %5987 = vmatpush.bf16.msra.mxu2 %v9878_v2  ;;  %5953 = vmatmul.bf16.vlgmr.msrb.gmra.mxu3 %v12563_v46  ;;  %v11496_v2 = vld [vmem:[%s12139_s22 + $0x1194] sm:$0xf0] }
 0x25b   : > { %6001 = vmatpush.bf16.msra.mxu3 %v10006_v18  ;;  %v9829_v18 = vld [vmem:[%s12139_s22 + $0x1288] sm:$0xf]  ;;  %v9702_v59 = vor.u32 %v11496_v2, %v9701_v7  ;;  %v11456_v2 = vld [vmem:[%s12139_s22 + $0x1054] sm:$0xf0] }
 0x25c   : > { %5960 = vmatpush.bf16.msra.mxu0 %v9606_v0  ;;  %v11560_v0 = vld [vmem:[%s12139_s22 + $0x1394] sm:$0xf0]  ;;  %v9830_v28 = vor.u32 %v11528_v57, %v9829_v18  ;;  %v9669_v18 = vld [vmem:[%s12139_s22 + $0x1148] sm:$0xf] }
 0x25d   : > { %5974 = vmatpush.bf16.msra.mxu1 %v9734_v12  ;;  %v5689_v12 = vadd.f32 %v5688_v25, %v13534_v37  ;;  %v9958_v54 = vor.u32 %v11560_v0, %v9957_v19  ;;  %v11524_v37 = vld [vmem:[%s12139_s22 + $0x1274] sm:$0xf0]  ;;  %v9797_v0 = vld [vmem:[%s12139_s22 + $0x1248] sm:$0xf] }
 0x25e   : > { %5988 = vmatpush.bf16.msra.mxu2 %v9862_v29  ;;  %v9574_v29 = vor.u32 %v11464_v15, %v9573_v30  ;;  %v9941_v30 = vld [vmem:[%s12139_s22 + $0x1368] sm:$0xf]  ;;  %v9686_v15 = vor.u32 %v11492_v8, %v9685_v22  ;;  %v11488_v19 = vld [vmem:[%s12139_s22 + $0x1154] sm:$0xf0] }
 0x25f   : > { %6002 = vmatpush.bf16.msra.mxu3 %v9990_v62  ;;  %v9557_v62 = vld [vmem:[%s12139_s22 + $0x1068] sm:$0xf]  ;;  %v5703_v49 = vadd.f32 %v5702_v23, %v5689_v12  ;;  %v11520_v12 = vld [vmem:[%s12139_s22 + $0x1254] sm:$0xf0]  ;;  %v5730_v23 = vpop.f32.mrf.mxu3  ;;  %v9670_v22 = vor.u32 %v11488_v19, %v9669_v18 }
 0x260   : > { %5961 = vmatpush.bf16.msra.mxu0 %v9590_v11  ;;  %v9813_v11 = vld [vmem:[%s12139_s22 + $0x1268] sm:$0xf]  ;;  %v5716_v25 = vpop.f32.mrf.mxu2  ;;  %v11448_v18 = vld [vmem:[%s12139_s22 + $0x1014] sm:$0xf0] }
 0x261   : > { %5975 = vmatpush.bf16.msra.mxu1 %v9718_v16  ;;  %v11556_v16 = vld [vmem:[%s12139_s22 + $0x1374] sm:$0xf0]  ;;  %v9814_v7 = vor.u32 %v11524_v37, %v9813_v11  ;;  %v9525_v8 = vld [vmem:[%s12139_s22 + $0x1028] sm:$0xf] }
 0x262   : > { %5989 = vmatpush.bf16.msra.mxu2 %v9846_v9  ;;  %v9558_v9 = vor.u32 %v11460_v3, %v9557_v62  ;;  %v9942_v57 = vor.u32 %v11556_v16, %v9941_v30  ;;  %v9653_v11 = vld [vmem:[%s12139_s22 + $0x1128] sm:$0xf]  ;;  %v11484_v30 = vld [vmem:[%s12139_s22 + $0x1134] sm:$0xf0] }
 0x263   : > { %6003 = vmatpush.bf16.msra.mxu3 %v9974_v20  ;;  %v9541_v20 = vld [vmem:[%s12139_s22 + $0x1048] sm:$0xf]  ;;  %v11600_v50 = vld [vmem:[%s12139_s22 + $0x14d4] sm:$0xf0] }
 0x264   : > { %5962 = vmatpush.bf16.msra.mxu0 %v9574_v29  ;;  %v5717_v29 = vadd.f32 %v5716_v25, %v5703_v49  ;;  %v9542_v62 = vor.u32 %v11456_v2, %v9541_v20  ;;  %v11452_v49 = vld [vmem:[%s12139_s22 + $0x1034] sm:$0xf0]  ;;  %v9781_v16 = vld [vmem:[%s12139_s22 + $0x1228] sm:$0xf] }
 0x265   : > { %5976 = vmatpush.bf16.msra.mxu1 %v9702_v59  ;;  %v9925_v59 = vld [vmem:[%s12139_s22 + $0x1348] sm:$0xf]  ;;  %v9526_v20 = vor.u32 %v11452_v49, %v9525_v8  ;;  %v11604_v8 = vld [vmem:[%s12139_s22 + $0x14f4] sm:$0xf0] }
 0x266   : > { %5990 = vmatpush.bf16.msra.mxu2 %v9830_v28  ;;  %v11552_v28 = vld [vmem:[%s12139_s22 + $0x1354] sm:$0xf0]  ;;  %v13613_v3 = vadd.f32 %v5730_v23, %v5717_v29  ;;  %v9509_v2 = vld [vmem:[%s12139_s22 + $0x1008] sm:$0xf] }
 0x267   : > { %6004 = vmatpush.bf16.msra.mxu3 %v9958_v54  ;;  %v9798_v54 = vor.u32 %v11520_v12, %v9797_v0  ;;  %v9926_v37 = vor.u32 %v11552_v28, %v9925_v59  ;;  %v9637_v19 = vld [vmem:[%s12139_s22 + $0x1108] sm:$0xf]  ;;  %v11480_v0 = vld [vmem:[%s12139_s22 + $0x1114] sm:$0xf0] }
 0x268   : > { %5963 = vmatpush.bf16.msra.mxu0 %v9558_v9  ;;  %14637 = vst [vmem:[#allocation43_spill] sm:$0xff] %v13613_v3  ;;  %v11516_v9 = vld [vmem:[%s12139_s22 + $0x1234] sm:$0xf0]  ;;  %v9765_v12 = vld [vmem:[%s12139_s22 + $0x1208] sm:$0xf] }
 0x269   : > { %5977 = vmatpush.bf16.msra.mxu1 %v9686_v15  ;;  %v9909_v15 = vld [vmem:[%s12139_s22 + $0x1328] sm:$0xf]  ;;  %v9782_v25 = vor.u32 %v11516_v9, %v9781_v16  ;;  %v11512_v23 = vld [vmem:[%s12139_s22 + $0x1214] sm:$0xf0] }
 0x26a   : > { %5991 = vmatpush.bf16.msra.mxu2 %v9814_v7  ;;  %v11548_v7 = vld [vmem:[%s12139_s22 + $0x1334] sm:$0xf0]  ;;  %v9893_v59 = vld [vmem:[%s12139_s22 + $0x1308] sm:$0xf]  ;;  %v9766_v16 = vor.u32 %v11512_v23, %v9765_v12 }
 0x26b   : > { %6005 = vmatpush.bf16.msra.mxu3 %v9942_v57  ;;  %v9654_v57 = vor.u32 %v11484_v30, %v9653_v11  ;;  %v9910_v29 = vor.u32 %v11548_v7, %v9909_v15  ;;  %v11544_v28 = vld [vmem:[%s12139_s22 + $0x1314] sm:$0xf0]  ;;  %v10261_v49 = vld [vmem:[%s12139_s22 + $0x15e8] sm:$0xf] }
 0x26c   : > { %5964 = vmatpush.bf16.msra.mxu0 %v9542_v62  ;;  %v10133_v62 = vld [vmem:[%s12139_s22 + $0x14e8] sm:$0xf]  ;;  %v11668_v30 = vld [vmem:[%s12139_s22 + $0x16f4] sm:$0xf0]  ;;  %v9894_v7 = vor.u32 %v11544_v28, %v9893_v59 }
 0x26d   : > { %5978 = vmatpush.bf16.msra.mxu1 %v9670_v22  ;;  %v9510_v22 = vor.u32 %v11448_v18, %v9509_v2  ;;  %v10389_v11 = vld [vmem:[%s12139_s22 + $0x16e8] sm:$0xf]  ;;  %v11700_v15 = vld [vmem:[%s12139_s22 + $0x17f4] sm:$0xf0] }
 0x26e   : > { %5992 = vmatpush.bf16.msra.mxu2 %v9798_v54  ;;  %v11636_v54 = vld [vmem:[%s12139_s22 + $0x15f4] sm:$0xf0]  ;;  %v10517_v9 = vld [vmem:[%s12139_s22 + $0x17e8] sm:$0xf]  ;;  %v10390_v18 = vor.u32 %v11668_v30, %v10389_v11 }
 0x26f   : > { %6006 = vmatpush.bf16.msra.mxu3 %v9926_v37  ;;  %v9638_v37 = vor.u32 %v11480_v0, %v9637_v19  ;;  %v10262_v2 = vor.u32 %v11636_v54, %v10261_v49  ;;  %v10117_v3 = vld [vmem:[%s12139_s22 + $0x14c8] sm:$0xf]  ;;  %v11664_v0 = vld [vmem:[%s12139_s22 + $0x16d4] sm:$0xf0] }
 0x270   : > { %5965 = vmatpush.bf16.msra.mxu0 %v9526_v20  ;;  %v10134_v20 = vor.u32 %v11604_v8, %v10133_v62  ;;  %v10373_v19 = vld [vmem:[%s12139_s22 + $0x16c8] sm:$0xf]  ;;  %v10118_v23 = vor.u32 %v11600_v50, %v10117_v3  ;;  %v11596_v8 = vld [vmem:[%s12139_s22 + $0x14b4] sm:$0xf0] }
 0x271   : > { %5979 = vmatpush.bf16.msra.mxu1 %v9654_v57  ;;  %v10518_v57 = vor.u32 %v11700_v15, %v10517_v9  ;;  %v10501_v12 = vld [vmem:[%s12139_s22 + $0x17c8] sm:$0xf]  ;;  %v10374_v28 = vor.u32 %v11664_v0, %v10373_v19  ;;  %v11628_v54 = vld [vmem:[%s12139_s22 + $0x15b4] sm:$0xf0] }
 0x272   : > { %5993 = vmatpush.bf16.msra.mxu2 %v9782_v25  ;;  %v11632_v25 = vld [vmem:[%s12139_s22 + $0x15d4] sm:$0xf0]  ;;  %v10101_v62 = vld [vmem:[%s12139_s22 + $0x14a8] sm:$0xf] }
 0x273   : > { %6007 = vmatpush.bf16.msra.mxu3 %v9910_v29  ;;  %v11696_v29 = vld [vmem:[%s12139_s22 + $0x17d4] sm:$0xf0]  ;;  %v10246_v59 = vor.u32 %v11632_v25, %v10245_v27  ;;  %v10229_v49 = vld [vmem:[%s12139_s22 + $0x15a8] sm:$0xf]  ;;  %v10102_v3 = vor.u32 %v11596_v8, %v10101_v62 }
 0x274   : > { %5966 = vmatpush.bf16.msra.mxu0 %v9510_v22  ;;  %v10502_v22 = vor.u32 %v11696_v29, %v10501_v12  ;;  %v10357_v11 = vld [vmem:[%s12139_s22 + $0x16a8] sm:$0xf]  ;;  %v11660_v30 = vld [vmem:[%s12139_s22 + $0x16b4] sm:$0xf0] }
 0x275   : > { %5980 = vmatpush.bf16.msra.mxu1 %v9638_v37  ;;  %v10485_v27 = vld [vmem:[%s12139_s22 + $0x17a8] sm:$0xf]  ;;  %v11692_v50 = vld [vmem:[%s12139_s22 + $0x17b4] sm:$0xf0]  ;;  %v10230_v37 = vor.u32 %v11628_v54, %v10229_v49 }
 0x276   : > { %5994 = vmatpush.bf16.msra.mxu2 %v9766_v16  ;;  %v10358_v16 = vor.u32 %v11660_v30, %v10357_v11  ;;  %v10085_v9 = vld [vmem:[%s12139_s22 + $0x1488] sm:$0xf]  ;;  %v11592_v15 = vld [vmem:[%s12139_s22 + $0x1494] sm:$0xf0] }
 0x277   : > { %6008 = vmatpush.bf16.msra.mxu3 %v9894_v7  ;;  %5967 = vmatmul.bf16.vlgmr.msra.gmra.mxu0 %v12652_v51  ;;  %v10213_v7 = vld [vmem:[%s12139_s22 + $0x1588] sm:$0xf]  ;;  %v11688_v19 = vld [vmem:[%s12139_s22 + $0x1794] sm:$0xf0]  ;;  %v10086_v0 = vor.u32 %v11592_v15, %v10085_v9 }
 0x278   : > { %6015 = vmatpush.bf16.msrb.mxu0 %v10134_v20  ;;  %5981 = vmatmul.bf16.vlgmr.msra.gmra.mxu1 %v12659_v56  ;;  %v10486_v20 = vor.u32 %v11692_v50, %v10485_v27  ;;  %v10469_v25 = vld [vmem:[%s12139_s22 + $0x1788] sm:$0xf]  ;;  %v11620_v8 = vld [vmem:[%s12139_s22 + $0x1574] sm:$0xf0] }
 0x279   : > { %6029 = vmatpush.bf16.msrb.mxu1 %v10262_v2  ;;  %5995 = vmatmul.bf16.vlgmr.msra.gmra.mxu2 %v12657_v55  ;;  %v11624_v2 = vld [vmem:[%s12139_s22 + $0x1594] sm:$0xf0]  ;;  %v10470_v62 = vor.u32 %v11688_v19, %v10469_v25  ;;  %v10325_v49 = vld [vmem:[%s12139_s22 + $0x1668] sm:$0xf] }
 0x27a   : > { %6043 = vmatpush.bf16.msrb.mxu2 %v10390_v18  ;;  %6009 = vmatmul.bf16.vlgmr.msra.gmra.mxu3 %v12663_v60  ;;  %v10341_v18 = vld [vmem:[%s12139_s22 + $0x1688] sm:$0xf]  ;;  %v10214_v12 = vor.u32 %v11624_v2, %v10213_v7  ;;  %v11684_v11 = vld [vmem:[%s12139_s22 + $0x1774] sm:$0xf0] }
 0x27b   : > { %6057 = vmatpush.bf16.msrb.mxu3 %v10518_v57  ;;  %v11656_v57 = vld [vmem:[%s12139_s22 + $0x1694] sm:$0xf0]  ;;  %v10453_v54 = vld [vmem:[%s12139_s22 + $0x1768] sm:$0xf] }
 0x27c   : > { %6016 = vmatpush.bf16.msrb.mxu0 %v10118_v23  ;;  %v10342_v29 = vor.u32 %v11656_v57, %v10341_v18  ;;  %v10069_v23 = vld [vmem:[%s12139_s22 + $0x1468] sm:$0xf]  ;;  %v10454_v9 = vor.u32 %v11684_v11, %v10453_v54  ;;  %v11616_v15 = vld [vmem:[%s12139_s22 + $0x1554] sm:$0xf0] }
 0x27d   : > { %6030 = vmatpush.bf16.msrb.mxu1 %v10246_v59  ;;  %v11588_v59 = vld [vmem:[%s12139_s22 + $0x1474] sm:$0xf0]  ;;  %v10309_v7 = vld [vmem:[%s12139_s22 + $0x1648] sm:$0xf] }
 0x27e   : > { %6044 = vmatpush.bf16.msrb.mxu2 %v10374_v28  ;;  %v10197_v28 = vld [vmem:[%s12139_s22 + $0x1568] sm:$0xf]  ;;  %v10070_v30 = vor.u32 %v11588_v59, %v10069_v23  ;;  %v11680_v18 = vld [vmem:[%s12139_s22 + $0x1754] sm:$0xf0] }
 0x27f   : > { %6058 = vmatpush.bf16.msrb.mxu3 %v10502_v22  ;;  %v11652_v22 = vld [vmem:[%s12139_s22 + $0x1674] sm:$0xf0]  ;;  %v10198_v27 = vor.u32 %v11620_v8, %v10197_v28  ;;  %v10437_v2 = vld [vmem:[%s12139_s22 + $0x1748] sm:$0xf] }
 0x280   : > { %6017 = vmatpush.bf16.msrb.mxu0 %v10102_v3  ;;  %v10326_v50 = vor.u32 %v11652_v22, %v10325_v49  ;;  %v10053_v3 = vld [vmem:[%s12139_s22 + $0x1448] sm:$0xf]  ;;  %v10438_v23 = vor.u32 %v11680_v18, %v10437_v2  ;;  %v11612_v59 = vld [vmem:[%s12139_s22 + $0x1534] sm:$0xf0]  ;;  %v7575_v2 = vld [vmem:[%s12139_s22 + $0xf8] sm:$0xf0] }
 0x281   : > { %6031 = vmatpush.bf16.msrb.mxu1 %v10230_v37  ;;  %v11584_v37 = vld [vmem:[%s12139_s22 + $0x1454] sm:$0xf0]  ;;  %v10293_v28 = vld [vmem:[%s12139_s22 + $0x1628] sm:$0xf]  ;;  %v10994_v18 = vld [vmem:[%s12139_s22 + $0x1ec] sm:$0xf] }
 0x282   : > { %6045 = vmatpush.bf16.msrb.mxu2 %v10358_v16  ;;  %v10181_v16 = vld [vmem:[%s12139_s22 + $0x1548] sm:$0xf]  ;;  %v10054_v57 = vor.u32 %v11584_v37, %v10053_v3  ;;  %v11676_v49 = vld [vmem:[%s12139_s22 + $0x1734] sm:$0xf0] }
 0x283   : > { %6059 = vmatpush.bf16.msrb.mxu3 %v10486_v20  ;;  %v11648_v20 = vld [vmem:[%s12139_s22 + $0x1654] sm:$0xf0]  ;;  %v10182_v25 = vor.u32 %v11616_v15, %v10181_v16  ;;  %v10421_v8 = vld [vmem:[%s12139_s22 + $0x1728] sm:$0xf] }
 0x284   : > { %6018 = vmatpush.bf16.msrb.mxu0 %v10086_v0  ;;  %v10310_v19 = vor.u32 %v11648_v20, %v10309_v7  ;;  %v10037_v0 = vld [vmem:[%s12139_s22 + $0x1428] sm:$0xf]  ;;  %v11576_v11 = vld [vmem:[%s12139_s22 + $0x1414] sm:$0xf0]  ;;  %v10422_v16 = vor.u32 %v11676_v49, %v10421_v8  ;;  %v10962_v20 = vld [vmem:[%s12139_s22 + $0xec] sm:$0xf] }
 0x285   : > { %6032 = vmatpush.bf16.msrb.mxu1 %v10214_v12  ;;  %v11580_v12 = vld [vmem:[%s12139_s22 + $0x1434] sm:$0xf0]  ;;  %v10021_v54 = vld [vmem:[%s12139_s22 + $0x1408] sm:$0xf] }
 0x286   : > { %6046 = vmatpush.bf16.msrb.mxu2 %v10342_v29  ;;  %v10165_v29 = vld [vmem:[%s12139_s22 + $0x1528] sm:$0xf]  ;;  %v10038_v22 = vor.u32 %v11580_v12, %v10037_v0  ;;  %v11608_v3 = vld [vmem:[%s12139_s22 + $0x1514] sm:$0xf0]  ;;  %v7831_v0 = vld [vmem:[%s12139_s22 + $0x2f8] sm:$0xf0] }
 0x287   : > { %6060 = vmatpush.bf16.msrb.mxu3 %v10470_v62  ;;  %v11644_v62 = vld [vmem:[%s12139_s22 + $0x1634] sm:$0xf0]  ;;  %v10277_v37 = vld [vmem:[%s12139_s22 + $0x1608] sm:$0xf] }
 0x288   : > { %6019 = vmatpush.bf16.msrb.mxu0 %v10070_v30  ;;  %v10166_v30 = vor.u32 %v11612_v59, %v10165_v29  ;;  %v10405_v15 = vld [vmem:[%s12139_s22 + $0x1708] sm:$0xf]  ;;  %v11672_v7 = vld [vmem:[%s12139_s22 + $0x1714] sm:$0xf0]  ;;  %v7959_v59 = vld [vmem:[%s12139_s22 + $0x3f8] sm:$0xf0] }
 0x289   : > { %6033 = vmatpush.bf16.msrb.mxu1 %v10198_v27  ;;  %v10294_v27 = vor.u32 %v11644_v62, %v10293_v28  ;;  %v10406_v28 = vor.u32 %v11672_v7, %v10405_v15  ;;  %v7578_v62 = vor.u32 %v10962_v20, %v7575_v2  ;;  %v10954_v20 = vld [vmem:[%s12139_s22 + $0xac] sm:$0xf]  ;;  %v7543_v2 = vld [vmem:[%s12139_s22 + $0xb8] sm:$0xf0] }
 0x28a   : > { %6047 = vmatpush.bf16.msrb.mxu2 %v10326_v50  ;;  %v10149_v50 = vld [vmem:[%s12139_s22 + $0x1508] sm:$0xf] }
 0x28b   : > { %6061 = vmatpush.bf16.msrb.mxu3 %v10454_v9  ;;  %v11640_v9 = vld [vmem:[%s12139_s22 + $0x1614] sm:$0xf0]  ;;  %v10150_v12 = vor.u32 %v11608_v3, %v10149_v50  ;;  %v11022_v50 = vld [vmem:[%s12139_s22 + $0x2cc] sm:$0xf]  ;;  %v7815_v3 = vld [vmem:[%s12139_s22 + $0x2d8] sm:$0xf0] }
 0x28c   : > { %6020 = vmatpush.bf16.msrb.mxu0 %v10054_v57  ;;  %v10022_v57 = vor.u32 %v11576_v11, %v10021_v54  ;;  %v10278_v29 = vor.u32 %v11640_v9, %v10277_v37  ;;  %v7559_v54 = vld [vmem:[%s12139_s22 + $0xd8] sm:$0xf0]  ;;  %v10990_v11 = vld [vmem:[%s12139_s22 + $0x1cc] sm:$0xf]  ;;  %v7818_v7 = vor.u32 %v11022_v50, %v7815_v3 }
 0x28d   : > { %6034 = vmatpush.bf16.msrb.mxu1 %v10182_v25  ;;  %v7703_v25 = vld [vmem:[%s12139_s22 + $0x1f8] sm:$0xf0]  ;;  %v11054_v37 = vld [vmem:[%s12139_s22 + $0x3cc] sm:$0xf] }
 0x28e   : > { %6048 = vmatpush.bf16.msrb.mxu2 %v10310_v19  ;;  %v11026_v19 = vld [vmem:[%s12139_s22 + $0x2ec] sm:$0xf]  ;;  %v7706_v8 = vor.u32 %v10994_v18, %v7703_v25  ;;  %v7671_v25 = vld [vmem:[%s12139_s22 + $0x1b8] sm:$0xf0] }
 0x28f   : > { %6062 = vmatpush.bf16.msrb.mxu3 %v10438_v23  ;;  %v11058_v23 = vld [vmem:[%s12139_s22 + $0x3ec] sm:$0xf]  ;;  %v7834_v49 = vor.u32 %v11026_v19, %v7831_v0  ;;  %v7799_v0 = vld [vmem:[%s12139_s22 + $0x2b8] sm:$0xf0] }
 0x290   : > { %6021 = vmatpush.bf16.msrb.mxu0 %v10038_v22  ;;  %v10958_v22 = vld [vmem:[%s12139_s22 + $0xcc] sm:$0xf]  ;;  %v7911_v50 = vld [vmem:[%s12139_s22 + $0x398] sm:$0xf0] }
 0x291   : > { %6035 = vmatpush.bf16.msrb.mxu1 %v10166_v30  ;;  %v7962_v30 = vor.u32 %v11058_v23, %v7959_v59  ;;  %v7562_v9 = vor.u32 %v10958_v22, %v7559_v54  ;;  %v10986_v18 = vld [vmem:[%s12139_s22 + $0x1ac] sm:$0xf]  ;;  %v7546_v23 = vor.u32 %v10954_v20, %v7543_v2  ;;  %v7655_v54 = vld [vmem:[%s12139_s22 + $0x198] sm:$0xf0] }
 0x292   : > { %6049 = vmatpush.bf16.msrb.mxu2 %v10294_v27  ;;  %v7687_v27 = vld [vmem:[%s12139_s22 + $0x1d8] sm:$0xf0]  ;;  %v11018_v19 = vld [vmem:[%s12139_s22 + $0x2ac] sm:$0xf]  ;;  %v7674_v59 = vor.u32 %v10986_v18, %v7671_v25 }
 0x293   : > { %6063 = vmatpush.bf16.msrb.mxu3 %v10422_v16  ;;  %v7943_v16 = vld [vmem:[%s12139_s22 + $0x3d8] sm:$0xf0]  ;;  %v7690_v15 = vor.u32 %v10990_v11, %v7687_v27  ;;  %v11014_v11 = vld [vmem:[%s12139_s22 + $0x28c] sm:$0xf] }
 0x294   : > { %6022 = vmatpush.bf16.msrb.mxu0 %v10022_v57  ;;  %v7946_v57 = vor.u32 %v11054_v37, %v7943_v16  ;;  %v11046_v27 = vld [vmem:[%s12139_s22 + $0x38c] sm:$0xf]  ;;  %v7639_v2 = vld [vmem:[%s12139_s22 + $0x178] sm:$0xf0] }
 0x295   : > { %6036 = vmatpush.bf16.msrb.mxu1 %v10150_v12  ;;  %v11050_v12 = vld [vmem:[%s12139_s22 + $0x3ac] sm:$0xf]  ;;  %v7914_v20 = vor.u32 %v11046_v27, %v7911_v50 }
 0x296   : > { %6050 = vmatpush.bf16.msrb.mxu2 %v10278_v29  ;;  %v7927_v29 = vld [vmem:[%s12139_s22 + $0x3b8] sm:$0xf0]  ;;  %v11010_v18 = vld [vmem:[%s12139_s22 + $0x26c] sm:$0xf] }
 0x297   : > { %6064 = vmatpush.bf16.msrb.mxu3 %v10406_v28  ;;  %6023 = vmatmul.bf16.vlgmr.msrb.gmra.mxu0 %v12762_v26  ;;  %v7802_v28 = vor.u32 %v11018_v19, %v7799_v0  ;;  %v7930_v22 = vor.u32 %v11050_v12, %v7927_v29  ;;  %v11042_v25 = vld [vmem:[%s12139_s22 + $0x36c] sm:$0xf]  ;;  %v7895_v19 = vld [vmem:[%s12139_s22 + $0x378] sm:$0xf0] }
 0x298   : > { %6071 = vmatpush.bf16.msra.mxu0 %v7578_v62  ;;  %6037 = vmatmul.bf16.vlgmr.msrb.gmra.mxu1 %v12769_v34  ;;  %v10950_v62 = vld [vmem:[%s12139_s22 + $0x8c] sm:$0xf] }
 0x299   : > { %6085 = vmatpush.bf16.msra.mxu1 %v7706_v8  ;;  %6051 = vmatmul.bf16.vlgmr.msrb.gmra.mxu2 %v12767_v33  ;;  %v7527_v8 = vld [vmem:[%s12139_s22 + $0x98] sm:$0xf0] }
 0x29a   : > { %6099 = vmatpush.bf16.msra.mxu2 %v7834_v49  ;;  %6065 = vmatmul.bf16.vlgmr.msrb.gmra.mxu3 %v12775_v48  ;;  %v10982_v49 = vld [vmem:[%s12139_s22 + $0x18c] sm:$0xf]  ;;  %v7530_v3 = vor.u32 %v10950_v62, %v7527_v8  ;;  %v7898_v62 = vor.u32 %v11042_v25, %v7895_v19  ;;  %v7623_v8 = vld [vmem:[%s12139_s22 + $0x158] sm:$0xf0] }
 0x29b   : > { %6113 = vmatpush.bf16.msra.mxu3 %v7962_v30  ;;  %v7783_v30 = vld [vmem:[%s12139_s22 + $0x298] sm:$0xf0]  ;;  %v7658_v37 = vor.u32 %v10982_v49, %v7655_v54  ;;  %v11006_v49 = vld [vmem:[%s12139_s22 + $0x24c] sm:$0xf] }
 0x29c   : > { %6072 = vmatpush.bf16.msra.mxu0 %v7562_v9  ;;  %v7786_v16 = vor.u32 %v11014_v11, %v7783_v30  ;;  %v10946_v9 = vld [vmem:[%s12139_s22 + $0x6c] sm:$0xf]  ;;  %v7879_v11 = vld [vmem:[%s12139_s22 + $0x358] sm:$0xf0] }
 0x29d   : > { %6086 = vmatpush.bf16.msra.mxu1 %v7690_v15  ;;  %v7511_v15 = vld [vmem:[%s12139_s22 + $0x78] sm:$0xf0]  ;;  %v11038_v54 = vld [vmem:[%s12139_s22 + $0x34c] sm:$0xf] }
 0x29e   : > { %6100 = vmatpush.bf16.msra.mxu2 %v7818_v7  ;;  %v10978_v7 = vld [vmem:[%s12139_s22 + $0x16c] sm:$0xf]  ;;  %v7514_v0 = vor.u32 %v10946_v9, %v7511_v15  ;;  %v7882_v9 = vor.u32 %v11038_v54, %v7879_v11  ;;  %v7607_v15 = vld [vmem:[%s12139_s22 + $0x138] sm:$0xf0] }
 0x29f   : > { %6114 = vmatpush.bf16.msra.mxu3 %v7946_v57  ;;  %v7767_v57 = vld [vmem:[%s12139_s22 + $0x278] sm:$0xf0]  ;;  %v7642_v12 = vor.u32 %v10978_v7, %v7639_v2  ;;  %v11002_v7 = vld [vmem:[%s12139_s22 + $0x22c] sm:$0xf] }
 0x2a0   : > { %6073 = vmatpush.bf16.msra.mxu0 %v7546_v23  ;;  %v7770_v29 = vor.u32 %v11010_v18, %v7767_v57  ;;  %v10942_v23 = vld [vmem:[%s12139_s22 + $0x4c] sm:$0xf]  ;;  %v7863_v18 = vld [vmem:[%s12139_s22 + $0x338] sm:$0xf0] }
 0x2a1   : > { %6087 = vmatpush.bf16.msra.mxu1 %v7674_v59  ;;  %v7495_v59 = vld [vmem:[%s12139_s22 + $0x58] sm:$0xf0]  ;;  %v11034_v2 = vld [vmem:[%s12139_s22 + $0x32c] sm:$0xf] }
 0x2a2   : > { %6101 = vmatpush.bf16.msra.mxu2 %v7802_v28  ;;  %v10974_v28 = vld [vmem:[%s12139_s22 + $0x14c] sm:$0xf]  ;;  %v7498_v30 = vor.u32 %v10942_v23, %v7495_v59  ;;  %v7463_v19 = vld [vmem:[%s12139_s22 + $0x18] sm:$0xf0] }
 0x2a3   : > { %6115 = vmatpush.bf16.msra.mxu3 %v7930_v22  ;;  %v7751_v22 = vld [vmem:[%s12139_s22 + $0x258] sm:$0xf0]  ;;  %v7626_v27 = vor.u32 %v10974_v28, %v7623_v8  ;;  %v10934_v25 = vld [vmem:[%s12139_s22 + $0xc] sm:$0xf]  ;;  %v7866_v28 = vor.u32 %v11034_v2, %v7863_v18 }
 0x2a4   : > { %6074 = vmatpush.bf16.msra.mxu0 %v7530_v3  ;;  %v7754_v50 = vor.u32 %v11006_v49, %v7751_v22  ;;  %v10938_v3 = vld [vmem:[%s12139_s22 + $0x2c] sm:$0xf]  ;;  %v7591_v23 = vld [vmem:[%s12139_s22 + $0x118] sm:$0xf0] }
 0x2a5   : > { %6088 = vmatpush.bf16.msra.mxu1 %v7658_v37  ;;  %v7479_v37 = vld [vmem:[%s12139_s22 + $0x38] sm:$0xf0]  ;;  %v10998_v59 = vld [vmem:[%s12139_s22 + $0x20c] sm:$0xf] }
 0x2a6   : > { %6102 = vmatpush.bf16.msra.mxu2 %v7786_v16  ;;  %v10970_v16 = vld [vmem:[%s12139_s22 + $0x12c] sm:$0xf]  ;;  %v7482_v57 = vor.u32 %v10938_v3, %v7479_v37  ;;  %v7847_v49 = vld [vmem:[%s12139_s22 + $0x318] sm:$0xf0] }
 0x2a7   : > { %6116 = vmatpush.bf16.msra.mxu3 %v7914_v20  ;;  %v7735_v20 = vld [vmem:[%s12139_s22 + $0x238] sm:$0xf0]  ;;  %v11030_v8 = vld [vmem:[%s12139_s22 + $0x30c] sm:$0xf] }
 0x2a8   : > { %6075 = vmatpush.bf16.msra.mxu0 %v7514_v0  ;;  %v7610_v0 = vor.u32 %v10970_v16, %v7607_v15  ;;  %v11090_v22 = vld [vmem:[%s12139_s22 + $0x4ec] sm:$0xf]  ;;  %v8087_v54 = vld [vmem:[%s12139_s22 + $0x4f8] sm:$0xf0] }
 0x2a9   : > { %6089 = vmatpush.bf16.msra.mxu1 %v7642_v12  ;;  %v7738_v12 = vor.u32 %v11002_v7, %v7735_v20  ;;  %v11122_v11 = vld [vmem:[%s12139_s22 + $0x5ec] sm:$0xf]  ;;  %v8343_v3 = vld [vmem:[%s12139_s22 + $0x6f8] sm:$0xf0]  ;;  %v7850_v7 = vor.u32 %v11030_v8, %v7847_v49  ;;  %v8090_v20 = vor.u32 %v11090_v22, %v8087_v54 }
 0x2aa   : > { %6103 = vmatpush.bf16.msra.mxu2 %v7770_v29  ;;  %v10966_v29 = vld [vmem:[%s12139_s22 + $0x10c] sm:$0xf]  ;;  %v8471_v15 = vld [vmem:[%s12139_s22 + $0x7f8] sm:$0xf0] }
 0x2ab   : > { %6117 = vmatpush.bf16.msra.mxu3 %v7898_v62  ;;  %v7719_v62 = vld [vmem:[%s12139_s22 + $0x218] sm:$0xf0]  ;;  %v7594_v37 = vor.u32 %v10966_v29, %v7591_v23  ;;  %v11150_v29 = vld [vmem:[%s12139_s22 + $0x6cc] sm:$0xf] }
 0x2ac   : > { %6076 = vmatpush.bf16.msra.mxu0 %v7498_v30  ;;  %v7466_v30 = vor.u32 %v10934_v25, %v7463_v19  ;;  %v7722_v16 = vor.u32 %v10998_v59, %v7719_v62  ;;  %v8071_v25 = vld [vmem:[%s12139_s22 + $0x4d8] sm:$0xf0]  ;;  %v11118_v19 = vld [vmem:[%s12139_s22 + $0x5cc] sm:$0xf] }
 0x2ad   : > { %6090 = vmatpush.bf16.msra.mxu1 %v7626_v27  ;;  %v8215_v27 = vld [vmem:[%s12139_s22 + $0x5f8] sm:$0xf0]  ;;  %v11182_v59 = vld [vmem:[%s12139_s22 + $0x7cc] sm:$0xf] }
 0x2ae   : > { %6104 = vmatpush.bf16.msra.mxu2 %v7754_v50  ;;  %v11154_v50 = vld [vmem:[%s12139_s22 + $0x6ec] sm:$0xf]  ;;  %v8218_v2 = vor.u32 %v11122_v11, %v8215_v27  ;;  %v8327_v23 = vld [vmem:[%s12139_s22 + $0x6d8] sm:$0xf0] }
 0x2af   : > { %6118 = vmatpush.bf16.msra.mxu3 %v7882_v9  ;;  %v11186_v9 = vld [vmem:[%s12139_s22 + $0x7ec] sm:$0xf]  ;;  %v8346_v18 = vor.u32 %v11154_v50, %v8343_v3  ;;  %v8330_v49 = vor.u32 %v11150_v29, %v8327_v23  ;;  %v8055_v54 = vld [vmem:[%s12139_s22 + $0x4b8] sm:$0xf0] }
 0x2b0   : > { %6077 = vmatpush.bf16.msra.mxu0 %v7482_v57  ;;  %v11086_v57 = vld [vmem:[%s12139_s22 + $0x4cc] sm:$0xf]  ;;  %v8183_v27 = vld [vmem:[%s12139_s22 + $0x5b8] sm:$0xf0] }
 0x2b1   : > { %6091 = vmatpush.bf16.msra.mxu1 %v7610_v0  ;;  %v8474_v0 = vor.u32 %v11186_v9, %v8471_v15  ;;  %v8074_v62 = vor.u32 %v11086_v57, %v8071_v25  ;;  %v11082_v22 = vld [vmem:[%s12139_s22 + $0x4ac] sm:$0xf]  ;;  %v8311_v3 = vld [vmem:[%s12139_s22 + $0x6b8] sm:$0xf0] }
 0x2b2   : > { %6105 = vmatpush.bf16.msra.mxu2 %v7738_v12  ;;  %v8199_v12 = vld [vmem:[%s12139_s22 + $0x5d8] sm:$0xf0]  ;;  %v11114_v11 = vld [vmem:[%s12139_s22 + $0x5ac] sm:$0xf]  ;;  %v8058_v9 = vor.u32 %v11082_v22, %v8055_v54 }
 0x2b3   : > { %6119 = vmatpush.bf16.msra.mxu3 %v7866_v28  ;;  %v8455_v28 = vld [vmem:[%s12139_s22 + $0x7d8] sm:$0xf0]  ;;  %v8202_v8 = vor.u32 %v11118_v19, %v8199_v12  ;;  %v11146_v50 = vld [vmem:[%s12139_s22 + $0x6ac] sm:$0xf]  ;;  %v8186_v15 = vor.u32 %v11114_v11, %v8183_v27 }
 0x2b4   : > { %6078 = vmatpush.bf16.msra.mxu0 %v7466_v30  ;;  %v8458_v30 = vor.u32 %v11182_v59, %v8455_v28  ;;  %v8295_v57 = vld [vmem:[%s12139_s22 + $0x698] sm:$0xf0]  ;;  %v11174_v25 = vld [vmem:[%s12139_s22 + $0x78c] sm:$0xf] }
 0x2b5   : > { %6092 = vmatpush.bf16.msra.mxu1 %v7594_v37  ;;  %v11178_v37 = vld [vmem:[%s12139_s22 + $0x7ac] sm:$0xf]  ;;  %v8023_v23 = vld [vmem:[%s12139_s22 + $0x478] sm:$0xf0] }
 0x2b6   : > { %6106 = vmatpush.bf16.msra.mxu2 %v7722_v16  ;;  %v8439_v16 = vld [vmem:[%s12139_s22 + $0x7b8] sm:$0xf0]  ;;  %v11074_v29 = vld [vmem:[%s12139_s22 + $0x46c] sm:$0xf] }
 0x2b7   : > { %6120 = vmatpush.bf16.msra.mxu3 %v7850_v7  ;;  %6079 = vmatmul.bf16.vlgmr.msra.gmra.mxu0 %v12244_v58  ;;  %v8314_v7 = vor.u32 %v11146_v50, %v8311_v3  ;;  %v11078_v58 = vld [vmem:[%s12139_s22 + $0x48c] sm:$0xf]  ;;  %v8407_v54 = vld [vmem:[%s12139_s22 + $0x778] sm:$0xf0]  ;;  %v8026_v11 = vor.u32 %v11074_v29, %v8023_v23 }
 0x2b8   : > { %6127 = vmatpush.bf16.msrb.mxu0 %v8090_v20  ;;  %6093 = vmatmul.bf16.vlgmr.msra.gmra.mxu1 %v12268_v10  ;;  %v8039_v20 = vld [vmem:[%s12139_s22 + $0x498] sm:$0xf0]  ;;  %v11142_v10 = vld [vmem:[%s12139_s22 + $0x68c] sm:$0xf] }
 0x2b9   : > { %6141 = vmatpush.bf16.msrb.mxu1 %v8218_v2  ;;  %6107 = vmatmul.bf16.vlgmr.msra.gmra.mxu2 %v12252_v1  ;;  %v11110_v2 = vld [vmem:[%s12139_s22 + $0x58c] sm:$0xf]  ;;  %v8442_v1 = vor.u32 %v11178_v37, %v8439_v16  ;;  %v8042_v19 = vor.u32 %v11078_v58, %v8039_v20  ;;  %v8298_v12 = vor.u32 %v11142_v10, %v8295_v57  ;;  %v8007_v3 = vld [vmem:[%s12139_s22 + $0x458] sm:$0xf0] }
 0x2ba   : > { %6155 = vmatpush.bf16.msrb.mxu2 %v8346_v18  ;;  %6121 = vmatmul.bf16.vlgmr.msra.gmra.mxu3 %v12276_v17  ;;  %v8167_v18 = vld [vmem:[%s12139_s22 + $0x598] sm:$0xf0]  ;;  %v11106_v59 = vld [vmem:[%s12139_s22 + $0x56c] sm:$0xf] }
 0x2bb   : > { %6169 = vmatpush.bf16.msrb.mxu3 %v8474_v0  ;;  %v8423_v17 = vld [vmem:[%s12139_s22 + $0x798] sm:$0xf0]  ;;  %v8170_v0 = vor.u32 %v11110_v2, %v8167_v18  ;;  %v11170_v22 = vld [vmem:[%s12139_s22 + $0x76c] sm:$0xf] }
 0x2bc   : > { %6128 = vmatpush.bf16.msrb.mxu0 %v8074_v62  ;;  %v8426_v28 = vor.u32 %v11174_v25, %v8423_v17  ;;  %v8151_v62 = vld [vmem:[%s12139_s22 + $0x578] sm:$0xf0]  ;;  %v11070_v50 = vld [vmem:[%s12139_s22 + $0x44c] sm:$0xf]  ;;  %v8410_v16 = vor.u32 %v11170_v22, %v8407_v54 }
 0x2bd   : > { %6142 = vmatpush.bf16.msrb.mxu1 %v8202_v8  ;;  %v11138_v8 = vld [vmem:[%s12139_s22 + $0x66c] sm:$0xf]  ;;  %v8391_v20 = vld [vmem:[%s12139_s22 + $0x758] sm:$0xf0]  ;;  %v8010_v2 = vor.u32 %v11070_v50, %v8007_v3 }
 0x2be   : > { %6156 = vmatpush.bf16.msrb.mxu2 %v8330_v49  ;;  %v8279_v49 = vld [vmem:[%s12139_s22 + $0x678] sm:$0xf0]  ;;  %v11102_v37 = vld [vmem:[%s12139_s22 + $0x54c] sm:$0xf] }
 0x2bf   : > { %6170 = vmatpush.bf16.msrb.mxu3 %v8458_v30  ;;  %v8154_v30 = vor.u32 %v11106_v59, %v8151_v62  ;;  %v8282_v27 = vor.u32 %v11138_v8, %v8279_v49  ;;  %v11166_v58 = vld [vmem:[%s12139_s22 + $0x74c] sm:$0xf]  ;;  %v7991_v57 = vld [vmem:[%s12139_s22 + $0x438] sm:$0xf0] }
 0x2c0   : > { %6129 = vmatpush.bf16.msrb.mxu0 %v8058_v9  ;;  %v8135_v9 = vld [vmem:[%s12139_s22 + $0x558] sm:$0xf0]  ;;  %v11066_v10 = vld [vmem:[%s12139_s22 + $0x42c] sm:$0xf]  ;;  %v8394_v17 = vor.u32 %v11166_v58, %v8391_v20 }
 0x2c1   : > { %6143 = vmatpush.bf16.msrb.mxu1 %v8186_v15  ;;  %v11134_v15 = vld [vmem:[%s12139_s22 + $0x64c] sm:$0xf]  ;;  %v8375_v23 = vld [vmem:[%s12139_s22 + $0x738] sm:$0xf0]  ;;  %v7994_v59 = vor.u32 %v11066_v10, %v7991_v57 }
 0x2c2   : > { %6157 = vmatpush.bf16.msrb.mxu2 %v8314_v7  ;;  %v8263_v7 = vld [vmem:[%s12139_s22 + $0x658] sm:$0xf0]  ;;  %v11098_v25 = vld [vmem:[%s12139_s22 + $0x52c] sm:$0xf] }
 0x2c3   : > { %6171 = vmatpush.bf16.msrb.mxu3 %v8442_v1  ;;  %v8138_v1 = vor.u32 %v11102_v37, %v8135_v9  ;;  %v8266_v18 = vor.u32 %v11134_v15, %v8263_v7  ;;  %v11162_v29 = vld [vmem:[%s12139_s22 + $0x72c] sm:$0xf]  ;;  %v7975_v62 = vld [vmem:[%s12139_s22 + $0x418] sm:$0xf0] }
 0x2c4   : > { %6130 = vmatpush.bf16.msrb.mxu0 %v8042_v19  ;;  %v8119_v19 = vld [vmem:[%s12139_s22 + $0x538] sm:$0xf0]  ;;  %v11094_v22 = vld [vmem:[%s12139_s22 + $0x50c] sm:$0xf] }
 0x2c5   : > { %6144 = vmatpush.bf16.msrb.mxu1 %v8170_v0  ;;  %v11130_v0 = vld [vmem:[%s12139_s22 + $0x62c] sm:$0xf]  ;;  %v8122_v8 = vor.u32 %v11098_v25, %v8119_v19  ;;  %v8103_v54 = vld [vmem:[%s12139_s22 + $0x518] sm:$0xf0] }
 0x2c6   : > { %6158 = vmatpush.bf16.msrb.mxu2 %v8298_v12  ;;  %v8247_v12 = vld [vmem:[%s12139_s22 + $0x638] sm:$0xf0]  ;;  %v11158_v50 = vld [vmem:[%s12139_s22 + $0x70c] sm:$0xf] }
 0x2c7   : > { %6172 = vmatpush.bf16.msrb.mxu3 %v8426_v28  ;;  %v11062_v28 = vld [vmem:[%s12139_s22 + $0x40c] sm:$0xf]  ;;  %v8250_v49 = vor.u32 %v11130_v0, %v8247_v12  ;;  %v8359_v3 = vld [vmem:[%s12139_s22 + $0x718] sm:$0xf0] }
 0x2c8   : > { %6131 = vmatpush.bf16.msrb.mxu0 %v8026_v11  ;;  %v11126_v11 = vld [vmem:[%s12139_s22 + $0x60c] sm:$0xf]  ;;  %v7978_v15 = vor.u32 %v11062_v28, %v7975_v62  ;;  %v8727_v7 = vld [vmem:[%s12139_s22 + $0x9f8] sm:$0xf0]  ;;  %v8362_v57 = vor.u32 %v11158_v50, %v8359_v3 }
 0x2c9   : > { %6145 = vmatpush.bf16.msrb.mxu1 %v8154_v30  ;;  %v8378_v30 = vor.u32 %v11162_v29, %v8375_v23  ;;  %v11218_v37 = vld [vmem:[%s12139_s22 + $0x8ec] sm:$0xf]  ;;  %v8855_v20 = vld [vmem:[%s12139_s22 + $0xaf8] sm:$0xf0] }
 0x2ca   : > { %6159 = vmatpush.bf16.msrb.mxu2 %v8282_v27  ;;  %v8231_v27 = vld [vmem:[%s12139_s22 + $0x618] sm:$0xf0]  ;;  %v11250_v9 = vld [vmem:[%s12139_s22 + $0x9ec] sm:$0xf] }
 0x2cb   : > { %6173 = vmatpush.bf16.msrb.mxu3 %v8410_v16  ;;  %v8599_v16 = vld [vmem:[%s12139_s22 + $0x8f8] sm:$0xf0]  ;;  %v11282_v58 = vld [vmem:[%s12139_s22 + $0xaec] sm:$0xf] }
 0x2cc   : > { %6132 = vmatpush.bf16.msrb.mxu0 %v8010_v2  ;;  %v8106_v2 = vor.u32 %v11094_v22, %v8103_v54  ;;  %v8983_v10 = vld [vmem:[%s12139_s22 + $0xbf8] sm:$0xf0]  ;;  %v8602_v25 = vor.u32 %v11218_v37, %v8599_v16  ;;  %v8858_v19 = vor.u32 %v11282_v58, %v8855_v20  ;;  %v11214_v0 = vld [vmem:[%s12139_s22 + $0x8cc] sm:$0xf] }
 0x2cd   : > { %6146 = vmatpush.bf16.msrb.mxu1 %v8138_v1  ;;  %v8234_v1 = vor.u32 %v11126_v11, %v8231_v27  ;;  %v8583_v12 = vld [vmem:[%s12139_s22 + $0x8d8] sm:$0xf0]  ;;  %v11246_v29 = vld [vmem:[%s12139_s22 + $0x9cc] sm:$0xf] }
 0x2ce   : > { %6160 = vmatpush.bf16.msrb.mxu2 %v8266_v18  ;;  %v11314_v18 = vld [vmem:[%s12139_s22 + $0xbec] sm:$0xf]  ;;  %v8839_v62 = vld [vmem:[%s12139_s22 + $0xad8] sm:$0xf0]  ;;  %v8586_v22 = vor.u32 %v11214_v0, %v8583_v12 }
 0x2cf   : > { %6174 = vmatpush.bf16.msrb.mxu3 %v8394_v17  ;;  %v8730_v17 = vor.u32 %v11250_v9, %v8727_v7  ;;  %v8986_v23 = vor.u32 %v11314_v18, %v8983_v10  ;;  %v11278_v28 = vld [vmem:[%s12139_s22 + $0xacc] sm:$0xf]  ;;  %v8567_v27 = vld [vmem:[%s12139_s22 + $0x8b8] sm:$0xf0] }
 0x2d0   : > { %6133 = vmatpush.bf16.msrb.mxu0 %v7994_v59  ;;  %v8711_v59 = vld [vmem:[%s12139_s22 + $0x9d8] sm:$0xf0]  ;;  %v8842_v11 = vor.u32 %v11278_v28, %v8839_v62  ;;  %v11242_v50 = vld [vmem:[%s12139_s22 + $0x9ac] sm:$0xf] }
 0x2d1   : > { %6147 = vmatpush.bf16.msrb.mxu1 %v8122_v8  ;;  %v11310_v8 = vld [vmem:[%s12139_s22 + $0xbcc] sm:$0xf]  ;;  %v8714_v54 = vor.u32 %v11246_v29, %v8711_v59  ;;  %v8695_v37 = vld [vmem:[%s12139_s22 + $0x9b8] sm:$0xf0] }
 0x2d2   : > { %6161 = vmatpush.bf16.msrb.mxu2 %v8250_v49  ;;  %v8967_v49 = vld [vmem:[%s12139_s22 + $0xbd8] sm:$0xf0]  ;;  %v11274_v16 = vld [vmem:[%s12139_s22 + $0xaac] sm:$0xf]  ;;  %v8698_v58 = vor.u32 %v11242_v50, %v8695_v37 }
 0x2d3   : > { %6175 = vmatpush.bf16.msrb.mxu3 %v8378_v30  ;;  %v11210_v30 = vld [vmem:[%s12139_s22 + $0x8ac] sm:$0xf]  ;;  %v8970_v3 = vor.u32 %v11310_v8, %v8967_v49  ;;  %v8823_v9 = vld [vmem:[%s12139_s22 + $0xab8] sm:$0xf0] }
 0x2d4   : > { %6134 = vmatpush.bf16.msrb.mxu0 %v7978_v15  ;;  %v11306_v15 = vld [vmem:[%s12139_s22 + $0xbac] sm:$0xf]  ;;  %v8951_v7 = vld [vmem:[%s12139_s22 + $0xbb8] sm:$0xf0]  ;;  %v8826_v20 = vor.u32 %v11274_v16, %v8823_v9 }
 0x2d5   : > { %6148 = vmatpush.bf16.msrb.mxu1 %v8106_v2  ;;  %v11206_v2 = vld [vmem:[%s12139_s22 + $0x88c] sm:$0xf]  ;;  %v8679_v18 = vld [vmem:[%s12139_s22 + $0x998] sm:$0xf0] }
 0x2d6   : > { %6162 = vmatpush.bf16.msrb.mxu2 %v8234_v1  ;;  %v11238_v1 = vld [vmem:[%s12139_s22 + $0x98c] sm:$0xf]  ;;  %v8535_v29 = vld [vmem:[%s12139_s22 + $0x878] sm:$0xf0] }
 0x2d7   : > { %6176 = vmatpush.bf16.msrb.mxu3 %v8362_v57  ;;  %6135 = vmatmul.bf16.vlgmr.msrb.gmra.mxu0 %v12352_v39  ;;  %v8570_v39 = vor.u32 %v11210_v30, %v8567_v27  ;;  %v11270_v10 = vld [vmem:[%s12139_s22 + $0xa8c] sm:$0xf]  ;;  %v8663_v28 = vld [vmem:[%s12139_s22 + $0x978] sm:$0xf0] }
 0x2d8   : > { %6183 = vmatpush.bf16.msra.mxu0 %v8602_v25  ;;  %6149 = vmatmul.bf16.vlgmr.msrb.gmra.mxu1 %v12359_v44  ;;  %v8954_v44 = vor.u32 %v11306_v15, %v8951_v7  ;;  %v11302_v57 = vld [vmem:[%s12139_s22 + $0xb8c] sm:$0xf]  ;;  %v8935_v25 = vld [vmem:[%s12139_s22 + $0xb98] sm:$0xf0] }
 0x2d9   : > { %6197 = vmatpush.bf16.msra.mxu1 %v8730_v17  ;;  %6163 = vmatmul.bf16.vlgmr.msrb.gmra.mxu2 %v12357_v43  ;;  %v8551_v43 = vld [vmem:[%s12139_s22 + $0x898] sm:$0xf0]  ;;  %v11202_v12 = vld [vmem:[%s12139_s22 + $0x86c] sm:$0xf]  ;;  %v8938_v59 = vor.u32 %v11302_v57, %v8935_v25  ;;  %v13893_v25 = vpop.f32.mrf.mxu0 }
 0x2da   : > { %6211 = vmatpush.bf16.msra.mxu2 %v8858_v19  ;;  %6177 = vmatmul.bf16.vlgmr.msrb.gmra.mxu3 %v12363_v47  ;;  %v8807_v47 = vld [vmem:[%s12139_s22 + $0xa98] sm:$0xf0]  ;;  %v8554_v17 = vor.u32 %v11206_v2, %v8551_v43  ;;  %v8682_v19 = vor.u32 %v11238_v1, %v8679_v18  ;;  %v11266_v62 = vld [vmem:[%s12139_s22 + $0xa6c] sm:$0xf] }
 0x2db   : > { %6225 = vmatpush.bf16.msra.mxu3 %v8986_v23  ;;  %v8810_v0 = vor.u32 %v11270_v10, %v8807_v47  ;;  %v11234_v23 = vld [vmem:[%s12139_s22 + $0x96c] sm:$0xf]  ;;  %v8791_v8 = vld [vmem:[%s12139_s22 + $0xa78] sm:$0xf0] }
 0x2dc   : > { %6184 = vmatpush.bf16.msra.mxu0 %v8586_v22  ;;  %v11298_v49 = vld [vmem:[%s12139_s22 + $0xb6c] sm:$0xf]  ;;  %v8919_v22 = vld [vmem:[%s12139_s22 + $0xb78] sm:$0xf0]  ;;  %v8794_v30 = vor.u32 %v11266_v62, %v8791_v8 }
 0x2dd   : > { %6198 = vmatpush.bf16.msra.mxu1 %v8714_v54  ;;  %v8538_v54 = vor.u32 %v11202_v12, %v8535_v29  ;;  %v11198_v27 = vld [vmem:[%s12139_s22 + $0x84c] sm:$0xf]  ;;  %v8519_v50 = vld [vmem:[%s12139_s22 + $0x858] sm:$0xf0]  ;;  %v8922_v37 = vor.u32 %v11298_v49, %v8919_v22 }
 0x2de   : > { %6212 = vmatpush.bf16.msra.mxu2 %v8842_v11  ;;  %v8666_v11 = vor.u32 %v11234_v23, %v8663_v28  ;;  %v8647_v16 = vld [vmem:[%s12139_s22 + $0x958] sm:$0xf0]  ;;  %v11262_v9 = vld [vmem:[%s12139_s22 + $0xa4c] sm:$0xf] }
 0x2df   : > { %6226 = vmatpush.bf16.msra.mxu3 %v8970_v3  ;;  %v11230_v3 = vld [vmem:[%s12139_s22 + $0x94c] sm:$0xf]  ;;  %v8775_v15 = vld [vmem:[%s12139_s22 + $0xa58] sm:$0xf0] }
 0x2e0   : > { %6185 = vmatpush.bf16.msra.mxu0 %v8570_v39  ;;  %v11294_v7 = vld [vmem:[%s12139_s22 + $0xb4c] sm:$0xf]  ;;  %v8903_v39 = vld [vmem:[%s12139_s22 + $0xb58] sm:$0xf0]  ;;  %v8778_v2 = vor.u32 %v11262_v9, %v8775_v15 }
 0x2e1   : > { %6199 = vmatpush.bf16.msra.mxu1 %v8698_v58  ;;  %v8522_v58 = vor.u32 %v11198_v27, %v8519_v50  ;;  %v11194_v43 = vld [vmem:[%s12139_s22 + $0x82c] sm:$0xf]  ;;  %v8503_v1 = vld [vmem:[%s12139_s22 + $0x838] sm:$0xf0]  ;;  %v8906_v18 = vor.u32 %v11294_v7, %v8903_v39  ;;  %v13913_v7 = vpop.f32.mrf.mxu2 }
 0x2e2   : > { %6213 = vmatpush.bf16.msra.mxu2 %v8826_v20  ;;  %v8650_v20 = vor.u32 %v11230_v3, %v8647_v16  ;;  %v8631_v10 = vld [vmem:[%s12139_s22 + $0x938] sm:$0xf0]  ;;  %v11258_v47 = vld [vmem:[%s12139_s22 + $0xa2c] sm:$0xf]  ;;  %14638 = vst [vmem:[#allocation44_spill] sm:$0xff] %v13913_v7 }
 0x2e3   : > { %6227 = vmatpush.bf16.msra.mxu3 %v8954_v44  ;;  %v11226_v44 = vld [vmem:[%s12139_s22 + $0x92c] sm:$0xf]  ;;  %v8759_v57 = vld [vmem:[%s12139_s22 + $0xa38] sm:$0xf0] }
 0x2e4   : > { %6186 = vmatpush.bf16.msra.mxu0 %v8554_v17  ;;  %v11290_v17 = vld [vmem:[%s12139_s22 + $0xb2c] sm:$0xf]  ;;  %v8487_v29 = vld [vmem:[%s12139_s22 + $0x818] sm:$0xf0]  ;;  %v8634_v23 = vor.u32 %v11226_v44, %v8631_v10  ;;  %v13917_v44 = vpop.f32.mrf.mxu0 }
 0x2e5   : > { %6200 = vmatpush.bf16.msra.mxu1 %v8682_v19  ;;  %v8887_v19 = vld [vmem:[%s12139_s22 + $0xb38] sm:$0xf0]  ;;  %v11190_v12 = vld [vmem:[%s12139_s22 + $0x80c] sm:$0xf] }
 0x2e6   : > { %6214 = vmatpush.bf16.msra.mxu2 %v8810_v0  ;;  %v8506_v0 = vor.u32 %v11194_v43, %v8503_v1  ;;  %v11222_v28 = vld [vmem:[%s12139_s22 + $0x90c] sm:$0xf]  ;;  %v8615_v62 = vld [vmem:[%s12139_s22 + $0x918] sm:$0xf0]  ;;  %v8890_v49 = vor.u32 %v11290_v17, %v8887_v19 }
 0x2e7   : > { %6228 = vmatpush.bf16.msra.mxu3 %v8938_v59  ;;  %v8762_v59 = vor.u32 %v11258_v47, %v8759_v57  ;;  %v11254_v8 = vld [vmem:[%s12139_s22 + $0xa0c] sm:$0xf]  ;;  %v8743_v22 = vld [vmem:[%s12139_s22 + $0xa18] sm:$0xf0]  ;;  %v8618_v39 = vor.u32 %v11222_v28, %v8615_v62 }
 0x2e8   : > { %6187 = vmatpush.bf16.msra.mxu0 %v8538_v54  ;;  %v11286_v54 = vld [vmem:[%s12139_s22 + $0xb0c] sm:$0xf]  ;;  %v9111_v50 = vld [vmem:[%s12139_s22 + $0xcf8] sm:$0xf0] }
 0x2e9   : > { %6201 = vmatpush.bf16.msra.mxu1 %v8666_v11  ;;  %v8871_v11 = vld [vmem:[%s12139_s22 + $0xb18] sm:$0xf0]  ;;  %v11346_v27 = vld [vmem:[%s12139_s22 + $0xcec] sm:$0xf] }
 0x2ea   : > { %6215 = vmatpush.bf16.msra.mxu2 %v8794_v30  ;;  %v13905_v30 = vpop.f32.mrf.mxu1  ;;  %v11378_v3 = vld [vmem:[%s12139_s22 + $0xdec] sm:$0xf]  ;;  %v9239_v16 = vld [vmem:[%s12139_s22 + $0xdf8] sm:$0xf0]  ;;  %v8874_v43 = vor.u32 %v11286_v54, %v8871_v11  ;;  %v9114_v1 = vor.u32 %v11346_v27, %v9111_v50 }
 0x2eb   : > { %6229 = vmatpush.bf16.msra.mxu3 %v8922_v37  ;;  %v8490_v37 = vor.u32 %v11190_v12, %v8487_v29  ;;  %v11410_v9 = vld [vmem:[%s12139_s22 + $0xeec] sm:$0xf]  ;;  %v9367_v15 = vld [vmem:[%s12139_s22 + $0xef8] sm:$0xf0] }
 0x2ec   : > { %6188 = vmatpush.bf16.msra.mxu0 %v8522_v58  ;;  %v8746_v58 = vor.u32 %v11254_v8, %v8743_v22  ;;  %v9370_v10 = vor.u32 %v11410_v9, %v9367_v15  ;;  %v11342_v47 = vld [vmem:[%s12139_s22 + $0xccc] sm:$0xf]  ;;  %v9095_v57 = vld [vmem:[%s12139_s22 + $0xcd8] sm:$0xf0]  ;;  %v13938_v9 = vpop.f32.mrf.mxu2 }
 0x2ed   : > { %6202 = vmatpush.bf16.msra.mxu1 %v8650_v20  ;;  %v11442_v20 = vld [vmem:[%s12139_s22 + $0xfec] sm:$0xf]  ;;  %v9351_v29 = vld [vmem:[%s12139_s22 + $0xed8] sm:$0xf0]  ;;  %v9098_v62 = vor.u32 %v11342_v47, %v9095_v57 }
 0x2ee   : > { %6216 = vmatpush.bf16.msra.mxu2 %v8778_v2  ;;  %v9495_v2 = vld [vmem:[%s12139_s22 + $0xff8] sm:$0xf0]  ;;  %v11374_v17 = vld [vmem:[%s12139_s22 + $0xdcc] sm:$0xf] }
 0x2ef   : > { %6230 = vmatpush.bf16.msra.mxu3 %v8906_v18  ;;  %v9242_v18 = vor.u32 %v11378_v3, %v9239_v16  ;;  %v9498_v19 = vor.u32 %v11442_v20, %v9495_v2  ;;  %v11406_v12 = vld [vmem:[%s12139_s22 + $0xecc] sm:$0xf]  ;;  %v9479_v28 = vld [vmem:[%s12139_s22 + $0xfd8] sm:$0xf0] }
 0x2f0   : > { %6189 = vmatpush.bf16.msra.mxu0 %v8506_v0  ;;  %v9223_v0 = vld [vmem:[%s12139_s22 + $0xdd8] sm:$0xf0]  ;;  %v9354_v22 = vor.u32 %v11406_v12, %v9351_v29  ;;  %v11338_v54 = vld [vmem:[%s12139_s22 + $0xcac] sm:$0xf] }
 0x2f1   : > { %6203 = vmatpush.bf16.msra.mxu1 %v8634_v23  ;;  %v13925_v23 = vpop.f32.mrf.mxu3  ;;  %v9079_v11 = vld [vmem:[%s12139_s22 + $0xcb8] sm:$0xf0]  ;;  %v11370_v27 = vld [vmem:[%s12139_s22 + $0xdac] sm:$0xf] }
 0x2f2   : > { %6217 = vmatpush.bf16.msra.mxu2 %v8762_v59  ;;  %14639 = vst [vmem:[#allocation45_spill] sm:$0xff] %v13925_v23  ;;  %v11438_v59 = vld [vmem:[%s12139_s22 + $0xfcc] sm:$0xf]  ;;  %v13929_v8 = vpop.f32.mrf.mxu1  ;;  %v9207_v3 = vld [vmem:[%s12139_s22 + $0xdb8] sm:$0xf0] }
 0x2f3   : > { %6231 = vmatpush.bf16.msra.mxu3 %v8890_v49  ;;  %v9226_v49 = vor.u32 %v11374_v17, %v9223_v0  ;;  %v9482_v50 = vor.u32 %v11438_v59, %v9479_v28  ;;  %v9335_v16 = vld [vmem:[%s12139_s22 + $0xeb8] sm:$0xf0]  ;;  %v11434_v15 = vld [vmem:[%s12139_s22 + $0xfac] sm:$0xf] }
 0x2f4   : > { %6190 = vmatpush.bf16.msra.mxu0 %v8490_v37  ;;  %v11402_v37 = vld [vmem:[%s12139_s22 + $0xeac] sm:$0xf]  ;;  %v9447_v17 = vld [vmem:[%s12139_s22 + $0xf98] sm:$0xf0] }
 0x2f5   : > { %6204 = vmatpush.bf16.msra.mxu1 %v8618_v39  ;;  %v9463_v39 = vld [vmem:[%s12139_s22 + $0xfb8] sm:$0xf0]  ;;  %v9338_v20 = vor.u32 %v11402_v37, %v9335_v16  ;;  %v11334_v2 = vld [vmem:[%s12139_s22 + $0xc8c] sm:$0xf]  ;;  %v13967_v37 = vpop.f32.mrf.mxu2 }
 0x2f6   : > { %6218 = vmatpush.bf16.msra.mxu2 %v8746_v58  ;;  %v9210_v58 = vor.u32 %v11370_v27, %v9207_v3  ;;  %v11430_v57 = vld [vmem:[%s12139_s22 + $0xf8c] sm:$0xf]  ;;  %v9047_v59 = vld [vmem:[%s12139_s22 + $0xc78] sm:$0xf0] }
 0x2f7   : > { %6232 = vmatpush.bf16.msra.mxu3 %v8874_v43  ;;  %6191 = vmatmul.bf16.vlgmr.msra.gmra.mxu0 %v12452_v31  ;;  %v9082_v31 = vor.u32 %v11338_v54, %v9079_v11  ;;  %v9063_v43 = vld [vmem:[%s12139_s22 + $0xc98] sm:$0xf0]  ;;  %v11330_v29 = vld [vmem:[%s12139_s22 + $0xc6c] sm:$0xf] }
 0x2f8   : > { %6239 = vmatpush.bf16.msrb.mxu0 %v9114_v1  ;;  %6205 = vmatmul.bf16.vlgmr.msra.gmra.mxu1 %v12459_v36  ;;  %v9466_v36 = vor.u32 %v11434_v15, %v9463_v39  ;;  %v9191_v1 = vld [vmem:[%s12139_s22 + $0xd98] sm:$0xf0]  ;;  %v11362_v28 = vld [vmem:[%s12139_s22 + $0xd6c] sm:$0xf]  ;;  %v9050_v3 = vor.u32 %v11330_v29, %v9047_v59 }
 0x2f9   : > { %6253 = vmatpush.bf16.msrb.mxu1 %v9242_v18  ;;  %6219 = vmatmul.bf16.vlgmr.msra.gmra.mxu2 %v12457_v35  ;;  %v11366_v35 = vld [vmem:[%s12139_s22 + $0xd8c] sm:$0xf]  ;;  %v13953_v47 = vpop.f32.mrf.mxu3  ;;  %v9303_v54 = vld [vmem:[%s12139_s22 + $0xe78] sm:$0xf0] }
 0x2fa   : > { %6267 = vmatpush.bf16.msrb.mxu2 %v9370_v10  ;;  %6233 = vmatmul.bf16.vlgmr.msra.gmra.mxu3 %v12463_v40  ;;  %v11398_v18 = vld [vmem:[%s12139_s22 + $0xe8c] sm:$0xf]  ;;  %v9319_v10 = vld [vmem:[%s12139_s22 + $0xe98] sm:$0xf0]  ;;  %v13951_v40 = vpop.f32.mrf.mxu0  ;;  %v9194_v0 = vor.u32 %v11366_v35, %v9191_v1  ;;  %v13963_v11 = vpop.f32.mrf.mxu1 }
 0x2fb   : > { %6281 = vmatpush.bf16.msrb.mxu3 %v9498_v19  ;;  %v9066_v19 = vor.u32 %v11334_v2, %v9063_v43  ;;  %v9322_v12 = vor.u32 %v11398_v18, %v9319_v10  ;;  %v11426_v27 = vld [vmem:[%s12139_s22 + $0xf6c] sm:$0xf]  ;;  %v9159_v2 = vld [vmem:[%s12139_s22 + $0xd58] sm:$0xf0] }
 0x2fc   : > { %6240 = vmatpush.bf16.msrb.mxu0 %v9098_v62  ;;  %v9450_v62 = vor.u32 %v11430_v57, %v9447_v17  ;;  %v11326_v39 = vld [vmem:[%s12139_s22 + $0xc4c] sm:$0xf]  ;;  %v9287_v35 = vld [vmem:[%s12139_s22 + $0xe58] sm:$0xf0] }
 0x2fd   : > { %6254 = vmatpush.bf16.msrb.mxu1 %v9226_v49  ;;  %v9175_v49 = vld [vmem:[%s12139_s22 + $0xd78] sm:$0xf0]  ;;  %v11390_v43 = vld [vmem:[%s12139_s22 + $0xe4c] sm:$0xf] }
 0x2fe   : > { %6268 = vmatpush.bf16.msrb.mxu2 %v9354_v22  ;;  %v11394_v22 = vld [vmem:[%s12139_s22 + $0xe6c] sm:$0xf]  ;;  %v9178_v16 = vor.u32 %v11362_v28, %v9175_v49  ;;  %v9415_v1 = vld [vmem:[%s12139_s22 + $0xf58] sm:$0xf0] }
 0x2ff   : > { %6282 = vmatpush.bf16.msrb.mxu3 %v9482_v50  ;;  %v9431_v50 = vld [vmem:[%s12139_s22 + $0xf78] sm:$0xf0]  ;;  %v9306_v15 = vor.u32 %v11394_v22, %v9303_v54  ;;  %v11354_v29 = vld [vmem:[%s12139_s22 + $0xd2c] sm:$0xf] }
 0x300   : > { %6241 = vmatpush.bf16.msrb.mxu0 %v9082_v31  ;;  %v9031_v31 = vld [vmem:[%s12139_s22 + $0xc58] sm:$0xf0]  ;;  %v11418_v22 = vld [vmem:[%s12139_s22 + $0xf2c] sm:$0xf] }
 0x301   : > { %6255 = vmatpush.bf16.msrb.mxu1 %v9210_v58  ;;  %v11358_v58 = vld [vmem:[%s12139_s22 + $0xd4c] sm:$0xf]  ;;  %v9034_v18 = vor.u32 %v11326_v39, %v9031_v31  ;;  %v13977_v10 = vpop.f32.mrf.mxu3  ;;  %v9143_v28 = vld [vmem:[%s12139_s22 + $0xd38] sm:$0xf0] }
 0x302   : > { %6269 = vmatpush.bf16.msrb.mxu2 %v9338_v20  ;;  %v9434_v20 = vor.u32 %v11426_v27, %v9431_v50  ;;  %v13979_v57 = vpop.f32.mrf.mxu0  ;;  %v9162_v17 = vor.u32 %v11358_v58, %v9159_v2  ;;  %v9271_v49 = vld [vmem:[%s12139_s22 + $0xe38] sm:$0xf0]  ;;  %v11318_v50 = vld [vmem:[%s12139_s22 + $0xc0c] sm:$0xf] }
 0x303   : > { %6283 = vmatpush.bf16.msrb.mxu3 %v9466_v36  ;;  %v11422_v36 = vld [vmem:[%s12139_s22 + $0xf4c] sm:$0xf]  ;;  %v9399_v54 = vld [vmem:[%s12139_s22 + $0xf38] sm:$0xf0] }
 0x304   : > { %6242 = vmatpush.bf16.msrb.mxu0 %v9066_v19  ;;  %v9290_v19 = vor.u32 %v11390_v43, %v9287_v35  ;;  %v9418_v59 = vor.u32 %v11422_v36, %v9415_v1  ;;  %v11350_v31 = vld [vmem:[%s12139_s22 + $0xd0c] sm:$0xf]  ;;  %v9127_v58 = vld [vmem:[%s12139_s22 + $0xd18] sm:$0xf0]  ;;  %v9402_v2 = vor.u32 %v11418_v22, %v9399_v54  ;;  %v13999_v1 = vpop.f32.mrf.mxu2 }
 0x305   : > { %6256 = vmatpush.bf16.msrb.mxu1 %v9194_v0  ;;  %v11322_v0 = vld [vmem:[%s12139_s22 + $0xc2c] sm:$0xf]  ;;  %v9255_v43 = vld [vmem:[%s12139_s22 + $0xe18] sm:$0xf0] }
 0x306   : > { %6270 = vmatpush.bf16.msrb.mxu2 %v9322_v12  ;;  %v9015_v12 = vld [vmem:[%s12139_s22 + $0xc38] sm:$0xf0]  ;;  %v11414_v35 = vld [vmem:[%s12139_s22 + $0xf0c] sm:$0xf] }
 0x307   : > { %6284 = vmatpush.bf16.msrb.mxu3 %v9450_v62  ;;  %v11386_v62 = vld [vmem:[%s12139_s22 + $0xe2c] sm:$0xf]  ;;  %v9018_v27 = vor.u32 %v11322_v0, %v9015_v12  ;;  %v9383_v36 = vld [vmem:[%s12139_s22 + $0xf18] sm:$0xf0] }
 0x308   : > { %6243 = vmatpush.bf16.msrb.mxu0 %v9050_v3  ;;  %v8999_v3 = vld [vmem:[%s12139_s22 + $0xc18] sm:$0xf0]  ;;  %v9274_v39 = vor.u32 %v11386_v62, %v9271_v49  ;;  %v11570_v49 = vld [vmem:[%s12139_s22 + $0x13ec] sm:$0xf]  ;;  %v9386_v54 = vor.u32 %v11414_v35, %v9383_v36 }
 0x309   : > { %6257 = vmatpush.bf16.msrb.mxu1 %v9178_v16  ;;  %v13991_v16 = vpop.f32.mrf.mxu1  ;;  %v9002_v0 = vor.u32 %v11318_v50, %v8999_v3  ;;  %v9751_v12 = vld [vmem:[%s12139_s22 + $0x11f8] sm:$0xf0]  ;;  %v14011_v3 = vpop.f32.mrf.mxu3  ;;  %v11566_v35 = vld [vmem:[%s12139_s22 + $0x13cc] sm:$0xf] }
 0x30a   : > { %6271 = vmatpush.bf16.msrb.mxu2 %v9306_v15  ;;  %v9146_v15 = vor.u32 %v11354_v29, %v9143_v28  ;;  %v11538_v29 = vld [vmem:[%s12139_s22 + $0x12ec] sm:$0xf]  ;;  %v9879_v28 = vld [vmem:[%s12139_s22 + $0x12f8] sm:$0xf0]  ;;  %v14009_v50 = vpop.f32.mrf.mxu0 }
 0x30b   : > { %6285 = vmatpush.bf16.msrb.mxu3 %v9434_v20  ;;  %v11382_v20 = vld [vmem:[%s12139_s22 + $0xe0c] sm:$0xf]  ;;  %v10007_v22 = vld [vmem:[%s12139_s22 + $0x13f8] sm:$0xf0]  ;;  %v9882_v7 = vor.u32 %v11538_v29, %v9879_v28 }
 0x30c   : > { %6244 = vmatpush.bf16.msrb.mxu0 %v9034_v18  ;;  %v11474_v18 = vld [vmem:[%s12139_s22 + $0x10ec] sm:$0xf]  ;;  %v9258_v62 = vor.u32 %v11382_v20, %v9255_v43  ;;  %v9735_v20 = vld [vmem:[%s12139_s22 + $0x11d8] sm:$0xf0] }
 0x30d   : > { %6258 = vmatpush.bf16.msrb.mxu1 %v9162_v17  ;;  %v9623_v17 = vld [vmem:[%s12139_s22 + $0x10f8] sm:$0xf0]  ;;  %v11534_v43 = vld [vmem:[%s12139_s22 + $0x12cc] sm:$0xf] }
 0x30e   : > { %6272 = vmatpush.bf16.msrb.mxu2 %v9290_v19  ;;  %v11506_v19 = vld [vmem:[%s12139_s22 + $0x11ec] sm:$0xf]  ;;  %v9991_v36 = vld [vmem:[%s12139_s22 + $0x13d8] sm:$0xf0] }
 0x30f   : > { %6286 = vmatpush.bf16.msrb.mxu3 %v9418_v59  ;;  %v9130_v59 = vor.u32 %v11350_v31, %v9127_v58  ;;  %v9754_v23 = vor.u32 %v11506_v19, %v9751_v12  ;;  %v11502_v31 = vld [vmem:[%s12139_s22 + $0x11cc] sm:$0xf]  ;;  %v10010_v58 = vor.u32 %v11570_v49, %v10007_v22  ;;  %v9591_v29 = vld [vmem:[%s12139_s22 + $0x10b8] sm:$0xf0] }
 0x310   : > { %6245 = vmatpush.bf16.msrb.mxu0 %v9018_v27  ;;  %v9626_v27 = vor.u32 %v11474_v18, %v9623_v17  ;;  %v9738_v19 = vor.u32 %v11502_v31, %v9735_v20  ;;  %v11466_v12 = vld [vmem:[%s12139_s22 + $0x10ac] sm:$0xf]  ;;  %v9847_v22 = vld [vmem:[%s12139_s22 + $0x12b8] sm:$0xf0] }
 0x311   : > { %6259 = vmatpush.bf16.msrb.mxu1 %v9146_v15  ;;  %v11470_v15 = vld [vmem:[%s12139_s22 + $0x10cc] sm:$0xf]  ;;  %v14021_v17 = vpop.f32.mrf.mxu1 }
 0x312   : > { %6273 = vmatpush.bf16.msrb.mxu2 %v9274_v39  ;;  %v9607_v39 = vld [vmem:[%s12139_s22 + $0x10d8] sm:$0xf0]  ;;  %v11498_v28 = vld [vmem:[%s12139_s22 + $0x11ac] sm:$0xf] }
 0x313   : > { %6287 = vmatpush.bf16.msrb.mxu3 %v9402_v2  ;;  %v9863_v2 = vld [vmem:[%s12139_s22 + $0x12d8] sm:$0xf0]  ;;  %v9610_v18 = vor.u32 %v11470_v15, %v9607_v39  ;;  %v11530_v49 = vld [vmem:[%s12139_s22 + $0x12ac] sm:$0xf]  ;;  %v14038_v39 = vpop.f32.mrf.mxu0 }
 0x314   : > { %6246 = vmatpush.bf16.msrb.mxu0 %v9002_v0  ;;  %v9866_v0 = vor.u32 %v11534_v43, %v9863_v2  ;;  %v9850_v31 = vor.u32 %v11530_v49, %v9847_v22  ;;  %v11494_v20 = vld [vmem:[%s12139_s22 + $0x118c] sm:$0xf]  ;;  %v14640_v43 = vperm.slane %v12669_v4, 0  ;;  %v9559_v22 = vld [vmem:[%s12139_s22 + $0x1078] sm:$0xf0] }
 0x315   : > { %6260 = vmatpush.bf16.msrb.mxu1 %v9130_v59  ;;  %v9994_v59 = vor.u32 %v11566_v35, %v9991_v36  ;;  %v9703_v35 = vld [vmem:[%s12139_s22 + $0x1198] sm:$0xf0]  ;;  %v11526_v36 = vld [vmem:[%s12139_s22 + $0x128c] sm:$0xf] }
 0x316   : > { %6274 = vmatpush.bf16.msrb.mxu2 %v9258_v62  ;;  %v9719_v62 = vld [vmem:[%s12139_s22 + $0x11b8] sm:$0xf0]  ;;  %v5075_v2 = vadd.f32 %v12757_v21, %v14640_v43  ;;  %v11458_v49 = vld [vmem:[%s12139_s22 + $0x106c] sm:$0xf] }
 0x317   : > { %6288 = vmatpush.bf16.msrb.mxu3 %v9386_v54  ;;  %6247 = vmatmul.bf16.vlgmr.msrb.gmra.mxu0 %v12552_v32  ;;  %v14030_v54 = vpop.f32.mrf.mxu2  ;;  %v9594_v32 = vor.u32 %v11466_v12, %v9591_v29  ;;  %v14052_v12 = vpop.f32.mrf.mxu3  ;;  %v11558_v29 = vld [vmem:[%s12139_s22 + $0x138c] sm:$0xf] }
 0x318   : > { %6295 = vmatpush.bf16.msra.mxu0 %v9626_v27  ;;  %6261 = vmatmul.bf16.vlgmr.msrb.gmra.mxu1 %v12559_v41  ;;  %v11858_v27 = vld [vmem:[%s12147_s21] sm:$0xf]  ;;  %v11462_v41 = vld [vmem:[%s12139_s22 + $0x108c] sm:$0xf] }
 0x319   : > { %6309 = vmatpush.bf16.msra.mxu1 %v9754_v23  ;;  %6275 = vmatmul.bf16.vlgmr.msrb.gmra.mxu2 %v12557_v38  ;;  %v9975_v23 = vld [vmem:[%s12139_s22 + $0x13b8] sm:$0xf0]  ;;  %v1097_v15 = vperm.slane %v11858_v27, 2  ;;  %v9722_v38 = vor.u32 %v11498_v28, %v9719_v62  ;;  %v14058_v62 = vpop.f32.mrf.mxu1  ;;  %v11522_v27 = vld [vmem:[%s12139_s22 + $0x126c] sm:$0xf] }
 0x31a   : > { %6323 = vmatpush.bf16.msra.mxu2 %v9882_v7  ;;  %v11562_v7 = vld [vmem:[%s12139_s22 + $0x13ac] sm:$0xf]  ;;  %6289 = vmatmul.bf16.vlgmr.msrb.gmra.mxu3 %v12563_v46  ;;  %v9959_v28 = vld [vmem:[%s12139_s22 + $0x1398] sm:$0xf0] }
 0x31b   : > { %6337 = vmatpush.bf16.msra.mxu3 %v10010_v58  ;;  %v9575_v58 = vld [vmem:[%s12139_s22 + $0x1098] sm:$0xf0]  ;;  %v9978_v46 = vor.u32 %v11562_v7, %v9975_v23  ;;  %v5745_v4 = vadd.f32 %v13917_v44, %v1097_v15  ;;  %v5747_v21 = vadd.f32 %v13951_v40, %v1097_v15  ;;  %v11490_v7 = vld [vmem:[%s12139_s22 + $0x116c] sm:$0xf]  ;;  %v5089_v23 = vadd.f32 %v12773_v45, %v5075_v2 }
 0x31c   : > { %6296 = vmatpush.bf16.msra.mxu0 %v9610_v18  ;;  %v9831_v18 = vld [vmem:[%s12139_s22 + $0x1298] sm:$0xf0]  ;;  %v9962_v44 = vor.u32 %v11558_v29, %v9959_v28  ;;  %v14082_v29 = vpop.f32.mrf.mxu0 }
 0x31d   : > { %6310 = vmatpush.bf16.msra.mxu1 %v9738_v19  ;;  %v14641_v19 = vperm.slane %v13185_v53, 1  ;;  %v9834_v53 = vor.u32 %v11526_v36, %v9831_v18  ;;  %v9687_v40 = vld [vmem:[%s12139_s22 + $0x1178] sm:$0xf0]  ;;  %v5761_v45 = vadd.f32 %v13963_v11, %v5747_v21  ;;  %v5103_v36 = vadd.f32 %v12789_v5, %v5089_v23 }
 0x31e   : > { %6324 = vmatpush.bf16.msra.mxu2 %v9866_v0  ;;  %v9815_v15 = vld [vmem:[%s12139_s22 + $0x1278] sm:$0xf0]  ;;  %v9690_v43 = vor.u32 %v11490_v7, %v9687_v40  ;;  %v11482_v7 = vld [vmem:[%s12139_s22 + $0x112c] sm:$0xf] }
 0x31f   : > { %6338 = vmatpush.bf16.msra.mxu3 %v9994_v59  ;;  %v5411_v0 = vadd.f32 %v13244_v13, %v14641_v19  ;;  %v9578_v59 = vor.u32 %v11462_v41, %v9575_v58  ;;  %v9706_v13 = vor.u32 %v11494_v20, %v9703_v35  ;;  %v9943_v41 = vld [vmem:[%s12139_s22 + $0x1378] sm:$0xf0]  ;;  %v5759_v58 = vadd.f32 %v13929_v8, %v5745_v4  ;;  %v11486_v35 = vld [vmem:[%s12139_s22 + $0x114c] sm:$0xf]  ;;  %v14084_v28 = vpop.f32.mrf.mxu3 }
 0x320   : > { %6297 = vmatpush.bf16.msra.mxu0 %v9594_v32  ;;  %v9562_v20 = vor.u32 %v11458_v49, %v9559_v22  ;;  %v9818_v2 = vor.u32 %v11522_v27, %v9815_v15  ;;  %v9671_v19 = vld [vmem:[%s12139_s22 + $0x1158] sm:$0xf0]  ;;  %v11518_v8 = vld [vmem:[%s12139_s22 + $0x124c] sm:$0xf]  ;;  %v5117_v23 = vadd.f32 %v12794_v14, %v5103_v36 }
 0x321   : > { %6311 = vmatpush.bf16.msra.mxu1 %v9722_v38  ;;  %v5425_v32 = vadd.f32 %v13254_v61, %v5411_v0  ;;  %v14068_v38 = vpop.f32.mrf.mxu2  ;;  %v11454_v61 = vld [vmem:[%s12139_s22 + $0x104c] sm:$0xf]  ;;  %v9799_v11 = vld [vmem:[%s12139_s22 + $0x1258] sm:$0xf0]  ;;  %v5773_v5 = vadd.f32 %v13938_v9, %v5759_v58  ;;  %v14098_v15 = vpop.f32.mrf.mxu1 }
 0x322   : > { %6325 = vmatpush.bf16.msra.mxu2 %v9850_v31  ;;  %v11554_v31 = vld [vmem:[%s12139_s22 + $0x136c] sm:$0xf]  ;;  %v9927_v21 = vld [vmem:[%s12139_s22 + $0x1358] sm:$0xf0] }
 0x323   : > { %6339 = vmatpush.bf16.msra.mxu3 %v9978_v46  ;;  %v9543_v46 = vld [vmem:[%s12139_s22 + $0x1058] sm:$0xf0]  ;;  %v9946_v18 = vor.u32 %v11554_v31, %v9943_v41  ;;  %v5439_v0 = vadd.f32 %v13268_v6, %v5425_v32  ;;  %v11550_v4 = vld [vmem:[%s12139_s22 + $0x134c] sm:$0xf]  ;;  %v9674_v6 = vor.u32 %v11486_v35, %v9671_v19  ;;  %v5787_v41 = vadd.f32 %v13953_v47, %v5773_v5 }
 0x324   : > { %6298 = vmatpush.bf16.msra.mxu0 %v9578_v59  ;;  %v5775_v59 = vadd.f32 %v13967_v37, %v5761_v45  ;;  %v11450_v49 = vld [vmem:[%s12139_s22 + $0x102c] sm:$0xf]  ;;  %v9527_v22 = vld [vmem:[%s12139_s22 + $0x1038] sm:$0xf0]  ;;  %v9930_v9 = vor.u32 %v11550_v4, %v9927_v21 }
 0x325   : > { %6312 = vmatpush.bf16.msra.mxu1 %v9706_v13  ;;  %v9546_v13 = vor.u32 %v11454_v61, %v9543_v46  ;;  %v11514_v40 = vld [vmem:[%s12139_s22 + $0x122c] sm:$0xf]  ;;  %v9783_v37 = vld [vmem:[%s12139_s22 + $0x1238] sm:$0xf0]  ;;  %v5453_v27 = vadd.f32 %v13273_v42, %v5439_v0  ;;  %v9530_v14 = vor.u32 %v11450_v49, %v9527_v22  ;;  %v14116_v0 = vpop.f32.mrf.mxu0 }
 0x326   : > { %6326 = vmatpush.bf16.msra.mxu2 %v9834_v53  ;;  %v9802_v53 = vor.u32 %v11518_v8, %v9799_v11  ;;  %v11546_v32 = vld [vmem:[%s12139_s22 + $0x132c] sm:$0xf]  ;;  %v9911_v31 = vld [vmem:[%s12139_s22 + $0x1338] sm:$0xf0]  ;;  %v5789_v58 = vadd.f32 %v13977_v10, %v5775_v59  ;;  %v5131_v10 = vadd.f32 %v12850_v52, %v5117_v23  ;;  %v5801_v59 = vadd.f32 %v13979_v57, %v5787_v41 }
 0x327   : > { %6340 = vmatpush.bf16.msra.mxu3 %v9962_v44  ;;  %v9655_v44 = vld [vmem:[%s12139_s22 + $0x1138] sm:$0xf0]  ;;  %v11446_v45 = vld [vmem:[%s12139_s22 + $0x100c] sm:$0xf]  ;;  %v9914_v35 = vor.u32 %v11546_v32, %v9911_v31  ;;  %v14126_v22 = vpop.f32.mrf.mxu3 }
 0x328   : > { %6299 = vmatpush.bf16.msra.mxu0 %v9562_v20  ;;  %v9511_v20 = vld [vmem:[%s12139_s22 + $0x1018] sm:$0xf0]  ;;  %v9658_v42 = vor.u32 %v11482_v7, %v9655_v44  ;;  %v11478_v61 = vld [vmem:[%s12139_s22 + $0x110c] sm:$0xf]  ;;  %v5803_v52 = vadd.f32 %v14009_v50, %v5789_v58 }
 0x329   : > { %6313 = vmatpush.bf16.msra.mxu1 %v9690_v43  ;;  %v14106_v43 = vpop.f32.mrf.mxu2  ;;  %v9639_v47 = vld [vmem:[%s12139_s22 + $0x1118] sm:$0xf0]  ;;  %v11510_v46 = vld [vmem:[%s12139_s22 + $0x120c] sm:$0xf]  ;;  %v14132_v31 = vpop.f32.mrf.mxu1 }
 0x32a   : > { %6327 = vmatpush.bf16.msra.mxu2 %v9818_v2  ;;  %v9786_v2 = vor.u32 %v11514_v40, %v9783_v37  ;;  %v9767_v36 = vld [vmem:[%s12139_s22 + $0x1218] sm:$0xf0]  ;;  %v14642_v8 = vld [vmem:[#allocation29_spill] sm:$0xff]  ;;  %v9642_v7 = vor.u32 %v11478_v61, %v9639_v47  ;;  %v5815_v61 = vadd.f32 %v13991_v16, %v5801_v59  ;;  %v5817_v47 = vadd.f32 %v14021_v17, %v5803_v52 }
 0x32b   : > { %6341 = vmatpush.bf16.msra.mxu3 %v9946_v18  ;;  %v11542_v18 = vld [vmem:[%s12139_s22 + $0x130c] sm:$0xf]  ;;  %v9895_v19 = vld [vmem:[%s12139_s22 + $0x1318] sm:$0xf0]  ;;  %v5467_v11 = vadd.f32 %v14642_v8, %v5453_v27  ;;  %v9770_v23 = vor.u32 %v11510_v46, %v9767_v36  ;;  %v14644_v27 = vld [vmem:[#allocation30_spill] sm:$0xff] }
 0x32c   : > { %6300 = vmatpush.bf16.msra.mxu0 %v9546_v13  ;;  %v11602_v4 = vld [vmem:[%s12139_s22 + $0x14ec] sm:$0xf]  ;;  %v10135_v21 = vld [vmem:[%s12139_s22 + $0x14f8] sm:$0xf0]  ;;  %v9514_v13 = vor.u32 %v11446_v45, %v9511_v20  ;;  %v9898_v50 = vor.u32 %v11542_v18, %v9895_v19  ;;  %v5831_v16 = vadd.f32 %v14030_v54, %v5817_v47 }
 0x32d   : > { %6314 = vmatpush.bf16.msra.mxu1 %v9674_v6  ;;  %v11634_v5 = vld [vmem:[%s12139_s22 + $0x15ec] sm:$0xf]  ;;  %v10263_v6 = vld [vmem:[%s12139_s22 + $0x15f8] sm:$0xf0]  ;;  %v10138_v37 = vor.u32 %v11602_v4, %v10135_v21  ;;  %v5481_v32 = vadd.f32 %v14644_v27, %v5467_v11 }
 0x32e   : > { %6328 = vmatpush.bf16.msra.mxu2 %v9802_v53  ;;  %v11666_v53 = vld [vmem:[%s12139_s22 + $0x16ec] sm:$0xf]  ;;  %v10391_v49 = vld [vmem:[%s12139_s22 + $0x16f8] sm:$0xf0]  ;;  %v10266_v41 = vor.u32 %v11634_v5, %v10263_v6 }
 0x32f   : > { %6342 = vmatpush.bf16.msra.mxu3 %v9930_v9  ;;  %v11698_v9 = vld [vmem:[%s12139_s22 + $0x17ec] sm:$0xf]  ;;  %v10519_v44 = vld [vmem:[%s12139_s22 + $0x17f8] sm:$0xf0]  ;;  %v10394_v58 = vor.u32 %v11666_v53, %v10391_v49  ;;  %v5829_v49 = vadd.f32 %v13999_v1, %v5815_v61 }
 0x330   : > { %6301 = vmatpush.bf16.msra.mxu0 %v9530_v14  ;;  %v14643_v40 = vld [vmem:[#allocation9_spill] sm:$0xff]  ;;  %v10119_v45 = vld [vmem:[%s12139_s22 + $0x14d8] sm:$0xf0]  ;;  %v10522_v46 = vor.u32 %v11698_v9, %v10519_v44  ;;  %v14648_v44 = vld [vmem:[#allocation32_spill] sm:$0xff] }
 0x331   : > { %6315 = vmatpush.bf16.msra.mxu1 %v9658_v42  ;;  %v5145_v57 = vadd.f32 %v14643_v40, %v5131_v10  ;;  %v11598_v14 = vld [vmem:[%s12139_s22 + $0x14cc] sm:$0xf]  ;;  %v14645_v42 = vld [vmem:[#allocation10_spill] sm:$0xff]  ;;  %v10247_v10 = vld [vmem:[%s12139_s22 + $0x15d8] sm:$0xf0]  ;;  %v14144_v8 = vpop.f32.mrf.mxu2 }
 0x332   : > { %6329 = vmatpush.bf16.msra.mxu2 %v9786_v2  ;;  %v11630_v20 = vld [vmem:[%s12139_s22 + $0x15cc] sm:$0xf]  ;;  %v10375_v36 = vld [vmem:[%s12139_s22 + $0x16d8] sm:$0xf0]  ;;  %v10122_v17 = vor.u32 %v11598_v14, %v10119_v45 }
 0x333   : > { %6343 = vmatpush.bf16.msra.mxu3 %v9914_v35  ;;  %v5159_v2 = vadd.f32 %v14645_v42, %v5145_v57  ;;  %v11662_v35 = vld [vmem:[%s12139_s22 + $0x16cc] sm:$0xf]  ;;  %v14646_v18 = vld [vmem:[#allocation31_spill] sm:$0xff]  ;;  %v10250_v21 = vor.u32 %v11630_v20, %v10247_v10  ;;  %v14159_v57 = vpop.f32.mrf.mxu0  ;;  %v14179_v10 = vpop.f32.mrf.mxu1 }
 0x334   : > { %6302 = vmatpush.bf16.msra.mxu0 %v9514_v13  ;;  %v5495_v19 = vadd.f32 %v14646_v18, %v5481_v32  ;;  %v11694_v11 = vld [vmem:[%s12139_s22 + $0x17cc] sm:$0xf]  ;;  %v10503_v4 = vld [vmem:[%s12139_s22 + $0x17d8] sm:$0xf0]  ;;  %v10378_v5 = vor.u32 %v11662_v35, %v10375_v36  ;;  %v5845_v32 = vadd.f32 %v14052_v12, %v5831_v16  ;;  %v5843_v12 = vadd.f32 %v14011_v3, %v5829_v49 }
 0x335   : > { %6316 = vmatpush.bf16.msra.mxu1 %v9642_v7  ;;  %v11594_v59 = vld [vmem:[%s12139_s22 + $0x14ac] sm:$0xf]  ;;  %v10103_v52 = vld [vmem:[%s12139_s22 + $0x14b8] sm:$0xf0]  ;;  %v10506_v54 = vor.u32 %v11694_v11, %v10503_v4 }
 0x336   : > { %6330 = vmatpush.bf16.msra.mxu2 %v9770_v23  ;;  %v11626_v13 = vld [vmem:[%s12139_s22 + $0x15ac] sm:$0xf]  ;;  %v14647_v6 = vld [vmem:[#allocation11_spill] sm:$0xff]  ;;  %v5509_v40 = vadd.f32 %v14648_v44, %v5495_v19  ;;  %v5857_v11 = vadd.f32 %v14038_v39, %v5843_v12 }
 0x337   : > { %6344 = vmatpush.bf16.msra.mxu3 %v9898_v50  ;;  %v5173_v53 = vadd.f32 %v14647_v6, %v5159_v2  ;;  %6303 = vmatmul.bf16.vlgmr.msra.gmra.mxu0 %v12652_v51  ;;  %v10231_v7 = vld [vmem:[%s12139_s22 + $0x15b8] sm:$0xf0]  ;;  %v11658_v23 = vld [vmem:[%s12139_s22 + $0x16ac] sm:$0xf]  ;;  %v14161_v50 = vpop.f32.mrf.mxu3  ;;  %v14649_v51 = vld [vmem:[#allocation12_spill] sm:$0xff]  ;;  %v5859_v2 = vadd.f32 %v14082_v29, %v5845_v32 }
 0x338   : > { %6351 = vmatpush.bf16.msrb.mxu0 %v10138_v37  ;;  %v10359_v9 = vld [vmem:[%s12139_s22 + $0x16b8] sm:$0xf0]  ;;  %6317 = vmatmul.bf16.vlgmr.msra.gmra.mxu1 %v12659_v56  ;;  %v11690_v1 = vld [vmem:[%s12139_s22 + $0x17ac] sm:$0xf]  ;;  %v14652_v29 = vld [vmem:[#allocation34_spill] sm:$0xff] }
 0x339   : > { %6365 = vmatpush.bf16.msrb.mxu1 %v10266_v41  ;;  %6331 = vmatmul.bf16.vlgmr.msra.gmra.mxu2 %v12657_v55  ;;  %v10487_v37 = vld [vmem:[%s12139_s22 + $0x17b8] sm:$0xf0]  ;;  %v5187_v27 = vadd.f32 %v14649_v51, %v5173_v53  ;;  %v10106_v41 = vor.u32 %v11594_v59, %v10103_v52  ;;  %v10234_v55 = vor.u32 %v11626_v13, %v10231_v7  ;;  %v11590_v45 = vld [vmem:[%s12139_s22 + $0x148c] sm:$0xf]  ;;  %v14186_v16 = vpop.f32.mrf.mxu2  ;;  %v14653_v13 = vld [vmem:[#allocation14_spill] sm:$0xff] }
 0x33a   : > { %6379 = vmatpush.bf16.msrb.mxu2 %v10394_v58  ;;  %6345 = vmatmul.bf16.vlgmr.msra.gmra.mxu3 %v12663_v60  ;;  %v14650_v58 = vld [vmem:[#allocation33_spill] sm:$0xff]  ;;  %v10362_v56 = vor.u32 %v11658_v23, %v10359_v9  ;;  %v10087_v20 = vld [vmem:[%s12139_s22 + $0x1498] sm:$0xf0]  ;;  %v10490_v60 = vor.u32 %v11690_v1, %v10487_v37  ;;  %v5873_v6 = vadd.f32 %v14098_v15, %v5859_v2  ;;  %v14656_v2 = vld [vmem:[#allocation36_spill] sm:$0xff] }
 0x33b   : > { %6393 = vmatpush.bf16.msrb.mxu3 %v10522_v46  ;;  %v5523_v14 = vadd.f32 %v14650_v58, %v5509_v40  ;;  %v11622_v42 = vld [vmem:[%s12139_s22 + $0x158c] sm:$0xf]  ;;  %v10215_v61 = vld [vmem:[%s12139_s22 + $0x1598] sm:$0xf0]  ;;  %v10090_v3 = vor.u32 %v11590_v45, %v10087_v20  ;;  %v14197_v44 = vpop.f32.mrf.mxu0  ;;  %v5871_v37 = vadd.f32 %v14058_v62, %v5857_v11 }
 0x33c   : > { %6352 = vmatpush.bf16.msrb.mxu0 %v10122_v17  ;;  %v11654_v47 = vld [vmem:[%s12139_s22 + $0x168c] sm:$0xf]  ;;  %v10343_v46 = vld [vmem:[%s12139_s22 + $0x1698] sm:$0xf0]  ;;  %v10218_v17 = vor.u32 %v11622_v42, %v10215_v61  ;;  %v5887_v51 = vadd.f32 %v14106_v43, %v5873_v6  ;;  %v14214_v61 = vpop.f32.mrf.mxu1 }
 0x33d   : > { %6366 = vmatpush.bf16.msrb.mxu1 %v10250_v21  ;;  %v11686_v35 = vld [vmem:[%s12139_s22 + $0x178c] sm:$0xf]  ;;  %v10471_v36 = vld [vmem:[%s12139_s22 + $0x1798] sm:$0xf0]  ;;  %v5537_v4 = vadd.f32 %v14652_v29, %v5523_v14  ;;  %v10346_v21 = vor.u32 %v11654_v47, %v10343_v46  ;;  %v5885_v43 = vadd.f32 %v14068_v38, %v5871_v37 }
 0x33e   : > { %6380 = vmatpush.bf16.msrb.mxu2 %v10378_v5  ;;  %v14651_v18 = vld [vmem:[#allocation13_spill] sm:$0xff]  ;;  %v10071_v59 = vld [vmem:[%s12139_s22 + $0x1478] sm:$0xf0]  ;;  %v10474_v53 = vor.u32 %v11686_v35, %v10471_v36  ;;  %v14657_v35 = vld [vmem:[#allocation16_spill] sm:$0xff] }
 0x33f   : > { %6394 = vmatpush.bf16.msrb.mxu3 %v10506_v54  ;;  %v5201_v19 = vadd.f32 %v14651_v18, %v5187_v27  ;;  %v11586_v5 = vld [vmem:[%s12139_s22 + $0x146c] sm:$0xf]  ;;  %v10199_v49 = vld [vmem:[%s12139_s22 + $0x1578] sm:$0xf0]  ;;  %v14203_v27 = vpop.f32.mrf.mxu3  ;;  %v5901_v18 = vadd.f32 %v14126_v22, %v5887_v51 }
 0x340   : > { %6353 = vmatpush.bf16.msrb.mxu0 %v10106_v41  ;;  %v11618_v52 = vld [vmem:[%s12139_s22 + $0x156c] sm:$0xf]  ;;  %v10327_v7 = vld [vmem:[%s12139_s22 + $0x1678] sm:$0xf0]  ;;  %v10074_v15 = vor.u32 %v11586_v5, %v10071_v59  ;;  %v5899_v5 = vadd.f32 %v14084_v28, %v5885_v43 }
 0x341   : > { %6367 = vmatpush.bf16.msrb.mxu1 %v10234_v55  ;;  %v5215_v39 = vadd.f32 %v14653_v13, %v5201_v19  ;;  %v11650_v54 = vld [vmem:[%s12139_s22 + $0x166c] sm:$0xf]  ;;  %v14654_v23 = vld [vmem:[#allocation35_spill] sm:$0xff]  ;;  %v10202_v32 = vor.u32 %v11618_v52, %v10199_v49  ;;  %v5915_v59 = vadd.f32 %v14159_v57, %v5901_v18  ;;  %v14660_v57 = vld [vmem:[#allocation38_spill] sm:$0xff] }
 0x342   : > { %6381 = vmatpush.bf16.msrb.mxu2 %v10362_v56  ;;  %v5551_v9 = vadd.f32 %v14654_v23, %v5537_v4  ;;  %v11682_v40 = vld [vmem:[%s12139_s22 + $0x176c] sm:$0xf]  ;;  %v10455_v1 = vld [vmem:[%s12139_s22 + $0x1778] sm:$0xf0]  ;;  %v10330_v41 = vor.u32 %v11650_v54, %v10327_v7  ;;  %v5913_v23 = vadd.f32 %v14116_v0, %v5899_v5  ;;  %v10801_v18 = vld [vmem:[%s14252_s18 + $0x228] sm:$0xf] }
 0x343   : > { %6395 = vmatpush.bf16.msrb.mxu3 %v10490_v60  ;;  %v11582_v58 = vld [vmem:[%s12139_s22 + $0x144c] sm:$0xf]  ;;  %v10055_v14 = vld [vmem:[%s12139_s22 + $0x1458] sm:$0xf0]  ;;  %v10458_v45 = vor.u32 %v11682_v40, %v10455_v1  ;;  %v5970_v37 = vpop.f32.mrf.mxu0 }
 0x344   : > { %6354 = vmatpush.bf16.msrb.mxu0 %v10090_v3  ;;  %v11614_v55 = vld [vmem:[%s12139_s22 + $0x154c] sm:$0xf]  ;;  %v14655_v56 = vld [vmem:[#allocation15_spill] sm:$0xff]  ;;  %v5565_v60 = vadd.f32 %v14656_v2, %v5551_v9  ;;  %v10058_v38 = vor.u32 %v11582_v58, %v10055_v14  ;;  %v14222_v3 = vpop.f32.mrf.mxu2  ;;  %v14661_v14 = vld [vmem:[#allocation18_spill] sm:$0xff] }
 0x345   : > { %6368 = vmatpush.bf16.msrb.mxu1 %v10218_v17  ;;  %v5229_v62 = vadd.f32 %v14655_v56, %v5215_v39  ;;  %v10183_v20 = vld [vmem:[%s12139_s22 + $0x1558] sm:$0xf0]  ;;  %v11646_v42 = vld [vmem:[%s12139_s22 + $0x164c] sm:$0xf]  ;;  %v5929_v56 = vadd.f32 %v14179_v10, %v5915_v59  ;;  %v10609_v2 = vld [vmem:[%s14252_s18 + $0xa8] sm:$0xf]  ;;  %v5927_v10 = vadd.f32 %v14132_v31, %v5913_v23 }
 0x346   : > { %6382 = vmatpush.bf16.msrb.mxu2 %v10346_v21  ;;  %v10311_v12 = vld [vmem:[%s12139_s22 + $0x1658] sm:$0xf0]  ;;  %v11678_v47 = vld [vmem:[%s12139_s22 + $0x174c] sm:$0xf]  ;;  %v10186_v29 = vor.u32 %v11614_v55, %v10183_v20  ;;  %v11744_v23 = vld [vmem:[%s14252_s18 + $0x158] sm:$0xf0] }
 0x347   : > { %6396 = vmatpush.bf16.msrb.mxu3 %v10474_v53  ;;  %v10439_v46 = vld [vmem:[%s12139_s22 + $0x1758] sm:$0xf0]  ;;  %v5243_v36 = vadd.f32 %v14657_v35, %v5229_v62  ;;  %v14658_v19 = vld [vmem:[#allocation37_spill] sm:$0xff]  ;;  %v10314_v4 = vor.u32 %v11646_v42, %v10311_v12  ;;  %v14239_v51 = vpop.f32.mrf.mxu3  ;;  %v5941_v31 = vadd.f32 %v14144_v8, %v5927_v10  ;;  %v11768_v8 = vld [vmem:[%s14252_s18 + $0x218] sm:$0xf0] }
 0x348   : > { %6355 = vmatpush.bf16.msrb.mxu0 %v10074_v15  ;;  %v5579_v11 = vadd.f32 %v14658_v19, %v5565_v60  ;;  %v11578_v17 = vld [vmem:[%s12139_s22 + $0x142c] sm:$0xf]  ;;  %v10039_v21 = vld [vmem:[%s12139_s22 + $0x1438] sm:$0xf0]  ;;  %v10442_v52 = vor.u32 %v11678_v47, %v10439_v46  ;;  %v10705_v47 = vld [vmem:[%s14252_s18 + $0x168] sm:$0xf]  ;;  %v5943_v46 = vadd.f32 %v14186_v16, %v5929_v56  ;;  %v5984_v19 = vpop.f32.mrf.mxu1 }
 0x349   : > { %6369 = vmatpush.bf16.msrb.mxu1 %v10202_v32  ;;  %v11610_v22 = vld [vmem:[%s12139_s22 + $0x152c] sm:$0xf]  ;;  %v10167_v13 = vld [vmem:[%s12139_s22 + $0x1538] sm:$0xf0]  ;;  %v10042_v9 = vor.u32 %v11578_v17, %v10039_v21  ;;  %v10669_v10 = vld [vmem:[%s14252_s18 + $0x120] sm:$0xf] }
 0x34a   : > { %6383 = vmatpush.bf16.msrb.mxu2 %v10330_v41  ;;  %v11642_v39 = vld [vmem:[%s12139_s22 + $0x162c] sm:$0xf]  ;;  %v10295_v6 = vld [vmem:[%s12139_s22 + $0x1638] sm:$0xf0]  ;;  %v5593_v1 = vadd.f32 %v14660_v57, %v5579_v11  ;;  %v10170_v15 = vor.u32 %v11610_v22, %v10167_v13  ;;  %v14664_v22 = vld [vmem:[#allocation40_spill] sm:$0xff]  ;;  %v5955_v57 = vadd.f32 %v14161_v50, %v5941_v31 }
 0x34b   : > { %6397 = vmatpush.bf16.msrb.mxu3 %v10458_v45  ;;  %v11674_v53 = vld [vmem:[%s12139_s22 + $0x172c] sm:$0xf]  ;;  %v10423_v49 = vld [vmem:[%s12139_s22 + $0x1738] sm:$0xf0]  ;;  %v10298_v32 = vor.u32 %v11642_v39, %v10295_v6  ;;  %v10597_v39 = vld [vmem:[%s14252_s18 + $0x90] sm:$0xf] }
 0x34c   : > { %v14659_v54 = vld [vmem:[#allocation17_spill] sm:$0xff]  ;;  %6356 = vmatpush.bf16.msrb.mxu0 %v10058_v38  ;;  %v10023_v28 = vld [vmem:[%s12139_s22 + $0x1418] sm:$0xf0]  ;;  %v10426_v62 = vor.u32 %v11674_v53, %v10423_v49  ;;  %v5998_v59 = vpop.f32.mrf.mxu2  ;;  %v11720_v6 = vld [vmem:[%s14252_s18 + $0x98] sm:$0xf0]  ;;  %v5969_v56 = vadd.f32 %v14197_v44, %v5955_v57 }
 0x34d   : > { %v5257_v7 = vadd.f32 %v14659_v54, %v5243_v36  ;;  %v11574_v40 = vld [vmem:[%s12139_s22 + $0x140c] sm:$0xf]  ;;  %6370 = vmatpush.bf16.msrb.mxu1 %v10186_v29  ;;  %v10151_v58 = vld [vmem:[%s12139_s22 + $0x1518] sm:$0xf0]  ;;  %v10693_v53 = vld [vmem:[%s14252_s18 + $0x150] sm:$0xf] }
 0x34e   : > { %6384 = vmatpush.bf16.msrb.mxu2 %v10314_v4  ;;  %v11606_v41 = vld [vmem:[%s12139_s22 + $0x150c] sm:$0xf]  ;;  %v10279_v43 = vld [vmem:[%s12139_s22 + $0x1618] sm:$0xf0]  ;;  %v10026_v35 = vor.u32 %v11574_v40, %v10023_v28  ;;  %v14665_v49 = vld [vmem:[#allocation20_spill] sm:$0xff]  ;;  %v14274_v28 = vpop.f32.mrf.mxu0 }
 0x34f   : > { %v11638_v0 = vld [vmem:[%s12139_s22 + $0x160c] sm:$0xf]  ;;  %v5271_v55 = vadd.f32 %v14661_v14, %v5257_v7  ;;  %6398 = vmatpush.bf16.msrb.mxu3 %v10442_v52  ;;  %v10407_v20 = vld [vmem:[%s12139_s22 + $0x1718] sm:$0xf0]  ;;  %v10154_v11 = vor.u32 %v11606_v41, %v10151_v58  ;;  %v5957_v7 = vadd.f32 %v14203_v27, %v5943_v46  ;;  %v10598_v27 = vor.u32 %v11720_v6, %v10597_v39  ;;  %v10753_v6 = vld [vmem:[%s14252_s18 + $0x1c8] sm:$0xf] }
 0x350   : > { %v11670_v45 = vld [vmem:[%s12139_s22 + $0x170c] sm:$0xf]  ;;  %v14662_v42 = vld [vmem:[#allocation39_spill] sm:$0xff]  ;;  %6357 = vmatpush.bf16.msrb.mxu0 %v10042_v9  ;;  %v10282_v29 = vor.u32 %v11638_v0, %v10279_v43  ;;  %v10681_v0 = vld [vmem:[%s14252_s18 + $0x138] sm:$0xf] }
 0x351   : > { %v5607_v12 = vadd.f32 %v14662_v42, %v5593_v1  ;;  %v11723_v60 = vld [vmem:[%s14252_s18 + $0xb0] sm:$0xf0]  ;;  %6371 = vmatpush.bf16.msrb.mxu1 %v10170_v15  ;;  %v10410_v16 = vor.u32 %v11670_v45, %v10407_v20  ;;  %v10789_v9 = vld [vmem:[%s14252_s18 + $0x210] sm:$0xf]  ;;  %v5971_v1 = vadd.f32 %v5970_v37, %v5957_v7  ;;  %v6012_v15 = vpop.f32.mrf.mxu3  ;;  %v11717_v58 = vld [vmem:[%s14252_s18 + $0x80] sm:$0xf0]  ;;  %v14288_v45 = vpop.f32.mrf.mxu1 }
 0x352   : > { %v11747_v36 = vld [vmem:[%s14252_s18 + $0x170] sm:$0xf0]  ;;  %6385 = vmatpush.bf16.msrb.mxu2 %v10298_v32  ;;  %v10610_v21 = vor.u32 %v11723_v60, %v10609_v2  ;;  %v10694_v32 = vor.u32 %v11744_v23, %v10693_v53  ;;  %v10790_v41 = vor.u32 %v11768_v8, %v10789_v9  ;;  %v14666_v14 = vld [vmem:[#allocation21_spill] sm:$0xff]  ;;  %v10777_v37 = vld [vmem:[%s14252_s18 + $0x1f8] sm:$0xf] }
 0x353   : > { %v11771_v38 = vld [vmem:[%s14252_s18 + $0x230] sm:$0xf0]  ;;  %6399 = vmatpush.bf16.msrb.mxu3 %v10426_v62  ;;  %v5621_v5 = vadd.f32 %v14664_v22, %v5607_v12  ;;  %v10706_v52 = vor.u32 %v11747_v36, %v10705_v47  ;;  %v11741_v50 = vld [vmem:[%s14252_s18 + $0x140] sm:$0xf0]  ;;  %v14667_v20 = vld [vmem:[#allocation22_spill] sm:$0xff] }
 0x354   : > { %v14663_v4 = vld [vmem:[#allocation19_spill] sm:$0xff]  ;;  %v10802_v13 = vor.u32 %v11771_v38, %v10801_v18  ;;  %6358 = vmatpush.bf16.msrb.mxu0 %v10026_v35  ;;  %v11765_v62 = vld [vmem:[%s14252_s18 + $0x200] sm:$0xf0]  ;;  %v14294_v2 = vpop.f32.mrf.mxu2  ;;  %v10573_v47 = vld [vmem:[%s14252_s18 + $0x60] sm:$0xf] }
 0x355   : > { %v5285_v17 = vadd.f32 %v14663_v4, %v5271_v55  ;;  %v5635_v40 = vadd.f32 %v13566_v24, %v5621_v5  ;;  %6372 = vmatpush.bf16.msrb.mxu1 %v10154_v11  ;;  %v10585_v24 = vld [vmem:[%s14252_s18 + $0x78] sm:$0xf]  ;;  %v14668_v42 = vld [vmem:[#allocation41_spill] sm:$0xff]  ;;  %v10778_v60 = vor.u32 %v11765_v62, %v10777_v37  ;;  %v11738_v35 = vld [vmem:[%s14252_s18 + $0x128] sm:$0xf0] }
 0x356   : > { %6386 = vmatpush.bf16.msrb.mxu2 %v10282_v29  ;;  %v10765_v36 = vld [vmem:[%s14252_s18 + $0x1e0] sm:$0xf]  ;;  %v11762_v18 = vld [vmem:[%s14252_s18 + $0x1e8] sm:$0xf0]  ;;  %v14669_v38 = vld [vmem:[#allocation23_spill] sm:$0xff]  ;;  %v6026_v31 = vpop.f32.mrf.mxu0 }
 0x357   : > { %v5299_v54 = vadd.f32 %v14665_v49, %v5285_v17  ;;  %6400 = vmatpush.bf16.msrb.mxu3 %v10410_v16  ;;  %6359 = vmatmul.bf16.vlgmr.msrb.gmra.mxu0 %v12762_v26  ;;  %v5649_v43 = vadd.f32 %v13570_v63, %v5635_v40  ;;  %v5985_v26 = vadd.f32 %v5984_v19, %v5971_v1  ;;  %v14670_v4 = vld [vmem:[#allocation42_spill] sm:$0xff]  ;;  %v11711_v5 = vld [vmem:[%s14252_s18 + $0x50] sm:$0xf0]  ;;  %v10549_v57 = vld [vmem:[%s14252_s18 + $0x30] sm:$0xf] }
 0x358   : > { %7059 = vmatpush.bf16.msra.mxu0 %v10610_v21  ;;  %6373 = vmatmul.bf16.vlgmr.msrb.gmra.mxu1 %v12769_v34  ;;  %v10586_v34 = vor.u32 %v11717_v58, %v10585_v24  ;;  %v10682_v63 = vor.u32 %v11741_v50, %v10681_v0  ;;  %v10670_v16 = vor.u32 %v11738_v35, %v10669_v10  ;;  %v10561_v22 = vld [vmem:[%s14252_s18 + $0x48] sm:$0xf]  ;;  %v11735_v39 = vld [vmem:[%s14252_s18 + $0x110] sm:$0xf0]  ;;  %v11708_v1 = vld [vmem:[%s14252_s18 + $0x38] sm:$0xf0] }
 0x359   : > { %7073 = vmatpush.bf16.msra.mxu1 %v10706_v52  ;;  %v5313_v55 = vadd.f32 %v14666_v14, %v5299_v54  ;;  %6387 = vmatmul.bf16.vlgmr.msrb.gmra.mxu2 %v12767_v33  ;;  %v5663_v12 = vadd.f32 %v14668_v42, %v5649_v43  ;;  %v11714_v33 = vld [vmem:[%s14252_s18 + $0x68] sm:$0xf0]  ;;  %v5999_v46 = vadd.f32 %v5998_v59, %v5985_v26  ;;  %v10657_v59 = vld [vmem:[%s14252_s18 + $0x108] sm:$0xf]  ;;  %v14671_v52 = vld [vmem:[#allocation25_spill] sm:$0xff]  ;;  %v6040_v9 = vpop.f32.mrf.mxu1 }
 0x35a   : > { %7087 = vmatpush.bf16.msra.mxu2 %v10802_v13  ;;  %6401 = vmatmul.bf16.vlgmr.msrb.gmra.mxu3 %v12775_v48  ;;  %v5983_v48 = vadd.f32 %v14214_v61, %v5969_v56  ;;  %v10574_v29 = vor.u32 %v11714_v33, %v10573_v47  ;;  %v14306_v61 = vpop.f32.mrf.mxu3  ;;  %v10766_v21 = vor.u32 %v11762_v18, %v10765_v36  ;;  %v11759_v53 = vld [vmem:[%s14252_s18 + $0x1d0] sm:$0xf0]  ;;  %v11756_v24 = vld [vmem:[%s14252_s18 + $0x1b8] sm:$0xf0]  ;;  %v10633_v26 = vld [vmem:[%s14252_s18 + $0xd8] sm:$0xf] }
 0x35b   : > { %v5327_v44 = vadd.f32 %v14667_v20, %v5313_v55  ;;  %v5677_v17 = vadd.f32 %v14670_v4, %v5663_v12  ;;  %v10562_v23 = vor.u32 %v11711_v5, %v10561_v22  ;;  %v10658_v8 = vor.u32 %v11735_v39, %v10657_v59  ;;  %v14673_v14 = vld [vmem:[#allocation27_spill] sm:$0xff]  ;;  %v14674_v37 = vld [vmem:[#allocation44_spill] sm:$0xff]  ;;  %v11729_v42 = vld [vmem:[%s14252_s18 + $0xe0] sm:$0xf0] }
 0x35c   : > { %7060 = vmatpush.bf16.msra.mxu0 %v10598_v27  ;;  %v5997_v11 = vadd.f32 %v14222_v3, %v5983_v48  ;;  %v6013_v3 = vadd.f32 %v6012_v15, %v5999_v46  ;;  %v10754_v40 = vor.u32 %v11759_v53, %v10753_v6  ;;  %v10645_v27 = vld [vmem:[%s14252_s18 + $0xf0] sm:$0xf]  ;;  %v14672_v15 = vld [vmem:[#allocation26_spill] sm:$0xff]  ;;  %v6054_v0 = vpop.f32.mrf.mxu2  ;;  %v10550_v50 = vor.u32 %v11708_v1, %v10549_v57  ;;  %v10537_v20 = vld [vmem:[%s14252_s18 + $0x18] sm:$0xf] }
 0x35d   : > { %7074 = vmatpush.bf16.msra.mxu1 %v10694_v32  ;;  %v5341_v19 = vadd.f32 %v14669_v38, %v5327_v44  ;;  %v5691_v49 = vadd.f32 %v13893_v25, %v5677_v17  ;;  %v11705_v44 = vld [vmem:[%s14252_s18 + $0x20] sm:$0xf0]  ;;  %v10729_v12 = vld [vmem:[%s14252_s18 + $0x198] sm:$0xf]  ;;  %v10634_v36 = vor.u32 %v11729_v42, %v10633_v26  ;;  %v11702_v38 = vld [vmem:[%s14252_s18 + $0x8] sm:$0xf0] }
 0x35e   : > { %7088 = vmatpush.bf16.msra.mxu2 %v10790_v41  ;;  %v6011_v54 = vadd.f32 %v14239_v51, %v5997_v11  ;;  %v6027_v7 = vadd.f32 %v6026_v31, %v6013_v3  ;;  %v11732_v41 = vld [vmem:[%s14252_s18 + $0xf8] sm:$0xf0]  ;;  %v10741_v51 = vld [vmem:[%s14252_s18 + $0x1b0] sm:$0xf]  ;;  %v10538_v48 = vor.u32 %v11705_v44, %v10537_v20  ;;  %v14676_v46 = vld [vmem:[#allocation45_spill] sm:$0xff]  ;;  %v14375_v26 = vpop.f32.mrf.mxu0 }
 0x35f   : > { %v5355_v13 = vadd.f32 %v14671_v52, %v5341_v19  ;;  %v5705_v58 = vadd.f32 %v13905_v30, %v5691_v49  ;;  %v10742_v43 = vor.u32 %v11756_v24, %v10741_v51  ;;  %v14675_v47 = vld [vmem:[#allocation28_spill] sm:$0xff]  ;;  %v10621_v19 = vld [vmem:[%s14252_s18 + $0xc0] sm:$0xf]  ;;  %v11726_v11 = vld [vmem:[%s14252_s18 + $0xc8] sm:$0xf0] }
 0x360   : > { %7061 = vmatpush.bf16.msra.mxu0 %v10586_v34  ;;  %v6025_v25 = vadd.f32 %v14274_v28, %v6011_v54  ;;  %v6041_v56 = vadd.f32 %v6040_v9, %v6027_v7  ;;  %v10646_v28 = vor.u32 %v11732_v41, %v10645_v27  ;;  %v10717_v4 = vld [vmem:[%s14252_s18 + $0x180] sm:$0xf]  ;;  %v11722_v17 = vld [vmem:[%s14252_s18 + $0xac] sm:$0xf]  ;;  %v10611_v31 = vld [vmem:[%s14252_s18 + $0xb4] sm:$0xf0]  ;;  %v10622_v53 = vor.u32 %v11726_v11, %v10621_v19 }
 0x361   : > { %7075 = vmatpush.bf16.msra.mxu1 %v10682_v63  ;;  %v5369_v32 = vadd.f32 %v14672_v15, %v5355_v13  ;;  %v5719_v62 = vadd.f32 %v14674_v37, %v5705_v58  ;;  %v11753_v63 = vld [vmem:[%s14252_s18 + $0x1a0] sm:$0xf0]  ;;  %v14677_v22 = vld [vmem:[#allocation24_spill] sm:$0xff]  ;;  %v11770_v13 = vld [vmem:[%s14252_s18 + $0x22c] sm:$0xf]  ;;  %v10614_v9 = vor.u32 %v11722_v17, %v10611_v31 }
 0x362   : > { %7089 = vmatpush.bf16.msra.mxu2 %v10778_v60  ;;  %v6039_v30 = vadd.f32 %v14288_v45, %v6025_v25  ;;  %v6055_v34 = vadd.f32 %v6054_v0, %v6041_v56  ;;  %v6068_v60 = vpop.f32.mrf.mxu3  ;;  %v10525_v45 = vld [vmem:[%s14252_s18] sm:$0xf]  ;;  %v10730_v18 = vor.u32 %v11753_v63, %v10729_v12  ;;  %v6407_v5 = vmax.f32 %v14677_v22, 0.0  ;;  %v10803_v3 = vld [vmem:[%s14252_s18 + $0x234] sm:$0xf0]  ;;  %v14678_v54 = vld [vmem:[#allocation43_spill] sm:$0xff] }
 0x363   : > { %v5383_v55 = vadd.f32 %v14673_v14, %v5369_v32  ;;  %v5733_v35 = vadd.f32 %v14676_v46, %v5719_v62  ;;  %v10526_v52 = vor.u32 %v11702_v38, %v10525_v45  ;;  %v6408_v7 = vmax.f32 %v14678_v54, 0.0  ;;  %v10599_v57 = vld [vmem:[%s14252_s18 + $0x9c] sm:$0xf0]  ;;  %v11743_v1 = vld [vmem:[%s14252_s18 + $0x154] sm:$0xf] }
 0x364   : > { %7062 = vmatpush.bf16.msra.mxu0 %v10574_v29  ;;  %v6053_v10 = vadd.f32 %v14294_v2, %v6039_v30  ;;  %v6069_v29 = vadd.f32 %v6068_v60, %v6055_v34  ;;  %v11750_v2 = vld [vmem:[%s14252_s18 + $0x188] sm:$0xf0]  ;;  %v10695_v27 = vld [vmem:[%s14252_s18 + $0x15c] sm:$0xf0]  ;;  %v11767_v32 = vld [vmem:[%s14252_s18 + $0x214] sm:$0xf]  ;;  %v14390_v19 = vpop.f32.mrf.mxu2 }
 0x365   : > { %7076 = vmatpush.bf16.msra.mxu1 %v10670_v16  ;;  %v5397_v33 = vadd.f32 %v14675_v47, %v5383_v55  ;;  %v11746_v16 = vld [vmem:[%s14252_s18 + $0x16c] sm:$0xf]  ;;  %v6412_v6 = vmax.f32 %v5733_v35, 0.0  ;;  %v10718_v49 = vor.u32 %v11750_v2, %v10717_v4  ;;  %v10791_v25 = vld [vmem:[%s14252_s18 + $0x21c] sm:$0xf0]  ;;  %v10698_v0 = vor.u32 %v11743_v1, %v10695_v27  ;;  %v14382_v47 = vpop.f32.mrf.mxu1 }
 0x366   : > { %7090 = vmatpush.bf16.msra.mxu2 %v10766_v21  ;;  %v10707_v21 = vld [vmem:[%s14252_s18 + $0x174] sm:$0xf0]  ;;  %v6067_v59 = vadd.f32 %v14306_v61, %v6053_v10  ;;  %v11716_v14 = vld [vmem:[%s14252_s18 + $0x7c] sm:$0xf]  ;;  %v10794_v55 = vor.u32 %v11767_v32, %v10791_v25  ;;  %v10587_v56 = vld [vmem:[%s14252_s18 + $0x84] sm:$0xf0] }
 0x367   : > { %v6411_v39 = vmax.f32 %v5397_v33, 0.0  ;;  %v10710_v61 = vor.u32 %v11746_v16, %v10707_v21  ;;  %v14361_v51 = vpack.c.bf16 %v6412_v6, %v6408_v7  ;;  %v10683_v37 = vld [vmem:[%s14252_s18 + $0x144] sm:$0xf0]  ;;  %v11764_v62 = vld [vmem:[%s14252_s18 + $0x1fc] sm:$0xf] }
 0x368   : > { %7063 = vmatpush.bf16.msra.mxu0 %v10562_v23  ;;  %v6413_v23 = vmax.f32 %v6069_v29, 0.0  ;;  %v6409_v15 = vmax.f32 %v6067_v59, 0.0  ;;  %v11713_v44 = vld [vmem:[%s14252_s18 + $0x64] sm:$0xf]  ;;  %v10575_v34 = vld [vmem:[%s14252_s18 + $0x6c] sm:$0xf0]  ;;  %v14400_v59 = vpop.f32.mrf.mxu0 }
 0x369   : > { %7077 = vmatpush.bf16.msra.mxu1 %v10658_v8  ;;  %v11719_v8 = vld [vmem:[%s14252_s18 + $0x94] sm:$0xf]  ;;  %v14359_v41 = vpack.c.bf16 %v6411_v39, %v6407_v5  ;;  %v11737_v42 = vld [vmem:[%s14252_s18 + $0x124] sm:$0xf]  ;;  %v10671_v12 = vld [vmem:[%s14252_s18 + $0x12c] sm:$0xf0]  ;;  %v10578_v33 = vor.u32 %v11713_v44, %v10575_v34 }
 0x36a   : > { %7091 = vmatpush.bf16.msra.mxu2 %v10754_v40  ;;  %v10806_v40 = vor.u32 %v11770_v13, %v10803_v3  ;;  %v14363_v24 = vpack.c.bf16 %v6413_v23, %v6409_v15  ;;  %v10602_v58 = vor.u32 %v11719_v8, %v10599_v57  ;;  %v11761_v63 = vld [vmem:[%s14252_s18 + $0x1e4] sm:$0xf]  ;;  %v10767_v60 = vld [vmem:[%s14252_s18 + $0x1ec] sm:$0xf0]  ;;  %v10674_v10 = vor.u32 %v11737_v42, %v10671_v12  ;;  %v10563_v46 = vld [vmem:[%s14252_s18 + $0x54] sm:$0xf0]  ;;  %v14392_v11 = vpop.f32.mrf.mxu3 }
 0x36b   : > { %v10770_v45 = vor.u32 %v11761_v63, %v10767_v60  ;;  %v11734_v35 = vld [vmem:[%s14252_s18 + $0x10c] sm:$0xf]  ;;  %v10755_v38 = vld [vmem:[%s14252_s18 + $0x1d4] sm:$0xf0]  ;;  %v11707_v2 = vld [vmem:[%s14252_s18 + $0x34] sm:$0xf] }
 0x36c   : > { %7064 = vmatpush.bf16.msra.mxu0 %v10550_v50  ;;  %v11740_v50 = vld [vmem:[%s14252_s18 + $0x13c] sm:$0xf]  ;;  %v10551_v31 = vld [vmem:[%s14252_s18 + $0x3c] sm:$0xf0]  ;;  %v11731_v16 = vld [vmem:[%s14252_s18 + $0xf4] sm:$0xf]  ;;  %v14416_v25 = vpop.f32.mrf.mxu2 }
 0x36d   : > { %7078 = vmatpush.bf16.msra.mxu1 %v10646_v28  ;;  %v10779_v28 = vld [vmem:[%s14252_s18 + $0x204] sm:$0xf0]  ;;  %v10686_v20 = vor.u32 %v11740_v50, %v10683_v37  ;;  %v10647_v21 = vld [vmem:[%s14252_s18 + $0xfc] sm:$0xf0]  ;;  %v11755_v22 = vld [vmem:[%s14252_s18 + $0x1b4] sm:$0xf]  ;;  %v14406_v54 = vpop.f32.mrf.mxu1 }
 0x36e   : > { %7092 = vmatpush.bf16.msra.mxu2 %v10742_v43  ;;  %v10590_v43 = vor.u32 %v11716_v14, %v10587_v56  ;;  %v10782_v30 = vor.u32 %v11764_v62, %v10779_v28  ;;  %v10743_v5 = vld [vmem:[%s14252_s18 + $0x1bc] sm:$0xf0]  ;;  %v10650_v13 = vor.u32 %v11731_v16, %v10647_v21  ;;  %v11704_v3 = vld [vmem:[%s14252_s18 + $0x1c] sm:$0xf]  ;;  %v10539_v6 = vld [vmem:[%s14252_s18 + $0x24] sm:$0xf0] }
 0x36f   : > { %v10746_v39 = vor.u32 %v11755_v22, %v10743_v5  ;;  %v11752_v7 = vld [vmem:[%s14252_s18 + $0x19c] sm:$0xf]  ;;  %v10731_v23 = vld [vmem:[%s14252_s18 + $0x1a4] sm:$0xf0]  ;;  %v11701_v8 = vld [vmem:[%s14252_s18 + $0x4] sm:$0xf] }
 0x370   : > { %7065 = vmatpush.bf16.msra.mxu0 %v10538_v48  ;;  %v11710_v48 = vld [vmem:[%s14252_s18 + $0x4c] sm:$0xf]  ;;  %v11725_v57 = vld [vmem:[%s14252_s18 + $0xc4] sm:$0xf]  ;;  %v10734_v1 = vor.u32 %v11752_v7, %v10731_v23  ;;  %v10623_v27 = vld [vmem:[%s14252_s18 + $0xcc] sm:$0xf0] }
 0x371   : > { %7079 = vmatpush.bf16.msra.mxu1 %v10634_v36  ;;  %v10659_v36 = vld [vmem:[%s14252_s18 + $0x114] sm:$0xf0]  ;;  %v10566_v29 = vor.u32 %v11710_v48, %v10563_v46  ;;  %v11749_v15 = vld [vmem:[%s14252_s18 + $0x184] sm:$0xf]  ;;  %v10719_v32 = vld [vmem:[%s14252_s18 + $0x18c] sm:$0xf0]  ;;  %v10626_v28 = vor.u32 %v11725_v57, %v10623_v27 }
 0x372   : > { %7093 = vmatpush.bf16.msra.mxu2 %v10730_v18  ;;  %v11758_v18 = vld [vmem:[%s14252_s18 + $0x1cc] sm:$0xf]  ;;  %v10662_v4 = vor.u32 %v11734_v35, %v10659_v36  ;;  %v11724_v14 = vld [vmem:[%s14252_s18 + $0xb8] sm:$0xf0]  ;;  %v10809_v50 = vld [vmem:[%s14252_s18 + $0x230] sm:$0xf] }
 0x373   : > { %v10758_v17 = vor.u32 %v11758_v18, %v10755_v38  ;;  %v11748_v56 = vld [vmem:[%s14252_s18 + $0x178] sm:$0xf0]  ;;  %v10605_v42 = vld [vmem:[%s14252_s18 + $0x98] sm:$0xf]  ;;  %v11721_v12 = vld [vmem:[%s14252_s18 + $0xa0] sm:$0xf0] }
 0x374   : > { %7066 = vmatpush.bf16.msra.mxu0 %v10526_v52  ;;  %v10554_v52 = vor.u32 %v11707_v2, %v10551_v31  ;;  %v11772_v37 = vld [vmem:[%s14252_s18 + $0x238] sm:$0xf0]  ;;  %v10701_v63 = vld [vmem:[%s14252_s18 + $0x158] sm:$0xf]  ;;  %v11745_v60 = vld [vmem:[%s14252_s18 + $0x160] sm:$0xf0]  ;;  %v10606_v46 = vor.u32 %v11721_v12, %v10605_v42  ;;  %v14448_v5 = vpop.f32.mrf.mxu2 }
 0x375   : > { %7080 = vmatpush.bf16.msra.mxu1 %v10622_v53  ;;  %v11728_v53 = vld [vmem:[%s14252_s18 + $0xdc] sm:$0xf]  ;;  %v10810_v34 = vor.u32 %v11772_v37, %v10809_v50  ;;  %v14434_v48 = vpop.f32.mrf.mxu1  ;;  %v10897_v35 = vld [vmem:[%s14252_s18 + $0x2e8] sm:$0xf]  ;;  %v11795_v36 = vld [vmem:[%s14252_s18 + $0x2f0] sm:$0xf0]  ;;  %v10702_v38 = vor.u32 %v11745_v60, %v10701_v63 }
 0x376   : > { %7094 = vmatpush.bf16.msra.mxu2 %v10718_v49  ;;  %v10635_v49 = vld [vmem:[%s14252_s18 + $0xe4] sm:$0xf0]  ;;  %v10885_v18 = vld [vmem:[%s14252_s18 + $0x2d0] sm:$0xf]  ;;  %v10689_v2 = vld [vmem:[%s14252_s18 + $0x140] sm:$0xf] }
 0x377   : > { %7067 = vmatmul.bf16.vlgmr.msra.gmra.mxu0 %v14359_v41  ;;  %v11792_v31 = vld [vmem:[%s14252_s18 + $0x2d8] sm:$0xf0]  ;;  %v11742_v16 = vld [vmem:[%s14252_s18 + $0x148] sm:$0xf0]  ;;  %v10785_v21 = vld [vmem:[%s14252_s18 + $0x200] sm:$0xf] }
 0x378   : > { %7115 = vmatpush.bf16.msrb.mxu0 %v10614_v9  ;;  %7081 = vmatmul.bf16.vlgmr.msra.gmra.mxu1 %v14361_v51  ;;  %v10542_v9 = vor.u32 %v11704_v3, %v10539_v6  ;;  %v11766_v22 = vld [vmem:[%s14252_s18 + $0x208] sm:$0xf0]  ;;  %v11859_v3 = vld [vmem:[%s12147_s21] sm:$0xf]  ;;  %v10581_v7 = vld [vmem:[%s14252_s18 + $0x68] sm:$0xf] }
 0x379   : > { %7129 = vmatpush.bf16.msrb.mxu1 %v10710_v61  ;;  %7095 = vmatmul.bf16.vlgmr.msra.gmra.mxu2 %v14363_v24  ;;  %v10638_v61 = vor.u32 %v11728_v53, %v10635_v49  ;;  %v10690_v53 = vor.u32 %v11742_v16, %v10689_v2  ;;  %v10786_v49 = vor.u32 %v11766_v22, %v10785_v21  ;;  %v11715_v23 = vld [vmem:[%s14252_s18 + $0x70] sm:$0xf0]  ;;  %v10873_v50 = vld [vmem:[%s14252_s18 + $0x2b8] sm:$0xf]  ;;  %v11789_v37 = vld [vmem:[%s14252_s18 + $0x2c0] sm:$0xf0] }
 0x37a   : > { %7143 = vmatpush.bf16.msrb.mxu2 %v10806_v40  ;;  %v10527_v40 = vld [vmem:[%s14252_s18 + $0xc] sm:$0xf0]  ;;  %v11763_v57 = vld [vmem:[%s14252_s18 + $0x1f0] sm:$0xf0]  ;;  %v10582_v27 = vor.u32 %v11715_v23, %v10581_v7  ;;  %v11709_v42 = vld [vmem:[%s14252_s18 + $0x40] sm:$0xf0] }
 0x37b   : > { %v10530_v62 = vor.u32 %v11701_v8, %v10527_v40  ;;  %v11739_v8 = vld [vmem:[%s14252_s18 + $0x130] sm:$0xf0]  ;;  %v10773_v40 = vld [vmem:[%s14252_s18 + $0x1e8] sm:$0xf]  ;;  %v10641_v22 = vld [vmem:[%s14252_s18 + $0xe0] sm:$0xf] }
 0x37c   : > { %7116 = vmatpush.bf16.msrb.mxu0 %v10602_v58  ;;  %v14418_v58 = vpop.f32.mrf.mxu3  ;;  %v14476_v12 = vpop.f32.mrf.mxu2 }
 0x37d   : > { %7130 = vmatpush.bf16.msrb.mxu1 %v10698_v0  ;;  %v10617_v0 = vld [vmem:[%s14252_s18 + $0xb0] sm:$0xf] }
 0x37e   : > { %7144 = vmatpush.bf16.msrb.mxu2 %v10794_v55  ;;  %v10713_v55 = vld [vmem:[%s14252_s18 + $0x170] sm:$0xf]  ;;  %v10618_v44 = vor.u32 %v11724_v14, %v10617_v0  ;;  %v14465_v0 = vpop.f32.mrf.mxu1 }
 0x380   : > { %7117 = vmatpush.bf16.msrb.mxu0 %v10590_v43  ;;  %v14426_v43 = vpop.f32.mrf.mxu0 }
 0x381   : > { %7131 = vmatpush.bf16.msrb.mxu1 %v10686_v20  ;;  %v10722_v20 = vor.u32 %v11749_v15, %v10719_v32  ;;  %v10569_v15 = vld [vmem:[%s14252_s18 + $0x50] sm:$0xf]  ;;  %v11712_v32 = vld [vmem:[%s14252_s18 + $0x58] sm:$0xf0] }
 0x382   : > { %7145 = vmatpush.bf16.msrb.mxu2 %v10782_v30  ;;  %v10714_v30 = vor.u32 %v11748_v56, %v10713_v55  ;;  %v10774_v55 = vor.u32 %v11763_v57, %v10773_v40  ;;  %v10665_v56 = vld [vmem:[%s14252_s18 + $0x110] sm:$0xf] }
 0x384   : > { %7118 = vmatpush.bf16.msrb.mxu0 %v10578_v33  ;;  %v10797_v33 = vld [vmem:[%s14252_s18 + $0x218] sm:$0xf]  ;;  %v14504_v40 = vpop.f32.mrf.mxu2 }
 0x385   : > { %7132 = vmatpush.bf16.msrb.mxu1 %v10674_v10  ;;  %v11769_v10 = vld [vmem:[%s14252_s18 + $0x220] sm:$0xf0] }
 0x386   : > { %7146 = vmatpush.bf16.msrb.mxu2 %v10770_v45  ;;  %v10593_v45 = vld [vmem:[%s14252_s18 + $0x80] sm:$0xf] }
 0x388   : > { %7119 = vmatpush.bf16.msrb.mxu0 %v10566_v29  ;;  %v10798_v29 = vor.u32 %v11769_v10, %v10797_v33  ;;  %v10653_v10 = vld [vmem:[%s14252_s18 + $0xf8] sm:$0xf] }
 0x389   : > { %7133 = vmatpush.bf16.msrb.mxu1 %v10662_v4  ;;  %v11718_v4 = vld [vmem:[%s14252_s18 + $0x88] sm:$0xf0] }
 0x38a   : > { %7147 = vmatpush.bf16.msrb.mxu2 %v10758_v17  ;;  %v10898_v17 = vor.u32 %v11795_v36, %v10897_v35  ;;  %v10594_v6 = vor.u32 %v11718_v4, %v10593_v45  ;;  %v11786_v45 = vld [vmem:[%s14252_s18 + $0x2a8] sm:$0xf0]  ;;  %v11733_v36 = vld [vmem:[%s14252_s18 + $0x100] sm:$0xf0] }
 0x38b   : > { %v10654_v16 = vor.u32 %v11733_v36, %v10653_v10  ;;  %v10899_v10 = vld [vmem:[%s14252_s18 + $0x2f4] sm:$0xf0] }
 0x38c   : > { %7120 = vmatpush.bf16.msrb.mxu0 %v10554_v52  ;;  %v14450_v52 = vpop.f32.mrf.mxu3  ;;  %7101 = vmatpush.bf16.msra.mxu3 %v10898_v17  ;;  %v10545_v17 = vld [vmem:[%s14252_s18 + $0x20] sm:$0xf] }
 0x38d   : > { %7134 = vmatpush.bf16.msrb.mxu1 %v10650_v13  ;;  %v10886_v13 = vor.u32 %v11792_v31, %v10885_v18  ;;  %v10749_v18 = vld [vmem:[%s14252_s18 + $0x1b8] sm:$0xf]  ;;  %v11706_v31 = vld [vmem:[%s14252_s18 + $0x28] sm:$0xf0] }
 0x38e   : > { %7148 = vmatpush.bf16.msrb.mxu2 %v10746_v39  ;;  %v1098_v39 = vperm.slane %v11859_v3, 3  ;;  %v11783_v3 = vld [vmem:[%s14252_s18 + $0x290] sm:$0xf0]  ;;  %v10546_v23 = vor.u32 %v11706_v31, %v10545_v17 }
 0x390   : > { %7121 = vmatpush.bf16.msrb.mxu0 %v10542_v9  ;;  %v10677_v9 = vld [vmem:[%s14252_s18 + $0x128] sm:$0xf]  ;;  %7102 = vmatpush.bf16.msra.mxu3 %v10886_v13 }
 0x391   : > { %7135 = vmatpush.bf16.msrb.mxu1 %v10638_v61  ;;  %v14457_v61 = vpop.f32.mrf.mxu0  ;;  %v10678_v14 = vor.u32 %v11739_v8, %v10677_v9  ;;  %v10849_v13 = vld [vmem:[%s14252_s18 + $0x288] sm:$0xf]  ;;  %v11703_v8 = vld [vmem:[%s14252_s18 + $0x10] sm:$0xf0] }
 0x392   : > { %7149 = vmatpush.bf16.msrb.mxu2 %v10734_v1  ;;  %v6081_v1 = vadd.f32 %v14375_v26, %v1098_v39  ;;  %v11760_v26 = vld [vmem:[%s14252_s18 + $0x1d8] sm:$0xf0]  ;;  %v10533_v9 = vld [vmem:[%s14252_s18 + $0x8] sm:$0xf] }
 0x394   : > { %7122 = vmatpush.bf16.msrb.mxu0 %v10530_v62  ;;  %v11736_v62 = vld [vmem:[%s14252_s18 + $0x118] sm:$0xf0]  ;;  %v14478_v63 = vpop.f32.mrf.mxu3 }
 0x395   : > { %7136 = vmatpush.bf16.msrb.mxu1 %v10626_v28  ;;  %v10761_v28 = vld [vmem:[%s14252_s18 + $0x1d0] sm:$0xf]  ;;  %v10666_v60 = vor.u32 %v11736_v62, %v10665_v56  ;;  %v11751_v56 = vld [vmem:[%s14252_s18 + $0x190] sm:$0xf0] }
 0x396   : > { %7150 = vmatpush.bf16.msrb.mxu2 %v10722_v20  ;;  %v10874_v20 = vor.u32 %v11789_v37, %v10873_v50  ;;  %v10762_v33 = vor.u32 %v11760_v26, %v10761_v28  ;;  %v10534_v28 = vor.u32 %v11703_v8, %v10533_v9  ;;  %v10825_v26 = vld [vmem:[%s14252_s18 + $0x258] sm:$0xf] }
 0x397   : > { %7123 = vmatmul.bf16.vlgmr.msrb.gmra.mxu0 %v14359_v41 }
 0x398   : > { %7171 = vmatpush.bf16.msra.mxu0 %v10618_v44  ;;  %7137 = vmatmul.bf16.vlgmr.msrb.gmra.mxu1 %v14361_v51  ;;  %v6095_v44 = vadd.f32 %v14382_v47, %v6081_v1  ;;  %v10861_v47 = vld [vmem:[%s14252_s18 + $0x2a0] sm:$0xf] }
 0x399   : > { %7185 = vmatpush.bf16.msra.mxu1 %v10714_v30  ;;  %7151 = vmatmul.bf16.vlgmr.msrb.gmra.mxu2 %v14363_v24  ;;  %v10570_v30 = vor.u32 %v11712_v32, %v10569_v15  ;;  %v14484_v35 = vpop.f32.mrf.mxu0  ;;  %v11780_v15 = vld [vmem:[%s14252_s18 + $0x278] sm:$0xf0] }
 0x39a   : > { %7199 = vmatpush.bf16.msra.mxu2 %v10810_v34  ;;  %v10557_v34 = vld [vmem:[%s14252_s18 + $0x38] sm:$0xf]  ;;  %7103 = vmatpush.bf16.msra.mxu3 %v10874_v20  ;;  %v6109_v4 = vadd.f32 %v14390_v19, %v6095_v44  ;;  %v11777_v20 = vld [vmem:[%s14252_s18 + $0x260] sm:$0xf0] }
 0x39b   : > { %v10558_v2 = vor.u32 %v11709_v42, %v10557_v34  ;;  %v10813_v42 = vld [vmem:[%s14252_s18 + $0x240] sm:$0xf] }
 0x39c   : > { %7172 = vmatpush.bf16.msra.mxu0 %v10606_v46  ;;  %v6083_v46 = vadd.f32 %v14400_v59, %v1098_v39  ;;  %v14492_v59 = vpop.f32.mrf.mxu1  ;;  %v11730_v39 = vld [vmem:[%s14252_s18 + $0xe8] sm:$0xf0]  ;;  %v6123_v7 = vadd.f32 %v14392_v11, %v6109_v4  ;;  %v10837_v11 = vld [vmem:[%s14252_s18 + $0x270] sm:$0xf] }
 0x39d   : > { %7186 = vmatpush.bf16.msra.mxu1 %v10702_v38  ;;  %v11757_v38 = vld [vmem:[%s14252_s18 + $0x1c0] sm:$0xf0]  ;;  %v10642_v57 = vor.u32 %v11730_v39, %v10641_v22  ;;  %v10838_v50 = vor.u32 %v11780_v15, %v10837_v11  ;;  %v10863_v39 = vld [vmem:[%s14252_s18 + $0x2ac] sm:$0xf0]  ;;  %v10839_v11 = vld [vmem:[%s14252_s18 + $0x27c] sm:$0xf0] }
 0x39e   : > { %7200 = vmatpush.bf16.msra.mxu2 %v10798_v29  ;;  %v10862_v29 = vor.u32 %v11786_v45, %v10861_v47  ;;  %v10750_v21 = vor.u32 %v11757_v38, %v10749_v18  ;;  %v6097_v19 = vadd.f32 %v14406_v54, %v6083_v46  ;;  %v14506_v54 = vpop.f32.mrf.mxu3  ;;  %v6137_v37 = vadd.f32 %v14426_v43, %v6123_v7  ;;  %v6222_v18 = vpop.f32.mrf.mxu2  ;;  %v10851_v7 = vld [vmem:[%s14252_s18 + $0x294] sm:$0xf0] }
 0x3a0   : > { %7173 = vmatpush.bf16.msra.mxu0 %v10594_v6  ;;  %7104 = vmatpush.bf16.msra.mxu3 %v10862_v29  ;;  %v10737_v6 = vld [vmem:[%s14252_s18 + $0x1a0] sm:$0xf]  ;;  %v6111_v32 = vadd.f32 %v14416_v25, %v6097_v19  ;;  %v6151_v47 = vadd.f32 %v14434_v48, %v6137_v37 }
 0x3a1   : > { %7187 = vmatpush.bf16.msra.mxu1 %v10690_v53  ;;  %v11754_v53 = vld [vmem:[%s14252_s18 + $0x1a8] sm:$0xf0]  ;;  %v6194_v62 = vpop.f32.mrf.mxu0  ;;  %v10887_v29 = vld [vmem:[%s14252_s18 + $0x2dc] sm:$0xf0] }
 0x3a2   : > { %7201 = vmatpush.bf16.msra.mxu2 %v10786_v49  ;;  %v10850_v49 = vor.u32 %v11783_v3, %v10849_v13  ;;  %v10738_v1 = vor.u32 %v11754_v53, %v10737_v6  ;;  %v6125_v34 = vadd.f32 %v14418_v58, %v6111_v32  ;;  %v11791_v58 = vld [vmem:[%s14252_s18 + $0x2d4] sm:$0xf]  ;;  %v6165_v4 = vadd.f32 %v14448_v5, %v6151_v47  ;;  %v11788_v5 = vld [vmem:[%s14252_s18 + $0x2bc] sm:$0xf] }
 0x3a4   : > { %7174 = vmatpush.bf16.msra.mxu0 %v10582_v27  ;;  %7105 = vmatpush.bf16.msra.mxu3 %v10850_v49  ;;  %v10629_v27 = vld [vmem:[%s14252_s18 + $0xc8] sm:$0xf]  ;;  %v6208_v43 = vpop.f32.mrf.mxu1  ;;  %v6139_v46 = vadd.f32 %v14457_v61, %v6125_v34  ;;  %v10890_v61 = vor.u32 %v11791_v58, %v10887_v29  ;;  %v11782_v49 = vld [vmem:[%s14252_s18 + $0x28c] sm:$0xf] }
 0x3a5   : > { %7188 = vmatpush.bf16.msra.mxu1 %v10678_v14  ;;  %v11727_v14 = vld [vmem:[%s14252_s18 + $0xd0] sm:$0xf0] }
 0x3a6   : > { %7202 = vmatpush.bf16.msra.mxu2 %v10774_v55  ;;  %v10725_v55 = vld [vmem:[%s14252_s18 + $0x188] sm:$0xf]  ;;  %v10630_v44 = vor.u32 %v11727_v14, %v10629_v27  ;;  %v6236_v38 = vpop.f32.mrf.mxu3  ;;  %v6153_v48 = vadd.f32 %v14465_v0, %v6139_v46  ;;  %v11779_v27 = vld [vmem:[%s14252_s18 + $0x274] sm:$0xf] }
 0x3a7   : > { %v10726_v25 = vor.u32 %v11751_v56, %v10725_v55  ;;  %v11776_v56 = vld [vmem:[%s14252_s18 + $0x25c] sm:$0xf] }
 0x3a8   : > { %7175 = vmatpush.bf16.msra.mxu0 %v10570_v30  ;;  %7106 = vmatpush.bf16.msra.mxu3 %v10838_v50  ;;  %v10826_v30 = vor.u32 %v11777_v20, %v10825_v26  ;;  %v6167_v31 = vadd.f32 %v14476_v12, %v6153_v48  ;;  %v10827_v50 = vld [vmem:[%s14252_s18 + $0x264] sm:$0xf0]  ;;  %v11773_v20 = vld [vmem:[%s14252_s18 + $0x244] sm:$0xf] }
 0x3a9   : > { %7189 = vmatpush.bf16.msra.mxu1 %v10666_v60  ;;  %v11774_v60 = vld [vmem:[%s14252_s18 + $0x248] sm:$0xf0] }
 0x3aa   : > { %7203 = vmatpush.bf16.msra.mxu2 %v10762_v33  ;;  %v11794_v33 = vld [vmem:[%s14252_s18 + $0x2ec] sm:$0xf]  ;;  %v10814_v45 = vor.u32 %v11774_v60, %v10813_v42  ;;  %v6181_v0 = vadd.f32 %v14478_v63, %v6167_v31 }
 0x3ab   : > { %v10902_v36 = vor.u32 %v11794_v33, %v10899_v10 }
 0x3ac   : > { %7176 = vmatpush.bf16.msra.mxu0 %v10558_v2  ;;  %7107 = vmatpush.bf16.msra.mxu3 %v10826_v30  ;;  %v6248_v2 = vpop.f32.mrf.mxu0  ;;  %v6262_v17 = vpop.f32.mrf.mxu1  ;;  %v6195_v3 = vadd.f32 %v6194_v62, %v6181_v0 }
 0x3ad   : > { %7190 = vmatpush.bf16.msra.mxu1 %v10654_v16 }
 0x3ae   : > { %7204 = vmatpush.bf16.msra.mxu2 %v10750_v21  ;;  %v10875_v21 = vld [vmem:[%s14252_s18 + $0x2c4] sm:$0xf0]  ;;  %v6209_v53 = vadd.f32 %v6208_v43, %v6195_v3 }
 0x3af   : > { %v10878_v22 = vor.u32 %v11788_v5, %v10875_v21 }
 0x3b0   : > { %7177 = vmatpush.bf16.msra.mxu0 %v10546_v23  ;;  %7108 = vmatpush.bf16.msra.mxu3 %v10814_v45  ;;  %v10854_v23 = vor.u32 %v11782_v49, %v10851_v7  ;;  %v11793_v49 = vld [vmem:[%s14252_s18 + $0x2e0] sm:$0xf0] }
 0x3b1   : > { %7191 = vmatpush.bf16.msra.mxu1 %v10642_v57 }
 0x3b2   : > { %7205 = vmatpush.bf16.msra.mxu2 %v10738_v1 }
 0x3b4   : > { %7178 = vmatpush.bf16.msra.mxu0 %v10534_v28  ;;  %7157 = vmatpush.bf16.msrb.mxu3 %v10902_v36  ;;  %v6250_v19 = vpop.f32.mrf.mxu0  ;;  %v6264_v6 = vpop.f32.mrf.mxu1 }
 0x3b5   : > { %7192 = vmatpush.bf16.msra.mxu1 %v10630_v44  ;;  %v10815_v44 = vld [vmem:[%s14252_s18 + $0x24c] sm:$0xf0] }
 0x3b6   : > { %7206 = vmatpush.bf16.msra.mxu2 %v10726_v25  ;;  %v10818_v25 = vor.u32 %v11773_v20, %v10815_v44 }
 0x3b7   : > { %7179 = vmatmul.bf16.vlgmr.msra.gmra.mxu0 %v14359_v41  ;;  %v6179_v41 = vadd.f32 %v14450_v52, %v6165_v4  ;;  %v11785_v52 = vld [vmem:[%s14252_s18 + $0x2a4] sm:$0xf] }
 0x3b8   : > { %7193 = vmatmul.bf16.vlgmr.msra.gmra.mxu1 %v14361_v51  ;;  %7158 = vmatpush.bf16.msrb.mxu3 %v10890_v61  ;;  %v6276_v51 = vpop.f32.mrf.mxu2  ;;  %v10866_v12 = vor.u32 %v11785_v52, %v10863_v39  ;;  %v11796_v52 = vld [vmem:[%s14252_s18 + $0x2f8] sm:$0xf0] }
 0x3b9   : > { %7207 = vmatmul.bf16.vlgmr.msra.gmra.mxu2 %v14363_v24  ;;  %v6193_v16 = vadd.f32 %v14484_v35, %v6179_v41  ;;  %v6290_v24 = vpop.f32.mrf.mxu3 }
 0x3bb   : > { %v6207_v13 = vadd.f32 %v14492_v59, %v6193_v16  ;;  %v6223_v59 = vadd.f32 %v6222_v18, %v6209_v53  ;;  %v10893_v53 = vld [vmem:[%s14252_s18 + $0x2d8] sm:$0xf] }
 0x3bc   : > { %7159 = vmatpush.bf16.msrb.mxu3 %v10878_v22  ;;  %v6304_v1 = vpop.f32.mrf.mxu0  ;;  %v6318_v32 = vpop.f32.mrf.mxu1  ;;  %v10894_v7 = vor.u32 %v11793_v49, %v10893_v53 }
 0x3bd   : > { %v6221_v35 = vadd.f32 %v14504_v40, %v6207_v13  ;;  %v10842_v40 = vor.u32 %v11779_v27, %v10839_v11  ;;  %v6237_v15 = vadd.f32 %v6236_v38, %v6223_v59  ;;  %v11784_v27 = vld [vmem:[%s14252_s18 + $0x298] sm:$0xf0] }
 0x3bf   : > { %v6235_v63 = vadd.f32 %v14506_v54, %v6221_v35  ;;  %v6251_v55 = vadd.f32 %v6250_v19, %v6237_v15  ;;  %v10830_v54 = vor.u32 %v11776_v56, %v10827_v50  ;;  %v10905_v19 = vld [vmem:[%s14252_s18 + $0x2f0] sm:$0xf]  ;;  %v11781_v15 = vld [vmem:[%s14252_s18 + $0x280] sm:$0xf0]  ;;  %v10821_v50 = vld [vmem:[%s14252_s18 + $0x248] sm:$0xf] }
 0x3c0   : > { %7160 = vmatpush.bf16.msrb.mxu3 %v10866_v12  ;;  %v6278_v9 = vpop.f32.mrf.mxu2  ;;  %v10906_v35 = vor.u32 %v11796_v52, %v10905_v19 }
 0x3c1   : > { %v6292_v8 = vpop.f32.mrf.mxu3  ;;  %v6249_v57 = vadd.f32 %v6248_v2, %v6235_v63  ;;  %v6265_v26 = vadd.f32 %v6264_v6, %v6251_v55  ;;  %v11790_v63 = vld [vmem:[%s14252_s18 + $0x2c8] sm:$0xf0] }
 0x3c2   : > { %v11778_v55 = vld [vmem:[%s14252_s18 + $0x268] sm:$0xf0] }
 0x3c3   : > { %v6263_v14 = vadd.f32 %v6262_v17, %v6249_v57  ;;  %v6279_v34 = vadd.f32 %v6278_v9, %v6265_v26  ;;  %v10869_v9 = vld [vmem:[%s14252_s18 + $0x2a8] sm:$0xf] }
 0x3c4   : > { %7161 = vmatpush.bf16.msrb.mxu3 %v10854_v23  ;;  %v6306_v42 = vpop.f32.mrf.mxu0  ;;  %v6320_v43 = vpop.f32.mrf.mxu1  ;;  %v10881_v23 = vld [vmem:[%s14252_s18 + $0x2c0] sm:$0xf] }
 0x3c5   : > { %v6277_v37 = vadd.f32 %v6276_v51, %v6263_v14  ;;  %v6293_v33 = vadd.f32 %v6292_v8, %v6279_v34  ;;  %v10882_v59 = vor.u32 %v11790_v63, %v10881_v23  ;;  %v11787_v8 = vld [vmem:[%s14252_s18 + $0x2b0] sm:$0xf0]  ;;  %v10833_v14 = vld [vmem:[%s14252_s18 + $0x260] sm:$0xf] }
 0x3c6   : > { %v10870_v57 = vor.u32 %v11787_v8, %v10869_v9  ;;  %v10834_v56 = vor.u32 %v11778_v55, %v10833_v14 }
 0x3c7   : > { %v6291_v30 = vadd.f32 %v6290_v24, %v6277_v37  ;;  %v6307_v47 = vadd.f32 %v6306_v42, %v6293_v33 }
 0x3c8   : > { %7162 = vmatpush.bf16.msrb.mxu3 %v10842_v40  ;;  %v6332_v62 = vpop.f32.mrf.mxu2  ;;  %v10845_v40 = vld [vmem:[%s14252_s18 + $0x278] sm:$0xf] }
 0x3c9   : > { %v6346_v28 = vpop.f32.mrf.mxu3  ;;  %v6305_v60 = vadd.f32 %v6304_v1, %v6291_v30  ;;  %v6321_v38 = vadd.f32 %v6320_v43, %v6307_v47  ;;  %v10857_v1 = vld [vmem:[%s14252_s18 + $0x290] sm:$0xf] }
 0x3ca   : > { %v10858_v11 = vor.u32 %v11784_v27, %v10857_v1 }
 0x3cb   : > { %v6319_v10 = vadd.f32 %v6318_v32, %v6305_v60  ;;  %v10846_v32 = vor.u32 %v11781_v15, %v10845_v40 }
 0x3cc   : > { %7163 = vmatpush.bf16.msrb.mxu3 %v10830_v54  ;;  %v11775_v54 = vld [vmem:[%s14252_s18 + $0x250] sm:$0xf0] }
 0x3cd   : > { %v6333_v36 = vadd.f32 %v6332_v62, %v6319_v10  ;;  %v10822_v37 = vor.u32 %v11775_v54, %v10821_v50 }
 0x3cf   : > { %v6347_v29 = vadd.f32 %v6346_v28, %v6333_v36 }
 0x3d0   : > { %7164 = vmatpush.bf16.msrb.mxu3 %v10818_v25  ;;  %v6334_v45 = vpop.f32.mrf.mxu2 }
 0x3d1   : > { %v6348_v46 = vpop.f32.mrf.mxu3  ;;  %v6335_v4 = vadd.f32 %v6334_v45, %v6321_v38 }
 0x3d3   : > { %v6349_v17 = vadd.f32 %v6348_v46, %v6335_v4 }
 0x3d4   : > { %v6360_v18 = vpop.f32.mrf.mxu0 }
 0x3d5   : > { %v6374_v58 = vpop.f32.mrf.mxu1  ;;  %v6361_v2 = vadd.f32 %v6360_v18, %v6347_v29 }
 0x3d7   : > { %v6375_v31 = vadd.f32 %v6374_v58, %v6361_v2 }
 0x3dc   : > { %v6388_v48 = vpop.f32.mrf.mxu2  ;;  %v6362_v41 = vpop.f32.mrf.mxu0 }
 0x3dd   : > { %v6402_v61 = vpop.f32.mrf.mxu3  ;;  %v6363_v16 = vadd.f32 %v6362_v41, %v6349_v17  ;;  %v6389_v5 = vadd.f32 %v6388_v48, %v6375_v31  ;;  %v6376_v21 = vpop.f32.mrf.mxu1 }
 0x3df   : > { %v6377_v51 = vadd.f32 %v6376_v21, %v6363_v16  ;;  %v6403_v22 = vadd.f32 %v6402_v61, %v6389_v5 }
 0x3e1   : > { %v6410_v39 = vmax.f32 %v6403_v22, 0.0 }
 0x3e4   : > { %v6390_v24 = vpop.f32.mrf.mxu2 }
 0x3e5   : > { %v6391_v0 = vadd.f32 %v6390_v24, %v6377_v51  ;;  %v6404_v13 = vpop.f32.mrf.mxu3 }
 0x3e7   : > { %v6405_v3 = vadd.f32 %v6404_v13, %v6391_v0 }
 0x3e9   : > { %v6414_v12 = vmax.f32 %v6405_v3, 0.0 }
 0x3eb   : > { %v6418_v6 = vpack.c.bf16 %v6414_v12, %v6410_v39 }
 0x3ed   : > { %7109 = vmatmul.bf16.vlgmr.msra.gmra.mxu3 %v6418_v6 }
 0x3ee   : > { %7213 = vmatpush.bf16.msra.mxu3 %v10906_v35 }
 0x3f2   : > { %7214 = vmatpush.bf16.msra.mxu3 %v10894_v7 }
 0x3f4   : > { %v7068_v62 = vpop.f32.mrf.mxu0 }
 0x3f5   : > { %v7082_v28 = vpop.f32.mrf.mxu1 }
 0x3f6   : > { %7215 = vmatpush.bf16.msra.mxu3 %v10882_v59  ;;  %v7083_v20 = vadd.f32 %v7082_v28, %v7068_v62 }
 0x3fa   : > { %7216 = vmatpush.bf16.msra.mxu3 %v10870_v57 }
 0x3fc   : > { %v7096_v26 = vpop.f32.mrf.mxu2  ;;  %v7070_v44 = vpop.f32.mrf.mxu0 }
 0x3fd   : > { %7165 = vmatmul.bf16.vlgmr.msrb.gmra.mxu3 %v6418_v6  ;;  %v7084_v25 = vpop.f32.mrf.mxu1  ;;  %v7097_v30 = vadd.f32 %v7096_v26, %v7083_v20 }
 0x3fe   : > { %7217 = vmatpush.bf16.msra.mxu3 %v10858_v11  ;;  %v7085_v43 = vadd.f32 %v7084_v25, %v7070_v44 }
 0x402   : > { %7218 = vmatpush.bf16.msra.mxu3 %v10846_v32 }
 0x404   : > { %v7098_v34 = vpop.f32.mrf.mxu2 }
 0x405   : > { %v7099_v47 = vadd.f32 %v7098_v34, %v7085_v43 }
 0x406   : > { %7219 = vmatpush.bf16.msra.mxu3 %v10834_v56 }
 0x40a   : > { %7220 = vmatpush.bf16.msra.mxu3 %v10822_v37 }
 0x40d   : > { %7221 = vmatmul.bf16.vlgmr.msra.gmra.mxu3 %v6418_v6 }
 0x414   : > { %v7124_v33 = vpop.f32.mrf.mxu0 }
 0x415   : > { %v7138_v10 = vpop.f32.mrf.mxu1 }
 0x416   : > { %v7139_v18 = vadd.f32 %v7138_v10, %v7124_v33 }
 0x41c   : > { %v7152_v45 = vpop.f32.mrf.mxu2  ;;  %v7126_v58 = vpop.f32.mrf.mxu0 }
 0x41d   : > { %v7153_v38 = vadd.f32 %v7152_v45, %v7139_v18  ;;  %v7140_v29 = vpop.f32.mrf.mxu1 }
 0x41e   : > { %v7141_v61 = vadd.f32 %v7140_v29, %v7126_v58 }
 0x424   : > { %v7154_v48 = vpop.f32.mrf.mxu2 }
 0x425   : > { %v7155_v17 = vadd.f32 %v7154_v48, %v7141_v61 }
 0x434   : > { %v7180_v41 = vpop.f32.mrf.mxu0 }
 0x435   : > { %v7194_v31 = vpop.f32.mrf.mxu1 }
 0x436   : > { %v7195_v51 = vadd.f32 %v7194_v31, %v7180_v41 }
 0x43c   : > { %v7208_v21 = vpop.f32.mrf.mxu2  ;;  %v7182_v13 = vpop.f32.mrf.mxu0 }
 0x43d   : > { %v7209_v24 = vadd.f32 %v7208_v21, %v7195_v51  ;;  %v7196_v3 = vpop.f32.mrf.mxu1 }
 0x43e   : > { %v7197_v52 = vadd.f32 %v7196_v3, %v7182_v13 }
 0x444   : > { %v7210_v19 = vpop.f32.mrf.mxu2 }
 0x445   : > { %v7211_v39 = vadd.f32 %v7210_v19, %v7197_v52 }
 0x470   : > { %v7110_v42 = vpop.f32.mrf.mxu3 }
 0x471   : > { %v7111_v60 = vadd.f32 %v7110_v42, %v7097_v30 }
 0x473   : > { %7227 = vst [vmem:[%s14572_s25] sm:$0xff] %v7111_v60 }
 0x478   : > { %v7112_v46 = vpop.f32.mrf.mxu3 }
 0x479   : > { %v7113_v36 = vadd.f32 %v7112_v46, %v7099_v47 }
 0x47b   : > { %7230 = vst [vmem:[%s14572_s25 + $0x18] sm:$0xff] %v7113_v36 }
 0x480   : > { %v7166_v4 = vpop.f32.mrf.mxu3 }
 0x481   : > { %v7167_v2 = vadd.f32 %v7166_v4, %v7153_v38 }
 0x483   : > { %7228 = vst [vmem:[%s14572_s25 + $0x8] sm:$0xff] %v7167_v2 }
 0x488   : > { %v7168_v16 = vpop.f32.mrf.mxu3 }
 0x489   : > { %v7169_v5 = vadd.f32 %v7168_v16, %v7155_v17 }
 0x48b   : > { %7231 = vst [vmem:[%s14572_s25 + $0x20] sm:$0xff] %v7169_v5 }
 0x490   : > { %v7222_v22 = vpop.f32.mrf.mxu3 }
 0x491   : > { %v7223_v0 = vadd.f32 %v7222_v22, %v7209_v24 }
 0x493   : > { %7229 = vst [vmem:[%s14572_s25 + $0x10] sm:$0xff] %v7223_v0 }
 0x498   : > { %v7224_v12 = vpop.f32.mrf.mxu3 }
 0x499   : > { %v7225_v35 = vadd.f32 %v7224_v12, %v7211_v39 }
 0x49b   : > { %7232 = vst [vmem:[%s14572_s25 + $0x28] sm:$0xff] %v7225_v35 }
 0x49c PF: > { %p17_p8 = scmp.ge.s32.totalorder %s12041_s20, 4   ;;  %s14679_s15 = smov %s11980_s16 }
 0x49d   : > { %s14680_s16 = smov %s11984_s17  ;;  %s14681_s17 = smov %s12051_s23 }
 0x49e   : > { %s14682_s18 = smov %s12041_s20  ;;  %19 = sbr.rel (!%p17_p8) target bundleno = 5 (0x5), region = 100 }
 0x4a3   :  { %7254 = vsyncpa [#allocation3], 1 }
 0x4a4   :  { %7256 = vsyncpa [#allocation3 + $0x1], 1 }
 0x4a5   :  { %7257 = vsyncpa [#allocation5], 1 }
 0x4a6   :  { %7259 = vsyncpa [#allocation5 + $0x1], 1 }

</bundles_post_ra>
